<compile_context>
chip_gen: v6e
topology: v6e:2x2x1
jax: 0.10.0
libtpu: 0.0.40
codegen_flags: <defaults>
</compile_context>

<pallas_src>
import jax
import jax.numpy as jnp
import numpy as np
from jax import lax
from jax.experimental import pallas as pl
from jax.experimental.pallas import tpu as pltpu

LANES = 128          # pad channel / feature dims to the 128-lane width
C_IN, C1, C2 = 3, 32, 64
IMG = 32
HIDDEN = 128
NUM_CLASSES = 10


# ---------------------------------------------------------------------------
# Kernel 1: fused (3x3 same conv) + bias + ReLU + 2x2/2 max-pool.
# The conv is ONE matmul: im2col patches (TH*W, 9*Cin) x weights (9*Cin, 128).
# All stores are lane-dense (last dim = 128).
# ---------------------------------------------------------------------------
def conv_relu_pool_kernel(p_ref, w_ref, b_ref, o_ref):
    # p_ref: (1, TH, W, K)          bf16 im2col patches (one image)
    # w_ref: (K, 128)               bf16 weights, zero-padded along Cout
    # b_ref: (1, 128)               f32 bias, zero-padded
    # o_ref: (1, TH//2, W//2, 128)  f32 pooled activations (channels padded)
    _, TH, W, K = p_ref.shape

    p = p_ref[0].reshape(TH * W, K)          # free: W % 8 == 0, lanes unchanged
    acc = jnp.dot(p, w_ref[...], preferred_element_type=jnp.float32)
    y = jnp.maximum(acc + b_ref[...], 0.0)   # bias + ReLU in f32 (VPU)

    # 2x2 max pool, stride 2, on 128-lane-dense data.
    y = y.reshape(TH // 2, 2, W, LANES)      # leading-dim split: layout-free
    y = jnp.max(y, axis=1)                   # H-direction pool (VPU)
    y = y.reshape(TH // 2, W // 2, 2, LANES)
    y = jnp.max(y, axis=2)                   # W-direction pool
    o_ref[0] = y                             # full 128-lane unmasked store


def conv_relu_pool(x_nhwc, w_mat, b_row):
    """x_nhwc: (B,H,W,Cin) f32; w_mat: (9*Cin,128) bf16; b_row: (1,128) f32.

    Returns (B, H//2, W//2, 128) f32; only the first Cout channels are valid.
    """
    B, H, W, Cin = x_nhwc.shape
    K = 9 * Cin
    assert w_mat.shape == (K, LANES)

    # im2col in the wrapper (plain XLA): 9 shifted taps -> (B, H, W, 9*Cin).
    xp = jnp.pad(x_nhwc, ((0, 0), (1, 1), (1, 1), (0, 0)))
    taps = [xp[:, kh:kh + H, kw:kw + W, :] for kh in range(3) for kw in range(3)]
    patches = jnp.concatenate(taps, axis=-1).astype(jnp.bfloat16)

    return pl.pallas_call(
        conv_relu_pool_kernel,
        out_shape=jax.ShapeDtypeStruct((B, H // 2, W // 2, LANES), jnp.float32),
        grid_spec=pltpu.PrefetchScalarGridSpec(
            num_scalar_prefetch=0,
            grid=(B,),
            in_specs=[
                pl.BlockSpec((1, H, W, K), lambda bi: (bi, 0, 0, 0)),
                pl.BlockSpec((K, LANES), lambda bi: (0, 0)),
                pl.BlockSpec((1, LANES), lambda bi: (0, 0)),
            ],
            out_specs=pl.BlockSpec((1, H // 2, W // 2, LANES),
                                   lambda bi: (bi, 0, 0, 0)),
        ),
        compiler_params=pltpu.CompilerParams(
            dimension_semantics=("parallel",)),
    )(patches, w_mat, b_row)


# ---------------------------------------------------------------------------
# Kernel 2: fused MLP head  fc1 (4096->128) + ReLU + fc2 (128->128-padded),
# K-tiled over fc1's contraction so the weight DMA pipelines behind the MXU.
# ---------------------------------------------------------------------------
def mlp_head_kernel(x_ref, w1_ref, b1_ref, w2_ref, b2_ref, o_ref, acc_ref):
    k = pl.program_id(0)

    @pl.when(k == 0)
    def _():
        acc_ref[...] = jnp.zeros_like(acc_ref)

    acc_ref[...] += jnp.dot(x_ref[...], w1_ref[...],
                            preferred_element_type=jnp.float32)

    @pl.when(k == pl.num_programs(0) - 1)
    def _():
        h = jnp.maximum(acc_ref[...] + b1_ref[...], 0.0)          # f32 ReLU
        o_ref[...] = (jnp.dot(h.astype(jnp.bfloat16), w2_ref[...],
                              preferred_element_type=jnp.float32)
                      + b2_ref[...])


def mlp_head(x_flat, w1, b1, w2, b2, *, tk=1024):
    """x_flat: (B,K1) bf16; w1: (K1,128) bf16; w2: (128,128) bf16 (padded)."""
    B, K1 = x_flat.shape
    assert K1 % tk == 0
    nk = K1 // tk
    return pl.pallas_call(
        mlp_head_kernel,
        out_shape=jax.ShapeDtypeStruct((B, LANES), jnp.float32),
        grid_spec=pltpu.PrefetchScalarGridSpec(
            num_scalar_prefetch=0,
            grid=(nk,),
            in_specs=[
                pl.BlockSpec((B, tk), lambda k: (0, k)),
                pl.BlockSpec((tk, LANES), lambda k: (k, 0)),
                pl.BlockSpec((1, LANES), lambda k: (0, 0)),
                pl.BlockSpec((LANES, LANES), lambda k: (0, 0)),
                pl.BlockSpec((1, LANES), lambda k: (0, 0)),
            ],
            out_specs=pl.BlockSpec((B, LANES), lambda k: (0, 0)),
            scratch_shapes=[pltpu.VMEM((B, LANES), jnp.float32)],
        ),
        compiler_params=pltpu.CompilerParams(
            dimension_semantics=("arbitrary",)),
    )(x_flat, w1, b1, w2, b2)


# ---------------------------------------------------------------------------
# One-time parameter preparation (padding / bf16 cast / fc1 row permutation).
# ---------------------------------------------------------------------------
def prepare_params(params):
    def conv_wb(w, b):
        kh, kw, cin, cout = w.shape
        w_mat = jnp.pad(w.reshape(kh * kw * cin, cout),
                        ((0, 0), (0, LANES - cout))).astype(jnp.bfloat16)
        b_row = jnp.pad(b, (0, LANES - cout)).reshape(1, LANES).astype(jnp.float32)
        return w_mat, b_row

    w1c, b1c = conv_wb(params["w_conv1"], params["b_conv1"])
    w2c, b2c = conv_wb(params["w_conv2"], params["b_conv2"])

    # fc1 rows: PyTorch NCHW flatten order (c*64 + h*8 + w)  ->  NHWC order
    # (h*512 + w*64 + c) produced by the conv kernels, so no activation
    # transpose is needed before the head.
    w_fc1 = params["w_fc1"].reshape(C2, 8, 8, HIDDEN).transpose(1, 2, 0, 3)
    w_fc1 = w_fc1.reshape(C2 * 8 * 8, HIDDEN).astype(jnp.bfloat16)
    b_fc1 = params["b_fc1"].reshape(1, HIDDEN).astype(jnp.float32)

    # fc2: pad the 10-wide output to 128 lanes (sliced back in the wrapper).
    w_fc2 = jnp.pad(params["w_fc2"],
                    ((0, 0), (0, LANES - NUM_CLASSES))).astype(jnp.bfloat16)
    b_fc2 = jnp.pad(params["b_fc2"],
                    (0, LANES - NUM_CLASSES)).reshape(1, LANES).astype(jnp.float32)

    return dict(w1c=w1c, b1c=b1c, w2c=w2c, b2c=b2c,
                w_fc1=w_fc1, b_fc1=b_fc1, w_fc2=w_fc2, b_fc2=b_fc2)


# ---------------------------------------------------------------------------
# SimpleCNN forward
# ---------------------------------------------------------------------------
@jax.jit
def simple_cnn_forward(x_nchw, kp):
    B = x_nchw.shape[0]
    x = jnp.transpose(x_nchw, (0, 2, 3, 1))                          # (B,32,32,3)
    h = conv_relu_pool(x, kp["w1c"], kp["b1c"])[..., :C1]            # (B,16,16,32)
    h = conv_relu_pool(h, kp["w2c"], kp["b2c"])[..., :C2]            # (B,8,8,64)
    h = h.reshape(B, C2 * 8 * 8).astype(jnp.bfloat16)                # NHWC flatten
    out = mlp_head(h, kp["w_fc1"], kp["b_fc1"], kp["w_fc2"], kp["b_fc2"])
    return out[:, :NUM_CLASSES]                                      # (B, 10)


# ---------------------------------------------------------------------------
# Pure-JAX f32 reference (PyTorch semantics) for correctness checking
# ---------------------------------------------------------------------------
def reference_forward(x_nchw, params):
    x = jnp.transpose(x_nchw, (0, 2, 3, 1))

    def conv_block(h, w, b):
        h = lax.conv_general_dilated(
            h, w, window_strides=(1, 1), padding="SAME",
            dimension_numbers=("NHWC", "HWIO", "NHWC"))
        h = jnp.maximum(h + b, 0.0)
        h = lax.reduce_window(h, -jnp.inf, lax.max,
                              (1, 2, 2, 1), (1, 2, 2, 1), "VALID")
        return h

    x = conv_block(x, params["w_conv1"], params["b_conv1"])
    x = conv_block(x, params["w_conv2"], params["b_conv2"])
    x = jnp.transpose(x, (0, 3, 1, 2)).reshape(x.shape[0], -1)   # NCHW flatten
    x = jnp.maximum(x @ params["w_fc1"] + params["b_fc1"], 0.0)
    return x @ params["w_fc2"] + params["b_fc2"]


if __name__ == "__main__":
    key = jax.random.PRNGKey(0)
    ks = jax.random.split(key, 9)

    params = {
        # conv weights stored HWIO (3,3,Cin,Cout)
        "w_conv1": 0.10 * jax.random.normal(ks[0], (3, 3, C_IN, C1), jnp.float32),
        "b_conv1": 0.01 * jax.random.normal(ks[1], (C1,), jnp.float32),
        "w_conv2": 0.05 * jax.random.normal(ks[2], (3, 3, C1, C2), jnp.float32),
        "b_conv2": 0.01 * jax.random.normal(ks[3], (C2,), jnp.float32),
        # fc weights stored (in, out)
        "w_fc1": 0.02 * jax.random.normal(ks[4], (C2 * 8 * 8, HIDDEN), jnp.float32),
        "b_fc1": 0.01 * jax.random.normal(ks[5], (HIDDEN,), jnp.float32),
        "w_fc2": 0.10 * jax.random.normal(ks[6], (HIDDEN, NUM_CLASSES), jnp.float32),
        "b_fc2": 0.01 * jax.random.normal(ks[7], (NUM_CLASSES,), jnp.float32),
    }
    kernel_params = prepare_params(params)

    # SimpleCNN implies 32x32 RGB inputs (fc1 in_features = 64*8*8).
    x = jax.random.normal(ks[8], (2, C_IN, IMG, IMG), jnp.float32)

    out = jax.block_until_ready(simple_cnn_forward(x, kernel_params))
    assert out.shape == (2, NUM_CLASSES) and out.dtype == jnp.float32

    ref = jax.block_until_ready(reference_forward(x, params))
    np.testing.assert_allclose(np.asarray(out), np.asarray(ref),
                               rtol=5e-2, atol=5e-2)

    print("KERNEL_OK")
</pallas_src>

<mosaic_0001>
module attributes {stable_mosaic.version = 11 : i64} {
  func.func @conv_relu_pool_kernel(%arg0: i32, %arg1: memref<1x32x32x27xbf16, #tpu.memory_space<vmem>>, %arg2: memref<27x128xbf16, #tpu.memory_space<vmem>>, %arg3: memref<1x128xf32, #tpu.memory_space<vmem>>, %arg4: memref<1x16x16x128xf32, #tpu.memory_space<vmem>>) attributes {dimension_semantics = [#tpu.dimension_semantics<parallel>], iteration_bounds = array<i64: 2>, scalar_prefetch = 0 : i64, scratch_operands = 0 : i64, tpu.core_type = #tpu.core_type<tc>, window_params = [{transform_indices = @transform_0, window_bounds = array<i64: 1, 32, 32, 27>}, {pipeline_mode = #tpu.pipeline_mode<synchronous>, transform_indices = @transform_1, window_bounds = array<i64: 27, 128>}, {pipeline_mode = #tpu.pipeline_mode<synchronous>, transform_indices = @transform_2, window_bounds = array<i64: 1, 128>}, {transform_indices = @transform_3, window_bounds = array<i64: 1, 16, 16, 128>}]} {
    %c0 = arith.constant 0 : index
    %c0_0 = arith.constant 0 : index
    %c0_1 = arith.constant 0 : index
    %c0_2 = arith.constant 0 : index
    %0 = vector.load %arg1[%c0, %c0_0, %c0_1, %c0_2] : memref<1x32x32x27xbf16, #tpu.memory_space<vmem>>, vector<1x32x32x27xbf16>
    %1 = vector.shape_cast %0 : vector<1x32x32x27xbf16> to vector<32x32x27xbf16>
    %2 = vector.shape_cast %1 : vector<32x32x27xbf16> to vector<1024x27xbf16>
    %c0_3 = arith.constant 0 : index
    %c0_4 = arith.constant 0 : index
    %3 = vector.load %arg2[%c0_3, %c0_4] : memref<27x128xbf16, #tpu.memory_space<vmem>>, vector<27x128xbf16>
    %cst = arith.constant dense<0.000000e+00> : vector<1024x128xf32>
    %4 = tpu.matmul %2, %3, %cst {dimension_numbers = #tpu.dot_dimension_numbers<[1], [0], [0], [1], [0, 0, 1, 1], [], []>} : vector<1024x27xbf16>, vector<27x128xbf16>, vector<1024x128xf32> -> vector<1024x128xf32>
    %c0_5 = arith.constant 0 : index
    %c0_6 = arith.constant 0 : index
    %5 = vector.load %arg3[%c0_5, %c0_6] : memref<1x128xf32, #tpu.memory_space<vmem>>, vector<1x128xf32>
    %6 = vector.broadcast %5 : vector<1x128xf32> to vector<1024x128xf32>
    %7 = arith.addf %4, %6 : vector<1024x128xf32>
    %cst_7 = arith.constant 0.000000e+00 : f32
    %8 = vector.broadcast %cst_7 : f32 to vector<1024x128xf32>
    %9 = arith.maximumf %7, %8 : vector<1024x128xf32>
    %10 = vector.shape_cast %9 : vector<1024x128xf32> to vector<16x2x32x128xf32>
    %cst_8 = arith.constant dense<0xFF800000> : vector<16x32x128xf32>
    %11 = vector.multi_reduction <maximumf>, %10, %cst_8 [1] : vector<16x2x32x128xf32> to vector<16x32x128xf32>
    %12 = vector.shape_cast %11 : vector<16x32x128xf32> to vector<16x16x2x128xf32>
    %cst_9 = arith.constant dense<0xFF800000> : vector<16x16x128xf32>
    %13 = vector.multi_reduction <maximumf>, %12, %cst_9 [2] : vector<16x16x2x128xf32> to vector<16x16x128xf32>
    %c0_10 = arith.constant 0 : index
    %c0_11 = arith.constant 0 : index
    %c0_12 = arith.constant 0 : index
    %c0_13 = arith.constant 0 : index
    %14 = vector.load %arg4[%c0_10, %c0_11, %c0_12, %c0_13] : memref<1x16x16x128xf32, #tpu.memory_space<vmem>>, vector<1x16x16x128xf32>
    %15 = vector.shape_cast %14 : vector<1x16x16x128xf32> to vector<16x16x128xf32>
    %16 = vector.shape_cast %13 : vector<16x16x128xf32> to vector<1x16x16x128xf32>
    tpu.vector_store %arg4[%c0_10, %c0_11, %c0_12, %c0_13], %16 {strides = array<i32>} : memref<1x16x16x128xf32, #tpu.memory_space<vmem>>, vector<1x16x16x128xf32>,
    return
  }
  func.func @transform_0(%arg0: i32) -> (i32, i32, i32, i32) {
    %c0_i32 = arith.constant 0 : i32
    %c0_i32_0 = arith.constant 0 : i32
    %c0_i32_1 = arith.constant 0 : i32
    %c0_i32_2 = arith.constant 0 : i32
    return %arg0, %c0_i32, %c0_i32_0, %c0_i32_1 : i32, i32, i32, i32
  }
  func.func @transform_1(%arg0: i32) -> (i32, i32) {
    %c0_i32 = arith.constant 0 : i32
    %c0_i32_0 = arith.constant 0 : i32
    %c0_i32_1 = arith.constant 0 : i32
    return %c0_i32, %c0_i32_0 : i32, i32
  }
  func.func @transform_2(%arg0: i32) -> (i32, i32) {
    %c0_i32 = arith.constant 0 : i32
    %c0_i32_0 = arith.constant 0 : i32
    %c0_i32_1 = arith.constant 0 : i32
    return %c0_i32, %c0_i32_0 : i32, i32
  }
  func.func @transform_3(%arg0: i32) -> (i32, i32, i32, i32) {
    %c0_i32 = arith.constant 0 : i32
    %c0_i32_0 = arith.constant 0 : i32
    %c0_i32_1 = arith.constant 0 : i32
    %c0_i32_2 = arith.constant 0 : i32
    return %arg0, %c0_i32, %c0_i32_0, %c0_i32_1 : i32, i32, i32, i32
  }
}

module attributes {stable_mosaic.version = 11 : i64} {
  func.func @conv_relu_pool_kernel(%arg0: i32, %arg1: memref<1x16x16x288xbf16, #tpu.memory_space<vmem>>, %arg2: memref<288x128xbf16, #tpu.memory_space<vmem>>, %arg3: memref<1x128xf32, #tpu.memory_space<vmem>>, %arg4: memref<1x8x8x128xf32, #tpu.memory_space<vmem>>) attributes {dimension_semantics = [#tpu.dimension_semantics<parallel>], iteration_bounds = array<i64: 2>, scalar_prefetch = 0 : i64, scratch_operands = 0 : i64, tpu.core_type = #tpu.core_type<tc>, window_params = [{transform_indices = @transform_0, window_bounds = array<i64: 1, 16, 16, 288>}, {pipeline_mode = #tpu.pipeline_mode<synchronous>, transform_indices = @transform_1, window_bounds = array<i64: 288, 128>}, {pipeline_mode = #tpu.pipeline_mode<synchronous>, transform_indices = @transform_2, window_bounds = array<i64: 1, 128>}, {transform_indices = @transform_3, window_bounds = array<i64: 1, 8, 8, 128>}]} {
    %c0 = arith.constant 0 : index
    %c0_0 = arith.constant 0 : index
    %c0_1 = arith.constant 0 : index
    %c0_2 = arith.constant 0 : index
    %0 = vector.load %arg1[%c0, %c0_0, %c0_1, %c0_2] : memref<1x16x16x288xbf16, #tpu.memory_space<vmem>>, vector<1x16x16x288xbf16>
    %1 = vector.shape_cast %0 : vector<1x16x16x288xbf16> to vector<16x16x288xbf16>
    %2 = vector.shape_cast %1 : vector<16x16x288xbf16> to vector<256x288xbf16>
    %c0_3 = arith.constant 0 : index
    %c0_4 = arith.constant 0 : index
    %3 = vector.load %arg2[%c0_3, %c0_4] : memref<288x128xbf16, #tpu.memory_space<vmem>>, vector<288x128xbf16>
    %cst = arith.constant dense<0.000000e+00> : vector<256x128xf32>
    %4 = tpu.matmul %2, %3, %cst {dimension_numbers = #tpu.dot_dimension_numbers<[1], [0], [0], [1], [0, 0, 1, 1], [], []>} : vector<256x288xbf16>, vector<288x128xbf16>, vector<256x128xf32> -> vector<256x128xf32>
    %c0_5 = arith.constant 0 : index
    %c0_6 = arith.constant 0 : index
    %5 = vector.load %arg3[%c0_5, %c0_6] : memref<1x128xf32, #tpu.memory_space<vmem>>, vector<1x128xf32>
    %6 = vector.broadcast %5 : vector<1x128xf32> to vector<256x128xf32>
    %7 = arith.addf %4, %6 : vector<256x128xf32>
    %cst_7 = arith.constant 0.000000e+00 : f32
    %8 = vector.broadcast %cst_7 : f32 to vector<256x128xf32>
    %9 = arith.maximumf %7, %8 : vector<256x128xf32>
    %10 = vector.shape_cast %9 : vector<256x128xf32> to vector<8x2x16x128xf32>
    %cst_8 = arith.constant dense<0xFF800000> : vector<8x16x128xf32>
    %11 = vector.multi_reduction <maximumf>, %10, %cst_8 [1] : vector<8x2x16x128xf32> to vector<8x16x128xf32>
    %12 = vector.shape_cast %11 : vector<8x16x128xf32> to vector<8x8x2x128xf32>
    %cst_9 = arith.constant dense<0xFF800000> : vector<8x8x128xf32>
    %13 = vector.multi_reduction <maximumf>, %12, %cst_9 [2] : vector<8x8x2x128xf32> to vector<8x8x128xf32>
    %c0_10 = arith.constant 0 : index
    %c0_11 = arith.constant 0 : index
    %c0_12 = arith.constant 0 : index
    %c0_13 = arith.constant 0 : index
    %14 = vector.load %arg4[%c0_10, %c0_11, %c0_12, %c0_13] : memref<1x8x8x128xf32, #tpu.memory_space<vmem>>, vector<1x8x8x128xf32>
    %15 = vector.shape_cast %14 : vector<1x8x8x128xf32> to vector<8x8x128xf32>
    %16 = vector.shape_cast %13 : vector<8x8x128xf32> to vector<1x8x8x128xf32>
    tpu.vector_store %arg4[%c0_10, %c0_11, %c0_12, %c0_13], %16 {strides = array<i32>} : memref<1x8x8x128xf32, #tpu.memory_space<vmem>>, vector<1x8x8x128xf32>,
    return
  }
  func.func @transform_0(%arg0: i32) -> (i32, i32, i32, i32) {
    %c0_i32 = arith.constant 0 : i32
    %c0_i32_0 = arith.constant 0 : i32
    %c0_i32_1 = arith.constant 0 : i32
    %c0_i32_2 = arith.constant 0 : i32
    return %arg0, %c0_i32, %c0_i32_0, %c0_i32_1 : i32, i32, i32, i32
  }
  func.func @transform_1(%arg0: i32) -> (i32, i32) {
    %c0_i32 = arith.constant 0 : i32
    %c0_i32_0 = arith.constant 0 : i32
    %c0_i32_1 = arith.constant 0 : i32
    return %c0_i32, %c0_i32_0 : i32, i32
  }
  func.func @transform_2(%arg0: i32) -> (i32, i32) {
    %c0_i32 = arith.constant 0 : i32
    %c0_i32_0 = arith.constant 0 : i32
    %c0_i32_1 = arith.constant 0 : i32
    return %c0_i32, %c0_i32_0 : i32, i32
  }
  func.func @transform_3(%arg0: i32) -> (i32, i32, i32, i32) {
    %c0_i32 = arith.constant 0 : i32
    %c0_i32_0 = arith.constant 0 : i32
    %c0_i32_1 = arith.constant 0 : i32
    %c0_i32_2 = arith.constant 0 : i32
    return %arg0, %c0_i32, %c0_i32_0, %c0_i32_1 : i32, i32, i32, i32
  }
}

module attributes {stable_mosaic.version = 11 : i64} {
  func.func @mlp_head_kernel(%arg0: i32, %arg1: memref<2x1024xbf16, #tpu.memory_space<vmem>>, %arg2: memref<1024x128xbf16, #tpu.memory_space<vmem>>, %arg3: memref<1x128xf32, #tpu.memory_space<vmem>>, %arg4: memref<128x128xbf16, #tpu.memory_space<vmem>>, %arg5: memref<1x128xf32, #tpu.memory_space<vmem>>, %arg6: memref<2x128xf32, #tpu.memory_space<vmem>>, %arg7: memref<2x128xf32, #tpu.memory_space<vmem>>) attributes {dimension_semantics = [#tpu.dimension_semantics<arbitrary>], iteration_bounds = array<i64: 4>, scalar_prefetch = 0 : i64, scratch_operands = 1 : i64, tpu.core_type = #tpu.core_type<tc>, window_params = [{transform_indices = @transform_0, window_bounds = array<i64: 2, 1024>}, {transform_indices = @transform_1, window_bounds = array<i64: 1024, 128>}, {pipeline_mode = #tpu.pipeline_mode<synchronous>, transform_indices = @transform_2, window_bounds = array<i64: 1, 128>}, {pipeline_mode = #tpu.pipeline_mode<synchronous>, transform_indices = @transform_3, window_bounds = array<i64: 128, 128>}, {pipeline_mode = #tpu.pipeline_mode<synchronous>, transform_indices = @transform_4, window_bounds = array<i64: 1, 128>}, {pipeline_mode = #tpu.pipeline_mode<synchronous>, transform_indices = @transform_5, window_bounds = array<i64: 2, 128>}]} {
    %c0_i32 = arith.constant 0 : i32
    %0 = arith.cmpi eq, %arg0, %c0_i32 : i32
    %1 = arith.extui %0 : i1 to i32
    %c0_i32_0 = arith.constant 0 : i32
    %2 = arith.cmpi ne, %1, %c0_i32_0 : i32
    scf.if %2 {
      %cst_9 = arith.constant 0.000000e+00 : f32
      %12 = vector.broadcast %cst_9 : f32 to vector<2x128xf32>
      %c0_10 = arith.constant 0 : index
      %c0_11 = arith.constant 0 : index
      %13 = vector.load %arg7[%c0_10, %c0_11] : memref<2x128xf32, #tpu.memory_space<vmem>>, vector<2x128xf32>
      tpu.vector_store %arg7[%c0_10, %c0_11], %12 {strides = array<i32>} : memref<2x128xf32, #tpu.memory_space<vmem>>, vector<2x128xf32>,
    } else {
    }
    %c0 = arith.constant 0 : index
    %c0_1 = arith.constant 0 : index
    %3 = vector.load %arg7[%c0, %c0_1] : memref<2x128xf32, #tpu.memory_space<vmem>>, vector<2x128xf32>
    %c0_2 = arith.constant 0 : index
    %c0_3 = arith.constant 0 : index
    %4 = vector.load %arg1[%c0_2, %c0_3] : memref<2x1024xbf16, #tpu.memory_space<vmem>>, vector<2x1024xbf16>
    %c0_4 = arith.constant 0 : index
    %c0_5 = arith.constant 0 : index
    %5 = vector.load %arg2[%c0_4, %c0_5] : memref<1024x128xbf16, #tpu.memory_space<vmem>>, vector<1024x128xbf16>
    %cst = arith.constant dense<0.000000e+00> : vector<2x128xf32>
    %6 = tpu.matmul %4, %5, %cst {dimension_numbers = #tpu.dot_dimension_numbers<[1], [0], [0], [1], [0, 0, 1, 1], [], []>} : vector<2x1024xbf16>, vector<1024x128xbf16>, vector<2x128xf32> -> vector<2x128xf32>
    %7 = arith.addf %3, %6 : vector<2x128xf32>
    %c0_6 = arith.constant 0 : index
    %c0_7 = arith.constant 0 : index
    %8 = vector.load %arg7[%c0_6, %c0_7] : memref<2x128xf32, #tpu.memory_space<vmem>>, vector<2x128xf32>
    tpu.vector_store %arg7[%c0_6, %c0_7], %7 {strides = array<i32>} : memref<2x128xf32, #tpu.memory_space<vmem>>, vector<2x128xf32>,
    %c3_i32 = arith.constant 3 : i32
    %9 = arith.cmpi eq, %arg0, %c3_i32 : i32
    %10 = arith.extui %9 : i1 to i32
    %c0_i32_8 = arith.constant 0 : i32
    %11 = arith.cmpi ne, %10, %c0_i32_8 : i32
    scf.if %11 {
      %c0_9 = arith.constant 0 : index
      %c0_10 = arith.constant 0 : index
      %12 = vector.load %arg7[%c0_9, %c0_10] : memref<2x128xf32, #tpu.memory_space<vmem>>, vector<2x128xf32>
      %c0_11 = arith.constant 0 : index
      %c0_12 = arith.constant 0 : index
      %13 = vector.load %arg3[%c0_11, %c0_12] : memref<1x128xf32, #tpu.memory_space<vmem>>, vector<1x128xf32>
      %14 = vector.broadcast %13 : vector<1x128xf32> to vector<2x128xf32>
      %15 = arith.addf %12, %14 : vector<2x128xf32>
      %cst_13 = arith.constant 0.000000e+00 : f32
      %16 = vector.broadcast %cst_13 : f32 to vector<2x128xf32>
      %17 = arith.maximumf %15, %16 : vector<2x128xf32>
      %18 = arith.truncf %17 : vector<2x128xf32> to vector<2x128xbf16>
      %c0_14 = arith.constant 0 : index
      %c0_15 = arith.constant 0 : index
      %19 = vector.load %arg4[%c0_14, %c0_15] : memref<128x128xbf16, #tpu.memory_space<vmem>>, vector<128x128xbf16>
      %cst_16 = arith.constant dense<0.000000e+00> : vector<2x128xf32>
      %20 = tpu.matmul %18, %19, %cst_16 {dimension_numbers = #tpu.dot_dimension_numbers<[1], [0], [0], [1], [0, 0, 1, 1], [], []>} : vector<2x128xbf16>, vector<128x128xbf16>, vector<2x128xf32> -> vector<2x128xf32>
      %c0_17 = arith.constant 0 : index
      %c0_18 = arith.constant 0 : index
      %21 = vector.load %arg5[%c0_17, %c0_18] : memref<1x128xf32, #tpu.memory_space<vmem>>, vector<1x128xf32>
      %22 = vector.broadcast %21 : vector<1x128xf32> to vector<2x128xf32>
      %23 = arith.addf %20, %22 : vector<2x128xf32>
      %c0_19 = arith.constant 0 : index
      %c0_20 = arith.constant 0 : index
      %24 = vector.load %arg6[%c0_19, %c0_20] : memref<2x128xf32, #tpu.memory_space<vmem>>, vector<2x128xf32>
      tpu.vector_store %arg6[%c0_19, %c0_20], %23 {strides = array<i32>} : memref<2x128xf32, #tpu.memory_space<vmem>>, vector<2x128xf32>,
    } else {
    }
    return
  }
  func.func @transform_0(%arg0: i32) -> (i32, i32) {
    %c0_i32 = arith.constant 0 : i32
    %c0_i32_0 = arith.constant 0 : i32
    return %c0_i32, %arg0 : i32, i32
  }
  func.func @transform_1(%arg0: i32) -> (i32, i32) {
    %c0_i32 = arith.constant 0 : i32
    %c0_i32_0 = arith.constant 0 : i32
    return %arg0, %c0_i32 : i32, i32
  }
  func.func @transform_2(%arg0: i32) -> (i32, i32) {
    %c0_i32 = arith.constant 0 : i32
    %c0_i32_0 = arith.constant 0 : i32
    %c0_i32_1 = arith.constant 0 : i32
    return %c0_i32, %c0_i32_0 : i32, i32
  }
  func.func @transform_3(%arg0: i32) -> (i32, i32) {
    %c0_i32 = arith.constant 0 : i32
    %c0_i32_0 = arith.constant 0 : i32
    %c0_i32_1 = arith.constant 0 : i32
    return %c0_i32, %c0_i32_0 : i32, i32
  }
  func.func @transform_4(%arg0: i32) -> (i32, i32) {
    %c0_i32 = arith.constant 0 : i32
    %c0_i32_0 = arith.constant 0 : i32
    %c0_i32_1 = arith.constant 0 : i32
    return %c0_i32, %c0_i32_0 : i32, i32
  }
  func.func @transform_5(%arg0: i32) -> (i32, i32) {
    %c0_i32 = arith.constant 0 : i32
    %c0_i32_0 = arith.constant 0 : i32
    %c0_i32_1 = arith.constant 0 : i32
    return %c0_i32, %c0_i32_0 : i32, i32
  }
}

</mosaic_0001>

<bundles_post_ra>
// kernel: simple_cnn_forward.3
= control target key start
LH: loop header
LB: loop body
LE: loop exit
PB: predicated region body
PF: predicated region fallthrough
CT: control target
= control target key end

     0   :  { %s5841_s12 = smov 0   ;;  %s7672_s0 = inlined_call_operand.vmem [shape: bf16[2,32,32,27], index: 0, kind: input, shape index: {}]   ;;  %s7673_s1 = inlined_call_operand.vmem [shape: bf16[27,128], index: 1, kind: input, shape index: {}]   ;;  %s7674_s2 = inlined_call_operand.vmem [shape: f32[1,128], index: 2, kind: input, shape index: {}]   ;;  %s7675_s3 = inlined_call_operand.vmem [shape: f32[2,16,16,128], index: 3, kind: output, shape index: {}]  }
   0x1 LB: > { %s5386_s13 = sadd.s32 4294967295, %s5817_s12   ;;  %p5390_p0 = scmp.ge.s32.totalorder %s5817_s12, 1  ;;  %s5817_s12 = sphi %s5841_s12, %s13_s12  }
   0x2   : > { %p137_p1 = scmp.lt.s32.totalorder %s5817_s12, 3 }
   0x4   : > { %p138_p2 = pnand %p5390_p0, %p137_p1 }
   0x5   : > { %p161_p3 = scmp.lt.s32.totalorder (!%p138_p2), %s5386_s13, 1 }
   0x6   : > { %141 = sbr.rel (%p138_p2) target bundleno = 893 (0x37d), region = 32 }
   0xb   : > { %v5742_v0 = vld [vmem:[%s7673_s1 + $0x8] sm:$0x3f]   ;;  %vm835_vm0 = vcmask 1044480   ;;  %vm836_vm1 = vcmask 1045504   ;;  %v5819_v1 = vmov 65535   ;;  %v5743_v5 = vld [vmem:[%s7673_s1] sm:$0xff]  }
   0xc   : > { %v837_v2 = vsel %vm835_vm0, 4294967295, %v5819_v1  ;;  %s7677_s13 = smov (!%p161_p3, %s5386_s13), 1  ;;  %vm642_vm2 = vcmask 220160   ;;  %vm2987_vm3 = vcmask 1041408   ;;  %vm5036_vm4 = vcmask 1041409  }
   0xd   : > { %v838_v3 = vsel %vm836_vm1, %v837_v2, 0  ;;  %s5528_s18 = sshll.u32 %s7677_s13, 9  ;;  %vm5038_vm5 = vcmask 1042434   ;;  %vm5040_vm6 = vcmask 1043459   ;;  %vm5042_vm7 = vcmask 1044484   ;;  %s5529_s24 = sshll.u32 %s7677_s13, 8 }
   0xe   : > { %v840_v4 = vand.u32 %v5742_v0, %v838_v3  ;;  %s5861_s21 = scalar_lea.vmem %s7672_s0, %s5528_s18  ;;  %vm5044_vm8 = vcmask 1045509   ;;  %vm5046_vm9 = vcmask 1046534   ;;  %vm5048_vm10 = vcmask 1047559   ;;  %s6117_s27 = scalar_lea.vmem %s7675_s3, %s5529_s24 }
   0xf   : > { %v5744_v6 = vld [vmem:[%s5861_s21] sm:$0xff]   ;;  %v5746_v8 = vld [vmem:[%s5861_s21 + $0x8] sm:$0xff]   ;;  %v5748_v10 = vld [vmem:[%s5861_s21 + $0x10] sm:$0xff]  }
  0x10   : > { %5596 = vmatprep.subr.bf16.mxu0 %v840_v4  ;;  %5728 = vmatprep.subr.bf16.mxu1 %v840_v4  ;;  %v5745_v7 = vld [vmem:[%s5861_s21 + $0x100] sm:$0xff]   ;;  %v5747_v9 = vld [vmem:[%s5861_s21 + $0x108] sm:$0xff]   ;;  %v5749_v11 = vld [vmem:[%s5861_s21 + $0x110] sm:$0xff]  }
  0x11   : > { %5597 = vmatpush3.bf16.msra.mxu0 %v840_v4  ;;  %5730 = vmatpush3.bf16.msra.mxu1 %v840_v4  ;;  %v5750_v12 = vld [vmem:[%s5861_s21 + $0x18] sm:$0xff]   ;;  %v5752_v14 = vld [vmem:[%s5861_s21 + $0x20] sm:$0xff]   ;;  %v5754_v16 = vld [vmem:[%s5861_s21 + $0x28] sm:$0xff]  }
  0x12   : > { %5598 = vmatprep.subr.bf16.mxu0 %v5743_v5  ;;  %5729 = vmatprep.subr.bf16.mxu1 %v5743_v5  ;;  %v5751_v13 = vld [vmem:[%s5861_s21 + $0x118] sm:$0xff]   ;;  %v5753_v15 = vld [vmem:[%s5861_s21 + $0x120] sm:$0xff]   ;;  %v5755_v17 = vld [vmem:[%s5861_s21 + $0x128] sm:$0xff]  }
  0x13   : > { %5600 = vmatprep.mubr.msk.bf16.mxu0 %vm642_vm2, %v5744_v6  ;;  %5664 = vmatprep.mubr.msk.bf16.mxu1 %vm642_vm2, %v5745_v7  ;;  %v5756_v18 = vld [vmem:[%s5861_s21 + $0x30] sm:$0xff]   ;;  %v5758_v20 = vld [vmem:[%s5861_s21 + $0x38] sm:$0xff]   ;;  %v5760_v22 = vld [vmem:[%s5861_s21 + $0x40] sm:$0xff]  }
  0x14   : > { %v5757_v19 = vld [vmem:[%s5861_s21 + $0x130] sm:$0xff]   ;;  %v5759_v21 = vld [vmem:[%s5861_s21 + $0x138] sm:$0xff]   ;;  %v5761_v23 = vld [vmem:[%s5861_s21 + $0x140] sm:$0xff]  }
  0x15   : > { %5599 = vmatpush3.bf16.msra.mxu0 %v5743_v5  ;;  %5731 = vmatpush3.bf16.msra.mxu1 %v5743_v5  ;;  %v5762_v24 = vld [vmem:[%s5861_s21 + $0x48] sm:$0xff]   ;;  %v5764_v26 = vld [vmem:[%s5861_s21 + $0x50] sm:$0xff]   ;;  %v5766_v28 = vld [vmem:[%s5861_s21 + $0x58] sm:$0xff]  }
  0x16   : > { %v5763_v25 = vld [vmem:[%s5861_s21 + $0x148] sm:$0xff]   ;;  %v5765_v27 = vld [vmem:[%s5861_s21 + $0x150] sm:$0xff]   ;;  %v5767_v29 = vld [vmem:[%s5861_s21 + $0x158] sm:$0xff]  }
  0x17   : > { %v5768_v30 = vld [vmem:[%s5861_s21 + $0x60] sm:$0xff]   ;;  %v5770_v32 = vld [vmem:[%s5861_s21 + $0x68] sm:$0xff]   ;;  %v5772_v34 = vld [vmem:[%s5861_s21 + $0x70] sm:$0xff]  }
  0x18   : > { %5601 = vmatmul.mubr.msk.bf16.vlgmr.msra.gmra.mxu0 %vm642_vm2, %v5746_v8  ;;  %5665 = vmatmul.mubr.msk.bf16.vlgmr.msra.gmra.mxu1 %vm642_vm2, %v5747_v9  ;;  %v5769_v31 = vld [vmem:[%s5861_s21 + $0x160] sm:$0xff]   ;;  %v5771_v33 = vld [vmem:[%s5861_s21 + $0x168] sm:$0xff]   ;;  %v5773_v35 = vld [vmem:[%s5861_s21 + $0x170] sm:$0xff]   ;;  %v5820_v8 = vmov 1983009808  }
  0x19   : > { %5604 = vmatprep.mubr.msk.bf16.mxu0 %vm642_vm2, %v5748_v10  ;;  %5668 = vmatprep.mubr.msk.bf16.mxu1 %vm642_vm2, %v5749_v11  ;;  %v5774_v36 = vld [vmem:[%s5861_s21 + $0x78] sm:$0xff]   ;;  %v5776_v38 = vld [vmem:[%s5861_s21 + $0x80] sm:$0xff]   ;;  %v5778_v40 = vld [vmem:[%s5861_s21 + $0x88] sm:$0xff]   ;;  %v1645_v9 = vunpack.c.l.s4 %v5820_v8  ;;  %v1647_v10 = vlaneseq }
  0x1a   : > { %v5775_v37 = vld [vmem:[%s5861_s21 + $0x178] sm:$0xff]   ;;  %v5777_v39 = vld [vmem:[%s5861_s21 + $0x180] sm:$0xff]   ;;  %v5779_v41 = vld [vmem:[%s5861_s21 + $0x188] sm:$0xff]  }
  0x1b   : > { %v5780_v42 = vld [vmem:[%s5861_s21 + $0x90] sm:$0xff]   ;;  %v5782_v44 = vld [vmem:[%s5861_s21 + $0x98] sm:$0xff]   ;;  %v5784_v46 = vld [vmem:[%s5861_s21 + $0xa0] sm:$0xff]  }
  0x1c   : > { %v5781_v43 = vld [vmem:[%s5861_s21 + $0x190] sm:$0xff]   ;;  %v5783_v45 = vld [vmem:[%s5861_s21 + $0x198] sm:$0xff]   ;;  %v5785_v47 = vld [vmem:[%s5861_s21 + $0x1a0] sm:$0xff]  }
  0x1d   : > { %v5786_v48 = vld [vmem:[%s5861_s21 + $0xa8] sm:$0xff]   ;;  %v5788_v50 = vld [vmem:[%s5861_s21 + $0xb0] sm:$0xff]   ;;  %v5790_v52 = vld [vmem:[%s5861_s21 + $0xb8] sm:$0xff]  }
  0x1e   : > { %v5787_v49 = vld [vmem:[%s5861_s21 + $0x1a8] sm:$0xff]   ;;  %v5789_v51 = vld [vmem:[%s5861_s21 + $0x1b0] sm:$0xff]   ;;  %v5791_v53 = vld [vmem:[%s5861_s21 + $0x1b8] sm:$0xff]  }
  0x1f   : > { %v5792_v54 = vld [vmem:[%s5861_s21 + $0xc0] sm:$0xff]   ;;  %v5794_v56 = vld [vmem:[%s5861_s21 + $0xc8] sm:$0xff]   ;;  %v5796_v58 = vld [vmem:[%s5861_s21 + $0xd0] sm:$0xff]  }
  0x20   : > { %5605 = vmatmul.mubr.msk.bf16.gmra.mxu0 %vm642_vm2, %v5750_v12  ;;  %5669 = vmatmul.mubr.msk.bf16.gmra.mxu1 %vm642_vm2, %v5751_v13  ;;  %v5793_v55 = vld [vmem:[%s5861_s21 + $0x1c0] sm:$0xff]   ;;  %v5795_v57 = vld [vmem:[%s5861_s21 + $0x1c8] sm:$0xff]   ;;  %v5797_v59 = vld [vmem:[%s5861_s21 + $0x1d0] sm:$0xff]  }
  0x21   : > { %5608 = vmatprep.mubr.msk.bf16.mxu0 %vm642_vm2, %v5752_v14  ;;  %5672 = vmatprep.mubr.msk.bf16.mxu1 %vm642_vm2, %v5753_v15  ;;  %v5798_v60 = vld [vmem:[%s5861_s21 + $0xd8] sm:$0xff]   ;;  %v5800_v62 = vld [vmem:[%s5861_s21 + $0xe0] sm:$0xff]   ;;  %v5802_v0 = vld [vmem:[%s5861_s21 + $0xe8] sm:$0xff]  }
  0x22   : > { %v5799_v61 = vld [vmem:[%s5861_s21 + $0x1d8] sm:$0xff]   ;;  %v5801_v63 = vld [vmem:[%s5861_s21 + $0x1e0] sm:$0xff]   ;;  %v5803_v1 = vld [vmem:[%s5861_s21 + $0x1e8] sm:$0xff]  }
  0x23   : > { %v5804_v2 = vld [vmem:[%s5861_s21 + $0xf0] sm:$0xff]   ;;  %v5806_v4 = vld [vmem:[%s5861_s21 + $0xf8] sm:$0xff]   ;;  %v5994_v13 = vld [vmem:[%s7674_s2] ss:$0 sm:$0xff] }
  0x24   : > { %v5805_v3 = vld [vmem:[%s5861_s21 + $0x1f0] sm:$0xff]   ;;  %v5807_v5 = vld [vmem:[%s5861_s21 + $0x1f8] sm:$0xff]  }
  0x28   : > { %5609 = vmatmul.mubr.msk.bf16.gmra.mxu0 %vm642_vm2, %v5754_v16  ;;  %5673 = vmatmul.mubr.msk.bf16.gmra.mxu1 %vm642_vm2, %v5755_v17  ;;  %v1646_v16 = vunpack.c.0.s8 %v1645_v9  ;;  %v1648_v17 = vshrl.u32 %v1647_v10, 7 }
  0x29   : > { %5612 = vmatprep.mubr.msk.bf16.mxu0 %vm642_vm2, %v5756_v18  ;;  %5676 = vmatprep.mubr.msk.bf16.mxu1 %vm642_vm2, %v5757_v19 }
  0x30   : > { %5613 = vmatmul.mubr.msk.bf16.gmra.mxu0 %vm642_vm2, %v5758_v20  ;;  %5677 = vmatmul.mubr.msk.bf16.gmra.mxu1 %vm642_vm2, %v5759_v21 }
  0x31   : > { %5616 = vmatprep.mubr.msk.bf16.mxu0 %vm642_vm2, %v5760_v22  ;;  %5680 = vmatprep.mubr.msk.bf16.mxu1 %vm642_vm2, %v5761_v23 }
  0x38   : > { %5617 = vmatmul.mubr.msk.bf16.gmra.mxu0 %vm642_vm2, %v5762_v24  ;;  %5681 = vmatmul.mubr.msk.bf16.gmra.mxu1 %vm642_vm2, %v5763_v25 }
  0x39   : > { %5620 = vmatprep.mubr.msk.bf16.mxu0 %vm642_vm2, %v5764_v26  ;;  %5684 = vmatprep.mubr.msk.bf16.mxu1 %vm642_vm2, %v5765_v27 }
  0x40   : > { %5621 = vmatmul.mubr.msk.bf16.gmra.mxu0 %vm642_vm2, %v5766_v28  ;;  %5685 = vmatmul.mubr.msk.bf16.gmra.mxu1 %vm642_vm2, %v5767_v29  ;;  %v6007_v29 = vsub.s32 %v1646_v16, %v1648_v17 }
  0x41   : > { %5624 = vmatprep.mubr.msk.bf16.mxu0 %vm642_vm2, %v5768_v30  ;;  %5688 = vmatprep.mubr.msk.bf16.mxu1 %vm642_vm2, %v5769_v31 }
  0x48   : > { %5625 = vmatmul.mubr.msk.bf16.gmra.mxu0 %vm642_vm2, %v5770_v32  ;;  %5689 = vmatmul.mubr.msk.bf16.gmra.mxu1 %vm642_vm2, %v5771_v33 }
  0x49   : > { %5628 = vmatprep.mubr.msk.bf16.mxu0 %vm642_vm2, %v5772_v34  ;;  %5692 = vmatprep.mubr.msk.bf16.mxu1 %vm642_vm2, %v5773_v35 }
  0x50   : > { %5629 = vmatmul.mubr.msk.bf16.gmra.mxu0 %vm642_vm2, %v5774_v36  ;;  %5693 = vmatmul.mubr.msk.bf16.gmra.mxu1 %vm642_vm2, %v5775_v37 }
  0x51   : > { %5632 = vmatprep.mubr.msk.bf16.mxu0 %vm642_vm2, %v5776_v38  ;;  %5696 = vmatprep.mubr.msk.bf16.mxu1 %vm642_vm2, %v5777_v39 }
  0x58   : > { %5633 = vmatmul.mubr.msk.bf16.gmra.mxu0 %vm642_vm2, %v5778_v40  ;;  %5697 = vmatmul.mubr.msk.bf16.gmra.mxu1 %vm642_vm2, %v5779_v41 }
  0x59   : > { %5636 = vmatprep.mubr.msk.bf16.mxu0 %vm642_vm2, %v5780_v42  ;;  %5700 = vmatprep.mubr.msk.bf16.mxu1 %vm642_vm2, %v5781_v43 }
  0x60   : > { %5637 = vmatmul.mubr.msk.bf16.gmra.mxu0 %vm642_vm2, %v5782_v44  ;;  %5701 = vmatmul.mubr.msk.bf16.gmra.mxu1 %vm642_vm2, %v5783_v45 }
  0x61   : > { %5640 = vmatprep.mubr.msk.bf16.mxu0 %vm642_vm2, %v5784_v46  ;;  %5704 = vmatprep.mubr.msk.bf16.mxu1 %vm642_vm2, %v5785_v47 }
  0x68   : > { %5641 = vmatmul.mubr.msk.bf16.gmra.mxu0 %vm642_vm2, %v5786_v48  ;;  %5705 = vmatmul.mubr.msk.bf16.gmra.mxu1 %vm642_vm2, %v5787_v49 }
  0x69   : > { %5644 = vmatprep.mubr.msk.bf16.mxu0 %vm642_vm2, %v5788_v50  ;;  %5708 = vmatprep.mubr.msk.bf16.mxu1 %vm642_vm2, %v5789_v51 }
  0x70   : > { %5645 = vmatmul.mubr.msk.bf16.gmra.mxu0 %vm642_vm2, %v5790_v52  ;;  %5709 = vmatmul.mubr.msk.bf16.gmra.mxu1 %vm642_vm2, %v5791_v53 }
  0x71   : > { %5648 = vmatprep.mubr.msk.bf16.mxu0 %vm642_vm2, %v5792_v54  ;;  %5712 = vmatprep.mubr.msk.bf16.mxu1 %vm642_vm2, %v5793_v55 }
  0x78   : > { %5649 = vmatmul.mubr.msk.bf16.gmra.mxu0 %vm642_vm2, %v5794_v56  ;;  %5713 = vmatmul.mubr.msk.bf16.gmra.mxu1 %vm642_vm2, %v5795_v57 }
  0x79   : > { %5652 = vmatprep.mubr.msk.bf16.mxu0 %vm642_vm2, %v5796_v58  ;;  %5716 = vmatprep.mubr.msk.bf16.mxu1 %vm642_vm2, %v5797_v59 }
  0x80   : > { %5653 = vmatmul.mubr.msk.bf16.gmra.mxu0 %vm642_vm2, %v5798_v60  ;;  %5717 = vmatmul.mubr.msk.bf16.gmra.mxu1 %vm642_vm2, %v5799_v61 }
  0x81   : > { %5656 = vmatprep.mubr.msk.bf16.mxu0 %vm642_vm2, %v5800_v62  ;;  %5720 = vmatprep.mubr.msk.bf16.mxu1 %vm642_vm2, %v5801_v63 }
  0x88   : > { %5657 = vmatmul.mubr.msk.bf16.gmra.mxu0 %vm642_vm2, %v5802_v0  ;;  %5721 = vmatmul.mubr.msk.bf16.gmra.mxu1 %vm642_vm2, %v5803_v1 }
  0x89   : > { %5660 = vmatprep.mubr.msk.bf16.mxu0 %vm642_vm2, %v5804_v2  ;;  %5724 = vmatprep.mubr.msk.bf16.mxu1 %vm642_vm2, %v5805_v3 }
  0x90   : > { %5661 = vmatmul.mubr.msk.bf16.gmra.mxu0 %vm642_vm2, %v5806_v4  ;;  %5725 = vmatmul.mubr.msk.bf16.gmra.mxu1 %vm642_vm2, %v5807_v5 }
  0xd8   : > { %v5602_v6 = vpop.f32.mrf.mxu0  ;;  %v5666_v7 = vpop.f32.mrf.mxu1 }
  0xd9   : > { %v885_v18 = vadd.f32 %v5602_v6, %v5994_v13  ;;  %v1141_v19 = vadd.f32 %v5666_v7, %v5994_v13 }
  0xda   : > { %v876_v11 = vpop.f32.mrf.mxu0  ;;  %v1132_v12 = vpop.f32.mrf.mxu1 }
  0xdb   : > { %v877_v22 = vadd.f32 %v5994_v13, %v876_v11  ;;  %v1133_v23 = vadd.f32 %v5994_v13, %v1132_v12  ;;  %v1389_v31 = vmax.f32 %v885_v18, 0.0  ;;  %v1453_v32 = vmax.f32 %v1141_v19, 0.0 }
  0xdc   : > { %v5603_v14 = vpop.f32.mrf.mxu0  ;;  %v5667_v15 = vpop.f32.mrf.mxu1 }
  0xdd   : > { %v6001_v24 = vadd.f32 %v5603_v14, %v5994_v13  ;;  %v6004_v25 = vadd.f32 %v5667_v15, %v5994_v13  ;;  %v1387_v41 = vmax.f32 %v877_v22, 0.0  ;;  %v1451_v42 = vmax.f32 %v1133_v23, 0.0 }
  0xde   : > { %v879_v20 = vpop.f32.mrf.mxu0  ;;  %v1135_v21 = vpop.f32.mrf.mxu1 }
  0xdf   : > { %v6011_v33 = vadd.f32 %v5994_v13, %v879_v20  ;;  %v6014_v34 = vadd.f32 %v5994_v13, %v1135_v21  ;;  %v1390_v43 = vmax.f32 %v6001_v24, 0.0  ;;  %v1454_v44 = vmax.f32 %v6004_v25, 0.0 }
  0xe0   : > { %v5606_v26 = vpop.f32.mrf.mxu0  ;;  %v5670_v27 = vpop.f32.mrf.mxu1 }
  0xe1   : > { %v901_v28 = vadd.f32 %v5606_v26, %v5994_v13  ;;  %v1157_v30 = vadd.f32 %v5670_v27, %v5994_v13  ;;  %v1388_v51 = vmax.f32 %v6011_v33, 0.0  ;;  %v1452_v52 = vmax.f32 %v6014_v34, 0.0 }
  0xe2   : > { %v892_v35 = vpop.f32.mrf.mxu0  ;;  %v1148_v36 = vpop.f32.mrf.mxu1 }
  0xe3   : > { %v1393_v37 = vmax.f32 %v901_v28, 0.0  ;;  %v1457_v38 = vmax.f32 %v1157_v30, 0.0  ;;  %v893_v39 = vadd.f32 %v5994_v13, %v892_v35  ;;  %v1149_v40 = vadd.f32 %v5994_v13, %v1148_v36 }
  0xe4   : > { %v5607_v45 = vpop.f32.mrf.mxu0  ;;  %v5671_v46 = vpop.f32.mrf.mxu1 }
  0xe5   : > { %v1517_v47 = vmax.f32 %v1389_v31, %v1393_v37  ;;  %v1549_v48 = vmax.f32 %v1453_v32, %v1457_v38  ;;  %v1391_v49 = vmax.f32 %v893_v39, 0.0  ;;  %v1455_v50 = vmax.f32 %v1149_v40, 0.0 }
  0xe6   : > { %v6023_v53 = vadd.f32 %v5607_v45, %v5994_v13  ;;  %v6026_v54 = vadd.f32 %v5671_v46, %v5994_v13 }
  0xe7   : > { %v1677_v55 = vcombine.high %v1517_v47, %v1517_v47  ;;  %v1684_v56 = vrot.slane %v1517_v47, %v6007_v29  ;;  %v2221_v57 = vcombine.high %v1549_v48, %v1549_v48  ;;  %v2228_v58 = vrot.slane %v1549_v48, %v6007_v29 }
  0xe8   : > { %v6030_v59 = vmax.f32 %v1387_v41, %v1391_v49  ;;  %v6032_v60 = vmax.f32 %v1451_v42, %v1455_v50  ;;  %v1394_v61 = vmax.f32 %v6023_v53, 0.0  ;;  %v1458_v62 = vmax.f32 %v6026_v54, 0.0 }
  0xe9   : > { %v1691_v63 = vrot.slane %v1677_v55, %v6007_v29  ;;  %v1692_v0 = vcombine.high %v1684_v56, %v1684_v56  ;;  %v3044_v1 = vsel %vm2987_vm3, %v1684_v56, -inf  ;;  %v2235_v2 = vrot.slane %v2221_v57, %v6007_v29 }
  0xea   : > { %v3045_v3 = vrot.slane %v3044_v1, 4  ;;  %v2236_v4 = vcombine.high %v2228_v58, %v2228_v58  ;;  %v3940_v5 = vsel %vm2987_vm3, %v2228_v58, -inf  ;;  %v1643_v6 = vcombine.high %v6030_v59, %v6030_v59 }
  0xeb   : > { %v1693_v7 = vcombine.high %v1691_v63, %v1691_v63  ;;  %v3051_v8 = vsel %vm2987_vm3, %v1692_v0, -inf  ;;  %v3058_v9 = vsel %vm2987_vm3, %v1691_v63, -inf  ;;  %v2237_v10 = vcombine.high %v2235_v2, %v2235_v2 }
  0xec   : > { %v3046_v11 = vmax.f32 %v3044_v1, %v3045_v3  ;;  %v3052_v12 = vrot.slane %v3051_v8, 4  ;;  %v3059_v14 = vrot.slane %v3058_v9, 4  ;;  %v3941_v15 = vrot.slane %v3940_v5, 4 }
  0xed   : > { %v3065_v16 = vsel %vm2987_vm3, %v1693_v7, -inf  ;;  %v3947_v17 = vsel %vm2987_vm3, %v2236_v4, -inf  ;;  %v3954_v18 = vsel %vm2987_vm3, %v2235_v2, -inf  ;;  %v3961_v19 = vsel %vm2987_vm3, %v2237_v10, -inf }
  0xee   : > { %v3047_v20 = vrot.slane %v3046_v11, 2  ;;  %v3053_v21 = vmax.f32 %v3051_v8, %v3052_v12  ;;  %v3060_v22 = vmax.f32 %v3058_v9, %v3059_v14  ;;  %v3066_v23 = vrot.slane %v3065_v16, 4 }
  0xef   : > { %v3942_v26 = vmax.f32 %v3940_v5, %v3941_v15  ;;  %v3948_v27 = vrot.slane %v3947_v17, 4  ;;  %v3955_v28 = vrot.slane %v3954_v18, 4  ;;  %v3962_v30 = vrot.slane %v3961_v19, 4 }
  0xf0   : > { %v3048_v31 = vmax.f32 %v3046_v11, %v3047_v20  ;;  %v3054_v32 = vrot.slane %v3053_v21, 2  ;;  %v3061_v35 = vrot.slane %v3060_v22, 2  ;;  %v3067_v36 = vmax.f32 %v3065_v16, %v3066_v23 }
  0xf1   : > { %v3943_v37 = vrot.slane %v3942_v26, 2  ;;  %v3949_v38 = vmax.f32 %v3947_v17, %v3948_v27  ;;  %v3956_v39 = vmax.f32 %v3954_v18, %v3955_v28  ;;  %v3963_v40 = vmax.f32 %v3961_v19, %v3962_v30 }
  0xf2   : > { %v3049_v41 = vrot.slane %v3048_v31, 1  ;;  %v3055_v42 = vmax.f32 %v3053_v21, %v3054_v32  ;;  %v3062_v45 = vmax.f32 %v3060_v22, %v3061_v35  ;;  %v3068_v46 = vrot.slane %v3067_v36, 2 }
  0xf3   : > { %v3944_v47 = vmax.f32 %v3942_v26, %v3943_v37  ;;  %v3950_v48 = vrot.slane %v3949_v38, 2  ;;  %v3957_v49 = vrot.slane %v3956_v39, 2  ;;  %v3964_v50 = vrot.slane %v3963_v40, 2 }
  0xf4   : > { %v3050_v55 = vmax.f32 %v3048_v31, %v3049_v41  ;;  %v3056_v56 = vrot.slane %v3055_v42, 1  ;;  %v3063_v57 = vrot.slane %v3062_v45, 1  ;;  %v3069_v58 = vmax.f32 %v3067_v36, %v3068_v46 }
  0xf5   : > { %v3945_v63 = vrot.slane %v3944_v47, 1  ;;  %v3951_v0 = vmax.f32 %v3949_v38, %v3950_v48  ;;  %v3958_v1 = vmax.f32 %v3956_v39, %v3957_v49  ;;  %v3965_v2 = vmax.f32 %v3963_v40, %v3964_v50 }
  0xf6   : > { %v3057_v3 = vmax.f32 %v3055_v42, %v3056_v56  ;;  %v3064_v4 = vmax.f32 %v3062_v45, %v3063_v57  ;;  %v3070_v5 = vrot.slane %v3069_v58, 1  ;;  %v1650_v7 = vrot.slane %v6030_v59, %v6007_v29 }
  0xf7   : > { %v3946_v8 = vmax.f32 %v3944_v47, %v3945_v63  ;;  %v3952_v9 = vrot.slane %v3951_v0, 1  ;;  %v3959_v10 = vrot.slane %v3958_v1, 1  ;;  %v3966_v11 = vrot.slane %v3965_v2, 1 }
  0xf8   : > { %v6050_v12 = vmax.f32 %v3069_v58, %v3070_v5  ;;  %v5050_v14 = vsel %vm5036_vm4, %v3057_v3, %v3050_v55  ;;  %v1657_v15 = vrot.slane %v1643_v6, %v6007_v29  ;;  %v1658_v16 = vcombine.high %v1650_v7, %v1650_v7 }
  0xf9   : > { %v6055_v17 = vsel %vm5038_vm5, %v3064_v4, %v5050_v14  ;;  %v3953_v18 = vmax.f32 %v3951_v0, %v3952_v9  ;;  %v3960_v19 = vmax.f32 %v3958_v1, %v3959_v10  ;;  %v6057_v20 = vmax.f32 %v3965_v2, %v3966_v11 }
  0xfa   : > { %v1659_v21 = vcombine.high %v1657_v15, %v1657_v15  ;;  %v2988_v59 = vsel %vm2987_vm3, %v1650_v7, -inf  ;;  %v2995_v22 = vsel %vm2987_vm3, %v1658_v16, -inf  ;;  %v3002_v23 = vsel %vm2987_vm3, %v1657_v15, -inf }
  0xfb   : > { %v5162_v26 = vsel %vm5036_vm4, %v3953_v18, %v3946_v8  ;;  %v2989_v27 = vrot.slane %v2988_v59, 4  ;;  %v2996_v28 = vrot.slane %v2995_v22, 4  ;;  %v3003_v6 = vrot.slane %v3002_v23, 4 }
  0xfc   : > { %v6064_v30 = vsel %vm5038_vm5, %v3960_v19, %v5162_v26  ;;  %v3009_v31 = vsel %vm2987_vm3, %v1659_v21, -inf  ;;  %v2187_v32 = vcombine.high %v6032_v60, %v6032_v60  ;;  %v2194_v35 = vrot.slane %v6032_v60, %v6007_v29 }
  0xfd   : > { %v2990_v36 = vmax.f32 %v2988_v59, %v2989_v27  ;;  %v2997_v37 = vmax.f32 %v2995_v22, %v2996_v28  ;;  %v3004_v38 = vmax.f32 %v3002_v23, %v3003_v6  ;;  %v3010_v39 = vrot.slane %v3009_v31, 4 }
  0xfe   : > { %v2201_v40 = vrot.slane %v2187_v32, %v6007_v29  ;;  %v2202_v41 = vcombine.high %v2194_v35, %v2194_v35  ;;  %v3884_v42 = vsel %vm2987_vm3, %v2194_v35, -inf  ;;  %v1518_v45 = vmax.f32 %v1390_v43, %v1394_v61 }
  0xff   : > { %v2991_v46 = vrot.slane %v2990_v36, 2  ;;  %v2998_v47 = vrot.slane %v2997_v37, 2  ;;  %v3005_v48 = vrot.slane %v3004_v38, 2  ;;  %v3011_v49 = vmax.f32 %v3009_v31, %v3010_v39 }
 0x100   : > { %v2203_v50 = vcombine.high %v2201_v40, %v2201_v40  ;;  %v3885_v60 = vrot.slane %v3884_v42, 4  ;;  %v3891_v55 = vsel %vm2987_vm3, %v2202_v41, -inf  ;;  %v3898_v56 = vsel %vm2987_vm3, %v2201_v40, -inf }
 0x101   : > { %v2992_v57 = vmax.f32 %v2990_v36, %v2991_v46  ;;  %v2999_v58 = vmax.f32 %v2997_v37, %v2998_v47  ;;  %v3006_v63 = vmax.f32 %v3004_v38, %v3005_v48  ;;  %v3012_v0 = vrot.slane %v3011_v49, 2 }
 0x102   : > { %v3886_v1 = vmax.f32 %v3884_v42, %v3885_v60  ;;  %v3892_v2 = vrot.slane %v3891_v55, 4  ;;  %v3899_v53 = vrot.slane %v3898_v56, 4  ;;  %v3905_v24 = vsel %vm2987_vm3, %v2203_v50, -inf }
 0x103   : > { %v2993_v43 = vrot.slane %v2992_v57, 1  ;;  %v3000_v61 = vrot.slane %v2999_v58, 1  ;;  %v3007_v3 = vrot.slane %v3006_v63, 1  ;;  %v3013_v4 = vmax.f32 %v3011_v49, %v3012_v0 }
 0x104   : > { %v3887_v5 = vrot.slane %v3886_v1, 2  ;;  %v3893_v7 = vmax.f32 %v3891_v55, %v3892_v2  ;;  %v3900_v8 = vmax.f32 %v3898_v56, %v3899_v53  ;;  %v3906_v9 = vrot.slane %v3905_v24, 4  ;;  %v895_v53 = vpop.f32.mrf.mxu0 }
 0x105   : > { %v2994_v10 = vmax.f32 %v2992_v57, %v2993_v43  ;;  %v3001_v11 = vmax.f32 %v2999_v58, %v3000_v61  ;;  %v3008_v14 = vmax.f32 %v3006_v63, %v3007_v3  ;;  %v3014_v15 = vrot.slane %v3013_v4, 1 }
 0x106   : > { %v3888_v16 = vmax.f32 %v3886_v1, %v3887_v5  ;;  %v3894_v18 = vrot.slane %v3893_v7, 2  ;;  %v3901_v19 = vrot.slane %v3900_v8, 2  ;;  %v3907_v21 = vmax.f32 %v3905_v24, %v3906_v9 }
 0x107   : > { %v3015_v59 = vmax.f32 %v3013_v4, %v3014_v15  ;;  %v5037_v22 = vsel %vm5036_vm4, %v3001_v11, %v2994_v10  ;;  %v1694_v23 = vcombine.high %v1518_v45, %v1518_v45  ;;  %v1701_v26 = vrot.slane %v1518_v45, %v6007_v29 }
 0x108   : > { %v5039_v27 = vsel %vm5038_vm5, %v3008_v14, %v5037_v22  ;;  %v3889_v28 = vrot.slane %v3888_v16, 1  ;;  %v3895_v6 = vmax.f32 %v3893_v7, %v3894_v18  ;;  %v3902_v31 = vmax.f32 %v3900_v8, %v3901_v19 }
 0x109   : > { %v3908_v32 = vrot.slane %v3907_v21, 2  ;;  %v1708_v35 = vrot.slane %v1694_v23, %v6007_v29  ;;  %v1709_v36 = vcombine.high %v1701_v26, %v1701_v26  ;;  %v3072_v37 = vsel %vm2987_vm3, %v1701_v26, -inf }
 0x10a   : > { %v3890_v38 = vmax.f32 %v3888_v16, %v3889_v28  ;;  %v3896_v39 = vrot.slane %v3895_v6, 1  ;;  %v3903_v40 = vrot.slane %v3902_v31, 1  ;;  %v3073_v41 = vrot.slane %v3072_v37, 4 }
 0x10b   : > { %v3909_v42 = vmax.f32 %v3907_v21, %v3908_v32  ;;  %v1710_v46 = vcombine.high %v1708_v35, %v1708_v35  ;;  %v3079_v47 = vsel %vm2987_vm3, %v1709_v36, -inf  ;;  %v3086_v45 = vsel %vm2987_vm3, %v1708_v35, -inf }
 0x10c   : > { %v3897_v48 = vmax.f32 %v3895_v6, %v3896_v39  ;;  %v3904_v49 = vmax.f32 %v3902_v31, %v3903_v40  ;;  %v3074_v50 = vmax.f32 %v3072_v37, %v3073_v41  ;;  %v3080_v60 = vrot.slane %v3079_v47, 4  ;;  %v1151_v31 = vpop.f32.mrf.mxu1 }
 0x10d   : > { %v3910_v55 = vrot.slane %v3909_v42, 1  ;;  %v3087_v56 = vrot.slane %v3086_v45, 4  ;;  %v3093_v57 = vsel %vm2987_vm3, %v1710_v46, -inf  ;;  %v5052_v58 = vsel %vm5040_vm6, %v6050_v12, %v6055_v17 }
 0x10e   : > { %v5155_v63 = vsel %vm5036_vm4, %v3897_v48, %v3890_v38  ;;  %v3075_v0 = vrot.slane %v3074_v50, 2  ;;  %v3081_v1 = vmax.f32 %v3079_v47, %v3080_v60  ;;  %v3094_v2 = vrot.slane %v3093_v57, 4  ;;  %v5610_v48 = vpop.f32.mrf.mxu0 }
 0x10f   : > { %v3911_v24 = vmax.f32 %v3909_v42, %v3910_v55  ;;  %v5156_v43 = vsel %vm5038_vm5, %v3904_v49, %v5155_v63  ;;  %v3088_v61 = vmax.f32 %v3086_v45, %v3087_v56  ;;  %v1550_v3 = vmax.f32 %v1454_v44, %v1458_v62  ;;  %v6123_v56 = vpop.f32.mrf.mxu1 }
 0x110   : > { %v3076_v4 = vmax.f32 %v3074_v50, %v3075_v0  ;;  %v3082_v5 = vrot.slane %v3081_v1, 2  ;;  %v3095_v12 = vmax.f32 %v3093_v57, %v3094_v2  ;;  %v6100_v17 = vsel %vm5040_vm6, %v6057_v20, %v6064_v30 }
 0x111   : > { %v3089_v7 = vrot.slane %v3088_v61, 2  ;;  %v2238_v8 = vcombine.high %v1550_v3, %v1550_v3  ;;  %v2245_v9 = vrot.slane %v1550_v3, %v6007_v29  ;;  %v896_v10 = vadd.f32 %v5994_v13, %v895_v53 }
 0x112   : > { %v3077_v11 = vrot.slane %v3076_v4, 1  ;;  %v3083_v54 = vmax.f32 %v3081_v1, %v3082_v5  ;;  %v3096_v14 = vrot.slane %v3095_v12, 2  ;;  %v6105_v25 = vsel %vm5040_vm6, %v3015_v59, %v5039_v27 }
 0x113   : > { %v3090_v44 = vmax.f32 %v3088_v61, %v3089_v7  ;;  %v2252_v62 = vrot.slane %v2238_v8, %v6007_v29  ;;  %v2253_v15 = vcombine.high %v2245_v9, %v2245_v9  ;;  %v3968_v20 = vsel %vm2987_vm3, %v2245_v9, -inf }
 0x114   : > { %v3078_v30 = vmax.f32 %v3076_v4, %v3077_v11  ;;  %v3084_v16 = vrot.slane %v3083_v54, 1  ;;  %v3097_v18 = vmax.f32 %v3095_v12, %v3096_v14  ;;  %v3969_v19 = vrot.slane %v3968_v20, 4 }
 0x115   : > { %v3091_v21 = vrot.slane %v3090_v44, 1  ;;  %v2254_v22 = vcombine.high %v2252_v62, %v2252_v62  ;;  %v3975_v23 = vsel %vm2987_vm3, %v2253_v15, -inf  ;;  %v3982_v26 = vsel %vm2987_vm3, %v2252_v62, -inf }
 0x116   : > { %v3085_v28 = vmax.f32 %v3083_v54, %v3084_v16  ;;  %v3098_v59 = vrot.slane %v3097_v18, 1  ;;  %v5053_v27 = vsel %vm5042_vm7, %v3078_v30, %v5052_v58  ;;  %v3970_v6 = vmax.f32 %v3968_v20, %v3969_v19 }
 0x117   : > { %v3092_v32 = vmax.f32 %v3090_v44, %v3091_v21  ;;  %v3976_v35 = vrot.slane %v3975_v23, 4  ;;  %v3983_v36 = vrot.slane %v3982_v26, 4  ;;  %v3989_v37 = vsel %vm2987_vm3, %v2254_v22, -inf }
 0x118   : > { %v3099_v38 = vmax.f32 %v3097_v18, %v3098_v59  ;;  %v5054_v39 = vsel %vm5044_vm8, %v3085_v28, %v5053_v27  ;;  %v3971_v40 = vrot.slane %v3970_v6, 2  ;;  %v3990_v41 = vrot.slane %v3989_v37, 4 }
 0x119   : > { %v5055_v42 = vsel %vm5046_vm9, %v3092_v32, %v5054_v39  ;;  %v3977_v46 = vmax.f32 %v3975_v23, %v3976_v35  ;;  %v3984_v47 = vmax.f32 %v3982_v26, %v3983_v36  ;;  %v1392_v45 = vmax.f32 %v896_v10, 0.0 }
 0x11a   : > { %v5056_v49 = vsel %vm5048_vm10, %v3099_v38, %v5055_v42  ;;  %v3972_v50 = vmax.f32 %v3970_v6, %v3971_v40  ;;  %v3991_v60 = vmax.f32 %v3989_v37, %v3990_v41  ;;  %v1152_v55 = vadd.f32 %v5994_v13, %v1151_v31 }
 0x11b   : > { %5300 = vst [vmem:[%s6117_s27 + $0x8] sm:$0xff] %v5056_v49  ;;  %v3978_v57 = vrot.slane %v3977_v46, 2  ;;  %v3985_v58 = vrot.slane %v3984_v47, 2  ;;  %v1516_v63 = vmax.f32 %v1388_v51, %v1392_v45  ;;  %v6129_v0 = vsel %vm5040_vm6, %v3911_v24, %v5156_v43  ;;  %v6138_v24 = vpop.f32.mrf.mxu0  ;;  %v6140_v43 = vpop.f32.mrf.mxu1 }
 0x11c   : > { %v3973_v1 = vrot.slane %v3972_v50, 1  ;;  %v3992_v2 = vrot.slane %v3991_v60, 2  ;;  %v1456_v53 = vmax.f32 %v1152_v55, 0.0  ;;  %v6132_v61 = vadd.f32 %v5610_v48, %v5994_v13 }
 0x11d   : > { %v3979_v3 = vmax.f32 %v3977_v46, %v3978_v57  ;;  %v3986_v4 = vmax.f32 %v3984_v47, %v3985_v58  ;;  %v1660_v5 = vcombine.high %v1516_v63, %v1516_v63  ;;  %v1667_v12 = vrot.slane %v1516_v63, %v6007_v29  ;;  %v6149_v22 = vpop.f32.mrf.mxu0  ;;  %v6151_v23 = vpop.f32.mrf.mxu1 }
 0x11e   : > { %v3974_v7 = vmax.f32 %v3972_v50, %v3973_v1  ;;  %v3993_v8 = vmax.f32 %v3991_v60, %v3992_v2  ;;  %v1548_v33 = vmax.f32 %v1452_v52, %v1456_v53  ;;  %v1397_v51 = vmax.f32 %v6132_v61, 0.0 }
 0x11f   : > { %v3980_v9 = vrot.slane %v3979_v3, 1  ;;  %v3987_v10 = vrot.slane %v3986_v4, 1  ;;  %v1674_v11 = vrot.slane %v1660_v5, %v6007_v29  ;;  %v1675_v54 = vcombine.high %v1667_v12, %v1667_v12  ;;  %v6161_v46 = vpop.f32.mrf.mxu0  ;;  %v6163_v47 = vpop.f32.mrf.mxu1 }
 0x120   : > { %v3994_v14 = vrot.slane %v3993_v8, 1  ;;  %v5165_v44 = vsel %vm5042_vm7, %v3974_v7, %v6100_v17  ;;  %v3016_v62 = vsel %vm2987_vm3, %v1667_v12, -inf  ;;  %v2204_v15 = vcombine.high %v1548_v33, %v1548_v33 }
 0x121   : > { %v3981_v34 = vmax.f32 %v3979_v3, %v3980_v9  ;;  %v3988_v52 = vmax.f32 %v3986_v4, %v3987_v10  ;;  %v1676_v20 = vcombine.high %v1674_v11, %v1674_v11  ;;  %v3017_v30 = vrot.slane %v3016_v62, 4  ;;  %v5614_v7 = vpop.f32.mrf.mxu0 }
 0x122   : > { %v3995_v16 = vmax.f32 %v3993_v8, %v3994_v14  ;;  %v3023_v18 = vsel %vm2987_vm3, %v1675_v54, -inf  ;;  %v3030_v19 = vsel %vm2987_vm3, %v1674_v11, -inf  ;;  %v2211_v21 = vrot.slane %v1548_v33, %v6007_v29  ;;  %v5678_v8 = vpop.f32.mrf.mxu1 }
 0x123   : > { %v5166_v17 = vsel %vm5044_vm8, %v3981_v34, %v5165_v44  ;;  %v3018_v26 = vmax.f32 %v3016_v62, %v3017_v30  ;;  %v3024_v28 = vrot.slane %v3023_v18, 4  ;;  %v3031_v59 = vrot.slane %v3030_v19, 4 }
 0x124   : > { %v5167_v27 = vsel %vm5046_vm9, %v3988_v52, %v5166_v17  ;;  %v3037_v6 = vsel %vm2987_vm3, %v1676_v20, -inf  ;;  %v2218_v31 = vrot.slane %v2204_v15, %v6007_v29  ;;  %v2219_v32 = vcombine.high %v2211_v21, %v2211_v21  ;;  %v1180_v17 = vpop.f32.mrf.mxu1 }
 0x125   : > { %v5168_v35 = vsel %vm5048_vm10, %v3995_v16, %v5167_v27  ;;  %v3019_v36 = vrot.slane %v3018_v26, 2  ;;  %v3025_v37 = vmax.f32 %v3023_v18, %v3024_v28  ;;  %v3032_v38 = vmax.f32 %v3030_v19, %v3031_v59 }
 0x126   : > { %5316 = vst [vmem:[%s6117_s27 + $0x88] sm:$0xff] %v5168_v35  ;;  %v3038_v39 = vrot.slane %v3037_v6, 4  ;;  %v2220_v40 = vcombine.high %v2218_v31, %v2218_v31  ;;  %v3912_v41 = vsel %vm2987_vm3, %v2211_v21, -inf  ;;  %v3919_v42 = vsel %vm2987_vm3, %v2219_v32, -inf  ;;  %v924_v21 = vpop.f32.mrf.mxu0 }
 0x127   : > { %v3020_v45 = vmax.f32 %v3018_v26, %v3019_v36  ;;  %v3026_v48 = vrot.slane %v3025_v37, 2  ;;  %v3033_v49 = vrot.slane %v3032_v38, 2  ;;  %v3913_v50 = vrot.slane %v3912_v41, 4 }
 0x128   : > { %v3039_v60 = vmax.f32 %v3037_v6, %v3038_v39  ;;  %v3920_v55 = vrot.slane %v3919_v42, 4  ;;  %v3926_v57 = vsel %vm2987_vm3, %v2218_v31, -inf  ;;  %v3933_v58 = vsel %vm2987_vm3, %v2220_v40, -inf }
 0x129   : > { %v3021_v63 = vrot.slane %v3020_v45, 1  ;;  %v3027_v1 = vmax.f32 %v3025_v37, %v3026_v48  ;;  %v3034_v2 = vmax.f32 %v3032_v38, %v3033_v49  ;;  %v3914_v53 = vmax.f32 %v3912_v41, %v3913_v50 }
 0x12a   : > { %v3040_v3 = vrot.slane %v3039_v60, 2  ;;  %v3921_v4 = vmax.f32 %v3919_v42, %v3920_v55  ;;  %v3927_v5 = vrot.slane %v3926_v57, 4  ;;  %v3934_v12 = vrot.slane %v3933_v58, 4  ;;  %v5615_v42 = vpop.f32.mrf.mxu0 }
 0x12b   : > { %v3022_v33 = vmax.f32 %v3020_v45, %v3021_v63  ;;  %v3028_v9 = vrot.slane %v3027_v1, 1  ;;  %v3035_v10 = vrot.slane %v3034_v2, 1  ;;  %v3915_v11 = vrot.slane %v3914_v53, 2  ;;  %v5679_v45 = vpop.f32.mrf.mxu1 }
 0x12c   : > { %v3041_v54 = vmax.f32 %v3039_v60, %v3040_v3  ;;  %v3922_v14 = vrot.slane %v3921_v4, 2  ;;  %v3928_v44 = vmax.f32 %v3926_v57, %v3927_v5  ;;  %v3935_v62 = vmax.f32 %v3933_v58, %v3934_v12  ;;  %v927_v3 = vpop.f32.mrf.mxu0 }
 0x12d   : > { %v3029_v15 = vmax.f32 %v3027_v1, %v3028_v9  ;;  %v3036_v34 = vmax.f32 %v3034_v2, %v3035_v10  ;;  %v5043_v52 = vsel %vm5042_vm7, %v3022_v33, %v6105_v25  ;;  %v3916_v20 = vmax.f32 %v3914_v53, %v3915_v11 }
 0x12e   : > { %v3042_v30 = vrot.slane %v3041_v54, 1  ;;  %v3923_v16 = vmax.f32 %v3921_v4, %v3922_v14  ;;  %v3929_v18 = vrot.slane %v3928_v44, 2  ;;  %v3936_v19 = vrot.slane %v3935_v62, 2 }
 0x12f   : > { %v5045_v26 = vsel %vm5044_vm8, %v3029_v15, %v5043_v52  ;;  %v3917_v28 = vrot.slane %v3916_v20, 1  ;;  %v1173_v59 = vadd.f32 %v6123_v56, %v5994_v13  ;;  %v909_v27 = vadd.f32 %v5994_v13, %v6138_v24 }
 0x130   : > { %v3043_v6 = vmax.f32 %v3041_v54, %v3042_v30  ;;  %v5047_v25 = vsel %vm5046_vm9, %v3036_v34, %v5045_v26  ;;  %v3924_v31 = vrot.slane %v3923_v16, 1  ;;  %v3930_v32 = vmax.f32 %v3928_v44, %v3929_v18 }
 0x131   : > { %v3918_v35 = vmax.f32 %v3916_v20, %v3917_v28  ;;  %v3937_v36 = vmax.f32 %v3935_v62, %v3936_v19  ;;  %v1461_v37 = vmax.f32 %v1173_v59, 0.0  ;;  %v1395_v38 = vmax.f32 %v909_v27, 0.0 }
 0x132   : > { %v5049_v39 = vsel %vm5048_vm10, %v3043_v6, %v5047_v25  ;;  %v3925_v40 = vmax.f32 %v3923_v16, %v3924_v31  ;;  %v3931_v41 = vrot.slane %v3930_v32, 1  ;;  %v1165_v56 = vadd.f32 %v5994_v13, %v6140_v43 }
 0x133   : > { %5299 = vst [vmem:[%s6117_s27] sm:$0xff] %v5049_v39  ;;  %v3938_v24 = vrot.slane %v3937_v36, 1  ;;  %v5158_v48 = vsel %vm5042_vm7, %v3918_v35, %v6129_v0  ;;  %v6183_v49 = vadd.f32 %v6149_v22, %v5994_v13  ;;  %v6187_v50 = vadd.f32 %v6151_v23, %v5994_v13 }
 0x134   : > { %v3932_v60 = vmax.f32 %v3930_v32, %v3931_v41  ;;  %v5159_v55 = vsel %vm5044_vm8, %v3925_v40, %v5158_v48  ;;  %v1459_v57 = vmax.f32 %v1165_v56, 0.0  ;;  %v6192_v43 = vadd.f32 %v5994_v13, %v6161_v46  ;;  %v1183_v46 = vpop.f32.mrf.mxu1 }
 0x135   : > { %v3939_v58 = vmax.f32 %v3937_v36, %v3938_v24  ;;  %v1398_v0 = vmax.f32 %v6183_v49, 0.0  ;;  %v1462_v63 = vmax.f32 %v6187_v50, 0.0  ;;  %v6198_v22 = vadd.f32 %v5994_v13, %v6163_v47 }
 0x136   : > { %v5160_v23 = vsel %vm5046_vm9, %v3932_v60, %v5159_v55  ;;  %v1396_v1 = vmax.f32 %v6192_v43, 0.0  ;;  %v933_v2 = vadd.f32 %v5614_v7, %v5994_v13  ;;  %v1189_v53 = vadd.f32 %v5678_v8, %v5994_v13 }
 0x137   : > { %v5161_v4 = vsel %vm5048_vm10, %v3939_v58, %v5160_v23  ;;  %v1460_v5 = vmax.f32 %v6198_v22, 0.0  ;;  %v925_v12 = vadd.f32 %v5994_v13, %v924_v21  ;;  %v1181_v33 = vadd.f32 %v5994_v13, %v1180_v17 }
 0x138   : > { %5315 = vst [vmem:[%s6117_s27 + $0x80] sm:$0xff] %v5161_v4  ;;  %v1401_v47 = vmax.f32 %v933_v2, 0.0  ;;  %v1465_v9 = vmax.f32 %v1189_v53, 0.0  ;;  %v6210_v10 = vadd.f32 %v5615_v42, %v5994_v13  ;;  %v6213_v7 = vadd.f32 %v5679_v45, %v5994_v13 }
 0x139   : > { %v1399_v8 = vmax.f32 %v925_v12, 0.0  ;;  %v1463_v11 = vmax.f32 %v1181_v33, 0.0  ;;  %v6216_v54 = vadd.f32 %v5994_v13, %v927_v3  ;;  %v6219_v14 = vadd.f32 %v5994_v13, %v1183_v46 }
 0x13a   : > { %v1521_v44 = vmax.f32 %v1397_v51, %v1401_v47  ;;  %v1553_v62 = vmax.f32 %v1461_v37, %v1465_v9  ;;  %v1402_v15 = vmax.f32 %v6210_v10, 0.0  ;;  %v1466_v34 = vmax.f32 %v6213_v7, 0.0 }
 0x13b   : > { %v1519_v52 = vmax.f32 %v1395_v38, %v1399_v8  ;;  %v6225_v20 = vmax.f32 %v1459_v57, %v1463_v11  ;;  %v1400_v30 = vmax.f32 %v6216_v54, 0.0  ;;  %v1464_v16 = vmax.f32 %v6219_v14, 0.0 }
 0x13c   : > { %v1745_v18 = vcombine.high %v1521_v44, %v1521_v44  ;;  %v1752_v19 = vrot.slane %v1521_v44, %v6007_v29  ;;  %v2289_v13 = vcombine.high %v1553_v62, %v1553_v62  ;;  %v2296_v21 = vrot.slane %v1553_v62, %v6007_v29 }
 0x13d   : > { %v1711_v61 = vcombine.high %v1519_v52, %v1519_v52  ;;  %v6232_v51 = vrot.slane %v1519_v52, %v6007_v29  ;;  %v2255_v17 = vcombine.high %v6225_v20, %v6225_v20  ;;  %v6238_v26 = vrot.slane %v6225_v20, %v6007_v29 }
 0x13e   : > { %v1759_v28 = vrot.slane %v1745_v18, %v6007_v29  ;;  %v1760_v59 = vcombine.high %v1752_v19, %v1752_v19  ;;  %v3156_v27 = vsel %vm2987_vm3, %v1752_v19, -inf  ;;  %v2303_v6 = vrot.slane %v2289_v13, %v6007_v29 }
 0x13f   : > { %v3157_v25 = vrot.slane %v3156_v27, 4  ;;  %v2304_v31 = vcombine.high %v2296_v21, %v2296_v21  ;;  %v4052_v32 = vsel %vm2987_vm3, %v2296_v21, -inf  ;;  %v6245_v35 = vrot.slane %v1711_v61, %v6007_v29 }
 0x140   : > { %v1761_v36 = vcombine.high %v1759_v28, %v1759_v28  ;;  %v3163_v37 = vsel %vm2987_vm3, %v1760_v59, -inf  ;;  %v3170_v38 = vsel %vm2987_vm3, %v1759_v28, -inf  ;;  %v2305_v39 = vcombine.high %v2303_v6, %v2303_v6 }
 0x141   : > { %v3158_v40 = vmax.f32 %v3156_v27, %v3157_v25  ;;  %v3164_v41 = vrot.slane %v3163_v37, 4  ;;  %v3171_v56 = vrot.slane %v3170_v38, 4  ;;  %v4053_v42 = vrot.slane %v4052_v32, 4 }
 0x142   : > { %v3177_v45 = vsel %vm2987_vm3, %v1761_v36, -inf  ;;  %v4059_v24 = vsel %vm2987_vm3, %v2304_v31, -inf  ;;  %v4066_v48 = vsel %vm2987_vm3, %v2303_v6, -inf  ;;  %v4073_v60 = vsel %vm2987_vm3, %v2305_v39, -inf }
 0x143   : > { %v3159_v55 = vrot.slane %v3158_v40, 2  ;;  %v3165_v57 = vmax.f32 %v3163_v37, %v3164_v41  ;;  %v3172_v58 = vmax.f32 %v3170_v38, %v3171_v56  ;;  %v3178_v23 = vrot.slane %v3177_v45, 4 }
 0x144   : > { %v4054_v2 = vmax.f32 %v4052_v32, %v4053_v42  ;;  %v4060_v53 = vrot.slane %v4059_v24, 4  ;;  %v4067_v3 = vrot.slane %v4066_v48, 4  ;;  %v4074_v46 = vrot.slane %v4073_v60, 4 }
 0x145   : > { %v3160_v4 = vmax.f32 %v3158_v40, %v3159_v55  ;;  %v3166_v12 = vrot.slane %v3165_v57, 2  ;;  %v3173_v33 = vrot.slane %v3172_v58, 2  ;;  %v3179_v47 = vmax.f32 %v3177_v45, %v3178_v23 }
 0x146   : > { %v4055_v9 = vrot.slane %v4054_v2, 2  ;;  %v4061_v8 = vmax.f32 %v4059_v24, %v4060_v53  ;;  %v4068_v11 = vmax.f32 %v4066_v48, %v4067_v3  ;;  %v4075_v44 = vmax.f32 %v4073_v60, %v4074_v46 }
 0x147   : > { %v3161_v62 = vrot.slane %v3160_v4, 1  ;;  %v3167_v52 = vmax.f32 %v3165_v57, %v3166_v12  ;;  %v3174_v18 = vmax.f32 %v3172_v58, %v3173_v33  ;;  %v3180_v19 = vrot.slane %v3179_v47, 2 }
 0x148   : > { %v4056_v13 = vmax.f32 %v4054_v2, %v4055_v9  ;;  %v4062_v21 = vrot.slane %v4061_v8, 2  ;;  %v4069_v61 = vrot.slane %v4068_v11, 2  ;;  %v4076_v28 = vrot.slane %v4075_v44, 2 }
 0x149   : > { %v3162_v59 = vmax.f32 %v3160_v4, %v3161_v62  ;;  %v3168_v27 = vrot.slane %v3167_v52, 1  ;;  %v3175_v6 = vrot.slane %v3174_v18, 1  ;;  %v3181_v25 = vmax.f32 %v3179_v47, %v3180_v19 }
 0x14a   : > { %v4057_v31 = vrot.slane %v4056_v13, 1  ;;  %v4063_v32 = vmax.f32 %v4061_v8, %v4062_v21  ;;  %v4070_v36 = vmax.f32 %v4068_v11, %v4069_v61  ;;  %v4077_v37 = vmax.f32 %v4075_v44, %v4076_v28 }
 0x14b   : > { %v3169_v38 = vmax.f32 %v3167_v52, %v3168_v27  ;;  %v3176_v39 = vmax.f32 %v3174_v18, %v3175_v6  ;;  %v3182_v40 = vrot.slane %v3181_v25, 1  ;;  %v1726_v41 = vcombine.high %v6232_v51, %v6232_v51 }
 0x14c   : > { %v4058_v56 = vmax.f32 %v4056_v13, %v4057_v31  ;;  %v4064_v42 = vrot.slane %v4063_v32, 1  ;;  %v4071_v45 = vrot.slane %v4070_v36, 1  ;;  %v4078_v24 = vrot.slane %v4077_v37, 1 }
 0x14d   : > { %v6255_v48 = vmax.f32 %v3181_v25, %v3182_v40  ;;  %v5064_v60 = vsel %vm5036_vm4, %v3169_v38, %v3162_v59  ;;  %v1727_v55 = vcombine.high %v6245_v35, %v6245_v35  ;;  %v3100_v57 = vsel %vm2987_vm3, %v6232_v51, -inf }
 0x14e   : > { %v5065_v58 = vsel %vm5038_vm5, %v3176_v39, %v5064_v60  ;;  %v4065_v23 = vmax.f32 %v4063_v32, %v4064_v42  ;;  %v4072_v2 = vmax.f32 %v4070_v36, %v4071_v45  ;;  %v6263_v53 = vmax.f32 %v4077_v37, %v4078_v24 }
 0x14f   : > { %v3101_v3 = vrot.slane %v3100_v57, 4  ;;  %v3107_v46 = vsel %vm2987_vm3, %v1726_v41, -inf  ;;  %v3114_v4 = vsel %vm2987_vm3, %v6245_v35, -inf  ;;  %v3121_v12 = vsel %vm2987_vm3, %v1727_v55, -inf }
 0x150   : > { %v5176_v33 = vsel %vm5036_vm4, %v4065_v23, %v4058_v56  ;;  %v3108_v47 = vrot.slane %v3107_v46, 4  ;;  %v3115_v9 = vrot.slane %v3114_v4, 4  ;;  %v3122_v8 = vrot.slane %v3121_v12, 4 }
 0x151   : > { %v5177_v51 = vsel %vm5038_vm5, %v4072_v2, %v5176_v33  ;;  %v3102_v11 = vmax.f32 %v3100_v57, %v3101_v3  ;;  %v2269_v44 = vrot.slane %v2255_v17, %v6007_v29  ;;  %v2270_v62 = vcombine.high %v6238_v26, %v6238_v26 }
 0x152   : > { %v3109_v52 = vmax.f32 %v3107_v46, %v3108_v47  ;;  %v3116_v35 = vmax.f32 %v3114_v4, %v3115_v9  ;;  %v3123_v18 = vmax.f32 %v3121_v12, %v3122_v8  ;;  %v3996_v19 = vsel %vm2987_vm3, %v6238_v26, -inf }
 0x153   : > { %v3103_v13 = vrot.slane %v3102_v11, 2  ;;  %v2271_v21 = vcombine.high %v2269_v44, %v2269_v44  ;;  %v3997_v61 = vrot.slane %v3996_v19, 4  ;;  %v4003_v28 = vsel %vm2987_vm3, %v2270_v62, -inf }
 0x154   : > { %v3110_v59 = vrot.slane %v3109_v52, 2  ;;  %v3117_v27 = vrot.slane %v3116_v35, 2  ;;  %v3124_v6 = vrot.slane %v3123_v18, 2  ;;  %v4004_v25 = vrot.slane %v4003_v28, 4 }
 0x155   : > { %v3104_v20 = vmax.f32 %v3102_v11, %v3103_v13  ;;  %v3998_v17 = vmax.f32 %v3996_v19, %v3997_v61  ;;  %v4010_v31 = vsel %vm2987_vm3, %v2269_v44, -inf  ;;  %v4017_v32 = vsel %vm2987_vm3, %v2271_v21, -inf }
 0x156   : > { %v3111_v36 = vmax.f32 %v3109_v52, %v3110_v59  ;;  %v3118_v37 = vmax.f32 %v3116_v35, %v3117_v27  ;;  %v3125_v38 = vmax.f32 %v3123_v18, %v3124_v6  ;;  %v4005_v39 = vmax.f32 %v4003_v28, %v4004_v25 }
 0x157   : > { %v3105_v26 = vrot.slane %v3104_v20, 1  ;;  %v3999_v40 = vrot.slane %v3998_v17, 2  ;;  %v4011_v41 = vrot.slane %v4010_v31, 4  ;;  %v4018_v56 = vrot.slane %v4017_v32, 4 }
 0x158   : > { %v3112_v42 = vrot.slane %v3111_v36, 1  ;;  %v3119_v45 = vrot.slane %v3118_v37, 1  ;;  %v3126_v24 = vrot.slane %v3125_v38, 1  ;;  %v4006_v60 = vrot.slane %v4005_v39, 2 }
 0x159   : > { %v3106_v55 = vmax.f32 %v3104_v20, %v3105_v26  ;;  %v4000_v57 = vmax.f32 %v3998_v17, %v3999_v40  ;;  %v4012_v23 = vmax.f32 %v4010_v31, %v4011_v41  ;;  %v4019_v2 = vmax.f32 %v4017_v32, %v4018_v56 }
 0x15a   : > { %v3113_v3 = vmax.f32 %v3111_v36, %v3112_v42  ;;  %v3120_v46 = vmax.f32 %v3118_v37, %v3119_v45  ;;  %v6282_v4 = vmax.f32 %v3125_v38, %v3126_v24  ;;  %v4007_v12 = vmax.f32 %v4005_v39, %v4006_v60 }
 0x15b   : > { %v4001_v33 = vrot.slane %v4000_v57, 1  ;;  %v4013_v47 = vrot.slane %v4012_v23, 2  ;;  %v4020_v9 = vrot.slane %v4019_v2, 2  ;;  %v1522_v8 = vmax.f32 %v1398_v0, %v1402_v15 }
 0x15c   : > { %v5057_v11 = vsel %vm5036_vm4, %v3113_v3, %v3106_v55  ;;  %v4008_v44 = vrot.slane %v4007_v12, 1  ;;  %v6291_v62 = vsel %vm5040_vm6, %v6255_v48, %v5065_v58  ;;  %v1554_v52 = vmax.f32 %v1462_v63, %v1466_v34 }
 0x15d   : > { %v6298_v35 = vsel %vm5038_vm5, %v3120_v46, %v5057_v11  ;;  %v4002_v18 = vmax.f32 %v4000_v57, %v4001_v33  ;;  %v4014_v10 = vmax.f32 %v4012_v23, %v4013_v47  ;;  %v4021_v19 = vmax.f32 %v4019_v2, %v4020_v9 }
 0x15e   : > { %v4009_v49 = vmax.f32 %v4007_v12, %v4008_v44  ;;  %v1762_v0 = vcombine.high %v1522_v8, %v1522_v8  ;;  %v1769_v15 = vrot.slane %v1522_v8, %v6007_v29  ;;  %v2306_v13 = vcombine.high %v1554_v52, %v1554_v52 }
 0x15f   : > { %v4015_v21 = vrot.slane %v4014_v10, 1  ;;  %v4022_v61 = vrot.slane %v4021_v19, 1  ;;  %v2313_v48 = vrot.slane %v1554_v52, %v6007_v29  ;;  %v6304_v7 = vsel %vm5040_vm6, %v6263_v53, %v5177_v51 }
 0x160   : > { %v5169_v50 = vsel %vm5036_vm4, %v4009_v49, %v4002_v18  ;;  %v1776_v63 = vrot.slane %v1762_v0, %v6007_v29  ;;  %v1777_v34 = vcombine.high %v1769_v15, %v1769_v15  ;;  %v3184_v58 = vsel %vm2987_vm3, %v1769_v15, -inf }
 0x161   : > { %v4016_v28 = vmax.f32 %v4014_v10, %v4015_v21  ;;  %v6309_v59 = vmax.f32 %v4021_v19, %v4022_v61  ;;  %v3185_v27 = vrot.slane %v3184_v58, 4  ;;  %v2320_v6 = vrot.slane %v2306_v13, %v6007_v29 }
 0x162   : > { %v1778_v25 = vcombine.high %v1776_v63, %v1776_v63  ;;  %v3191_v20 = vsel %vm2987_vm3, %v1777_v34, -inf  ;;  %v3198_v17 = vsel %vm2987_vm3, %v1776_v63, -inf  ;;  %v2321_v53 = vcombine.high %v2313_v48, %v2313_v48 }
 0x163   : > { %v6315_v51 = vsel %vm5038_vm5, %v4016_v28, %v5169_v50  ;;  %v3186_v31 = vmax.f32 %v3184_v58, %v3185_v27  ;;  %v3192_v32 = vrot.slane %v3191_v20, 4  ;;  %v3199_v36 = vrot.slane %v3198_v17, 4  ;;  %v6324_v27 = vpop.f32.mrf.mxu0 }
 0x164   : > { %v3205_v37 = vsel %vm2987_vm3, %v1778_v25, -inf  ;;  %v2322_v38 = vcombine.high %v2320_v6, %v2320_v6  ;;  %v4080_v39 = vsel %vm2987_vm3, %v2313_v48, -inf  ;;  %v4087_v26 = vsel %vm2987_vm3, %v2321_v53, -inf }
 0x165   : > { %v3187_v40 = vrot.slane %v3186_v31, 2  ;;  %v3193_v41 = vmax.f32 %v3191_v20, %v3192_v32  ;;  %v3200_v56 = vmax.f32 %v3198_v17, %v3199_v36  ;;  %v3206_v42 = vrot.slane %v3205_v37, 4  ;;  %v6341_v54 = vpop.f32.mrf.mxu0 }
 0x166   : > { %v4081_v45 = vrot.slane %v4080_v39, 4  ;;  %v4088_v24 = vrot.slane %v4087_v26, 4  ;;  %v4094_v60 = vsel %vm2987_vm3, %v2320_v6, -inf  ;;  %v4101_v55 = vsel %vm2987_vm3, %v2322_v38, -inf  ;;  %v6326_v6 = vpop.f32.mrf.mxu1 }
 0x167   : > { %v3188_v57 = vmax.f32 %v3186_v31, %v3187_v40  ;;  %v3194_v23 = vrot.slane %v3193_v41, 2  ;;  %v3201_v2 = vrot.slane %v3200_v56, 2  ;;  %v3207_v3 = vmax.f32 %v3205_v37, %v3206_v42 }
 0x168   : > { %v4082_v46 = vmax.f32 %v4080_v39, %v4081_v45  ;;  %v4089_v12 = vmax.f32 %v4087_v26, %v4088_v24  ;;  %v4095_v33 = vrot.slane %v4094_v60, 4  ;;  %v4102_v47 = vrot.slane %v4101_v55, 4  ;;  %v6343_v43 = vpop.f32.mrf.mxu1 }
 0x169   : > { %v3189_v9 = vrot.slane %v3188_v57, 1  ;;  %v3195_v8 = vmax.f32 %v3193_v41, %v3194_v23  ;;  %v3202_v11 = vmax.f32 %v3200_v56, %v3201_v2  ;;  %v3208_v44 = vrot.slane %v3207_v3, 2 }
 0x16a   : > { %v4083_v52 = vrot.slane %v4082_v46, 2  ;;  %v4090_v18 = vrot.slane %v4089_v12, 2  ;;  %v4096_v10 = vmax.f32 %v4094_v60, %v4095_v33  ;;  %v4103_v19 = vmax.f32 %v4101_v55, %v4102_v47  ;;  %v6366_v2 = vpop.f32.mrf.mxu1 }
 0x16b   : > { %v3190_v49 = vmax.f32 %v3188_v57, %v3189_v9  ;;  %v3196_v0 = vrot.slane %v3195_v8, 1  ;;  %v3203_v15 = vrot.slane %v3202_v11, 1  ;;  %v3209_v13 = vmax.f32 %v3207_v3, %v3208_v44 }
 0x16c   : > { %v4084_v21 = vmax.f32 %v4082_v46, %v4083_v52  ;;  %v4091_v61 = vmax.f32 %v4089_v12, %v4090_v18  ;;  %v4097_v48 = vrot.slane %v4096_v10, 2  ;;  %v4104_v50 = vrot.slane %v4103_v19, 2 }
 0x16d   : > { %v3197_v63 = vmax.f32 %v3195_v8, %v3196_v0  ;;  %v3204_v34 = vmax.f32 %v3202_v11, %v3203_v15  ;;  %v3210_v58 = vrot.slane %v3209_v13, 1  ;;  %v5067_v28 = vsel %vm5042_vm7, %v3190_v49, %v6291_v62 }
 0x16e   : > { %v4085_v25 = vrot.slane %v4084_v21, 1  ;;  %v4092_v20 = vrot.slane %v4091_v61, 1  ;;  %v4098_v17 = vmax.f32 %v4096_v10, %v4097_v48  ;;  %v4105_v53 = vmax.f32 %v4103_v19, %v4104_v50 }
 0x16f   : > { %v3211_v31 = vmax.f32 %v3209_v13, %v3210_v58  ;;  %v5068_v32 = vsel %vm5044_vm8, %v3197_v63, %v5067_v28  ;;  %v1520_v36 = vmax.f32 %v1396_v1, %v1400_v30  ;;  %v6336_v62 = vsel %vm5040_vm6, %v6282_v4, %v6298_v35 }
 0x170   : > { %v5069_v37 = vsel %vm5046_vm9, %v3204_v34, %v5068_v32  ;;  %v4086_v38 = vmax.f32 %v4084_v21, %v4085_v25  ;;  %v4093_v39 = vmax.f32 %v4091_v61, %v4092_v20  ;;  %v4099_v26 = vrot.slane %v4098_v17, 1  ;;  %v6377_v21 = vpop.f32.mrf.mxu1 }
 0x171   : > { %v5070_v40 = vsel %vm5048_vm10, %v3211_v31, %v5069_v37  ;;  %v4106_v41 = vrot.slane %v4105_v53, 1  ;;  %v1728_v56 = vcombine.high %v1520_v36, %v1520_v36  ;;  %v1735_v42 = vrot.slane %v1520_v36, %v6007_v29 }
 0x172   : > { %5302 = vst [vmem:[%s6117_s27 + $0x18] sm:$0xff] %v5070_v40  ;;  %v4100_v1 = vmax.f32 %v4098_v17, %v4099_v26  ;;  %v5179_v30 = vsel %vm5042_vm7, %v4086_v38, %v6304_v7  ;;  %v1552_v4 = vmax.f32 %v1460_v5, %v1464_v16  ;;  %v6355_v35 = vsel %vm5040_vm6, %v6309_v59, %v6315_v51  ;;  %v6364_v51 = vpop.f32.mrf.mxu0  ;;  %v5686_v26 = vpop.f32.mrf.mxu1 }
 0x173   : > { %v4107_v45 = vmax.f32 %v4105_v53, %v4106_v41  ;;  %v5180_v24 = vsel %vm5044_vm8, %v4093_v39, %v5179_v30  ;;  %v1742_v60 = vrot.slane %v1728_v56, %v6007_v29  ;;  %v1743_v55 = vcombine.high %v1735_v42, %v1735_v42 }
 0x174   : > { %v5181_v57 = vsel %vm5046_vm9, %v4100_v1, %v5180_v24  ;;  %v3128_v7 = vsel %vm2987_vm3, %v1735_v42, -inf  ;;  %v2272_v14 = vcombine.high %v1552_v4, %v1552_v4  ;;  %v2279_v22 = vrot.slane %v1552_v4, %v6007_v29  ;;  %v6375_v13 = vpop.f32.mrf.mxu0 }
 0x175   : > { %v5182_v5 = vsel %vm5048_vm10, %v4107_v45, %v5181_v57  ;;  %v1744_v16 = vcombine.high %v1742_v60, %v1742_v60  ;;  %v3129_v23 = vrot.slane %v3128_v7, 4  ;;  %v3135_v59 = vsel %vm2987_vm3, %v1743_v55, -inf }
 0x176   : > { %5318 = vst [vmem:[%s6117_s27 + $0x98] sm:$0xff] %v5182_v5  ;;  %v3136_v3 = vrot.slane %v3135_v59, 4  ;;  %v3142_v46 = vsel %vm2987_vm3, %v1742_v60, -inf  ;;  %v2286_v12 = vrot.slane %v2272_v14, %v6007_v29  ;;  %v2287_v33 = vcombine.high %v2279_v22, %v2279_v22  ;;  %v5622_v39 = vpop.f32.mrf.mxu0 }
 0x177   : > { %v3130_v47 = vmax.f32 %v3128_v7, %v3129_v23  ;;  %v3143_v9 = vrot.slane %v3142_v46, 4  ;;  %v3149_v8 = vsel %vm2987_vm3, %v1744_v16, -inf  ;;  %v4024_v11 = vsel %vm2987_vm3, %v2279_v22, -inf  ;;  %v1212_v23 = vpop.f32.mrf.mxu1 }
 0x178   : > { %v3137_v44 = vmax.f32 %v3135_v59, %v3136_v3  ;;  %v3150_v52 = vrot.slane %v3149_v8, 4  ;;  %v2288_v18 = vcombine.high %v2286_v12, %v2286_v12  ;;  %v4025_v10 = vrot.slane %v4024_v11, 4  ;;  %v956_v16 = vpop.f32.mrf.mxu0 }
 0x179   : > { %v3131_v19 = vrot.slane %v3130_v47, 2  ;;  %v3144_v49 = vmax.f32 %v3142_v46, %v3143_v9  ;;  %v4031_v0 = vsel %vm2987_vm3, %v2287_v33, -inf  ;;  %v4038_v15 = vsel %vm2987_vm3, %v2286_v12, -inf }
 0x17a   : > { %v3138_v61 = vrot.slane %v3137_v44, 2  ;;  %v3151_v48 = vmax.f32 %v3149_v8, %v3150_v52  ;;  %v4026_v50 = vmax.f32 %v4024_v11, %v4025_v10  ;;  %v4032_v63 = vrot.slane %v4031_v0, 4  ;;  %v6387_v8 = vld [vmem:[%s7674_s2] ss:$0 sm:$0xff] }
 0x17b   : > { %v3132_v34 = vmax.f32 %v3130_v47, %v3131_v19  ;;  %v3145_v58 = vrot.slane %v3144_v49, 2  ;;  %v4039_v28 = vrot.slane %v4038_v15, 4  ;;  %v4045_v25 = vsel %vm2987_vm3, %v2288_v18, -inf }
 0x17c   : > { %v3139_v20 = vmax.f32 %v3137_v44, %v3138_v61  ;;  %v3152_v17 = vrot.slane %v3151_v48, 2  ;;  %v4027_v53 = vrot.slane %v4026_v50, 2  ;;  %v4033_v31 = vmax.f32 %v4031_v0, %v4032_v63  ;;  %v5687_v61 = vpop.f32.mrf.mxu1 }
 0x17d   : > { %v3133_v32 = vrot.slane %v3132_v34, 1  ;;  %v3146_v36 = vmax.f32 %v3144_v49, %v3145_v58  ;;  %v4040_v37 = vmax.f32 %v4038_v15, %v4039_v28  ;;  %v4046_v38 = vrot.slane %v4045_v25, 4  ;;  %v5623_v15 = vpop.f32.mrf.mxu0 }
 0x17e   : > { %v3140_v40 = vrot.slane %v3139_v20, 1  ;;  %v3153_v41 = vmax.f32 %v3151_v48, %v3152_v17  ;;  %v4028_v56 = vmax.f32 %v4026_v50, %v4027_v53  ;;  %v4034_v42 = vrot.slane %v4033_v31, 2 }
 0x17f   : > { %v3134_v1 = vmax.f32 %v3132_v34, %v3133_v32  ;;  %v3147_v30 = vrot.slane %v3146_v36, 1  ;;  %v4041_v4 = vrot.slane %v4040_v37, 2  ;;  %v4047_v45 = vmax.f32 %v4045_v25, %v4046_v38  ;;  %v959_v53 = vpop.f32.mrf.mxu0 }
 0x180   : > { %v3141_v24 = vmax.f32 %v3139_v20, %v3140_v40  ;;  %v3154_v60 = vrot.slane %v3153_v41, 1  ;;  %v4029_v55 = vrot.slane %v4028_v56, 1  ;;  %v4035_v57 = vmax.f32 %v4033_v31, %v4034_v42  ;;  %v1215_v31 = vpop.f32.mrf.mxu1 }
 0x181   : > { %v3148_v7 = vmax.f32 %v3146_v36, %v3147_v30  ;;  %v5060_v14 = vsel %vm5042_vm7, %v3134_v1, %v6336_v62  ;;  %v4042_v22 = vmax.f32 %v4040_v37, %v4041_v4  ;;  %v4048_v5 = vrot.slane %v4047_v45, 2 }
 0x182   : > { %v3155_v59 = vmax.f32 %v3153_v41, %v3154_v60  ;;  %v5061_v3 = vsel %vm5044_vm8, %v3141_v24, %v5060_v14  ;;  %v4030_v46 = vmax.f32 %v4028_v56, %v4029_v55  ;;  %v4036_v12 = vrot.slane %v4035_v57, 1 }
 0x183   : > { %v5062_v33 = vsel %vm5046_vm9, %v3148_v7, %v5061_v3  ;;  %v4043_v47 = vrot.slane %v4042_v22, 1  ;;  %v4049_v9 = vmax.f32 %v4047_v45, %v4048_v5  ;;  %v949_v62 = vadd.f32 %v6387_v8, %v6324_v27 }
 0x184   : > { %v5063_v11 = vsel %vm5048_vm10, %v3155_v59, %v5062_v33  ;;  %v4037_v44 = vmax.f32 %v4035_v57, %v4036_v12  ;;  %v5172_v52 = vsel %vm5042_vm7, %v4030_v46, %v6355_v35  ;;  %v1205_v18 = vadd.f32 %v6387_v8, %v6326_v6 }
 0x185   : > { %5301 = vst [vmem:[%s6117_s27 + $0x10] sm:$0xff] %v5063_v11  ;;  %v4044_v10 = vmax.f32 %v4042_v22, %v4043_v47  ;;  %v4050_v19 = vrot.slane %v4049_v9, 1  ;;  %v1405_v49 = vmax.f32 %v949_v62, 0.0  ;;  %v941_v0 = vadd.f32 %v6387_v8, %v6341_v54 }
 0x186   : > { %v5173_v27 = vsel %vm5044_vm8, %v4037_v44, %v5172_v52  ;;  %v1469_v48 = vmax.f32 %v1205_v18, 0.0  ;;  %v1197_v50 = vadd.f32 %v6387_v8, %v6343_v43  ;;  %v6404_v35 = vadd.f32 %v6387_v8, %v6364_v51 }
 0x187   : > { %v4051_v6 = vmax.f32 %v4049_v9, %v4050_v19  ;;  %v5174_v63 = vsel %vm5046_vm9, %v4044_v10, %v5173_v27  ;;  %v1403_v34 = vmax.f32 %v941_v0, 0.0  ;;  %v6409_v54 = vadd.f32 %v6387_v8, %v6366_v2 }
 0x188   : > { %v1467_v58 = vmax.f32 %v1197_v50, 0.0  ;;  %v1406_v28 = vmax.f32 %v6404_v35, 0.0  ;;  %v6414_v25 = vadd.f32 %v6387_v8, %v6375_v13  ;;  %v6418_v43 = vadd.f32 %v6387_v8, %v6377_v21 }
 0x189   : > { %v5175_v51 = vsel %vm5048_vm10, %v4051_v6, %v5174_v63  ;;  %v1470_v20 = vmax.f32 %v6409_v54, 0.0  ;;  %v965_v17 = vadd.f32 %v6387_v8, %v5622_v39  ;;  %v1221_v2 = vadd.f32 %v6387_v8, %v5686_v26 }
 0x18a   : > { %5317 = vst [vmem:[%s6117_s27 + $0x90] sm:$0xff] %v5175_v51  ;;  %v1404_v32 = vmax.f32 %v6414_v25, 0.0  ;;  %v1468_v13 = vmax.f32 %v6418_v43, 0.0  ;;  %v957_v36 = vadd.f32 %v6387_v8, %v956_v16  ;;  %v1213_v21 = vadd.f32 %v6387_v8, %v1212_v23 }
 0x18b   : > { %v1409_v37 = vmax.f32 %v965_v17, 0.0  ;;  %v1473_v38 = vmax.f32 %v1221_v2, 0.0  ;;  %v6430_v40 = vadd.f32 %v6387_v8, %v5623_v15  ;;  %v6433_v39 = vadd.f32 %v6387_v8, %v5687_v61 }
 0x18c   : > { %v1407_v26 = vmax.f32 %v957_v36, 0.0  ;;  %v1471_v41 = vmax.f32 %v1213_v21, 0.0  ;;  %v6436_v56 = vadd.f32 %v6387_v8, %v959_v53  ;;  %v6439_v42 = vadd.f32 %v6387_v8, %v1215_v31 }
 0x18d   : > { %v1525_v1 = vmax.f32 %v1405_v49, %v1409_v37  ;;  %v1557_v30 = vmax.f32 %v1469_v48, %v1473_v38  ;;  %v1410_v4 = vmax.f32 %v6430_v40, 0.0  ;;  %v1474_v45 = vmax.f32 %v6433_v39, 0.0 }
 0x18e   : > { %v1523_v24 = vmax.f32 %v1403_v34, %v1407_v26  ;;  %v6443_v60 = vmax.f32 %v1467_v58, %v1471_v41  ;;  %v1408_v55 = vmax.f32 %v6436_v56, 0.0  ;;  %v1472_v57 = vmax.f32 %v6439_v42, 0.0 }
 0x18f   : > { %v1813_v7 = vcombine.high %v1525_v1, %v1525_v1  ;;  %v1820_v14 = vrot.slane %v1525_v1, %v6007_v29  ;;  %v2357_v22 = vcombine.high %v1557_v30, %v1557_v30  ;;  %v2364_v5 = vrot.slane %v1557_v30, %v6007_v29 }
 0x190   : > { %v1779_v16 = vcombine.high %v1523_v24, %v1523_v24  ;;  %v6450_v23 = vrot.slane %v1523_v24, %v6007_v29  ;;  %v2323_v59 = vcombine.high %v6443_v60, %v6443_v60  ;;  %v6456_v3 = vrot.slane %v6443_v60, %v6007_v29 }
 0x191   : > { %v1827_v46 = vrot.slane %v1813_v7, %v6007_v29  ;;  %v1828_v12 = vcombine.high %v1820_v14, %v1820_v14  ;;  %v3268_v33 = vsel %vm2987_vm3, %v1820_v14, -inf  ;;  %v2371_v47 = vrot.slane %v2357_v22, %v6007_v29 }
 0x192   : > { %v3269_v9 = vrot.slane %v3268_v33, 4  ;;  %v2372_v62 = vcombine.high %v2364_v5, %v2364_v5  ;;  %v4164_v11 = vsel %vm2987_vm3, %v2364_v5, -inf  ;;  %v6463_v44 = vrot.slane %v1779_v16, %v6007_v29 }
 0x193   : > { %v1829_v52 = vcombine.high %v1827_v46, %v1827_v46  ;;  %v3275_v18 = vsel %vm2987_vm3, %v1828_v12, -inf  ;;  %v3282_v10 = vsel %vm2987_vm3, %v1827_v46, -inf  ;;  %v2373_v19 = vcombine.high %v2371_v47, %v2371_v47 }
 0x194   : > { %v3270_v49 = vmax.f32 %v3268_v33, %v3269_v9  ;;  %v3276_v0 = vrot.slane %v3275_v18, 4  ;;  %v3283_v15 = vrot.slane %v3282_v10, 4  ;;  %v4165_v61 = vrot.slane %v4164_v11, 4 }
 0x195   : > { %v3289_v27 = vsel %vm2987_vm3, %v1829_v52, -inf  ;;  %v4171_v48 = vsel %vm2987_vm3, %v2372_v62, -inf  ;;  %v4178_v50 = vsel %vm2987_vm3, %v2371_v47, -inf  ;;  %v4185_v6 = vsel %vm2987_vm3, %v2373_v19, -inf }
 0x196   : > { %v3271_v63 = vrot.slane %v3270_v49, 2  ;;  %v3277_v34 = vmax.f32 %v3275_v18, %v3276_v0  ;;  %v3284_v58 = vmax.f32 %v3282_v10, %v3283_v15  ;;  %v3290_v51 = vrot.slane %v3289_v27, 4 }
 0x197   : > { %v4166_v17 = vmax.f32 %v4164_v11, %v4165_v61  ;;  %v4172_v2 = vrot.slane %v4171_v48, 4  ;;  %v4179_v53 = vrot.slane %v4178_v50, 4  ;;  %v4186_v31 = vrot.slane %v4185_v6, 4 }
 0x198   : > { %v3272_v36 = vmax.f32 %v3270_v49, %v3271_v63  ;;  %v3278_v21 = vrot.slane %v3277_v34, 2  ;;  %v3285_v37 = vrot.slane %v3284_v58, 2  ;;  %v3291_v38 = vmax.f32 %v3289_v27, %v3290_v51 }
 0x199   : > { %v4167_v26 = vrot.slane %v4166_v17, 2  ;;  %v4173_v41 = vmax.f32 %v4171_v48, %v4172_v2  ;;  %v4180_v1 = vmax.f32 %v4178_v50, %v4179_v53  ;;  %v4187_v30 = vmax.f32 %v4185_v6, %v4186_v31 }
 0x19a   : > { %v3273_v24 = vrot.slane %v3272_v36, 1  ;;  %v3279_v7 = vmax.f32 %v3277_v34, %v3278_v21  ;;  %v3286_v14 = vmax.f32 %v3284_v58, %v3285_v37  ;;  %v3292_v22 = vrot.slane %v3291_v38, 2 }
 0x19b   : > { %v4168_v5 = vmax.f32 %v4166_v17, %v4167_v26  ;;  %v4174_v16 = vrot.slane %v4173_v41, 2  ;;  %v4181_v46 = vrot.slane %v4180_v1, 2  ;;  %v4188_v12 = vrot.slane %v4187_v30, 2 }
 0x19c   : > { %v3274_v33 = vmax.f32 %v3272_v36, %v3273_v24  ;;  %v3280_v47 = vrot.slane %v3279_v7, 1  ;;  %v3287_v9 = vrot.slane %v3286_v14, 1  ;;  %v3293_v62 = vmax.f32 %v3291_v38, %v3292_v22 }
 0x19d   : > { %v4169_v11 = vrot.slane %v4168_v5, 1  ;;  %v4175_v52 = vmax.f32 %v4173_v41, %v4174_v16  ;;  %v4182_v18 = vmax.f32 %v4180_v1, %v4181_v46  ;;  %v4189_v10 = vmax.f32 %v4187_v30, %v4188_v12 }
 0x19e   : > { %v3281_v19 = vmax.f32 %v3279_v7, %v3280_v47  ;;  %v3288_v49 = vmax.f32 %v3286_v14, %v3287_v9  ;;  %v3294_v0 = vrot.slane %v3293_v62, 1  ;;  %v1794_v15 = vcombine.high %v6450_v23, %v6450_v23 }
 0x19f   : > { %v4170_v61 = vmax.f32 %v4168_v5, %v4169_v11  ;;  %v4176_v27 = vrot.slane %v4175_v52, 1  ;;  %v4183_v48 = vrot.slane %v4182_v18, 1  ;;  %v4190_v50 = vrot.slane %v4189_v10, 1 }
 0x1a0   : > { %v6473_v6 = vmax.f32 %v3293_v62, %v3294_v0  ;;  %v5078_v63 = vsel %vm5036_vm4, %v3281_v19, %v3274_v33  ;;  %v1795_v34 = vcombine.high %v6463_v44, %v6463_v44  ;;  %v3212_v58 = vsel %vm2987_vm3, %v6450_v23, -inf }
 0x1a1   : > { %v5079_v51 = vsel %vm5038_vm5, %v3288_v49, %v5078_v63  ;;  %v4177_v17 = vmax.f32 %v4175_v52, %v4176_v27  ;;  %v4184_v2 = vmax.f32 %v4182_v18, %v4183_v48  ;;  %v6481_v53 = vmax.f32 %v4189_v10, %v4190_v50 }
 0x1a2   : > { %v3213_v31 = vrot.slane %v3212_v58, 4  ;;  %v3219_v36 = vsel %vm2987_vm3, %v1794_v15, -inf  ;;  %v3226_v21 = vsel %vm2987_vm3, %v6463_v44, -inf  ;;  %v3233_v37 = vsel %vm2987_vm3, %v1795_v34, -inf }
 0x1a3   : > { %v5190_v38 = vsel %vm5036_vm4, %v4177_v17, %v4170_v61  ;;  %v3220_v26 = vrot.slane %v3219_v36, 4  ;;  %v3227_v41 = vrot.slane %v3226_v21, 4  ;;  %v3234_v1 = vrot.slane %v3233_v37, 4 }
 0x1a4   : > { %v5191_v23 = vsel %vm5038_vm5, %v4184_v2, %v5190_v38  ;;  %v3214_v30 = vmax.f32 %v3212_v58, %v3213_v31  ;;  %v2337_v24 = vrot.slane %v2323_v59, %v6007_v29  ;;  %v2338_v7 = vcombine.high %v6456_v3, %v6456_v3 }
 0x1a5   : > { %v3221_v14 = vmax.f32 %v3219_v36, %v3220_v26  ;;  %v3228_v44 = vmax.f32 %v3226_v21, %v3227_v41  ;;  %v3235_v22 = vmax.f32 %v3233_v37, %v3234_v1  ;;  %v4108_v5 = vsel %vm2987_vm3, %v6456_v3, -inf }
 0x1a6   : > { %v3215_v16 = vrot.slane %v3214_v30, 2  ;;  %v2339_v46 = vcombine.high %v2337_v24, %v2337_v24  ;;  %v4109_v12 = vrot.slane %v4108_v5, 4  ;;  %v4115_v33 = vsel %vm2987_vm3, %v2338_v7, -inf }
 0x1a7   : > { %v3222_v47 = vrot.slane %v3221_v14, 2  ;;  %v3229_v9 = vrot.slane %v3228_v44, 2  ;;  %v3236_v62 = vrot.slane %v3235_v22, 2  ;;  %v4116_v11 = vrot.slane %v4115_v33, 4 }
 0x1a8   : > { %v3216_v60 = vmax.f32 %v3214_v30, %v3215_v16  ;;  %v4110_v59 = vmax.f32 %v4108_v5, %v4109_v12  ;;  %v4122_v52 = vsel %vm2987_vm3, %v2337_v24, -inf  ;;  %v4129_v18 = vsel %vm2987_vm3, %v2339_v46, -inf }
 0x1a9   : > { %v3223_v10 = vmax.f32 %v3221_v14, %v3222_v47  ;;  %v3230_v19 = vmax.f32 %v3228_v44, %v3229_v9  ;;  %v3237_v49 = vmax.f32 %v3235_v22, %v3236_v62  ;;  %v4117_v0 = vmax.f32 %v4115_v33, %v4116_v11 }
 0x1aa   : > { %v3217_v3 = vrot.slane %v3216_v60, 1  ;;  %v4111_v15 = vrot.slane %v4110_v59, 2  ;;  %v4123_v61 = vrot.slane %v4122_v52, 4  ;;  %v4130_v27 = vrot.slane %v4129_v18, 4 }
 0x1ab   : > { %v3224_v48 = vrot.slane %v3223_v10, 1  ;;  %v3231_v50 = vrot.slane %v3230_v19, 1  ;;  %v3238_v63 = vrot.slane %v3237_v49, 1  ;;  %v4118_v34 = vrot.slane %v4117_v0, 2 }
 0x1ac   : > { %v3218_v58 = vmax.f32 %v3216_v60, %v3217_v3  ;;  %v4112_v17 = vmax.f32 %v4110_v59, %v4111_v15  ;;  %v4124_v2 = vmax.f32 %v4122_v52, %v4123_v61  ;;  %v4131_v31 = vmax.f32 %v4129_v18, %v4130_v27 }
 0x1ad   : > { %v3225_v36 = vmax.f32 %v3223_v10, %v3224_v48  ;;  %v3232_v21 = vmax.f32 %v3230_v19, %v3231_v50  ;;  %v6500_v37 = vmax.f32 %v3237_v49, %v3238_v63  ;;  %v4119_v38 = vmax.f32 %v4117_v0, %v4118_v34 }
 0x1ae   : > { %v4113_v26 = vrot.slane %v4112_v17, 1  ;;  %v4125_v41 = vrot.slane %v4124_v2, 2  ;;  %v4132_v1 = vrot.slane %v4131_v31, 2  ;;  %v1526_v30 = vmax.f32 %v1406_v28, %v1410_v4 }
 0x1af   : > { %v5071_v24 = vsel %vm5036_vm4, %v3225_v36, %v3218_v58  ;;  %v4120_v7 = vrot.slane %v4119_v38, 1  ;;  %v6509_v14 = vsel %vm5040_vm6, %v6473_v6, %v5079_v51  ;;  %v1558_v44 = vmax.f32 %v1470_v20, %v1474_v45 }
 0x1b0   : > { %v6516_v22 = vsel %vm5038_vm5, %v3232_v21, %v5071_v24  ;;  %v4114_v5 = vmax.f32 %v4112_v17, %v4113_v26  ;;  %v4126_v40 = vmax.f32 %v4124_v2, %v4125_v41  ;;  %v4133_v16 = vmax.f32 %v4131_v31, %v4132_v1 }
 0x1b1   : > { %v4121_v35 = vmax.f32 %v4119_v38, %v4120_v7  ;;  %v1830_v28 = vcombine.high %v1526_v30, %v1526_v30  ;;  %v1837_v4 = vrot.slane %v1526_v30, %v6007_v29  ;;  %v2374_v46 = vcombine.high %v1558_v44, %v1558_v44 }
 0x1b2   : > { %v4127_v12 = vrot.slane %v4126_v40, 1  ;;  %v4134_v33 = vrot.slane %v4133_v16, 1  ;;  %v2381_v6 = vrot.slane %v1558_v44, %v6007_v29  ;;  %v6522_v39 = vsel %vm5040_vm6, %v6481_v53, %v5191_v23 }
 0x1b3   : > { %v5183_v54 = vsel %vm5036_vm4, %v4121_v35, %v4114_v5  ;;  %v1844_v20 = vrot.slane %v1830_v28, %v6007_v29  ;;  %v1845_v45 = vcombine.high %v1837_v4, %v1837_v4  ;;  %v3296_v51 = vsel %vm2987_vm3, %v1837_v4, -inf }
 0x1b4   : > { %v4128_v47 = vmax.f32 %v4126_v40, %v4127_v12  ;;  %v6527_v9 = vmax.f32 %v4133_v16, %v4134_v33  ;;  %v3297_v62 = vrot.slane %v3296_v51, 4  ;;  %v2388_v11 = vrot.slane %v2374_v46, %v6007_v29 }
 0x1b5   : > { %v1846_v60 = vcombine.high %v1844_v20, %v1844_v20  ;;  %v3303_v59 = vsel %vm2987_vm3, %v1845_v45, -inf  ;;  %v3310_v52 = vsel %vm2987_vm3, %v1844_v20, -inf  ;;  %v2389_v53 = vcombine.high %v2381_v6, %v2381_v6 }
 0x1b6   : > { %v6533_v23 = vsel %vm5038_vm5, %v4128_v47, %v5183_v54  ;;  %v3298_v18 = vmax.f32 %v3296_v51, %v3297_v62  ;;  %v3304_v10 = vrot.slane %v3303_v59, 4  ;;  %v3311_v19 = vrot.slane %v3310_v52, 4 }
 0x1b7   : > { %v3317_v49 = vsel %vm2987_vm3, %v1846_v60, -inf  ;;  %v2390_v0 = vcombine.high %v2388_v11, %v2388_v11  ;;  %v4192_v3 = vsel %vm2987_vm3, %v2381_v6, -inf  ;;  %v4199_v15 = vsel %vm2987_vm3, %v2389_v53, -inf  ;;  %v6544_v60 = vpop.f32.mrf.mxu1 }
 0x1b8   : > { %v3299_v61 = vrot.slane %v3298_v18, 2  ;;  %v3305_v27 = vmax.f32 %v3303_v59, %v3304_v10  ;;  %v3312_v48 = vmax.f32 %v3310_v52, %v3311_v19  ;;  %v3318_v50 = vrot.slane %v3317_v49, 4 }
 0x1b9   : > { %v4193_v63 = vrot.slane %v4192_v3, 4  ;;  %v4200_v34 = vrot.slane %v4199_v15, 4  ;;  %v4206_v58 = vsel %vm2987_vm3, %v2388_v11, -inf  ;;  %v4213_v17 = vsel %vm2987_vm3, %v2390_v0, -inf  ;;  %v6542_v11 = vpop.f32.mrf.mxu0  ;;  %v6561_v25 = vpop.f32.mrf.mxu1 }
 0x1ba   : > { %v3300_v2 = vmax.f32 %v3298_v18, %v3299_v61  ;;  %v3306_v31 = vrot.slane %v3305_v27, 2  ;;  %v3313_v36 = vrot.slane %v3312_v48, 2  ;;  %v3319_v21 = vmax.f32 %v3317_v49, %v3318_v50 }
 0x1bb   : > { %v4194_v38 = vmax.f32 %v4192_v3, %v4193_v63  ;;  %v4201_v26 = vmax.f32 %v4199_v15, %v4200_v34  ;;  %v4207_v41 = vrot.slane %v4206_v58, 4  ;;  %v4214_v1 = vrot.slane %v4213_v17, 4  ;;  %v6559_v56 = vpop.f32.mrf.mxu0 }
 0x1bc   : > { %v3301_v30 = vrot.slane %v3300_v2, 1  ;;  %v3307_v24 = vmax.f32 %v3305_v27, %v3306_v31  ;;  %v3314_v7 = vmax.f32 %v3312_v48, %v3313_v36  ;;  %v3320_v44 = vrot.slane %v3319_v21, 2 }
 0x1bd   : > { %v4195_v5 = vrot.slane %v4194_v38, 2  ;;  %v4202_v40 = vrot.slane %v4201_v26, 2  ;;  %v4208_v16 = vmax.f32 %v4206_v58, %v4207_v41  ;;  %v4215_v35 = vmax.f32 %v4213_v17, %v4214_v1 }
 0x1be   : > { %v3302_v28 = vmax.f32 %v3300_v2, %v3301_v30  ;;  %v3308_v4 = vrot.slane %v3307_v24, 1  ;;  %v3315_v46 = vrot.slane %v3314_v7, 1  ;;  %v3321_v12 = vmax.f32 %v3319_v21, %v3320_v44  ;;  %v6584_v21 = vpop.f32.mrf.mxu1 }
 0x1bf   : > { %v4196_v33 = vmax.f32 %v4194_v38, %v4195_v5  ;;  %v4203_v6 = vmax.f32 %v4201_v26, %v4202_v40  ;;  %v4209_v54 = vrot.slane %v4208_v16, 2  ;;  %v4216_v20 = vrot.slane %v4215_v35, 2 }
 0x1c0   : > { %v3309_v45 = vmax.f32 %v3307_v24, %v3308_v4  ;;  %v3316_v51 = vmax.f32 %v3314_v7, %v3315_v46  ;;  %v3322_v47 = vrot.slane %v3321_v12, 1  ;;  %v5081_v62 = vsel %vm5042_vm7, %v3302_v28, %v6509_v14 }
 0x1c1   : > { %v4197_v59 = vrot.slane %v4196_v33, 1  ;;  %v4204_v52 = vrot.slane %v4203_v6, 1  ;;  %v4210_v53 = vmax.f32 %v4208_v16, %v4209_v54  ;;  %v4217_v18 = vmax.f32 %v4215_v35, %v4216_v20 }
 0x1c2   : > { %v3323_v10 = vmax.f32 %v3321_v12, %v3322_v47  ;;  %v5082_v19 = vsel %vm5044_vm8, %v3309_v45, %v5081_v62  ;;  %v1524_v49 = vmax.f32 %v1404_v32, %v1408_v55  ;;  %v6554_v14 = vsel %vm5040_vm6, %v6500_v37, %v6516_v22 }
 0x1c3   : > { %v5083_v0 = vsel %vm5046_vm9, %v3316_v51, %v5082_v19  ;;  %v4198_v3 = vmax.f32 %v4196_v33, %v4197_v59  ;;  %v4205_v15 = vmax.f32 %v4203_v6, %v4204_v52  ;;  %v4211_v61 = vrot.slane %v4210_v53, 1  ;;  %v6595_v6 = vpop.f32.mrf.mxu1 }
 0x1c4   : > { %v5084_v27 = vsel %vm5048_vm10, %v3323_v10, %v5083_v0  ;;  %v4218_v48 = vrot.slane %v4217_v18, 1  ;;  %v1796_v50 = vcombine.high %v1524_v49, %v1524_v49  ;;  %v1803_v63 = vrot.slane %v1524_v49, %v6007_v29 }
 0x1c5   : > { %5304 = vst [vmem:[%s6117_s27 + $0x28] sm:$0xff] %v5084_v27  ;;  %v4212_v32 = vmax.f32 %v4210_v53, %v4211_v61  ;;  %v5193_v55 = vsel %vm5042_vm7, %v4198_v3, %v6522_v39  ;;  %v1556_v37 = vmax.f32 %v1468_v13, %v1472_v57  ;;  %v6573_v22 = vsel %vm5040_vm6, %v6527_v9, %v6533_v23  ;;  %v6582_v23 = vpop.f32.mrf.mxu0  ;;  %v5694_v27 = vpop.f32.mrf.mxu1 }
 0x1c6   : > { %v4219_v34 = vmax.f32 %v4217_v18, %v4218_v48  ;;  %v5194_v58 = vsel %vm5044_vm8, %v4205_v15, %v5193_v55  ;;  %v1810_v17 = vrot.slane %v1796_v50, %v6007_v29  ;;  %v1811_v2 = vcombine.high %v1803_v63, %v1803_v63 }
 0x1c7   : > { %v5195_v31 = vsel %vm5046_vm9, %v4212_v32, %v5194_v58  ;;  %v3240_v39 = vsel %vm2987_vm3, %v1803_v63, -inf  ;;  %v2340_v42 = vcombine.high %v1556_v37, %v1556_v37  ;;  %v2347_v43 = vrot.slane %v1556_v37, %v6007_v29  ;;  %v6593_v33 = vpop.f32.mrf.mxu0 }
 0x1c8   : > { %v5196_v13 = vsel %vm5048_vm10, %v4219_v34, %v5195_v31  ;;  %v1812_v57 = vcombine.high %v1810_v17, %v1810_v17  ;;  %v3241_v36 = vrot.slane %v3240_v39, 4  ;;  %v3247_v9 = vsel %vm2987_vm3, %v1811_v2, -inf }
 0x1c9   : > { %5320 = vst [vmem:[%s6117_s27 + $0xa8] sm:$0xff] %v5196_v13  ;;  %v3248_v38 = vrot.slane %v3247_v9, 4  ;;  %v3254_v26 = vsel %vm2987_vm3, %v1810_v17, -inf  ;;  %v2354_v41 = vrot.slane %v2340_v42, %v6007_v29  ;;  %v2355_v1 = vcombine.high %v2347_v43, %v2347_v43  ;;  %v5630_v61 = vpop.f32.mrf.mxu0 }
 0x1ca   : > { %v3242_v30 = vmax.f32 %v3240_v39, %v3241_v36  ;;  %v3255_v24 = vrot.slane %v3254_v26, 4  ;;  %v3261_v7 = vsel %vm2987_vm3, %v1812_v57, -inf  ;;  %v4136_v44 = vsel %vm2987_vm3, %v2347_v43, -inf }
 0x1cb   : > { %v3249_v5 = vmax.f32 %v3247_v9, %v3248_v38  ;;  %v3262_v40 = vrot.slane %v3261_v7, 4  ;;  %v2356_v16 = vcombine.high %v2354_v41, %v2354_v41  ;;  %v4137_v35 = vrot.slane %v4136_v44, 4  ;;  %v988_v36 = vpop.f32.mrf.mxu0  ;;  %v1244_v9 = vpop.f32.mrf.mxu1 }
 0x1cc   : > { %v3243_v28 = vrot.slane %v3242_v30, 2  ;;  %v3256_v4 = vmax.f32 %v3254_v26, %v3255_v24  ;;  %v4143_v46 = vsel %vm2987_vm3, %v2355_v1, -inf  ;;  %v4150_v12 = vsel %vm2987_vm3, %v2354_v41, -inf }
 0x1cd   : > { %v3250_v54 = vrot.slane %v3249_v5, 2  ;;  %v3263_v20 = vmax.f32 %v3261_v7, %v3262_v40  ;;  %v4138_v45 = vmax.f32 %v4136_v44, %v4137_v35  ;;  %v4144_v51 = vrot.slane %v4143_v46, 4 }
 0x1ce   : > { %v3244_v47 = vmax.f32 %v3242_v30, %v3243_v28  ;;  %v3257_v62 = vrot.slane %v3256_v4, 2  ;;  %v4151_v59 = vrot.slane %v4150_v12, 4  ;;  %v4157_v52 = vsel %vm2987_vm3, %v2356_v16, -inf }
 0x1cf   : > { %v3251_v53 = vmax.f32 %v3249_v5, %v3250_v54  ;;  %v3264_v18 = vrot.slane %v3263_v20, 2  ;;  %v4139_v10 = vrot.slane %v4138_v45, 2  ;;  %v4145_v19 = vmax.f32 %v4143_v46, %v4144_v51  ;;  %v5695_v54 = vpop.f32.mrf.mxu1 }
 0x1d0   : > { %v3245_v49 = vrot.slane %v3244_v47, 1  ;;  %v3258_v0 = vmax.f32 %v3256_v4, %v3257_v62  ;;  %v4152_v3 = vmax.f32 %v4150_v12, %v4151_v59  ;;  %v4158_v15 = vrot.slane %v4157_v52, 4  ;;  %v5631_v12 = vpop.f32.mrf.mxu0 }
 0x1d1   : > { %v3252_v48 = vrot.slane %v3251_v53, 1  ;;  %v3265_v50 = vmax.f32 %v3263_v20, %v3264_v18  ;;  %v4140_v63 = vmax.f32 %v4138_v45, %v4139_v10  ;;  %v4146_v32 = vrot.slane %v4145_v19, 2 }
 0x1d2   : > { %v3246_v55 = vmax.f32 %v3244_v47, %v3245_v49  ;;  %v3259_v37 = vrot.slane %v3258_v0, 1  ;;  %v4153_v34 = vrot.slane %v4152_v3, 2  ;;  %v4159_v58 = vmax.f32 %v4157_v52, %v4158_v15  ;;  %v991_v10 = vpop.f32.mrf.mxu0 }
 0x1d3   : > { %v3253_v17 = vmax.f32 %v3251_v53, %v3252_v48  ;;  %v3266_v2 = vrot.slane %v3265_v50, 1  ;;  %v4141_v31 = vrot.slane %v4140_v63, 1  ;;  %v4147_v39 = vmax.f32 %v4145_v19, %v4146_v32  ;;  %v1247_v19 = vpop.f32.mrf.mxu1 }
 0x1d4   : > { %v3260_v42 = vmax.f32 %v3258_v0, %v3259_v37  ;;  %v5074_v43 = vsel %vm5042_vm7, %v3246_v55, %v6554_v14  ;;  %v4154_v13 = vmax.f32 %v4152_v3, %v4153_v34  ;;  %v4160_v57 = vrot.slane %v4159_v58, 2 }
 0x1d5   : > { %v3267_v38 = vmax.f32 %v3265_v50, %v3266_v2  ;;  %v5075_v26 = vsel %vm5044_vm8, %v3253_v17, %v5074_v43  ;;  %v4142_v41 = vmax.f32 %v4140_v63, %v4141_v31  ;;  %v4148_v1 = vrot.slane %v4147_v39, 1 }
 0x1d6   : > { %v5076_v30 = vsel %vm5046_vm9, %v3260_v42, %v5075_v26  ;;  %v4155_v24 = vrot.slane %v4154_v13, 1  ;;  %v4161_v7 = vmax.f32 %v4159_v58, %v4160_v57  ;;  %v981_v44 = vadd.f32 %v6387_v8, %v6542_v11 }
 0x1d7   : > { %v5077_v5 = vsel %vm5048_vm10, %v3267_v38, %v5076_v30  ;;  %v4149_v14 = vmax.f32 %v4147_v39, %v4148_v1  ;;  %v5186_v40 = vsel %vm5042_vm7, %v4142_v41, %v6573_v22  ;;  %v1237_v16 = vadd.f32 %v6387_v8, %v6544_v60 }
 0x1d8   : > { %5303 = vst [vmem:[%s6117_s27 + $0x20] sm:$0xff] %v5077_v5  ;;  %v4156_v35 = vmax.f32 %v4154_v13, %v4155_v24  ;;  %v4162_v28 = vrot.slane %v4161_v7, 1  ;;  %v1413_v4 = vmax.f32 %v981_v44, 0.0  ;;  %v973_v46 = vadd.f32 %v6387_v8, %v6559_v56 }
 0x1d9   : > { %v5187_v11 = vsel %vm5044_vm8, %v4149_v14, %v5186_v40  ;;  %v1477_v20 = vmax.f32 %v1237_v16, 0.0  ;;  %v1229_v45 = vadd.f32 %v6387_v8, %v6561_v25  ;;  %v6617_v22 = vadd.f32 %v6387_v8, %v6582_v23 }
 0x1da   : > { %v4163_v60 = vmax.f32 %v4161_v7, %v4162_v28  ;;  %v5188_v51 = vsel %vm5046_vm9, %v4156_v35, %v5187_v11  ;;  %v1411_v47 = vmax.f32 %v973_v46, 0.0  ;;  %v6622_v56 = vadd.f32 %v6387_v8, %v6584_v21 }
 0x1db   : > { %v1475_v62 = vmax.f32 %v1229_v45, 0.0  ;;  %v1414_v59 = vmax.f32 %v6617_v22, 0.0  ;;  %v6627_v52 = vadd.f32 %v6387_v8, %v6593_v33  ;;  %v6631_v25 = vadd.f32 %v6387_v8, %v6595_v6 }
 0x1dc   : > { %v5189_v23 = vsel %vm5048_vm10, %v4163_v60, %v5188_v51  ;;  %v1478_v53 = vmax.f32 %v6622_v56, 0.0  ;;  %v997_v18 = vadd.f32 %v6387_v8, %v5630_v61  ;;  %v1253_v21 = vadd.f32 %v6387_v8, %v5694_v27 }
 0x1dd   : > { %5319 = vst [vmem:[%s6117_s27 + $0xa0] sm:$0xff] %v5189_v23  ;;  %v1412_v49 = vmax.f32 %v6627_v52, 0.0  ;;  %v1476_v33 = vmax.f32 %v6631_v25, 0.0  ;;  %v989_v0 = vadd.f32 %v6387_v8, %v988_v36  ;;  %v1245_v6 = vadd.f32 %v6387_v8, %v1244_v9 }
 0x1de   : > { %v1417_v3 = vmax.f32 %v997_v18, 0.0  ;;  %v1481_v15 = vmax.f32 %v1253_v21, 0.0  ;;  %v6643_v48 = vadd.f32 %v6387_v8, %v5631_v12  ;;  %v6646_v61 = vadd.f32 %v6387_v8, %v5695_v54 }
 0x1df   : > { %v1415_v27 = vmax.f32 %v989_v0, 0.0  ;;  %v1479_v50 = vmax.f32 %v1245_v6, 0.0  ;;  %v6649_v63 = vadd.f32 %v6387_v8, %v991_v10  ;;  %v6652_v32 = vadd.f32 %v6387_v8, %v1247_v19 }
 0x1e0   : > { %v1529_v55 = vmax.f32 %v1413_v4, %v1417_v3  ;;  %v1561_v37 = vmax.f32 %v1477_v20, %v1481_v15  ;;  %v1418_v34 = vmax.f32 %v6643_v48, 0.0  ;;  %v1482_v58 = vmax.f32 %v6646_v61, 0.0 }
 0x1e1   : > { %v1527_v17 = vmax.f32 %v1411_v47, %v1415_v27  ;;  %v6656_v2 = vmax.f32 %v1475_v62, %v1479_v50  ;;  %v1416_v31 = vmax.f32 %v6649_v63, 0.0  ;;  %v1480_v39 = vmax.f32 %v6652_v32, 0.0 }
 0x1e2   : > { %v1881_v42 = vcombine.high %v1529_v55, %v1529_v55  ;;  %v1888_v43 = vrot.slane %v1529_v55, %v6007_v29  ;;  %v2425_v13 = vcombine.high %v1561_v37, %v1561_v37  ;;  %v2432_v8 = vrot.slane %v1561_v37, %v6007_v29 }
 0x1e3   : > { %v1847_v57 = vcombine.high %v1527_v17, %v1527_v17  ;;  %v6663_v36 = vrot.slane %v1527_v17, %v6007_v29  ;;  %v2391_v9 = vcombine.high %v6656_v2, %v6656_v2  ;;  %v6669_v38 = vrot.slane %v6656_v2, %v6007_v29 }
 0x1e4   : > { %v1895_v26 = vrot.slane %v1881_v42, %v6007_v29  ;;  %v1896_v41 = vcombine.high %v1888_v43, %v1888_v43  ;;  %v3380_v1 = vsel %vm2987_vm3, %v1888_v43, -inf  ;;  %v2439_v30 = vrot.slane %v2425_v13, %v6007_v29 }
 0x1e5   : > { %v3381_v24 = vrot.slane %v3380_v1, 4  ;;  %v2440_v7 = vcombine.high %v2432_v8, %v2432_v8  ;;  %v4276_v44 = vsel %vm2987_vm3, %v2432_v8, -inf  ;;  %v6676_v5 = vrot.slane %v1847_v57, %v6007_v29 }
 0x1e6   : > { %v1897_v14 = vcombine.high %v1895_v26, %v1895_v26  ;;  %v3387_v40 = vsel %vm2987_vm3, %v1896_v41, -inf  ;;  %v3394_v16 = vsel %vm2987_vm3, %v1895_v26, -inf  ;;  %v2441_v35 = vcombine.high %v2439_v30, %v2439_v30 }
 0x1e7   : > { %v3382_v28 = vmax.f32 %v3380_v1, %v3381_v24  ;;  %v3388_v4 = vrot.slane %v3387_v40, 4  ;;  %v3395_v46 = vrot.slane %v3394_v16, 4  ;;  %v4277_v12 = vrot.slane %v4276_v44, 4 }
 0x1e8   : > { %v3401_v54 = vsel %vm2987_vm3, %v1897_v14, -inf  ;;  %v4283_v11 = vsel %vm2987_vm3, %v2440_v7, -inf  ;;  %v4290_v20 = vsel %vm2987_vm3, %v2439_v30, -inf  ;;  %v4297_v45 = vsel %vm2987_vm3, %v2441_v35, -inf }
 0x1e9   : > { %v3383_v60 = vrot.slane %v3382_v28, 2  ;;  %v3389_v51 = vmax.f32 %v3387_v40, %v3388_v4  ;;  %v3396_v47 = vmax.f32 %v3394_v16, %v3395_v46  ;;  %v3402_v62 = vrot.slane %v3401_v54, 4 }
 0x1ea   : > { %v4278_v23 = vmax.f32 %v4276_v44, %v4277_v12  ;;  %v4284_v18 = vrot.slane %v4283_v11, 4  ;;  %v4291_v21 = vrot.slane %v4290_v20, 4  ;;  %v4298_v10 = vrot.slane %v4297_v45, 4 }
 0x1eb   : > { %v3384_v19 = vmax.f32 %v3382_v28, %v3383_v60  ;;  %v3390_v0 = vrot.slane %v3389_v51, 2  ;;  %v3397_v6 = vrot.slane %v3396_v47, 2  ;;  %v3403_v3 = vmax.f32 %v3401_v54, %v3402_v62 }
 0x1ec   : > { %v4279_v15 = vrot.slane %v4278_v23, 2  ;;  %v4285_v27 = vmax.f32 %v4283_v11, %v4284_v18  ;;  %v4292_v50 = vmax.f32 %v4290_v20, %v4291_v21  ;;  %v4299_v55 = vmax.f32 %v4297_v45, %v4298_v10 }
 0x1ed   : > { %v3385_v37 = vrot.slane %v3384_v19, 1  ;;  %v3391_v17 = vmax.f32 %v3389_v51, %v3390_v0  ;;  %v3398_v42 = vmax.f32 %v3396_v47, %v3397_v6  ;;  %v3404_v43 = vrot.slane %v3403_v3, 2 }
 0x1ee   : > { %v4280_v13 = vmax.f32 %v4278_v23, %v4279_v15  ;;  %v4286_v8 = vrot.slane %v4285_v27, 2  ;;  %v4293_v57 = vrot.slane %v4292_v50, 2  ;;  %v4300_v26 = vrot.slane %v4299_v55, 2 }
 0x1ef   : > { %v3386_v41 = vmax.f32 %v3384_v19, %v3385_v37  ;;  %v3392_v1 = vrot.slane %v3391_v17, 1  ;;  %v3399_v30 = vrot.slane %v3398_v42, 1  ;;  %v3405_v24 = vmax.f32 %v3403_v3, %v3404_v43 }
 0x1f0   : > { %v4281_v7 = vrot.slane %v4280_v13, 1  ;;  %v4287_v44 = vmax.f32 %v4285_v27, %v4286_v8  ;;  %v4294_v14 = vmax.f32 %v4292_v50, %v4293_v57  ;;  %v4301_v40 = vmax.f32 %v4299_v55, %v4300_v26 }
 0x1f1   : > { %v3393_v16 = vmax.f32 %v3391_v17, %v3392_v1  ;;  %v3400_v35 = vmax.f32 %v3398_v42, %v3399_v30  ;;  %v3406_v28 = vrot.slane %v3405_v24, 1  ;;  %v1862_v4 = vcombine.high %v6663_v36, %v6663_v36 }
 0x1f2   : > { %v4282_v46 = vmax.f32 %v4280_v13, %v4281_v7  ;;  %v4288_v12 = vrot.slane %v4287_v44, 1  ;;  %v4295_v54 = vrot.slane %v4294_v14, 1  ;;  %v4302_v11 = vrot.slane %v4301_v40, 1 }
 0x1f3   : > { %v6686_v20 = vmax.f32 %v3405_v24, %v3406_v28  ;;  %v5092_v45 = vsel %vm5036_vm4, %v3393_v16, %v3386_v41  ;;  %v1863_v60 = vcombine.high %v6676_v5, %v6676_v5  ;;  %v3324_v51 = vsel %vm2987_vm3, %v6663_v36, -inf }
 0x1f4   : > { %v5093_v47 = vsel %vm5038_vm5, %v3400_v35, %v5092_v45  ;;  %v4289_v62 = vmax.f32 %v4287_v44, %v4288_v12  ;;  %v4296_v23 = vmax.f32 %v4294_v14, %v4295_v54  ;;  %v6694_v18 = vmax.f32 %v4301_v40, %v4302_v11 }
 0x1f5   : > { %v3325_v21 = vrot.slane %v3324_v51, 4  ;;  %v3331_v10 = vsel %vm2987_vm3, %v1862_v4, -inf  ;;  %v3338_v19 = vsel %vm2987_vm3, %v6676_v5, -inf  ;;  %v3345_v0 = vsel %vm2987_vm3, %v1863_v60, -inf }
 0x1f6   : > { %v5204_v6 = vsel %vm5036_vm4, %v4289_v62, %v4282_v46  ;;  %v3332_v3 = vrot.slane %v3331_v10, 4  ;;  %v3339_v15 = vrot.slane %v3338_v19, 4  ;;  %v3346_v27 = vrot.slane %v3345_v0, 4 }
 0x1f7   : > { %v5205_v36 = vsel %vm5038_vm5, %v4296_v23, %v5204_v6  ;;  %v3326_v50 = vmax.f32 %v3324_v51, %v3325_v21  ;;  %v2405_v55 = vrot.slane %v2391_v9, %v6007_v29  ;;  %v2406_v37 = vcombine.high %v6669_v38, %v6669_v38 }
 0x1f8   : > { %v3333_v17 = vmax.f32 %v3331_v10, %v3332_v3  ;;  %v3340_v5 = vmax.f32 %v3338_v19, %v3339_v15  ;;  %v3347_v42 = vmax.f32 %v3345_v0, %v3346_v27  ;;  %v4220_v43 = vsel %vm2987_vm3, %v6669_v38, -inf }
 0x1f9   : > { %v3327_v13 = vrot.slane %v3326_v50, 2  ;;  %v2407_v8 = vcombine.high %v2405_v55, %v2405_v55  ;;  %v4221_v57 = vrot.slane %v4220_v43, 4  ;;  %v4227_v26 = vsel %vm2987_vm3, %v2406_v37, -inf }
 0x1fa   : > { %v3334_v41 = vrot.slane %v3333_v17, 2  ;;  %v3341_v1 = vrot.slane %v3340_v5, 2  ;;  %v3348_v30 = vrot.slane %v3347_v42, 2  ;;  %v4228_v24 = vrot.slane %v4227_v26, 4 }
 0x1fb   : > { %v3328_v2 = vmax.f32 %v3326_v50, %v3327_v13  ;;  %v4222_v9 = vmax.f32 %v4220_v43, %v4221_v57  ;;  %v4234_v7 = vsel %vm2987_vm3, %v2405_v55, -inf  ;;  %v4241_v44 = vsel %vm2987_vm3, %v2407_v8, -inf }
 0x1fc   : > { %v3335_v14 = vmax.f32 %v3333_v17, %v3334_v41  ;;  %v3342_v40 = vmax.f32 %v3340_v5, %v3341_v1  ;;  %v3349_v16 = vmax.f32 %v3347_v42, %v3348_v30  ;;  %v4229_v35 = vmax.f32 %v4227_v26, %v4228_v24 }
 0x1fd   : > { %v3329_v38 = vrot.slane %v3328_v2, 1  ;;  %v4223_v28 = vrot.slane %v4222_v9, 2  ;;  %v4235_v4 = vrot.slane %v4234_v7, 4  ;;  %v4242_v46 = vrot.slane %v4241_v44, 4 }
 0x1fe   : > { %v3336_v12 = vrot.slane %v3335_v14, 1  ;;  %v3343_v54 = vrot.slane %v3342_v40, 1  ;;  %v3350_v11 = vrot.slane %v3349_v16, 1  ;;  %v4230_v45 = vrot.slane %v4229_v35, 2 }
 0x1ff   : > { %v3330_v60 = vmax.f32 %v3328_v2, %v3329_v38  ;;  %v4224_v51 = vmax.f32 %v4222_v9, %v4223_v28  ;;  %v4236_v62 = vmax.f32 %v4234_v7, %v4235_v4  ;;  %v4243_v23 = vmax.f32 %v4241_v44, %v4242_v46 }
 0x200   : > { %v3337_v21 = vmax.f32 %v3335_v14, %v3336_v12  ;;  %v3344_v10 = vmax.f32 %v3342_v40, %v3343_v54  ;;  %v6713_v19 = vmax.f32 %v3349_v16, %v3350_v11  ;;  %v4231_v0 = vmax.f32 %v4229_v35, %v4230_v45 }
 0x201   : > { %v4225_v6 = vrot.slane %v4224_v51, 1  ;;  %v4237_v3 = vrot.slane %v4236_v62, 2  ;;  %v4244_v15 = vrot.slane %v4243_v23, 2  ;;  %v1530_v27 = vmax.f32 %v1414_v59, %v1418_v34 }
 0x202   : > { %v5085_v50 = vsel %vm5036_vm4, %v3337_v21, %v3330_v60  ;;  %v4232_v55 = vrot.slane %v4231_v0, 1  ;;  %v6722_v37 = vsel %vm5040_vm6, %v6686_v20, %v5093_v47  ;;  %v1562_v17 = vmax.f32 %v1478_v53, %v1482_v58 }
 0x203   : > { %v6729_v5 = vsel %vm5038_vm5, %v3344_v10, %v5085_v50  ;;  %v4226_v42 = vmax.f32 %v4224_v51, %v4225_v6  ;;  %v4238_v48 = vmax.f32 %v4236_v62, %v4237_v3  ;;  %v4245_v43 = vmax.f32 %v4243_v23, %v4244_v15 }
 0x204   : > { %v4233_v22 = vmax.f32 %v4231_v0, %v4232_v55  ;;  %v1898_v59 = vcombine.high %v1530_v27, %v1530_v27  ;;  %v1905_v34 = vrot.slane %v1530_v27, %v6007_v29  ;;  %v2442_v13 = vcombine.high %v1562_v17, %v1562_v17 }
 0x205   : > { %v4239_v8 = vrot.slane %v4238_v48, 1  ;;  %v4246_v57 = vrot.slane %v4245_v43, 1  ;;  %v2449_v20 = vrot.slane %v1562_v17, %v6007_v29  ;;  %v6735_v61 = vsel %vm5040_vm6, %v6694_v18, %v5205_v36 }
 0x206   : > { %v5197_v56 = vsel %vm5036_vm4, %v4233_v22, %v4226_v42  ;;  %v1912_v53 = vrot.slane %v1898_v59, %v6007_v29  ;;  %v1913_v58 = vcombine.high %v1905_v34, %v1905_v34  ;;  %v3408_v47 = vsel %vm2987_vm3, %v1905_v34, -inf }
 0x207   : > { %v4240_v26 = vmax.f32 %v4238_v48, %v4239_v8  ;;  %v6740_v41 = vmax.f32 %v4245_v43, %v4246_v57  ;;  %v3409_v1 = vrot.slane %v3408_v47, 4  ;;  %v2456_v30 = vrot.slane %v2442_v13, %v6007_v29 }
 0x208   : > { %v1914_v24 = vcombine.high %v1912_v53, %v1912_v53  ;;  %v3415_v2 = vsel %vm2987_vm3, %v1913_v58, -inf  ;;  %v3422_v9 = vsel %vm2987_vm3, %v1912_v53, -inf  ;;  %v2457_v18 = vcombine.high %v2449_v20, %v2449_v20 }
 0x209   : > { %v6746_v36 = vsel %vm5038_vm5, %v4240_v26, %v5197_v56  ;;  %v3410_v7 = vmax.f32 %v3408_v47, %v3409_v1  ;;  %v3416_v44 = vrot.slane %v3415_v2, 4  ;;  %v3423_v14 = vrot.slane %v3422_v9, 4  ;;  %v6755_v1 = vpop.f32.mrf.mxu0 }
 0x20a   : > { %v3429_v40 = vsel %vm2987_vm3, %v1914_v24, -inf  ;;  %v2458_v16 = vcombine.high %v2456_v30, %v2456_v30  ;;  %v4304_v35 = vsel %vm2987_vm3, %v2449_v20, -inf  ;;  %v4311_v38 = vsel %vm2987_vm3, %v2457_v18, -inf }
 0x20b   : > { %v3411_v28 = vrot.slane %v3410_v7, 2  ;;  %v3417_v4 = vmax.f32 %v3415_v2, %v3416_v44  ;;  %v3424_v46 = vmax.f32 %v3422_v9, %v3423_v14  ;;  %v3430_v12 = vrot.slane %v3429_v40, 4  ;;  %v6772_v63 = vpop.f32.mrf.mxu0 }
 0x20c   : > { %v4305_v54 = vrot.slane %v4304_v35, 4  ;;  %v4312_v11 = vrot.slane %v4311_v38, 4  ;;  %v4318_v45 = vsel %vm2987_vm3, %v2456_v30, -inf  ;;  %v4325_v60 = vsel %vm2987_vm3, %v2458_v16, -inf  ;;  %v6757_v30 = vpop.f32.mrf.mxu1 }
 0x20d   : > { %v3412_v51 = vmax.f32 %v3410_v7, %v3411_v28  ;;  %v3418_v62 = vrot.slane %v3417_v4, 2  ;;  %v3425_v23 = vrot.slane %v3424_v46, 2  ;;  %v3431_v21 = vmax.f32 %v3429_v40, %v3430_v12 }
 0x20e   : > { %v4306_v10 = vmax.f32 %v4304_v35, %v4305_v54  ;;  %v4313_v0 = vmax.f32 %v4311_v38, %v4312_v11  ;;  %v4319_v6 = vrot.slane %v4318_v45, 4  ;;  %v4326_v3 = vrot.slane %v4325_v60, 4  ;;  %v6774_v52 = vpop.f32.mrf.mxu1 }
 0x20f   : > { %v3413_v15 = vrot.slane %v3412_v51, 1  ;;  %v3419_v27 = vmax.f32 %v3417_v4, %v3418_v62  ;;  %v3426_v50 = vmax.f32 %v3424_v46, %v3425_v23  ;;  %v3432_v55 = vrot.slane %v3431_v21, 2 }
 0x210   : > { %v4307_v17 = vrot.slane %v4306_v10, 2  ;;  %v4314_v42 = vrot.slane %v4313_v0, 2  ;;  %v4320_v48 = vmax.f32 %v4318_v45, %v4319_v6  ;;  %v4327_v43 = vmax.f32 %v4325_v60, %v4326_v3  ;;  %v6797_v23 = vpop.f32.mrf.mxu1 }
 0x211   : > { %v3414_v22 = vmax.f32 %v3412_v51, %v3413_v15  ;;  %v3420_v59 = vrot.slane %v3419_v27, 1  ;;  %v3427_v34 = vrot.slane %v3426_v50, 1  ;;  %v3433_v13 = vmax.f32 %v3431_v21, %v3432_v55 }
 0x212   : > { %v4308_v8 = vmax.f32 %v4306_v10, %v4307_v17  ;;  %v4315_v57 = vmax.f32 %v4313_v0, %v4314_v42  ;;  %v4321_v20 = vrot.slane %v4320_v48, 2  ;;  %v4328_v56 = vrot.slane %v4327_v43, 2 }
 0x213   : > { %v3421_v53 = vmax.f32 %v3419_v27, %v3420_v59  ;;  %v3428_v58 = vmax.f32 %v3426_v50, %v3427_v34  ;;  %v3434_v47 = vrot.slane %v3433_v13, 1  ;;  %v5095_v26 = vsel %vm5042_vm7, %v3414_v22, %v6722_v37 }
 0x214   : > { %v4309_v24 = vrot.slane %v4308_v8, 1  ;;  %v4316_v2 = vrot.slane %v4315_v57, 1  ;;  %v4322_v9 = vmax.f32 %v4320_v48, %v4321_v20  ;;  %v4329_v18 = vmax.f32 %v4327_v43, %v4328_v56 }
 0x215   : > { %v3435_v7 = vmax.f32 %v3433_v13, %v3434_v47  ;;  %v5096_v44 = vsel %vm5044_vm8, %v3421_v53, %v5095_v26  ;;  %v1528_v14 = vmax.f32 %v1412_v49, %v1416_v31  ;;  %v6767_v37 = vsel %vm5040_vm6, %v6713_v19, %v6729_v5 }
 0x216   : > { %v5097_v40 = vsel %vm5046_vm9, %v3428_v58, %v5096_v44  ;;  %v4310_v16 = vmax.f32 %v4308_v8, %v4309_v24  ;;  %v4317_v35 = vmax.f32 %v4315_v57, %v4316_v2  ;;  %v4323_v38 = vrot.slane %v4322_v9, 1  ;;  %v6808_v8 = vpop.f32.mrf.mxu1 }
 0x217   : > { %v5098_v28 = vsel %vm5048_vm10, %v3435_v7, %v5097_v40  ;;  %v4330_v4 = vrot.slane %v4329_v18, 1  ;;  %v1864_v46 = vcombine.high %v1528_v14, %v1528_v14  ;;  %v1871_v12 = vrot.slane %v1528_v14, %v6007_v29 }
 0x218   : > { %5306 = vst [vmem:[%s6117_s27 + $0x38] sm:$0xff] %v5098_v28  ;;  %v4324_v49 = vmax.f32 %v4322_v9, %v4323_v38  ;;  %v5207_v31 = vsel %vm5042_vm7, %v4310_v16, %v6735_v61  ;;  %v1560_v19 = vmax.f32 %v1476_v33, %v1480_v39  ;;  %v6786_v5 = vsel %vm5040_vm6, %v6740_v41, %v6746_v36  ;;  %v6795_v36 = vpop.f32.mrf.mxu0  ;;  %v5702_v38 = vpop.f32.mrf.mxu1 }
 0x219   : > { %v4331_v54 = vmax.f32 %v4329_v18, %v4330_v4  ;;  %v5208_v11 = vsel %vm5044_vm8, %v4317_v35, %v5207_v31  ;;  %v1878_v45 = vrot.slane %v1864_v46, %v6007_v29  ;;  %v1879_v60 = vcombine.high %v1871_v12, %v1871_v12 }
 0x21a   : > { %v5209_v51 = vsel %vm5046_vm9, %v4324_v49, %v5208_v11  ;;  %v3352_v61 = vsel %vm2987_vm3, %v1871_v12, -inf  ;;  %v2408_v32 = vcombine.high %v1560_v19, %v1560_v19  ;;  %v2415_v25 = vrot.slane %v1560_v19, %v6007_v29  ;;  %v6806_v13 = vpop.f32.mrf.mxu0 }
 0x21b   : > { %v5210_v33 = vsel %vm5048_vm10, %v4331_v54, %v5209_v51  ;;  %v1880_v39 = vcombine.high %v1878_v45, %v1878_v45  ;;  %v3353_v62 = vrot.slane %v3352_v61, 4  ;;  %v3359_v41 = vsel %vm2987_vm3, %v1879_v60, -inf }
 0x21c   : > { %5322 = vst [vmem:[%s6117_s27 + $0xb8] sm:$0xff] %v5210_v33  ;;  %v3360_v21 = vrot.slane %v3359_v41, 4  ;;  %v3366_v10 = vsel %vm2987_vm3, %v1878_v45, -inf  ;;  %v2422_v0 = vrot.slane %v2408_v32, %v6007_v29  ;;  %v2423_v6 = vcombine.high %v2415_v25, %v2415_v25  ;;  %v5638_v35 = vpop.f32.mrf.mxu0 }
 0x21d   : > { %v3354_v3 = vmax.f32 %v3352_v61, %v3353_v62  ;;  %v3367_v15 = vrot.slane %v3366_v10, 4  ;;  %v3373_v27 = vsel %vm2987_vm3, %v1880_v39, -inf  ;;  %v4248_v50 = vsel %vm2987_vm3, %v2415_v25, -inf  ;;  %v1276_v62 = vpop.f32.mrf.mxu1 }
 0x21e   : > { %v3361_v55 = vmax.f32 %v3359_v41, %v3360_v21  ;;  %v3374_v17 = vrot.slane %v3373_v27, 4  ;;  %v2424_v42 = vcombine.high %v2422_v0, %v2422_v0  ;;  %v4249_v48 = vrot.slane %v4248_v50, 4  ;;  %v1020_v39 = vpop.f32.mrf.mxu0 }
 0x21f   : > { %v3355_v43 = vrot.slane %v3354_v3, 2  ;;  %v3368_v22 = vmax.f32 %v3366_v10, %v3367_v15  ;;  %v4255_v59 = vsel %vm2987_vm3, %v2423_v6, -inf  ;;  %v4262_v34 = vsel %vm2987_vm3, %v2422_v0, -inf }
 0x220   : > { %v3362_v57 = vrot.slane %v3361_v55, 2  ;;  %v3375_v20 = vmax.f32 %v3373_v27, %v3374_v17  ;;  %v4250_v56 = vmax.f32 %v4248_v50, %v4249_v48  ;;  %v4256_v53 = vrot.slane %v4255_v59, 4  ;;  %v6818_v27 = vld [vmem:[%s7674_s2] ss:$0 sm:$0xff] }
 0x221   : > { %v3356_v58 = vmax.f32 %v3354_v3, %v3355_v43  ;;  %v3369_v47 = vrot.slane %v3368_v22, 2  ;;  %v4263_v26 = vrot.slane %v4262_v34, 4  ;;  %v4269_v24 = vsel %vm2987_vm3, %v2424_v42, -inf }
 0x222   : > { %v3363_v2 = vmax.f32 %v3361_v55, %v3362_v57  ;;  %v3376_v9 = vrot.slane %v3375_v20, 2  ;;  %v4251_v18 = vrot.slane %v4250_v56, 2  ;;  %v4257_v7 = vmax.f32 %v4255_v59, %v4256_v53  ;;  %v5703_v57 = vpop.f32.mrf.mxu1 }
 0x223   : > { %v3357_v44 = vrot.slane %v3356_v58, 1  ;;  %v3370_v14 = vmax.f32 %v3368_v22, %v3369_v47  ;;  %v4264_v40 = vmax.f32 %v4262_v34, %v4263_v26  ;;  %v4270_v16 = vrot.slane %v4269_v24, 4  ;;  %v5639_v34 = vpop.f32.mrf.mxu0 }
 0x224   : > { %v3364_v28 = vrot.slane %v3363_v2, 1  ;;  %v3377_v4 = vmax.f32 %v3375_v20, %v3376_v9  ;;  %v4252_v46 = vmax.f32 %v4250_v56, %v4251_v18  ;;  %v4258_v12 = vrot.slane %v4257_v7, 2 }
 0x225   : > { %v3358_v49 = vmax.f32 %v3356_v58, %v3357_v44  ;;  %v3371_v31 = vrot.slane %v3370_v14, 1  ;;  %v4265_v19 = vrot.slane %v4264_v40, 2  ;;  %v4271_v54 = vmax.f32 %v4269_v24, %v4270_v16  ;;  %v1023_v18 = vpop.f32.mrf.mxu0 }
 0x226   : > { %v3365_v11 = vmax.f32 %v3363_v2, %v3364_v28  ;;  %v3378_v45 = vrot.slane %v3377_v4, 1  ;;  %v4253_v60 = vrot.slane %v4252_v46, 1  ;;  %v4259_v51 = vmax.f32 %v4257_v7, %v4258_v12  ;;  %v1279_v7 = vpop.f32.mrf.mxu1 }
 0x227   : > { %v3372_v61 = vmax.f32 %v3370_v14, %v3371_v31  ;;  %v5088_v32 = vsel %vm5042_vm7, %v3358_v49, %v6767_v37  ;;  %v4266_v25 = vmax.f32 %v4264_v40, %v4265_v19  ;;  %v4272_v33 = vrot.slane %v4271_v54, 2 }
 0x228   : > { %v3379_v41 = vmax.f32 %v3377_v4, %v3378_v45  ;;  %v5089_v21 = vsel %vm5044_vm8, %v3365_v11, %v5088_v32  ;;  %v4254_v10 = vmax.f32 %v4252_v46, %v4253_v60  ;;  %v4260_v0 = vrot.slane %v4259_v51, 1 }
 0x229   : > { %v5090_v6 = vsel %vm5046_vm9, %v3372_v61, %v5089_v21  ;;  %v4267_v3 = vrot.slane %v4266_v25, 1  ;;  %v4273_v15 = vmax.f32 %v4271_v54, %v4272_v33  ;;  %v1013_v37 = vadd.f32 %v6818_v27, %v6755_v1 }
 0x22a   : > { %v5091_v50 = vsel %vm5048_vm10, %v3379_v41, %v5090_v6  ;;  %v4261_v55 = vmax.f32 %v4259_v51, %v4260_v0  ;;  %v5200_v17 = vsel %vm5042_vm7, %v4254_v10, %v6786_v5  ;;  %v1269_v42 = vadd.f32 %v6818_v27, %v6757_v30 }
 0x22b   : > { %5305 = vst [vmem:[%s6117_s27 + $0x30] sm:$0xff] %v5091_v50  ;;  %v4268_v48 = vmax.f32 %v4266_v25, %v4267_v3  ;;  %v4274_v43 = vrot.slane %v4273_v15, 1  ;;  %v1421_v22 = vmax.f32 %v1013_v37, 0.0  ;;  %v1005_v59 = vadd.f32 %v6818_v27, %v6772_v63 }
 0x22c   : > { %v5201_v1 = vsel %vm5044_vm8, %v4261_v55, %v5200_v17  ;;  %v1485_v20 = vmax.f32 %v1269_v42, 0.0  ;;  %v1261_v56 = vadd.f32 %v6818_v27, %v6774_v52  ;;  %v6835_v5 = vadd.f32 %v6818_v27, %v6795_v36 }
 0x22d   : > { %v4275_v30 = vmax.f32 %v4273_v15, %v4274_v43  ;;  %v5202_v53 = vsel %vm5046_vm9, %v4268_v48, %v5201_v1  ;;  %v1419_v58 = vmax.f32 %v1005_v59, 0.0  ;;  %v6840_v63 = vadd.f32 %v6818_v27, %v6797_v23 }
 0x22e   : > { %v1483_v47 = vmax.f32 %v1261_v56, 0.0  ;;  %v1422_v26 = vmax.f32 %v6835_v5, 0.0  ;;  %v6845_v24 = vadd.f32 %v6818_v27, %v6806_v13  ;;  %v6849_v52 = vadd.f32 %v6818_v27, %v6808_v8 }
 0x22f   : > { %v5203_v36 = vsel %vm5048_vm10, %v4275_v30, %v5202_v53  ;;  %v1486_v2 = vmax.f32 %v6840_v63, 0.0  ;;  %v1029_v9 = vadd.f32 %v6818_v27, %v5638_v35  ;;  %v1285_v23 = vadd.f32 %v6818_v27, %v5702_v38 }
 0x230   : > { %5321 = vst [vmem:[%s6117_s27 + $0xb0] sm:$0xff] %v5203_v36  ;;  %v1420_v44 = vmax.f32 %v6845_v24, 0.0  ;;  %v1484_v13 = vmax.f32 %v6849_v52, 0.0  ;;  %v1021_v14 = vadd.f32 %v6818_v27, %v1020_v39  ;;  %v1277_v8 = vadd.f32 %v6818_v27, %v1276_v62 }
 0x231   : > { %v1425_v40 = vmax.f32 %v1029_v9, 0.0  ;;  %v1489_v16 = vmax.f32 %v1285_v23, 0.0  ;;  %v6861_v28 = vadd.f32 %v6818_v27, %v5639_v34  ;;  %v6864_v35 = vadd.f32 %v6818_v27, %v5703_v57 }
 0x232   : > { %v1423_v38 = vmax.f32 %v1021_v14, 0.0  ;;  %v1487_v4 = vmax.f32 %v1277_v8, 0.0  ;;  %v6867_v46 = vadd.f32 %v6818_v27, %v1023_v18  ;;  %v6870_v12 = vadd.f32 %v6818_v27, %v1279_v7 }
 0x233   : > { %v1533_v49 = vmax.f32 %v1421_v22, %v1425_v40  ;;  %v1565_v31 = vmax.f32 %v1485_v20, %v1489_v16  ;;  %v1426_v19 = vmax.f32 %v6861_v28, 0.0  ;;  %v1490_v54 = vmax.f32 %v6864_v35, 0.0 }
 0x234   : > { %v1531_v11 = vmax.f32 %v1419_v58, %v1423_v38  ;;  %v6874_v45 = vmax.f32 %v1483_v47, %v1487_v4  ;;  %v1424_v60 = vmax.f32 %v6867_v46, 0.0  ;;  %v1488_v51 = vmax.f32 %v6870_v12, 0.0 }
 0x235   : > { %v1949_v61 = vcombine.high %v1533_v49, %v1533_v49  ;;  %v1956_v32 = vrot.slane %v1533_v49, %v6007_v29  ;;  %v2493_v25 = vcombine.high %v1565_v31, %v1565_v31  ;;  %v2500_v33 = vrot.slane %v1565_v31, %v6007_v29 }
 0x236   : > { %v1915_v39 = vcombine.high %v1531_v11, %v1531_v11  ;;  %v6881_v62 = vrot.slane %v1531_v11, %v6007_v29  ;;  %v2459_v41 = vcombine.high %v6874_v45, %v6874_v45  ;;  %v6887_v21 = vrot.slane %v6874_v45, %v6007_v29 }
 0x237   : > { %v1963_v10 = vrot.slane %v1949_v61, %v6007_v29  ;;  %v1964_v0 = vcombine.high %v1956_v32, %v1956_v32  ;;  %v3492_v6 = vsel %vm2987_vm3, %v1956_v32, -inf  ;;  %v2507_v3 = vrot.slane %v2493_v25, %v6007_v29 }
 0x238   : > { %v3493_v15 = vrot.slane %v3492_v6, 4  ;;  %v2508_v37 = vcombine.high %v2500_v33, %v2500_v33  ;;  %v4388_v50 = vsel %vm2987_vm3, %v2500_v33, -inf  ;;  %v6894_v55 = vrot.slane %v1915_v39, %v6007_v29 }
 0x239   : > { %v1965_v17 = vcombine.high %v1963_v10, %v1963_v10  ;;  %v3499_v42 = vsel %vm2987_vm3, %v1964_v0, -inf  ;;  %v3506_v48 = vsel %vm2987_vm3, %v1963_v10, -inf  ;;  %v2509_v43 = vcombine.high %v2507_v3, %v2507_v3 }
 0x23a   : > { %v3494_v22 = vmax.f32 %v3492_v6, %v3493_v15  ;;  %v3500_v59 = vrot.slane %v3499_v42, 4  ;;  %v3507_v34 = vrot.slane %v3506_v48, 4  ;;  %v4389_v57 = vrot.slane %v4388_v50, 4 }
 0x23b   : > { %v3513_v1 = vsel %vm2987_vm3, %v1965_v17, -inf  ;;  %v4395_v20 = vsel %vm2987_vm3, %v2508_v37, -inf  ;;  %v4402_v56 = vsel %vm2987_vm3, %v2507_v3, -inf  ;;  %v4409_v30 = vsel %vm2987_vm3, %v2509_v43, -inf }
 0x23c   : > { %v3495_v53 = vrot.slane %v3494_v22, 2  ;;  %v3501_v58 = vmax.f32 %v3499_v42, %v3500_v59  ;;  %v3508_v47 = vmax.f32 %v3506_v48, %v3507_v34  ;;  %v3514_v36 = vrot.slane %v3513_v1, 4 }
 0x23d   : > { %v4390_v9 = vmax.f32 %v4388_v50, %v4389_v57  ;;  %v4396_v23 = vrot.slane %v4395_v20, 4  ;;  %v4403_v18 = vrot.slane %v4402_v56, 4  ;;  %v4410_v7 = vrot.slane %v4409_v30, 4 }
 0x23e   : > { %v3496_v14 = vmax.f32 %v3494_v22, %v3495_v53  ;;  %v3502_v8 = vrot.slane %v3501_v58, 2  ;;  %v3509_v40 = vrot.slane %v3508_v47, 2  ;;  %v3515_v16 = vmax.f32 %v3513_v1, %v3514_v36 }
 0x23f   : > { %v4391_v38 = vrot.slane %v4390_v9, 2  ;;  %v4397_v4 = vmax.f32 %v4395_v20, %v4396_v23  ;;  %v4404_v49 = vmax.f32 %v4402_v56, %v4403_v18  ;;  %v4411_v31 = vmax.f32 %v4409_v30, %v4410_v7 }
 0x240   : > { %v3497_v11 = vrot.slane %v3496_v14, 1  ;;  %v3503_v61 = vmax.f32 %v3501_v58, %v3502_v8  ;;  %v3510_v32 = vmax.f32 %v3508_v47, %v3509_v40  ;;  %v3516_v25 = vrot.slane %v3515_v16, 2 }
 0x241   : > { %v4392_v33 = vmax.f32 %v4390_v9, %v4391_v38  ;;  %v4398_v39 = vrot.slane %v4397_v4, 2  ;;  %v4405_v10 = vrot.slane %v4404_v49, 2  ;;  %v4412_v0 = vrot.slane %v4411_v31, 2 }
 0x242   : > { %v3498_v6 = vmax.f32 %v3496_v14, %v3497_v11  ;;  %v3504_v3 = vrot.slane %v3503_v61, 1  ;;  %v3511_v15 = vrot.slane %v3510_v32, 1  ;;  %v3517_v37 = vmax.f32 %v3515_v16, %v3516_v25 }
 0x243   : > { %v4393_v50 = vrot.slane %v4392_v33, 1  ;;  %v4399_v17 = vmax.f32 %v4397_v4, %v4398_v39  ;;  %v4406_v42 = vmax.f32 %v4404_v49, %v4405_v10  ;;  %v4413_v48 = vmax.f32 %v4411_v31, %v4412_v0 }
 0x244   : > { %v3505_v43 = vmax.f32 %v3503_v61, %v3504_v3  ;;  %v3512_v22 = vmax.f32 %v3510_v32, %v3511_v15  ;;  %v3518_v59 = vrot.slane %v3517_v37, 1  ;;  %v1930_v34 = vcombine.high %v6881_v62, %v6881_v62 }
 0x245   : > { %v4394_v57 = vmax.f32 %v4392_v33, %v4393_v50  ;;  %v4400_v1 = vrot.slane %v4399_v17, 1  ;;  %v4407_v20 = vrot.slane %v4406_v42, 1  ;;  %v4414_v56 = vrot.slane %v4413_v48, 1 }
 0x246   : > { %v6904_v30 = vmax.f32 %v3517_v37, %v3518_v59  ;;  %v5106_v53 = vsel %vm5036_vm4, %v3505_v43, %v3498_v6  ;;  %v1931_v58 = vcombine.high %v6894_v55, %v6894_v55  ;;  %v3436_v47 = vsel %vm2987_vm3, %v6881_v62, -inf }
 0x247   : > { %v5107_v36 = vsel %vm5038_vm5, %v3512_v22, %v5106_v53  ;;  %v4401_v9 = vmax.f32 %v4399_v17, %v4400_v1  ;;  %v4408_v23 = vmax.f32 %v4406_v42, %v4407_v20  ;;  %v6912_v18 = vmax.f32 %v4413_v48, %v4414_v56 }
 0x248   : > { %v3437_v7 = vrot.slane %v3436_v47, 4  ;;  %v3443_v14 = vsel %vm2987_vm3, %v1930_v34, -inf  ;;  %v3450_v8 = vsel %vm2987_vm3, %v6894_v55, -inf  ;;  %v3457_v40 = vsel %vm2987_vm3, %v1931_v58, -inf }
 0x249   : > { %v5218_v16 = vsel %vm5036_vm4, %v4401_v9, %v4394_v57  ;;  %v3444_v38 = vrot.slane %v3443_v14, 4  ;;  %v3451_v4 = vrot.slane %v3450_v8, 4  ;;  %v3458_v49 = vrot.slane %v3457_v40, 4 }
 0x24a   : > { %v5219_v62 = vsel %vm5038_vm5, %v4408_v23, %v5218_v16  ;;  %v3438_v31 = vmax.f32 %v3436_v47, %v3437_v7  ;;  %v2473_v11 = vrot.slane %v2459_v41, %v6007_v29  ;;  %v2474_v61 = vcombine.high %v6887_v21, %v6887_v21 }
 0x24b   : > { %v3445_v32 = vmax.f32 %v3443_v14, %v3444_v38  ;;  %v3452_v55 = vmax.f32 %v3450_v8, %v3451_v4  ;;  %v3459_v25 = vmax.f32 %v3457_v40, %v3458_v49  ;;  %v4332_v33 = vsel %vm2987_vm3, %v6887_v21, -inf }
 0x24c   : > { %v3439_v39 = vrot.slane %v3438_v31, 2  ;;  %v2475_v10 = vcombine.high %v2473_v11, %v2473_v11  ;;  %v4333_v0 = vrot.slane %v4332_v33, 4  ;;  %v4339_v6 = vsel %vm2987_vm3, %v2474_v61, -inf }
 0x24d   : > { %v3446_v3 = vrot.slane %v3445_v32, 2  ;;  %v3453_v15 = vrot.slane %v3452_v55, 2  ;;  %v3460_v37 = vrot.slane %v3459_v25, 2  ;;  %v4340_v50 = vrot.slane %v4339_v6, 4 }
 0x24e   : > { %v3440_v45 = vmax.f32 %v3438_v31, %v3439_v39  ;;  %v4334_v41 = vmax.f32 %v4332_v33, %v4333_v0  ;;  %v4346_v17 = vsel %vm2987_vm3, %v2473_v11, -inf  ;;  %v4353_v42 = vsel %vm2987_vm3, %v2475_v10, -inf }
 0x24f   : > { %v3447_v48 = vmax.f32 %v3445_v32, %v3446_v3  ;;  %v3454_v43 = vmax.f32 %v3452_v55, %v3453_v15  ;;  %v3461_v22 = vmax.f32 %v3459_v25, %v3460_v37  ;;  %v4341_v59 = vmax.f32 %v4339_v6, %v4340_v50 }
 0x250   : > { %v3441_v21 = vrot.slane %v3440_v45, 1  ;;  %v4335_v34 = vrot.slane %v4334_v41, 2  ;;  %v4347_v57 = vrot.slane %v4346_v17, 4  ;;  %v4354_v1 = vrot.slane %v4353_v42, 4 }
 0x251   : > { %v3448_v20 = vrot.slane %v3447_v48, 1  ;;  %v3455_v56 = vrot.slane %v3454_v43, 1  ;;  %v3462_v53 = vrot.slane %v3461_v22, 1  ;;  %v4342_v58 = vrot.slane %v4341_v59, 2 }
 0x252   : > { %v3442_v47 = vmax.f32 %v3440_v45, %v3441_v21  ;;  %v4336_v9 = vmax.f32 %v4334_v41, %v4335_v34  ;;  %v4348_v23 = vmax.f32 %v4346_v17, %v4347_v57  ;;  %v4355_v7 = vmax.f32 %v4353_v42, %v4354_v1 }
 0x253   : > { %v3449_v14 = vmax.f32 %v3447_v48, %v3448_v20  ;;  %v3456_v8 = vmax.f32 %v3454_v43, %v3455_v56  ;;  %v6931_v40 = vmax.f32 %v3461_v22, %v3462_v53  ;;  %v4343_v16 = vmax.f32 %v4341_v59, %v4342_v58 }
 0x254   : > { %v4337_v38 = vrot.slane %v4336_v9, 1  ;;  %v4349_v4 = vrot.slane %v4348_v23, 2  ;;  %v4356_v49 = vrot.slane %v4355_v7, 2  ;;  %v1534_v31 = vmax.f32 %v1422_v26, %v1426_v19 }
 0x255   : > { %v5099_v11 = vsel %vm5036_vm4, %v3449_v14, %v3442_v47  ;;  %v4344_v61 = vrot.slane %v4343_v16, 1  ;;  %v6940_v32 = vsel %vm5040_vm6, %v6904_v30, %v5107_v36  ;;  %v1566_v55 = vmax.f32 %v1486_v2, %v1490_v54 }
 0x256   : > { %v6947_v25 = vsel %vm5038_vm5, %v3456_v8, %v5099_v11  ;;  %v4338_v33 = vmax.f32 %v4336_v9, %v4337_v38  ;;  %v4350_v28 = vmax.f32 %v4348_v23, %v4349_v4  ;;  %v4357_v39 = vmax.f32 %v4355_v7, %v4356_v49 }
 0x257   : > { %v4345_v5 = vmax.f32 %v4343_v16, %v4344_v61  ;;  %v1966_v26 = vcombine.high %v1534_v31, %v1534_v31  ;;  %v1973_v19 = vrot.slane %v1534_v31, %v6007_v29  ;;  %v2510_v10 = vcombine.high %v1566_v55, %v1566_v55 }
 0x258   : > { %v4351_v0 = vrot.slane %v4350_v28, 1  ;;  %v4358_v6 = vrot.slane %v4357_v39, 1  ;;  %v2517_v30 = vrot.slane %v1566_v55, %v6007_v29  ;;  %v6953_v35 = vsel %vm5040_vm6, %v6912_v18, %v5219_v62 }
 0x259   : > { %v5211_v63 = vsel %vm5036_vm4, %v4345_v5, %v4338_v33  ;;  %v1980_v2 = vrot.slane %v1966_v26, %v6007_v29  ;;  %v1981_v54 = vcombine.high %v1973_v19, %v1973_v19  ;;  %v3520_v36 = vsel %vm2987_vm3, %v1973_v19, -inf }
 0x25a   : > { %v4352_v3 = vmax.f32 %v4350_v28, %v4351_v0  ;;  %v6958_v15 = vmax.f32 %v4357_v39, %v4358_v6  ;;  %v3521_v37 = vrot.slane %v3520_v36, 4  ;;  %v2524_v50 = vrot.slane %v2510_v10, %v6007_v29 }
 0x25b   : > { %v1982_v45 = vcombine.high %v1980_v2, %v1980_v2  ;;  %v3527_v41 = vsel %vm2987_vm3, %v1981_v54, -inf  ;;  %v3534_v17 = vsel %vm2987_vm3, %v1980_v2, -inf  ;;  %v2525_v18 = vcombine.high %v2517_v30, %v2517_v30 }
 0x25c   : > { %v6964_v62 = vsel %vm5038_vm5, %v4352_v3, %v5211_v63  ;;  %v3522_v42 = vmax.f32 %v3520_v36, %v3521_v37  ;;  %v3528_v48 = vrot.slane %v3527_v41, 4  ;;  %v3535_v43 = vrot.slane %v3534_v17, 4 }
 0x25d   : > { %v3541_v22 = vsel %vm2987_vm3, %v1982_v45, -inf  ;;  %v2526_v59 = vcombine.high %v2524_v50, %v2524_v50  ;;  %v4416_v21 = vsel %vm2987_vm3, %v2517_v30, -inf  ;;  %v4423_v34 = vsel %vm2987_vm3, %v2525_v18, -inf  ;;  %v6975_v45 = vpop.f32.mrf.mxu1 }
 0x25e   : > { %v3523_v57 = vrot.slane %v3522_v42, 2  ;;  %v3529_v1 = vmax.f32 %v3527_v41, %v3528_v48  ;;  %v3536_v20 = vmax.f32 %v3534_v17, %v3535_v43  ;;  %v3542_v56 = vrot.slane %v3541_v22, 4 }
 0x25f   : > { %v4417_v53 = vrot.slane %v4416_v21, 4  ;;  %v4424_v58 = vrot.slane %v4423_v34, 4  ;;  %v4430_v47 = vsel %vm2987_vm3, %v2524_v50, -inf  ;;  %v4437_v9 = vsel %vm2987_vm3, %v2526_v59, -inf  ;;  %v6973_v50 = vpop.f32.mrf.mxu0  ;;  %v6992_v24 = vpop.f32.mrf.mxu1 }
 0x260   : > { %v3524_v23 = vmax.f32 %v3522_v42, %v3523_v57  ;;  %v3530_v7 = vrot.slane %v3529_v1, 2  ;;  %v3537_v14 = vrot.slane %v3536_v20, 2  ;;  %v3543_v8 = vmax.f32 %v3541_v22, %v3542_v56 }
 0x261   : > { %v4418_v16 = vmax.f32 %v4416_v21, %v4417_v53  ;;  %v4425_v38 = vmax.f32 %v4423_v34, %v4424_v58  ;;  %v4431_v4 = vrot.slane %v4430_v47, 4  ;;  %v4438_v49 = vrot.slane %v4437_v9, 4  ;;  %v6990_v46 = vpop.f32.mrf.mxu0 }
 0x262   : > { %v3525_v31 = vrot.slane %v3524_v23, 1  ;;  %v3531_v11 = vmax.f32 %v3529_v1, %v3530_v7  ;;  %v3538_v61 = vmax.f32 %v3536_v20, %v3537_v14  ;;  %v3544_v55 = vrot.slane %v3543_v8, 2 }
 0x263   : > { %v4419_v33 = vrot.slane %v4418_v16, 2  ;;  %v4426_v28 = vrot.slane %v4425_v38, 2  ;;  %v4432_v39 = vmax.f32 %v4430_v47, %v4431_v4  ;;  %v4439_v5 = vmax.f32 %v4437_v9, %v4438_v49 }
 0x264   : > { %v3526_v26 = vmax.f32 %v3524_v23, %v3525_v31  ;;  %v3532_v19 = vrot.slane %v3531_v11, 1  ;;  %v3539_v10 = vrot.slane %v3538_v61, 1  ;;  %v3545_v0 = vmax.f32 %v3543_v8, %v3544_v55  ;;  %v7015_v8 = vpop.f32.mrf.mxu1 }
 0x265   : > { %v4420_v6 = vmax.f32 %v4418_v16, %v4419_v33  ;;  %v4427_v30 = vmax.f32 %v4425_v38, %v4426_v28  ;;  %v4433_v63 = vrot.slane %v4432_v39, 2  ;;  %v4440_v2 = vrot.slane %v4439_v5, 2 }
 0x266   : > { %v3533_v54 = vmax.f32 %v3531_v11, %v3532_v19  ;;  %v3540_v36 = vmax.f32 %v3538_v61, %v3539_v10  ;;  %v3546_v3 = vrot.slane %v3545_v0, 1  ;;  %v5109_v37 = vsel %vm5042_vm7, %v3526_v26, %v6940_v32 }
 0x267   : > { %v4421_v41 = vrot.slane %v4420_v6, 1  ;;  %v4428_v17 = vrot.slane %v4427_v30, 1  ;;  %v4434_v18 = vmax.f32 %v4432_v39, %v4433_v63  ;;  %v4441_v42 = vmax.f32 %v4439_v5, %v4440_v2 }
 0x268   : > { %v3547_v48 = vmax.f32 %v3545_v0, %v3546_v3  ;;  %v5110_v43 = vsel %vm5044_vm8, %v3533_v54, %v5109_v37  ;;  %v1532_v22 = vmax.f32 %v1420_v44, %v1424_v60  ;;  %v6985_v32 = vsel %vm5040_vm6, %v6931_v40, %v6947_v25 }
 0x269   : > { %v5111_v59 = vsel %vm5046_vm9, %v3540_v36, %v5110_v43  ;;  %v4422_v21 = vmax.f32 %v4420_v6, %v4421_v41  ;;  %v4429_v34 = vmax.f32 %v4427_v30, %v4428_v17  ;;  %v4435_v57 = vrot.slane %v4434_v18, 1  ;;  %v7026_v30 = vpop.f32.mrf.mxu1 }
 0x26a   : > { %v5112_v1 = vsel %vm5048_vm10, %v3547_v48, %v5111_v59  ;;  %v4442_v20 = vrot.slane %v4441_v42, 1  ;;  %v1932_v56 = vcombine.high %v1532_v22, %v1532_v22  ;;  %v1939_v53 = vrot.slane %v1532_v22, %v6007_v29 }
 0x26b   : > { %5308 = vst [vmem:[%s6117_s27 + $0x48] sm:$0xff] %v5112_v1  ;;  %v4436_v44 = vmax.f32 %v4434_v18, %v4435_v57  ;;  %v5221_v60 = vsel %vm5042_vm7, %v4422_v21, %v6953_v35  ;;  %v1564_v40 = vmax.f32 %v1484_v13, %v1488_v51  ;;  %v7004_v25 = vsel %vm5040_vm6, %v6958_v15, %v6964_v62  ;;  %v7013_v62 = vpop.f32.mrf.mxu0  ;;  %v5710_v1 = vpop.f32.mrf.mxu1 }
 0x26c   : > { %v4443_v58 = vmax.f32 %v4441_v42, %v4442_v20  ;;  %v5222_v47 = vsel %vm5044_vm8, %v4429_v34, %v5221_v60  ;;  %v1946_v9 = vrot.slane %v1932_v56, %v6007_v29  ;;  %v1947_v23 = vcombine.high %v1939_v53, %v1939_v53 }
 0x26d   : > { %v5223_v7 = vsel %vm5046_vm9, %v4436_v44, %v5222_v47  ;;  %v3464_v35 = vsel %vm2987_vm3, %v1939_v53, -inf  ;;  %v2476_v12 = vcombine.high %v1564_v40, %v1564_v40  ;;  %v2483_v52 = vrot.slane %v1564_v40, %v6007_v29  ;;  %v7024_v6 = vpop.f32.mrf.mxu0 }
 0x26e   : > { %v5224_v13 = vsel %vm5048_vm10, %v4443_v58, %v5223_v7  ;;  %v1948_v51 = vcombine.high %v1946_v9, %v1946_v9  ;;  %v3465_v14 = vrot.slane %v3464_v35, 4  ;;  %v3471_v15 = vsel %vm2987_vm3, %v1947_v23, -inf }
 0x26f   : > { %5324 = vst [vmem:[%s6117_s27 + $0xc8] sm:$0xff] %v5224_v13  ;;  %v3472_v16 = vrot.slane %v3471_v15, 4  ;;  %v3478_v38 = vsel %vm2987_vm3, %v1946_v9, -inf  ;;  %v2490_v4 = vrot.slane %v2476_v12, %v6007_v29  ;;  %v2491_v49 = vcombine.high %v2483_v52, %v2483_v52  ;;  %v5646_v57 = vpop.f32.mrf.mxu0 }
 0x270   : > { %v3466_v31 = vmax.f32 %v3464_v35, %v3465_v14  ;;  %v3479_v11 = vrot.slane %v3478_v38, 4  ;;  %v3485_v61 = vsel %vm2987_vm3, %v1948_v51, -inf  ;;  %v4360_v55 = vsel %vm2987_vm3, %v2483_v52, -inf }
 0x271   : > { %v3473_v33 = vmax.f32 %v3471_v15, %v3472_v16  ;;  %v3486_v28 = vrot.slane %v3485_v61, 4  ;;  %v2492_v39 = vcombine.high %v2490_v4, %v2490_v4  ;;  %v4361_v5 = vrot.slane %v4360_v55, 4  ;;  %v1052_v14 = vpop.f32.mrf.mxu0  ;;  %v1308_v15 = vpop.f32.mrf.mxu1 }
 0x272   : > { %v3467_v26 = vrot.slane %v3466_v31, 2  ;;  %v3480_v19 = vmax.f32 %v3478_v38, %v3479_v11  ;;  %v4367_v10 = vsel %vm2987_vm3, %v2491_v49, -inf  ;;  %v4374_v0 = vsel %vm2987_vm3, %v2490_v4, -inf }
 0x273   : > { %v3474_v63 = vrot.slane %v3473_v33, 2  ;;  %v3487_v2 = vmax.f32 %v3485_v61, %v3486_v28  ;;  %v4362_v54 = vmax.f32 %v4360_v55, %v4361_v5  ;;  %v4368_v36 = vrot.slane %v4367_v10, 4 }
 0x274   : > { %v3468_v3 = vmax.f32 %v3466_v31, %v3467_v26  ;;  %v3481_v37 = vrot.slane %v3480_v19, 2  ;;  %v4375_v41 = vrot.slane %v4374_v0, 4  ;;  %v4381_v17 = vsel %vm2987_vm3, %v2492_v39, -inf }
 0x275   : > { %v3475_v18 = vmax.f32 %v3473_v33, %v3474_v63  ;;  %v3488_v42 = vrot.slane %v3487_v2, 2  ;;  %v4363_v48 = vrot.slane %v4362_v54, 2  ;;  %v4369_v43 = vmax.f32 %v4367_v10, %v4368_v36  ;;  %v5711_v63 = vpop.f32.mrf.mxu1 }
 0x276   : > { %v3469_v22 = vrot.slane %v3468_v3, 1  ;;  %v3482_v59 = vmax.f32 %v3480_v19, %v3481_v37  ;;  %v4376_v21 = vmax.f32 %v4374_v0, %v4375_v41  ;;  %v4382_v34 = vrot.slane %v4381_v17, 4  ;;  %v5647_v0 = vpop.f32.mrf.mxu0 }
 0x277   : > { %v3476_v20 = vrot.slane %v3475_v18, 1  ;;  %v3489_v56 = vmax.f32 %v3487_v2, %v3488_v42  ;;  %v4364_v53 = vmax.f32 %v4362_v54, %v4363_v48  ;;  %v4370_v44 = vrot.slane %v4369_v43, 2 }
 0x278   : > { %v3470_v60 = vmax.f32 %v3468_v3, %v3469_v22  ;;  %v3483_v40 = vrot.slane %v3482_v59, 1  ;;  %v4377_v58 = vrot.slane %v4376_v21, 2  ;;  %v4383_v47 = vmax.f32 %v4381_v17, %v4382_v34  ;;  %v1055_v48 = vpop.f32.mrf.mxu0 }
 0x279   : > { %v3477_v9 = vmax.f32 %v3475_v18, %v3476_v20  ;;  %v3490_v23 = vrot.slane %v3489_v56, 1  ;;  %v4365_v7 = vrot.slane %v4364_v53, 1  ;;  %v4371_v35 = vmax.f32 %v4369_v43, %v4370_v44  ;;  %v1311_v43 = vpop.f32.mrf.mxu1 }
 0x27a   : > { %v3484_v12 = vmax.f32 %v3482_v59, %v3483_v40  ;;  %v5102_v52 = vsel %vm5042_vm7, %v3470_v60, %v6985_v32  ;;  %v4378_v13 = vmax.f32 %v4376_v21, %v4377_v58  ;;  %v4384_v51 = vrot.slane %v4383_v47, 2 }
 0x27b   : > { %v3491_v16 = vmax.f32 %v3489_v56, %v3490_v23  ;;  %v5103_v38 = vsel %vm5044_vm8, %v3477_v9, %v5102_v52  ;;  %v4366_v4 = vmax.f32 %v4364_v53, %v4365_v7  ;;  %v4372_v49 = vrot.slane %v4371_v35, 1 }
 0x27c   : > { %v5104_v31 = vsel %vm5046_vm9, %v3484_v12, %v5103_v38  ;;  %v4379_v11 = vrot.slane %v4378_v13, 1  ;;  %v4385_v61 = vmax.f32 %v4383_v47, %v4384_v51  ;;  %v1045_v55 = vadd.f32 %v6818_v27, %v6973_v50 }
 0x27d   : > { %v5105_v33 = vsel %vm5048_vm10, %v3491_v16, %v5104_v31  ;;  %v4373_v32 = vmax.f32 %v4371_v35, %v4372_v49  ;;  %v5214_v28 = vsel %vm5042_vm7, %v4366_v4, %v7004_v25  ;;  %v1301_v39 = vadd.f32 %v6818_v27, %v6975_v45 }
 0x27e   : > { %5307 = vst [vmem:[%s6117_s27 + $0x40] sm:$0xff] %v5105_v33  ;;  %v4380_v5 = vmax.f32 %v4378_v13, %v4379_v11  ;;  %v4386_v26 = vrot.slane %v4385_v61, 1  ;;  %v1429_v19 = vmax.f32 %v1045_v55, 0.0  ;;  %v1037_v10 = vadd.f32 %v6818_v27, %v6990_v46 }
 0x27f   : > { %v5215_v50 = vsel %vm5044_vm8, %v4373_v32, %v5214_v28  ;;  %v1493_v2 = vmax.f32 %v1301_v39, 0.0  ;;  %v1293_v54 = vadd.f32 %v6818_v27, %v6992_v24  ;;  %v7048_v25 = vadd.f32 %v6818_v27, %v7013_v62 }
 0x280   : > { %v4387_v45 = vmax.f32 %v4385_v61, %v4386_v26  ;;  %v5216_v36 = vsel %vm5046_vm9, %v4380_v5, %v5215_v50  ;;  %v1427_v3 = vmax.f32 %v1037_v10, 0.0  ;;  %v7053_v46 = vadd.f32 %v6818_v27, %v7015_v8 }
 0x281   : > { %v1491_v37 = vmax.f32 %v1293_v54, 0.0  ;;  %v1430_v41 = vmax.f32 %v7048_v25, 0.0  ;;  %v7058_v17 = vadd.f32 %v6818_v27, %v7024_v6  ;;  %v7062_v24 = vadd.f32 %v6818_v27, %v7026_v30 }
 0x282   : > { %v5217_v62 = vsel %vm5048_vm10, %v4387_v45, %v5216_v36  ;;  %v1494_v18 = vmax.f32 %v7053_v46, 0.0  ;;  %v1061_v42 = vadd.f32 %v6818_v27, %v5646_v57  ;;  %v1317_v8 = vadd.f32 %v6818_v27, %v5710_v1 }
 0x283   : > { %5323 = vst [vmem:[%s6117_s27 + $0xc0] sm:$0xff] %v5217_v62  ;;  %v1428_v22 = vmax.f32 %v7058_v17, 0.0  ;;  %v1492_v6 = vmax.f32 %v7062_v24, 0.0  ;;  %v1053_v59 = vadd.f32 %v6818_v27, %v1052_v14  ;;  %v1309_v30 = vadd.f32 %v6818_v27, %v1308_v15 }
 0x284   : > { %v1433_v21 = vmax.f32 %v1061_v42, 0.0  ;;  %v1497_v34 = vmax.f32 %v1317_v8, 0.0  ;;  %v7074_v20 = vadd.f32 %v6818_v27, %v5647_v0  ;;  %v7077_v57 = vadd.f32 %v6818_v27, %v5711_v63 }
 0x285   : > { %v1431_v1 = vmax.f32 %v1053_v59, 0.0  ;;  %v1495_v56 = vmax.f32 %v1309_v30, 0.0  ;;  %v7080_v53 = vadd.f32 %v6818_v27, %v1055_v48  ;;  %v7083_v44 = vadd.f32 %v6818_v27, %v1311_v43 }
 0x286   : > { %v1537_v60 = vmax.f32 %v1429_v19, %v1433_v21  ;;  %v1569_v40 = vmax.f32 %v1493_v2, %v1497_v34  ;;  %v1434_v58 = vmax.f32 %v7074_v20, 0.0  ;;  %v1498_v47 = vmax.f32 %v7077_v57, 0.0 }
 0x287   : > { %v1535_v9 = vmax.f32 %v1427_v3, %v1431_v1  ;;  %v7087_v23 = vmax.f32 %v1491_v37, %v1495_v56  ;;  %v1432_v7 = vmax.f32 %v7080_v53, 0.0  ;;  %v1496_v35 = vmax.f32 %v7083_v44, 0.0 }
 0x288   : > { %v2017_v12 = vcombine.high %v1537_v60, %v1537_v60  ;;  %v2024_v52 = vrot.slane %v1537_v60, %v6007_v29  ;;  %v2561_v13 = vcombine.high %v1569_v40, %v1569_v40  ;;  %v2568_v27 = vrot.slane %v1569_v40, %v6007_v29 }
 0x289   : > { %v1983_v51 = vcombine.high %v1535_v9, %v1535_v9  ;;  %v7094_v14 = vrot.slane %v1535_v9, %v6007_v29  ;;  %v2527_v15 = vcombine.high %v7087_v23, %v7087_v23  ;;  %v7100_v16 = vrot.slane %v7087_v23, %v6007_v29 }
 0x28a   : > { %v2031_v38 = vrot.slane %v2017_v12, %v6007_v29  ;;  %v2032_v4 = vcombine.high %v2024_v52, %v2024_v52  ;;  %v3604_v49 = vsel %vm2987_vm3, %v2024_v52, -inf  ;;  %v2575_v31 = vrot.slane %v2561_v13, %v6007_v29 }
 0x28b   : > { %v3605_v11 = vrot.slane %v3604_v49, 4  ;;  %v2576_v61 = vcombine.high %v2568_v27, %v2568_v27  ;;  %v4500_v55 = vsel %vm2987_vm3, %v2568_v27, -inf  ;;  %v7107_v33 = vrot.slane %v1983_v51, %v6007_v29 }
 0x28c   : > { %v2033_v32 = vcombine.high %v2031_v38, %v2031_v38  ;;  %v3611_v28 = vsel %vm2987_vm3, %v2032_v4, -inf  ;;  %v3618_v39 = vsel %vm2987_vm3, %v2031_v38, -inf  ;;  %v2577_v5 = vcombine.high %v2575_v31, %v2575_v31 }
 0x28d   : > { %v3606_v26 = vmax.f32 %v3604_v49, %v3605_v11  ;;  %v3612_v19 = vrot.slane %v3611_v28, 4  ;;  %v3619_v10 = vrot.slane %v3618_v39, 4  ;;  %v4501_v0 = vrot.slane %v4500_v55, 4 }
 0x28e   : > { %v3625_v63 = vsel %vm2987_vm3, %v2033_v32, -inf  ;;  %v4507_v50 = vsel %vm2987_vm3, %v2576_v61, -inf  ;;  %v4514_v2 = vsel %vm2987_vm3, %v2575_v31, -inf  ;;  %v4521_v54 = vsel %vm2987_vm3, %v2577_v5, -inf }
 0x28f   : > { %v3607_v45 = vrot.slane %v3606_v26, 2  ;;  %v3613_v36 = vmax.f32 %v3611_v28, %v3612_v19  ;;  %v3620_v3 = vmax.f32 %v3618_v39, %v3619_v10  ;;  %v3626_v37 = vrot.slane %v3625_v63, 4 }
 0x290   : > { %v4502_v62 = vmax.f32 %v4500_v55, %v4501_v0  ;;  %v4508_v42 = vrot.slane %v4507_v50, 4  ;;  %v4515_v8 = vrot.slane %v4514_v2, 4  ;;  %v4522_v48 = vrot.slane %v4521_v54, 4 }
 0x291   : > { %v3608_v43 = vmax.f32 %v3606_v26, %v3607_v45  ;;  %v3614_v59 = vrot.slane %v3613_v36, 2  ;;  %v3621_v30 = vrot.slane %v3620_v3, 2  ;;  %v3627_v21 = vmax.f32 %v3625_v63, %v3626_v37 }
 0x292   : > { %v4503_v34 = vrot.slane %v4502_v62, 2  ;;  %v4509_v1 = vmax.f32 %v4507_v50, %v4508_v42  ;;  %v4516_v56 = vmax.f32 %v4514_v2, %v4515_v8  ;;  %v4523_v60 = vmax.f32 %v4521_v54, %v4522_v48 }
 0x293   : > { %v3609_v40 = vrot.slane %v3608_v43, 1  ;;  %v3615_v9 = vmax.f32 %v3613_v36, %v3614_v59  ;;  %v3622_v12 = vmax.f32 %v3620_v3, %v3621_v30  ;;  %v3628_v52 = vrot.slane %v3627_v21, 2 }
 0x294   : > { %v4504_v13 = vmax.f32 %v4502_v62, %v4503_v34  ;;  %v4510_v27 = vrot.slane %v4509_v1, 2  ;;  %v4517_v51 = vrot.slane %v4516_v56, 2  ;;  %v4524_v38 = vrot.slane %v4523_v60, 2 }
 0x295   : > { %v3610_v4 = vmax.f32 %v3608_v43, %v3609_v40  ;;  %v3616_v49 = vrot.slane %v3615_v9, 1  ;;  %v3623_v31 = vrot.slane %v3622_v12, 1  ;;  %v3629_v11 = vmax.f32 %v3627_v21, %v3628_v52 }
 0x296   : > { %v4505_v61 = vrot.slane %v4504_v13, 1  ;;  %v4511_v55 = vmax.f32 %v4509_v1, %v4510_v27  ;;  %v4518_v32 = vmax.f32 %v4516_v56, %v4517_v51  ;;  %v4525_v28 = vmax.f32 %v4523_v60, %v4524_v38 }
 0x297   : > { %v3617_v39 = vmax.f32 %v3615_v9, %v3616_v49  ;;  %v3624_v5 = vmax.f32 %v3622_v12, %v3623_v31  ;;  %v3630_v26 = vrot.slane %v3629_v11, 1  ;;  %v1998_v19 = vcombine.high %v7094_v14, %v7094_v14 }
 0x298   : > { %v4506_v10 = vmax.f32 %v4504_v13, %v4505_v61  ;;  %v4512_v0 = vrot.slane %v4511_v55, 1  ;;  %v4519_v63 = vrot.slane %v4518_v32, 1  ;;  %v4526_v50 = vrot.slane %v4525_v28, 1 }
 0x299   : > { %v7117_v2 = vmax.f32 %v3629_v11, %v3630_v26  ;;  %v5120_v54 = vsel %vm5036_vm4, %v3617_v39, %v3610_v4  ;;  %v1999_v45 = vcombine.high %v7107_v33, %v7107_v33  ;;  %v3548_v36 = vsel %vm2987_vm3, %v7094_v14, -inf }
 0x29a   : > { %v5121_v3 = vsel %vm5038_vm5, %v3624_v5, %v5120_v54  ;;  %v4513_v37 = vmax.f32 %v4511_v55, %v4512_v0  ;;  %v4520_v62 = vmax.f32 %v4518_v32, %v4519_v63  ;;  %v7125_v42 = vmax.f32 %v4525_v28, %v4526_v50 }
 0x29b   : > { %v3549_v8 = vrot.slane %v3548_v36, 4  ;;  %v3555_v48 = vsel %vm2987_vm3, %v1998_v19, -inf  ;;  %v3562_v43 = vsel %vm2987_vm3, %v7107_v33, -inf  ;;  %v3569_v59 = vsel %vm2987_vm3, %v1999_v45, -inf }
 0x29c   : > { %v5232_v30 = vsel %vm5036_vm4, %v4513_v37, %v4506_v10  ;;  %v3556_v21 = vrot.slane %v3555_v48, 4  ;;  %v3563_v34 = vrot.slane %v3562_v43, 4  ;;  %v3570_v1 = vrot.slane %v3569_v59, 4 }
 0x29d   : > { %v5233_v14 = vsel %vm5038_vm5, %v4520_v62, %v5232_v30  ;;  %v3550_v56 = vmax.f32 %v3548_v36, %v3549_v8  ;;  %v2541_v60 = vrot.slane %v2527_v15, %v6007_v29  ;;  %v2542_v40 = vcombine.high %v7100_v16, %v7100_v16 }
 0x29e   : > { %v3557_v9 = vmax.f32 %v3555_v48, %v3556_v21  ;;  %v3564_v33 = vmax.f32 %v3562_v43, %v3563_v34  ;;  %v3571_v12 = vmax.f32 %v3569_v59, %v3570_v1  ;;  %v4444_v52 = vsel %vm2987_vm3, %v7100_v16, -inf }
 0x29f   : > { %v3551_v13 = vrot.slane %v3550_v56, 2  ;;  %v2543_v27 = vcombine.high %v2541_v60, %v2541_v60  ;;  %v4445_v51 = vrot.slane %v4444_v52, 4  ;;  %v4451_v38 = vsel %vm2987_vm3, %v2542_v40, -inf }
 0x2a0   : > { %v3558_v4 = vrot.slane %v3557_v9, 2  ;;  %v3565_v49 = vrot.slane %v3564_v33, 2  ;;  %v3572_v31 = vrot.slane %v3571_v12, 2  ;;  %v4452_v11 = vrot.slane %v4451_v38, 4 }
 0x2a1   : > { %v3552_v23 = vmax.f32 %v3550_v56, %v3551_v13  ;;  %v4446_v15 = vmax.f32 %v4444_v52, %v4445_v51  ;;  %v4458_v61 = vsel %vm2987_vm3, %v2541_v60, -inf  ;;  %v4465_v55 = vsel %vm2987_vm3, %v2543_v27, -inf }
 0x2a2   : > { %v3559_v32 = vmax.f32 %v3557_v9, %v3558_v4  ;;  %v3566_v28 = vmax.f32 %v3564_v33, %v3565_v49  ;;  %v3573_v39 = vmax.f32 %v3571_v12, %v3572_v31  ;;  %v4453_v5 = vmax.f32 %v4451_v38, %v4452_v11 }
 0x2a3   : > { %v3553_v16 = vrot.slane %v3552_v23, 1  ;;  %v4447_v26 = vrot.slane %v4446_v15, 2  ;;  %v4459_v19 = vrot.slane %v4458_v61, 4  ;;  %v4466_v10 = vrot.slane %v4465_v55, 4 }
 0x2a4   : > { %v3560_v0 = vrot.slane %v3559_v32, 1  ;;  %v3567_v63 = vrot.slane %v3566_v28, 1  ;;  %v3574_v50 = vrot.slane %v3573_v39, 1  ;;  %v4454_v54 = vrot.slane %v4453_v5, 2 }
 0x2a5   : > { %v3554_v45 = vmax.f32 %v3552_v23, %v3553_v16  ;;  %v4448_v36 = vmax.f32 %v4446_v15, %v4447_v26  ;;  %v4460_v37 = vmax.f32 %v4458_v61, %v4459_v19  ;;  %v4467_v62 = vmax.f32 %v4465_v55, %v4466_v10 }
 0x2a6   : > { %v3561_v8 = vmax.f32 %v3559_v32, %v3560_v0  ;;  %v3568_v48 = vmax.f32 %v3566_v28, %v3567_v63  ;;  %v7144_v43 = vmax.f32 %v3573_v39, %v3574_v50  ;;  %v4455_v59 = vmax.f32 %v4453_v5, %v4454_v54 }
 0x2a7   : > { %v4449_v30 = vrot.slane %v4448_v36, 1  ;;  %v4461_v21 = vrot.slane %v4460_v37, 2  ;;  %v4468_v34 = vrot.slane %v4467_v62, 2  ;;  %v1538_v1 = vmax.f32 %v1430_v41, %v1434_v58 }
 0x2a8   : > { %v5113_v56 = vsel %vm5036_vm4, %v3561_v8, %v3554_v45  ;;  %v4456_v60 = vrot.slane %v4455_v59, 1  ;;  %v7153_v40 = vsel %vm5040_vm6, %v7117_v2, %v5121_v3  ;;  %v1570_v9 = vmax.f32 %v1494_v18, %v1498_v47 }
 0x2a9   : > { %v7160_v33 = vsel %vm5038_vm5, %v3568_v48, %v5113_v56  ;;  %v4450_v12 = vmax.f32 %v4448_v36, %v4449_v30  ;;  %v4462_v20 = vmax.f32 %v4460_v37, %v4461_v21  ;;  %v4469_v52 = vmax.f32 %v4467_v62, %v4468_v34 }
 0x2aa   : > { %v4457_v25 = vmax.f32 %v4455_v59, %v4456_v60  ;;  %v2034_v41 = vcombine.high %v1538_v1, %v1538_v1  ;;  %v2041_v58 = vrot.slane %v1538_v1, %v6007_v29  ;;  %v2578_v13 = vcombine.high %v1570_v9, %v1570_v9 }
 0x2ab   : > { %v4463_v27 = vrot.slane %v4462_v20, 1  ;;  %v4470_v51 = vrot.slane %v4469_v52, 1  ;;  %v2585_v2 = vrot.slane %v1570_v9, %v6007_v29  ;;  %v7166_v57 = vsel %vm5040_vm6, %v7125_v42, %v5233_v14 }
 0x2ac   : > { %v5225_v46 = vsel %vm5036_vm4, %v4457_v25, %v4450_v12  ;;  %v2048_v18 = vrot.slane %v2034_v41, %v6007_v29  ;;  %v2049_v47 = vcombine.high %v2041_v58, %v2041_v58  ;;  %v3632_v3 = vsel %vm2987_vm3, %v2041_v58, -inf }
 0x2ad   : > { %v4464_v38 = vmax.f32 %v4462_v20, %v4463_v27  ;;  %v7171_v4 = vmax.f32 %v4469_v52, %v4470_v51  ;;  %v3633_v49 = vrot.slane %v3632_v3, 4  ;;  %v2592_v31 = vrot.slane %v2578_v13, %v6007_v29 }
 0x2ae   : > { %v2050_v11 = vcombine.high %v2048_v18, %v2048_v18  ;;  %v3639_v23 = vsel %vm2987_vm3, %v2049_v47, -inf  ;;  %v3646_v15 = vsel %vm2987_vm3, %v2048_v18, -inf  ;;  %v2593_v42 = vcombine.high %v2585_v2, %v2585_v2 }
 0x2af   : > { %v7177_v14 = vsel %vm5038_vm5, %v4464_v38, %v5225_v46  ;;  %v3634_v61 = vmax.f32 %v3632_v3, %v3633_v49  ;;  %v3640_v55 = vrot.slane %v3639_v23, 4  ;;  %v3647_v32 = vrot.slane %v3646_v15, 4  ;;  %v7186_v49 = vpop.f32.mrf.mxu0 }
 0x2b0   : > { %v3653_v28 = vsel %vm2987_vm3, %v2050_v11, -inf  ;;  %v2594_v39 = vcombine.high %v2592_v31, %v2592_v31  ;;  %v4528_v5 = vsel %vm2987_vm3, %v2585_v2, -inf  ;;  %v4535_v16 = vsel %vm2987_vm3, %v2593_v42, -inf }
 0x2b1   : > { %v3635_v26 = vrot.slane %v3634_v61, 2  ;;  %v3641_v19 = vmax.f32 %v3639_v23, %v3640_v55  ;;  %v3648_v10 = vmax.f32 %v3646_v15, %v3647_v32  ;;  %v3654_v0 = vrot.slane %v3653_v28, 4  ;;  %v7203_v53 = vpop.f32.mrf.mxu0 }
 0x2b2   : > { %v4529_v63 = vrot.slane %v4528_v5, 4  ;;  %v4536_v50 = vrot.slane %v4535_v16, 4  ;;  %v4542_v54 = vsel %vm2987_vm3, %v2592_v31, -inf  ;;  %v4549_v45 = vsel %vm2987_vm3, %v2594_v39, -inf  ;;  %v7188_v31 = vpop.f32.mrf.mxu1 }
 0x2b3   : > { %v3636_v36 = vmax.f32 %v3634_v61, %v3635_v26  ;;  %v3642_v37 = vrot.slane %v3641_v19, 2  ;;  %v3649_v62 = vrot.slane %v3648_v10, 2  ;;  %v3655_v8 = vmax.f32 %v3653_v28, %v3654_v0 }
 0x2b4   : > { %v4530_v48 = vmax.f32 %v4528_v5, %v4529_v63  ;;  %v4537_v59 = vmax.f32 %v4535_v16, %v4536_v50  ;;  %v4543_v30 = vrot.slane %v4542_v54, 4  ;;  %v4550_v21 = vrot.slane %v4549_v45, 4  ;;  %v7205_v17 = vpop.f32.mrf.mxu1 }
 0x2b5   : > { %v3637_v34 = vrot.slane %v3636_v36, 1  ;;  %v3643_v1 = vmax.f32 %v3641_v19, %v3642_v37  ;;  %v3650_v56 = vmax.f32 %v3648_v10, %v3649_v62  ;;  %v3656_v60 = vrot.slane %v3655_v8, 2 }
 0x2b6   : > { %v4531_v9 = vrot.slane %v4530_v48, 2  ;;  %v4538_v12 = vrot.slane %v4537_v59, 2  ;;  %v4544_v20 = vmax.f32 %v4542_v54, %v4543_v30  ;;  %v4551_v52 = vmax.f32 %v4549_v45, %v4550_v21  ;;  %v7228_v62 = vpop.f32.mrf.mxu1 }
 0x2b7   : > { %v3638_v25 = vmax.f32 %v3636_v36, %v3637_v34  ;;  %v3644_v41 = vrot.slane %v3643_v1, 1  ;;  %v3651_v58 = vrot.slane %v3650_v56, 1  ;;  %v3657_v13 = vmax.f32 %v3655_v8, %v3656_v60 }
 0x2b8   : > { %v4532_v27 = vmax.f32 %v4530_v48, %v4531_v9  ;;  %v4539_v51 = vmax.f32 %v4537_v59, %v4538_v12  ;;  %v4545_v2 = vrot.slane %v4544_v20, 2  ;;  %v4552_v46 = vrot.slane %v4551_v52, 2 }
 0x2b9   : > { %v3645_v18 = vmax.f32 %v3643_v1, %v3644_v41  ;;  %v3652_v47 = vmax.f32 %v3650_v56, %v3651_v58  ;;  %v3658_v3 = vrot.slane %v3657_v13, 1  ;;  %v5123_v38 = vsel %vm5042_vm7, %v3638_v25, %v7153_v40 }
 0x2ba   : > { %v4533_v11 = vrot.slane %v4532_v27, 1  ;;  %v4540_v23 = vrot.slane %v4539_v51, 1  ;;  %v4546_v15 = vmax.f32 %v4544_v20, %v4545_v2  ;;  %v4553_v42 = vmax.f32 %v4551_v52, %v4552_v46 }
 0x2bb   : > { %v3659_v61 = vmax.f32 %v3657_v13, %v3658_v3  ;;  %v5124_v55 = vsel %vm5044_vm8, %v3645_v18, %v5123_v38  ;;  %v1536_v32 = vmax.f32 %v1428_v22, %v1432_v7  ;;  %v7198_v40 = vsel %vm5040_vm6, %v7144_v43, %v7160_v33 }
 0x2bc   : > { %v5125_v28 = vsel %vm5046_vm9, %v3652_v47, %v5124_v55  ;;  %v4534_v39 = vmax.f32 %v4532_v27, %v4533_v11  ;;  %v4541_v5 = vmax.f32 %v4539_v51, %v4540_v23  ;;  %v4547_v16 = vrot.slane %v4546_v15, 1  ;;  %v7239_v27 = vpop.f32.mrf.mxu1 }
 0x2bd   : > { %v5126_v26 = vsel %vm5048_vm10, %v3659_v61, %v5125_v28  ;;  %v4554_v19 = vrot.slane %v4553_v42, 1  ;;  %v2000_v10 = vcombine.high %v1536_v32, %v1536_v32  ;;  %v2007_v0 = vrot.slane %v1536_v32, %v6007_v29 }
 0x2be   : > { %5310 = vst [vmem:[%s6117_s27 + $0x58] sm:$0xff] %v5126_v26  ;;  %v4548_v22 = vmax.f32 %v4546_v15, %v4547_v16  ;;  %v5235_v7 = vsel %vm5042_vm7, %v4534_v39, %v7166_v57  ;;  %v1568_v43 = vmax.f32 %v1492_v6, %v1496_v35  ;;  %v7217_v33 = vsel %vm5040_vm6, %v7171_v4, %v7177_v14  ;;  %v7226_v14 = vpop.f32.mrf.mxu0  ;;  %v5718_v16 = vpop.f32.mrf.mxu1 }
 0x2bf   : > { %v4555_v63 = vmax.f32 %v4553_v42, %v4554_v19  ;;  %v5236_v50 = vsel %vm5044_vm8, %v4541_v5, %v5235_v7  ;;  %v2014_v54 = vrot.slane %v2000_v10, %v6007_v29  ;;  %v2015_v45 = vcombine.high %v2007_v0, %v2007_v0 }
 0x2c0   : > { %v5237_v36 = vsel %vm5046_vm9, %v4548_v22, %v5236_v50  ;;  %v3576_v57 = vsel %vm2987_vm3, %v2007_v0, -inf  ;;  %v2544_v44 = vcombine.high %v1568_v43, %v1568_v43  ;;  %v2551_v24 = vrot.slane %v1568_v43, %v6007_v29  ;;  %v7237_v13 = vpop.f32.mrf.mxu0 }
 0x2c1   : > { %v5238_v6 = vsel %vm5048_vm10, %v4555_v63, %v5237_v36  ;;  %v2016_v35 = vcombine.high %v2014_v54, %v2014_v54  ;;  %v3577_v37 = vrot.slane %v3576_v57, 4  ;;  %v3583_v4 = vsel %vm2987_vm3, %v2015_v45, -inf }
 0x2c2   : > { %5326 = vst [vmem:[%s6117_s27 + $0xd8] sm:$0xff] %v5238_v6  ;;  %v3584_v8 = vrot.slane %v3583_v4, 4  ;;  %v3590_v48 = vsel %vm2987_vm3, %v2014_v54, -inf  ;;  %v2558_v59 = vrot.slane %v2544_v44, %v6007_v29  ;;  %v2559_v30 = vcombine.high %v2551_v24, %v2551_v24  ;;  %v5654_v5 = vpop.f32.mrf.mxu0 }
 0x2c3   : > { %v3578_v21 = vmax.f32 %v3576_v57, %v3577_v37  ;;  %v3591_v34 = vrot.slane %v3590_v48, 4  ;;  %v3597_v1 = vsel %vm2987_vm3, %v2016_v35, -inf  ;;  %v4472_v56 = vsel %vm2987_vm3, %v2551_v24, -inf  ;;  %v1340_v37 = vpop.f32.mrf.mxu1 }
 0x2c4   : > { %v3585_v60 = vmax.f32 %v3583_v4, %v3584_v8  ;;  %v3598_v9 = vrot.slane %v3597_v1, 4  ;;  %v2560_v12 = vcombine.high %v2558_v59, %v2558_v59  ;;  %v4473_v20 = vrot.slane %v4472_v56, 4  ;;  %v1084_v35 = vpop.f32.mrf.mxu0 }
 0x2c5   : > { %v3579_v52 = vrot.slane %v3578_v21, 2  ;;  %v3592_v25 = vmax.f32 %v3590_v48, %v3591_v34  ;;  %v4479_v41 = vsel %vm2987_vm3, %v2559_v30, -inf  ;;  %v4486_v58 = vsel %vm2987_vm3, %v2558_v59, -inf }
 0x2c6   : > { %v3586_v51 = vrot.slane %v3585_v60, 2  ;;  %v3599_v2 = vmax.f32 %v3597_v1, %v3598_v9  ;;  %v4474_v46 = vmax.f32 %v4472_v56, %v4473_v20  ;;  %v4480_v18 = vrot.slane %v4479_v41, 4  ;;  %v7249_v1 = vld [vmem:[%s7674_s2] ss:$0 sm:$0xff] }
 0x2c7   : > { %v3580_v47 = vmax.f32 %v3578_v21, %v3579_v52  ;;  %v3593_v3 = vrot.slane %v3592_v25, 2  ;;  %v4487_v38 = vrot.slane %v4486_v58, 4  ;;  %v4493_v11 = vsel %vm2987_vm3, %v2560_v12, -inf }
 0x2c8   : > { %v3587_v23 = vmax.f32 %v3585_v60, %v3586_v51  ;;  %v3600_v15 = vrot.slane %v3599_v2, 2  ;;  %v4475_v42 = vrot.slane %v4474_v46, 2  ;;  %v4481_v61 = vmax.f32 %v4479_v41, %v4480_v18  ;;  %v5719_v51 = vpop.f32.mrf.mxu1 }
 0x2c9   : > { %v3581_v55 = vrot.slane %v3580_v47, 1  ;;  %v3594_v32 = vmax.f32 %v3592_v25, %v3593_v3  ;;  %v4488_v28 = vmax.f32 %v4486_v58, %v4487_v38  ;;  %v4494_v39 = vrot.slane %v4493_v11, 4  ;;  %v5655_v58 = vpop.f32.mrf.mxu0 }
 0x2ca   : > { %v3588_v26 = vrot.slane %v3587_v23, 1  ;;  %v3601_v19 = vmax.f32 %v3599_v2, %v3600_v15  ;;  %v4476_v10 = vmax.f32 %v4474_v46, %v4475_v42  ;;  %v4482_v0 = vrot.slane %v4481_v61, 2 }
 0x2cb   : > { %v3582_v22 = vmax.f32 %v3580_v47, %v3581_v55  ;;  %v3595_v7 = vrot.slane %v3594_v32, 1  ;;  %v4489_v43 = vrot.slane %v4488_v28, 2  ;;  %v4495_v63 = vmax.f32 %v4493_v11, %v4494_v39  ;;  %v1087_v42 = vpop.f32.mrf.mxu0 }
 0x2cc   : > { %v3589_v50 = vmax.f32 %v3587_v23, %v3588_v26  ;;  %v3602_v54 = vrot.slane %v3601_v19, 1  ;;  %v4477_v45 = vrot.slane %v4476_v10, 1  ;;  %v4483_v36 = vmax.f32 %v4481_v61, %v4482_v0  ;;  %v1343_v61 = vpop.f32.mrf.mxu1 }
 0x2cd   : > { %v3596_v57 = vmax.f32 %v3594_v32, %v3595_v7  ;;  %v5116_v44 = vsel %vm5042_vm7, %v3582_v22, %v7198_v40  ;;  %v4490_v24 = vmax.f32 %v4488_v28, %v4489_v43  ;;  %v4496_v6 = vrot.slane %v4495_v63, 2 }
 0x2ce   : > { %v3603_v4 = vmax.f32 %v3601_v19, %v3602_v54  ;;  %v5117_v8 = vsel %vm5044_vm8, %v3589_v50, %v5116_v44  ;;  %v4478_v48 = vmax.f32 %v4476_v10, %v4477_v45  ;;  %v4484_v59 = vrot.slane %v4483_v36, 1 }
 0x2cf   : > { %v5118_v30 = vsel %vm5046_vm9, %v3596_v57, %v5117_v8  ;;  %v4491_v21 = vrot.slane %v4490_v24, 1  ;;  %v4497_v34 = vmax.f32 %v4495_v63, %v4496_v6  ;;  %v1077_v40 = vadd.f32 %v7249_v1, %v7186_v49 }
 0x2d0   : > { %v5119_v56 = vsel %vm5048_vm10, %v3603_v4, %v5118_v30  ;;  %v4485_v60 = vmax.f32 %v4483_v36, %v4484_v59  ;;  %v5228_v9 = vsel %vm5042_vm7, %v4478_v48, %v7217_v33  ;;  %v1333_v12 = vadd.f32 %v7249_v1, %v7188_v31 }
 0x2d1   : > { %5309 = vst [vmem:[%s6117_s27 + $0x50] sm:$0xff] %v5119_v56  ;;  %v4492_v20 = vmax.f32 %v4490_v24, %v4491_v21  ;;  %v4498_v52 = vrot.slane %v4497_v34, 1  ;;  %v1437_v25 = vmax.f32 %v1077_v40, 0.0  ;;  %v1069_v41 = vadd.f32 %v7249_v1, %v7203_v53 }
 0x2d2   : > { %v5229_v49 = vsel %vm5044_vm8, %v4485_v60, %v5228_v9  ;;  %v1501_v2 = vmax.f32 %v1333_v12, 0.0  ;;  %v1325_v46 = vadd.f32 %v7249_v1, %v7205_v17  ;;  %v7266_v33 = vadd.f32 %v7249_v1, %v7226_v14 }
 0x2d3   : > { %v4499_v31 = vmax.f32 %v4497_v34, %v4498_v52  ;;  %v5230_v18 = vsel %vm5046_vm9, %v4492_v20, %v5229_v49  ;;  %v1435_v47 = vmax.f32 %v1069_v41, 0.0  ;;  %v7271_v53 = vadd.f32 %v7249_v1, %v7228_v62 }
 0x2d4   : > { %v1499_v3 = vmax.f32 %v1325_v46, 0.0  ;;  %v1438_v38 = vmax.f32 %v7266_v33, 0.0  ;;  %v7276_v11 = vadd.f32 %v7249_v1, %v7237_v13  ;;  %v7280_v17 = vadd.f32 %v7249_v1, %v7239_v27 }
 0x2d5   : > { %v5231_v14 = vsel %vm5048_vm10, %v4499_v31, %v5230_v18  ;;  %v1502_v23 = vmax.f32 %v7271_v53, 0.0  ;;  %v1093_v15 = vadd.f32 %v7249_v1, %v5654_v5  ;;  %v1349_v62 = vadd.f32 %v7249_v1, %v5718_v16 }
 0x2d6   : > { %5325 = vst [vmem:[%s6117_s27 + $0xd0] sm:$0xff] %v5231_v14  ;;  %v1436_v55 = vmax.f32 %v7276_v11, 0.0  ;;  %v1500_v13 = vmax.f32 %v7280_v17, 0.0  ;;  %v1085_v32 = vadd.f32 %v7249_v1, %v1084_v35  ;;  %v1341_v27 = vadd.f32 %v7249_v1, %v1340_v37 }
 0x2d7   : > { %v1441_v28 = vmax.f32 %v1093_v15, 0.0  ;;  %v1505_v39 = vmax.f32 %v1349_v62, 0.0  ;;  %v7292_v26 = vadd.f32 %v7249_v1, %v5655_v58  ;;  %v7295_v5 = vadd.f32 %v7249_v1, %v5719_v51 }
 0x2d8   : > { %v1439_v16 = vmax.f32 %v1085_v32, 0.0  ;;  %v1503_v19 = vmax.f32 %v1341_v27, 0.0  ;;  %v7298_v10 = vadd.f32 %v7249_v1, %v1087_v42  ;;  %v7301_v0 = vadd.f32 %v7249_v1, %v1343_v61 }
 0x2d9   : > { %v1541_v22 = vmax.f32 %v1437_v25, %v1441_v28  ;;  %v1573_v7 = vmax.f32 %v1501_v2, %v1505_v39  ;;  %v1442_v43 = vmax.f32 %v7292_v26, 0.0  ;;  %v1506_v63 = vmax.f32 %v7295_v5, 0.0 }
 0x2da   : > { %v1539_v50 = vmax.f32 %v1435_v47, %v1439_v16  ;;  %v7305_v54 = vmax.f32 %v1499_v3, %v1503_v19  ;;  %v1440_v45 = vmax.f32 %v7298_v10, 0.0  ;;  %v1504_v36 = vmax.f32 %v7301_v0, 0.0 }
 0x2db   : > { %v2085_v57 = vcombine.high %v1541_v22, %v1541_v22  ;;  %v2092_v44 = vrot.slane %v1541_v22, %v6007_v29  ;;  %v2629_v24 = vcombine.high %v1573_v7, %v1573_v7  ;;  %v2636_v6 = vrot.slane %v1573_v7, %v6007_v29 }
 0x2dc   : > { %v2051_v35 = vcombine.high %v1539_v50, %v1539_v50  ;;  %v7312_v37 = vrot.slane %v1539_v50, %v6007_v29  ;;  %v2595_v4 = vcombine.high %v7305_v54, %v7305_v54  ;;  %v7318_v8 = vrot.slane %v7305_v54, %v6007_v29 }
 0x2dd   : > { %v2099_v48 = vrot.slane %v2085_v57, %v6007_v29  ;;  %v2100_v59 = vcombine.high %v2092_v44, %v2092_v44  ;;  %v3716_v30 = vsel %vm2987_vm3, %v2092_v44, -inf  ;;  %v2643_v21 = vrot.slane %v2629_v24, %v6007_v29 }
 0x2de   : > { %v3717_v34 = vrot.slane %v3716_v30, 4  ;;  %v2644_v40 = vcombine.high %v2636_v6, %v2636_v6  ;;  %v4612_v56 = vsel %vm2987_vm3, %v2636_v6, -inf  ;;  %v7325_v60 = vrot.slane %v2051_v35, %v6007_v29 }
 0x2df   : > { %v2101_v9 = vcombine.high %v2099_v48, %v2099_v48  ;;  %v3723_v12 = vsel %vm2987_vm3, %v2100_v59, -inf  ;;  %v3730_v20 = vsel %vm2987_vm3, %v2099_v48, -inf  ;;  %v2645_v52 = vcombine.high %v2643_v21, %v2643_v21 }
 0x2e0   : > { %v3718_v25 = vmax.f32 %v3716_v30, %v3717_v34  ;;  %v3724_v41 = vrot.slane %v3723_v12, 4  ;;  %v3731_v58 = vrot.slane %v3730_v20, 4  ;;  %v4613_v51 = vrot.slane %v4612_v56, 4 }
 0x2e1   : > { %v3737_v49 = vsel %vm2987_vm3, %v2101_v9, -inf  ;;  %v4619_v2 = vsel %vm2987_vm3, %v2644_v40, -inf  ;;  %v4626_v46 = vsel %vm2987_vm3, %v2643_v21, -inf  ;;  %v4633_v31 = vsel %vm2987_vm3, %v2645_v52, -inf }
 0x2e2   : > { %v3719_v18 = vrot.slane %v3718_v25, 2  ;;  %v3725_v47 = vmax.f32 %v3723_v12, %v3724_v41  ;;  %v3732_v3 = vmax.f32 %v3730_v20, %v3731_v58  ;;  %v3738_v14 = vrot.slane %v3737_v49, 4 }
 0x2e3   : > { %v4614_v15 = vmax.f32 %v4612_v56, %v4613_v51  ;;  %v4620_v62 = vrot.slane %v4619_v2, 4  ;;  %v4627_v42 = vrot.slane %v4626_v46, 4  ;;  %v4634_v61 = vrot.slane %v4633_v31, 4 }
 0x2e4   : > { %v3720_v32 = vmax.f32 %v3718_v25, %v3719_v18  ;;  %v3726_v27 = vrot.slane %v3725_v47, 2  ;;  %v3733_v28 = vrot.slane %v3732_v3, 2  ;;  %v3739_v39 = vmax.f32 %v3737_v49, %v3738_v14 }
 0x2e5   : > { %v4615_v16 = vrot.slane %v4614_v15, 2  ;;  %v4621_v19 = vmax.f32 %v4619_v2, %v4620_v62  ;;  %v4628_v22 = vmax.f32 %v4626_v46, %v4627_v42  ;;  %v4635_v7 = vmax.f32 %v4633_v31, %v4634_v61 }
 0x2e6   : > { %v3721_v50 = vrot.slane %v3720_v32, 1  ;;  %v3727_v57 = vmax.f32 %v3725_v47, %v3726_v27  ;;  %v3734_v44 = vmax.f32 %v3732_v3, %v3733_v28  ;;  %v3740_v24 = vrot.slane %v3739_v39, 2 }
 0x2e7   : > { %v4616_v6 = vmax.f32 %v4614_v15, %v4615_v16  ;;  %v4622_v35 = vrot.slane %v4621_v19, 2  ;;  %v4629_v48 = vrot.slane %v4628_v22, 2  ;;  %v4636_v59 = vrot.slane %v4635_v7, 2 }
 0x2e8   : > { %v3722_v30 = vmax.f32 %v3720_v32, %v3721_v50  ;;  %v3728_v21 = vrot.slane %v3727_v57, 1  ;;  %v3735_v34 = vrot.slane %v3734_v44, 1  ;;  %v3741_v40 = vmax.f32 %v3739_v39, %v3740_v24 }
 0x2e9   : > { %v4617_v56 = vrot.slane %v4616_v6, 1  ;;  %v4623_v9 = vmax.f32 %v4621_v19, %v4622_v35  ;;  %v4630_v12 = vmax.f32 %v4628_v22, %v4629_v48  ;;  %v4637_v20 = vmax.f32 %v4635_v7, %v4636_v59 }
 0x2ea   : > { %v3729_v52 = vmax.f32 %v3727_v57, %v3728_v21  ;;  %v3736_v25 = vmax.f32 %v3734_v44, %v3735_v34  ;;  %v3742_v41 = vrot.slane %v3741_v40, 1  ;;  %v2066_v58 = vcombine.high %v7312_v37, %v7312_v37 }
 0x2eb   : > { %v4618_v51 = vmax.f32 %v4616_v6, %v4617_v56  ;;  %v4624_v49 = vrot.slane %v4623_v9, 1  ;;  %v4631_v2 = vrot.slane %v4630_v12, 1  ;;  %v4638_v46 = vrot.slane %v4637_v20, 1 }
 0x2ec   : > { %v7335_v31 = vmax.f32 %v3741_v40, %v3742_v41  ;;  %v5134_v18 = vsel %vm5036_vm4, %v3729_v52, %v3722_v30  ;;  %v2067_v47 = vcombine.high %v7325_v60, %v7325_v60  ;;  %v3660_v3 = vsel %vm2987_vm3, %v7312_v37, -inf }
 0x2ed   : > { %v5135_v14 = vsel %vm5038_vm5, %v3736_v25, %v5134_v18  ;;  %v4625_v15 = vmax.f32 %v4623_v9, %v4624_v49  ;;  %v4632_v62 = vmax.f32 %v4630_v12, %v4631_v2  ;;  %v7343_v42 = vmax.f32 %v4637_v20, %v4638_v46 }
 0x2ee   : > { %v3661_v61 = vrot.slane %v3660_v3, 4  ;;  %v3667_v32 = vsel %vm2987_vm3, %v2066_v58, -inf  ;;  %v3674_v27 = vsel %vm2987_vm3, %v7325_v60, -inf  ;;  %v3681_v28 = vsel %vm2987_vm3, %v2067_v47, -inf }
 0x2ef   : > { %v5246_v39 = vsel %vm5036_vm4, %v4625_v15, %v4618_v51  ;;  %v3668_v16 = vrot.slane %v3667_v32, 4  ;;  %v3675_v19 = vrot.slane %v3674_v27, 4  ;;  %v3682_v22 = vrot.slane %v3681_v28, 4 }
 0x2f0   : > { %v5247_v37 = vsel %vm5038_vm5, %v4632_v62, %v5246_v39  ;;  %v3662_v7 = vmax.f32 %v3660_v3, %v3661_v61  ;;  %v2609_v50 = vrot.slane %v2595_v4, %v6007_v29  ;;  %v2610_v57 = vcombine.high %v7318_v8, %v7318_v8 }
 0x2f1   : > { %v3669_v44 = vmax.f32 %v3667_v32, %v3668_v16  ;;  %v3676_v60 = vmax.f32 %v3674_v27, %v3675_v19  ;;  %v3683_v24 = vmax.f32 %v3681_v28, %v3682_v22  ;;  %v4556_v6 = vsel %vm2987_vm3, %v7318_v8, -inf }
 0x2f2   : > { %v3663_v35 = vrot.slane %v3662_v7, 2  ;;  %v2611_v48 = vcombine.high %v2609_v50, %v2609_v50  ;;  %v4557_v59 = vrot.slane %v4556_v6, 4  ;;  %v4563_v30 = vsel %vm2987_vm3, %v2610_v57, -inf }
 0x2f3   : > { %v3670_v21 = vrot.slane %v3669_v44, 2  ;;  %v3677_v34 = vrot.slane %v3676_v60, 2  ;;  %v3684_v40 = vrot.slane %v3683_v24, 2  ;;  %v4564_v56 = vrot.slane %v4563_v30, 4 }
 0x2f4   : > { %v3664_v54 = vmax.f32 %v3662_v7, %v3663_v35  ;;  %v4558_v4 = vmax.f32 %v4556_v6, %v4557_v59  ;;  %v4570_v9 = vsel %vm2987_vm3, %v2609_v50, -inf  ;;  %v4577_v12 = vsel %vm2987_vm3, %v2611_v48, -inf }
 0x2f5   : > { %v3671_v20 = vmax.f32 %v3669_v44, %v3670_v21  ;;  %v3678_v52 = vmax.f32 %v3676_v60, %v3677_v34  ;;  %v3685_v25 = vmax.f32 %v3683_v24, %v3684_v40  ;;  %v4565_v41 = vmax.f32 %v4563_v30, %v4564_v56 }
 0x2f6   : > { %v3665_v8 = vrot.slane %v3664_v54, 1  ;;  %v4559_v58 = vrot.slane %v4558_v4, 2  ;;  %v4571_v51 = vrot.slane %v4570_v9, 4  ;;  %v4578_v49 = vrot.slane %v4577_v12, 4 }
 0x2f7   : > { %v3672_v2 = vrot.slane %v3671_v20, 1  ;;  %v3679_v46 = vrot.slane %v3678_v52, 1  ;;  %v3686_v18 = vrot.slane %v3685_v25, 1  ;;  %v4566_v47 = vrot.slane %v4565_v41, 2 }
 0x2f8   : > { %v3666_v3 = vmax.f32 %v3664_v54, %v3665_v8  ;;  %v4560_v15 = vmax.f32 %v4558_v4, %v4559_v58  ;;  %v4572_v62 = vmax.f32 %v4570_v9, %v4571_v51  ;;  %v4579_v61 = vmax.f32 %v4577_v12, %v4578_v49 }
 0x2f9   : > { %v3673_v32 = vmax.f32 %v3671_v20, %v3672_v2  ;;  %v3680_v27 = vmax.f32 %v3678_v52, %v3679_v46  ;;  %v7362_v28 = vmax.f32 %v3685_v25, %v3686_v18  ;;  %v4567_v39 = vmax.f32 %v4565_v41, %v4566_v47 }
 0x2fa   : > { %v4561_v16 = vrot.slane %v4560_v15, 1  ;;  %v4573_v19 = vrot.slane %v4572_v62, 2  ;;  %v4580_v22 = vrot.slane %v4579_v61, 2  ;;  %v1542_v7 = vmax.f32 %v1438_v38, %v1442_v43 }
 0x2fb   : > { %v5127_v50 = vsel %vm5036_vm4, %v3673_v32, %v3666_v3  ;;  %v4568_v57 = vrot.slane %v4567_v39, 1  ;;  %v7371_v44 = vsel %vm5040_vm6, %v7335_v31, %v5135_v14  ;;  %v1574_v60 = vmax.f32 %v1502_v23, %v1506_v63 }
 0x2fc   : > { %v7378_v24 = vsel %vm5038_vm5, %v3680_v27, %v5127_v50  ;;  %v4562_v6 = vmax.f32 %v4560_v15, %v4561_v16  ;;  %v4574_v26 = vmax.f32 %v4572_v62, %v4573_v19  ;;  %v4581_v35 = vmax.f32 %v4579_v61, %v4580_v22 }
 0x2fd   : > { %v4569_v33 = vmax.f32 %v4567_v39, %v4568_v57  ;;  %v2102_v38 = vcombine.high %v1542_v7, %v1542_v7  ;;  %v2109_v43 = vrot.slane %v1542_v7, %v6007_v29  ;;  %v2646_v48 = vcombine.high %v1574_v60, %v1574_v60 }
 0x2fe   : > { %v4575_v59 = vrot.slane %v4574_v26, 1  ;;  %v4582_v30 = vrot.slane %v4581_v35, 1  ;;  %v2653_v31 = vrot.slane %v1574_v60, %v6007_v29  ;;  %v7384_v5 = vsel %vm5040_vm6, %v7343_v42, %v5247_v37 }
 0x2ff   : > { %v5239_v53 = vsel %vm5036_vm4, %v4569_v33, %v4562_v6  ;;  %v2116_v23 = vrot.slane %v2102_v38, %v6007_v29  ;;  %v2117_v63 = vcombine.high %v2109_v43, %v2109_v43  ;;  %v3744_v14 = vsel %vm2987_vm3, %v2109_v43, -inf }
 0x300   : > { %v4576_v21 = vmax.f32 %v4574_v26, %v4575_v59  ;;  %v7389_v34 = vmax.f32 %v4581_v35, %v4582_v30  ;;  %v3745_v40 = vrot.slane %v3744_v14, 4  ;;  %v2660_v56 = vrot.slane %v2646_v48, %v6007_v29 }
 0x301   : > { %v2118_v54 = vcombine.high %v2116_v23, %v2116_v23  ;;  %v3751_v4 = vsel %vm2987_vm3, %v2117_v63, -inf  ;;  %v3758_v9 = vsel %vm2987_vm3, %v2116_v23, -inf  ;;  %v2661_v42 = vcombine.high %v2653_v31, %v2653_v31 }
 0x302   : > { %v7395_v37 = vsel %vm5038_vm5, %v4576_v21, %v5239_v53  ;;  %v3746_v12 = vmax.f32 %v3744_v14, %v3745_v40  ;;  %v3752_v20 = vrot.slane %v3751_v4, 4  ;;  %v3759_v52 = vrot.slane %v3758_v9, 4 }
 0x303   : > { %v3765_v25 = vsel %vm2987_vm3, %v2118_v54, -inf  ;;  %v2662_v41 = vcombine.high %v2660_v56, %v2660_v56  ;;  %v4640_v8 = vsel %vm2987_vm3, %v2653_v31, -inf  ;;  %v4647_v58 = vsel %vm2987_vm3, %v2661_v42, -inf  ;;  %v7406_v54 = vpop.f32.mrf.mxu1 }
 0x304   : > { %v3747_v51 = vrot.slane %v3746_v12, 2  ;;  %v3753_v49 = vmax.f32 %v3751_v4, %v3752_v20  ;;  %v3760_v2 = vmax.f32 %v3758_v9, %v3759_v52  ;;  %v3766_v46 = vrot.slane %v3765_v25, 4 }
 0x305   : > { %v4641_v18 = vrot.slane %v4640_v8, 4  ;;  %v4648_v47 = vrot.slane %v4647_v58, 4  ;;  %v4654_v3 = vsel %vm2987_vm3, %v2660_v56, -inf  ;;  %v4661_v15 = vsel %vm2987_vm3, %v2662_v41, -inf  ;;  %v7404_v56 = vpop.f32.mrf.mxu0  ;;  %v7423_v11 = vpop.f32.mrf.mxu1 }
 0x306   : > { %v3748_v62 = vmax.f32 %v3746_v12, %v3747_v51  ;;  %v3754_v61 = vrot.slane %v3753_v49, 2  ;;  %v3761_v32 = vrot.slane %v3760_v2, 2  ;;  %v3767_v27 = vmax.f32 %v3765_v25, %v3766_v46 }
 0x307   : > { %v4642_v39 = vmax.f32 %v4640_v8, %v4641_v18  ;;  %v4649_v16 = vmax.f32 %v4647_v58, %v4648_v47  ;;  %v4655_v19 = vrot.slane %v4654_v3, 4  ;;  %v4662_v22 = vrot.slane %v4661_v15, 4  ;;  %v7421_v10 = vpop.f32.mrf.mxu0 }
 0x308   : > { %v3749_v7 = vrot.slane %v3748_v62, 1  ;;  %v3755_v50 = vmax.f32 %v3753_v49, %v3754_v61  ;;  %v3762_v57 = vmax.f32 %v3760_v2, %v3761_v32  ;;  %v3768_v60 = vrot.slane %v3767_v27, 2 }
 0x309   : > { %v4643_v6 = vrot.slane %v4642_v39, 2  ;;  %v4650_v26 = vrot.slane %v4649_v16, 2  ;;  %v4656_v35 = vmax.f32 %v4654_v3, %v4655_v19  ;;  %v4663_v33 = vmax.f32 %v4661_v15, %v4662_v22 }
 0x30a   : > { %v3750_v38 = vmax.f32 %v3748_v62, %v3749_v7  ;;  %v3756_v43 = vrot.slane %v3755_v50, 1  ;;  %v3763_v48 = vrot.slane %v3762_v57, 1  ;;  %v3769_v59 = vmax.f32 %v3767_v27, %v3768_v60  ;;  %v7446_v27 = vpop.f32.mrf.mxu1 }
 0x30b   : > { %v4644_v30 = vmax.f32 %v4642_v39, %v4643_v6  ;;  %v4651_v31 = vmax.f32 %v4649_v16, %v4650_v26  ;;  %v4657_v53 = vrot.slane %v4656_v35, 2  ;;  %v4664_v23 = vrot.slane %v4663_v33, 2 }
 0x30c   : > { %v3757_v63 = vmax.f32 %v3755_v50, %v3756_v43  ;;  %v3764_v14 = vmax.f32 %v3762_v57, %v3763_v48  ;;  %v3770_v21 = vrot.slane %v3769_v59, 1  ;;  %v5137_v40 = vsel %vm5042_vm7, %v3750_v38, %v7371_v44 }
 0x30d   : > { %v4645_v4 = vrot.slane %v4644_v30, 1  ;;  %v4652_v9 = vrot.slane %v4651_v31, 1  ;;  %v4658_v42 = vmax.f32 %v4656_v35, %v4657_v53  ;;  %v4665_v12 = vmax.f32 %v4663_v33, %v4664_v23 }
 0x30e   : > { %v3771_v20 = vmax.f32 %v3769_v59, %v3770_v21  ;;  %v5138_v52 = vsel %vm5044_vm8, %v3757_v63, %v5137_v40  ;;  %v1540_v25 = vmax.f32 %v1436_v55, %v1440_v45  ;;  %v7416_v44 = vsel %vm5040_vm6, %v7362_v28, %v7378_v24 }
 0x30f   : > { %v5139_v41 = vsel %vm5046_vm9, %v3764_v14, %v5138_v52  ;;  %v4646_v8 = vmax.f32 %v4644_v30, %v4645_v4  ;;  %v4653_v58 = vmax.f32 %v4651_v31, %v4652_v9  ;;  %v4659_v51 = vrot.slane %v4658_v42, 1  ;;  %v7457_v31 = vpop.f32.mrf.mxu1 }
 0x310   : > { %v5140_v49 = vsel %vm5048_vm10, %v3771_v20, %v5139_v41  ;;  %v4666_v2 = vrot.slane %v4665_v12, 1  ;;  %v2068_v46 = vcombine.high %v1540_v25, %v1540_v25  ;;  %v2075_v18 = vrot.slane %v1540_v25, %v6007_v29 }
 0x311   : > { %5312 = vst [vmem:[%s6117_s27 + $0x68] sm:$0xff] %v5140_v49  ;;  %v4660_v55 = vmax.f32 %v4658_v42, %v4659_v51  ;;  %v5249_v45 = vsel %vm5042_vm7, %v4646_v8, %v7384_v5  ;;  %v1572_v28 = vmax.f32 %v1500_v13, %v1504_v36  ;;  %v7435_v24 = vsel %vm5040_vm6, %v7389_v34, %v7395_v37  ;;  %v7444_v37 = vpop.f32.mrf.mxu0  ;;  %v5726_v49 = vpop.f32.mrf.mxu1 }
 0x312   : > { %v4667_v47 = vmax.f32 %v4665_v12, %v4666_v2  ;;  %v5250_v3 = vsel %vm5044_vm8, %v4653_v58, %v5249_v45  ;;  %v2082_v15 = vrot.slane %v2068_v46, %v6007_v29  ;;  %v2083_v62 = vcombine.high %v2075_v18, %v2075_v18 }
 0x313   : > { %v5251_v61 = vsel %vm5046_vm9, %v4660_v55, %v5250_v3  ;;  %v3688_v5 = vsel %vm2987_vm3, %v2075_v18, -inf  ;;  %v2612_v0 = vcombine.high %v1572_v28, %v1572_v28  ;;  %v2619_v17 = vrot.slane %v1572_v28, %v6007_v29  ;;  %v7455_v30 = vpop.f32.mrf.mxu0 }
 0x314   : > { %v5252_v13 = vsel %vm5048_vm10, %v4667_v47, %v5251_v61  ;;  %v2084_v36 = vcombine.high %v2082_v15, %v2082_v15  ;;  %v3689_v32 = vrot.slane %v3688_v5, 4  ;;  %v3695_v34 = vsel %vm2987_vm3, %v2083_v62, -inf }
 0x315   : > { %5328 = vst [vmem:[%s6117_s27 + $0xe8] sm:$0xff] %v5252_v13  ;;  %v3696_v39 = vrot.slane %v3695_v34, 4  ;;  %v3702_v16 = vsel %vm2987_vm3, %v2082_v15, -inf  ;;  %v2626_v19 = vrot.slane %v2612_v0, %v6007_v29  ;;  %v2627_v22 = vcombine.high %v2619_v17, %v2619_v17  ;;  %v5662_v51 = vpop.f32.mrf.mxu0 }
 0x316   : > { %v3690_v7 = vmax.f32 %v3688_v5, %v3689_v32  ;;  %v3703_v50 = vrot.slane %v3702_v16, 4  ;;  %v3709_v57 = vsel %vm2987_vm3, %v2084_v36, -inf  ;;  %v4584_v60 = vsel %vm2987_vm3, %v2619_v17, -inf }
 0x317   : > { %v3697_v6 = vmax.f32 %v3695_v34, %v3696_v39  ;;  %v3710_v26 = vrot.slane %v3709_v57, 4  ;;  %v2628_v35 = vcombine.high %v2626_v19, %v2626_v19  ;;  %v4585_v33 = vrot.slane %v4584_v60, 4  ;;  %v1116_v32 = vpop.f32.mrf.mxu0  ;;  %v1372_v34 = vpop.f32.mrf.mxu1 }
 0x318   : > { %v3691_v38 = vrot.slane %v3690_v7, 2  ;;  %v3704_v43 = vmax.f32 %v3702_v16, %v3703_v50  ;;  %v4591_v48 = vsel %vm2987_vm3, %v2627_v22, -inf  ;;  %v4598_v59 = vsel %vm2987_vm3, %v2626_v19, -inf }
 0x319   : > { %v3698_v53 = vrot.slane %v3697_v6, 2  ;;  %v3711_v23 = vmax.f32 %v3709_v57, %v3710_v26  ;;  %v4586_v63 = vmax.f32 %v4584_v60, %v4585_v33  ;;  %v4592_v14 = vrot.slane %v4591_v48, 4 }
 0x31a   : > { %v3692_v21 = vmax.f32 %v3690_v7, %v3691_v38  ;;  %v3705_v40 = vrot.slane %v3704_v43, 2  ;;  %v4599_v4 = vrot.slane %v4598_v59, 4  ;;  %v4605_v9 = vsel %vm2987_vm3, %v2628_v35, -inf }
 0x31b   : > { %v3699_v42 = vmax.f32 %v3697_v6, %v3698_v53  ;;  %v3712_v12 = vrot.slane %v3711_v23, 2  ;;  %v4587_v20 = vrot.slane %v4586_v63, 2  ;;  %v4593_v52 = vmax.f32 %v4591_v48, %v4592_v14  ;;  %v5727_v53 = vpop.f32.mrf.mxu1 }
 0x31c   : > { %v3693_v25 = vrot.slane %v3692_v21, 1  ;;  %v3706_v41 = vmax.f32 %v3704_v43, %v3705_v40  ;;  %v4600_v8 = vmax.f32 %v4598_v59, %v4599_v4  ;;  %v4606_v58 = vrot.slane %v4605_v9, 4  ;;  %v5663_v59 = vpop.f32.mrf.mxu0 }
 0x31d   : > { %v3700_v2 = vrot.slane %v3699_v42, 1  ;;  %v3713_v46 = vmax.f32 %v3711_v23, %v3712_v12  ;;  %v4588_v18 = vmax.f32 %v4586_v63, %v4587_v20  ;;  %v4594_v55 = vrot.slane %v4593_v52, 2 }
 0x31e   : > { %v3694_v45 = vmax.f32 %v3692_v21, %v3693_v25  ;;  %v3707_v28 = vrot.slane %v3706_v41, 1  ;;  %v4601_v47 = vrot.slane %v4600_v8, 2  ;;  %v4607_v3 = vmax.f32 %v4605_v9, %v4606_v58  ;;  %v1119_v20 = vpop.f32.mrf.mxu0 }
 0x31f   : > { %v3701_v15 = vmax.f32 %v3699_v42, %v3700_v2  ;;  %v3714_v62 = vrot.slane %v3713_v46, 1  ;;  %v4589_v61 = vrot.slane %v4588_v18, 1  ;;  %v4595_v5 = vmax.f32 %v4593_v52, %v4594_v55  ;;  %v1375_v52 = vpop.f32.mrf.mxu1 }
 0x320   : > { %v3708_v0 = vmax.f32 %v3706_v41, %v3707_v28  ;;  %v5130_v17 = vsel %vm5042_vm7, %v3694_v45, %v7416_v44  ;;  %v4602_v13 = vmax.f32 %v4600_v8, %v4601_v47  ;;  %v4608_v36 = vrot.slane %v4607_v3, 2 }
 0x321   : > { %v3715_v39 = vmax.f32 %v3713_v46, %v3714_v62  ;;  %v5131_v16 = vsel %vm5044_vm8, %v3701_v15, %v5130_v17  ;;  %v4590_v19 = vmax.f32 %v4588_v18, %v4589_v61  ;;  %v4596_v22 = vrot.slane %v4595_v5, 1 }
 0x322   : > { %v5132_v7 = vsel %vm5046_vm9, %v3708_v0, %v5131_v16  ;;  %v4603_v50 = vrot.slane %v4602_v13, 1  ;;  %v4609_v57 = vmax.f32 %v4607_v3, %v4608_v36  ;;  %v1109_v60 = vadd.f32 %v7249_v1, %v7404_v56 }
 0x323   : > { %v5133_v6 = vsel %vm5048_vm10, %v3715_v39, %v5132_v7  ;;  %v4597_v44 = vmax.f32 %v4595_v5, %v4596_v22  ;;  %v5242_v26 = vsel %vm5042_vm7, %v4590_v19, %v7435_v24  ;;  %v1365_v35 = vadd.f32 %v7249_v1, %v7406_v54 }
 0x324   : > { %5311 = vst [vmem:[%s6117_s27 + $0x60] sm:$0xff] %v5133_v6  ;;  %v4604_v33 = vmax.f32 %v4602_v13, %v4603_v50  ;;  %v4610_v38 = vrot.slane %v4609_v57, 1  ;;  %v1445_v43 = vmax.f32 %v1109_v60, 0.0  ;;  %v1101_v48 = vadd.f32 %v7249_v1, %v7421_v10 }
 0x325   : > { %v5243_v56 = vsel %vm5044_vm8, %v4597_v44, %v5242_v26  ;;  %v1509_v23 = vmax.f32 %v1365_v35, 0.0  ;;  %v1357_v63 = vadd.f32 %v7249_v1, %v7423_v11  ;;  %v7479_v24 = vadd.f32 %v7249_v1, %v7444_v37 }
 0x326   : > { %v4611_v54 = vmax.f32 %v4609_v57, %v4610_v38  ;;  %v5244_v14 = vsel %vm5046_vm9, %v4604_v33, %v5243_v56  ;;  %v1443_v21 = vmax.f32 %v1101_v48, 0.0  ;;  %v7484_v10 = vadd.f32 %v7249_v1, %v7446_v27 }
 0x327   : > { %v1507_v40 = vmax.f32 %v1357_v63, 0.0  ;;  %v1446_v4 = vmax.f32 %v7479_v24, 0.0  ;;  %v7489_v9 = vadd.f32 %v7249_v1, %v7455_v30  ;;  %v7493_v11 = vadd.f32 %v7249_v1, %v7457_v31 }
 0x328   : > { %v5245_v37 = vsel %vm5048_vm10, %v4611_v54, %v5244_v14  ;;  %v1510_v42 = vmax.f32 %v7484_v10, 0.0  ;;  %v1125_v12 = vadd.f32 %v7249_v1, %v5662_v51  ;;  %v1381_v27 = vadd.f32 %v7249_v1, %v5726_v49 }
 0x329   : > { %5327 = vst [vmem:[%s6117_s27 + $0xe0] sm:$0xff] %v5245_v37  ;;  %v1444_v25 = vmax.f32 %v7489_v9, 0.0  ;;  %v1508_v30 = vmax.f32 %v7493_v11, 0.0  ;;  %v1117_v41 = vadd.f32 %v7249_v1, %v1116_v32  ;;  %v1373_v31 = vadd.f32 %v7249_v1, %v1372_v34 }
 0x32a   : > { %v1449_v8 = vmax.f32 %v1125_v12, 0.0  ;;  %v1513_v58 = vmax.f32 %v1381_v27, 0.0  ;;  %v7505_v2 = vadd.f32 %v7249_v1, %v5663_v59  ;;  %v7508_v51 = vadd.f32 %v7249_v1, %v5727_v53 }
 0x32b   : > { %v1447_v49 = vmax.f32 %v1117_v41, 0.0  ;;  %v1511_v46 = vmax.f32 %v1373_v31, 0.0  ;;  %v7511_v18 = vadd.f32 %v7249_v1, %v1119_v20  ;;  %v7514_v55 = vadd.f32 %v7249_v1, %v1375_v52 }
 0x32c   : > { %v1545_v45 = vmax.f32 %v1445_v43, %v1449_v8  ;;  %v1577_v28 = vmax.f32 %v1509_v23, %v1513_v58  ;;  %v1450_v47 = vmax.f32 %v7505_v2, 0.0  ;;  %v1514_v3 = vmax.f32 %v7508_v51, 0.0 }
 0x32d   : > { %v1543_v15 = vmax.f32 %v1443_v21, %v1447_v49  ;;  %v7518_v62 = vmax.f32 %v1507_v40, %v1511_v46  ;;  %v1448_v61 = vmax.f32 %v7511_v18, 0.0  ;;  %v1512_v5 = vmax.f32 %v7514_v55, 0.0 }
 0x32e   : > { %v2153_v0 = vcombine.high %v1545_v45, %v1545_v45  ;;  %v2160_v17 = vrot.slane %v1545_v45, %v6007_v29  ;;  %v2697_v13 = vcombine.high %v1577_v28, %v1577_v28  ;;  %v2704_v1 = vrot.slane %v1577_v28, %v6007_v29 }
 0x32f   : > { %v2119_v36 = vcombine.high %v1543_v15, %v1543_v15  ;;  %v7525_v32 = vrot.slane %v1543_v15, %v6007_v29  ;;  %v2663_v34 = vcombine.high %v7518_v62, %v7518_v62  ;;  %v7531_v39 = vrot.slane %v7518_v62, %v6007_v29 }
 0x330   : > { %v2167_v16 = vrot.slane %v2153_v0, %v6007_v29  ;;  %v2168_v19 = vcombine.high %v2160_v17, %v2160_v17  ;;  %v3828_v22 = vsel %vm2987_vm3, %v2160_v17, -inf  ;;  %v2711_v7 = vrot.slane %v2697_v13, %v6007_v29 }
 0x331   : > { %v3829_v50 = vrot.slane %v3828_v22, 4  ;;  %v2712_v57 = vcombine.high %v2704_v1, %v2704_v1  ;;  %v4724_v60 = vsel %vm2987_vm3, %v2704_v1, -inf  ;;  %v7538_v6 = vrot.slane %v2119_v36, %v6007_v29 }
 0x332   : > { %v2169_v44 = vcombine.high %v2167_v16, %v2167_v16  ;;  %v3835_v26 = vsel %vm2987_vm3, %v2168_v19, -inf  ;;  %v3842_v35 = vsel %vm2987_vm3, %v2167_v16, -inf  ;;  %v2713_v33 = vcombine.high %v2711_v7, %v2711_v7 }
 0x333   : > { %v3830_v38 = vmax.f32 %v3828_v22, %v3829_v50  ;;  %v3836_v43 = vrot.slane %v3835_v26, 4  ;;  %v3843_v48 = vrot.slane %v3842_v35, 4  ;;  %v4725_v59 = vrot.slane %v4724_v60, 4 }
 0x334   : > { %v3849_v53 = vsel %vm2987_vm3, %v2169_v44, -inf  ;;  %v4731_v56 = vsel %vm2987_vm3, %v2712_v57, -inf  ;;  %v4738_v23 = vsel %vm2987_vm3, %v2711_v7, -inf  ;;  %v4745_v63 = vsel %vm2987_vm3, %v2713_v33, -inf }
 0x335   : > { %v3831_v54 = vrot.slane %v3830_v38, 2  ;;  %v3837_v14 = vmax.f32 %v3835_v26, %v3836_v43  ;;  %v3844_v21 = vmax.f32 %v3842_v35, %v3843_v48  ;;  %v3850_v40 = vrot.slane %v3849_v53, 4 }
 0x336   : > { %v4726_v37 = vmax.f32 %v4724_v60, %v4725_v59  ;;  %v4732_v12 = vrot.slane %v4731_v56, 4  ;;  %v4739_v27 = vrot.slane %v4738_v23, 4  ;;  %v4746_v20 = vrot.slane %v4745_v63, 4 }
 0x337   : > { %v3832_v52 = vmax.f32 %v3830_v38, %v3831_v54  ;;  %v3838_v41 = vrot.slane %v3837_v14, 2  ;;  %v3845_v31 = vrot.slane %v3844_v21, 2  ;;  %v3851_v8 = vmax.f32 %v3849_v53, %v3850_v40 }
 0x338   : > { %v4727_v58 = vrot.slane %v4726_v37, 2  ;;  %v4733_v49 = vmax.f32 %v4731_v56, %v4732_v12  ;;  %v4740_v46 = vmax.f32 %v4738_v23, %v4739_v27  ;;  %v4747_v45 = vmax.f32 %v4745_v63, %v4746_v20 }
 0x339   : > { %v3833_v28 = vrot.slane %v3832_v52, 1  ;;  %v3839_v15 = vmax.f32 %v3837_v14, %v3838_v41  ;;  %v3846_v0 = vmax.f32 %v3844_v21, %v3845_v31  ;;  %v3852_v17 = vrot.slane %v3851_v8, 2 }
 0x33a   : > { %v4728_v13 = vmax.f32 %v4726_v37, %v4727_v58  ;;  %v4734_v1 = vrot.slane %v4733_v49, 2  ;;  %v4741_v36 = vrot.slane %v4740_v46, 2  ;;  %v4748_v16 = vrot.slane %v4747_v45, 2 }
 0x33b   : > { %v3834_v19 = vmax.f32 %v3832_v52, %v3833_v28  ;;  %v3840_v22 = vrot.slane %v3839_v15, 1  ;;  %v3847_v7 = vrot.slane %v3846_v0, 1  ;;  %v3853_v50 = vmax.f32 %v3851_v8, %v3852_v17 }
 0x33c   : > { %v4729_v57 = vrot.slane %v4728_v13, 1  ;;  %v4735_v60 = vmax.f32 %v4733_v49, %v4734_v1  ;;  %v4742_v44 = vmax.f32 %v4740_v46, %v4741_v36  ;;  %v4749_v26 = vmax.f32 %v4747_v45, %v4748_v16 }
 0x33d   : > { %v3841_v35 = vmax.f32 %v3839_v15, %v3840_v22  ;;  %v3848_v33 = vmax.f32 %v3846_v0, %v3847_v7  ;;  %v3854_v38 = vrot.slane %v3853_v50, 1  ;;  %v2134_v43 = vcombine.high %v7525_v32, %v7525_v32 }
 0x33e   : > { %v4730_v48 = vmax.f32 %v4728_v13, %v4729_v57  ;;  %v4736_v59 = vrot.slane %v4735_v60, 1  ;;  %v4743_v53 = vrot.slane %v4742_v44, 1  ;;  %v4750_v56 = vrot.slane %v4749_v26, 1 }
 0x33f   : > { %v7548_v23 = vmax.f32 %v3853_v50, %v3854_v38  ;;  %v5148_v63 = vsel %vm5036_vm4, %v3841_v35, %v3834_v19  ;;  %v2135_v54 = vcombine.high %v7538_v6, %v7538_v6  ;;  %v3772_v14 = vsel %vm2987_vm3, %v7525_v32, -inf }
 0x340   : > { %v5149_v21 = vsel %vm5038_vm5, %v3848_v33, %v5148_v63  ;;  %v4737_v40 = vmax.f32 %v4735_v60, %v4736_v59  ;;  %v4744_v37 = vmax.f32 %v4742_v44, %v4743_v53  ;;  %v7556_v12 = vmax.f32 %v4749_v26, %v4750_v56 }
 0x341   : > { %v3773_v27 = vrot.slane %v3772_v14, 4  ;;  %v3779_v20 = vsel %vm2987_vm3, %v2134_v43, -inf  ;;  %v3786_v52 = vsel %vm2987_vm3, %v7538_v6, -inf  ;;  %v3793_v41 = vsel %vm2987_vm3, %v2135_v54, -inf }
 0x342   : > { %v5260_v31 = vsel %vm5036_vm4, %v4737_v40, %v4730_v48  ;;  %v3780_v8 = vrot.slane %v3779_v20, 4  ;;  %v3787_v58 = vrot.slane %v3786_v52, 4  ;;  %v3794_v49 = vrot.slane %v3793_v41, 4 }
 0x343   : > { %v5261_v32 = vsel %vm5038_vm5, %v4744_v37, %v5260_v31  ;;  %v3774_v46 = vmax.f32 %v3772_v14, %v3773_v27  ;;  %v2677_v45 = vrot.slane %v2663_v34, %v6007_v29  ;;  %v2678_v28 = vcombine.high %v7531_v39, %v7531_v39 }
 0x344   : > { %v3781_v15 = vmax.f32 %v3779_v20, %v3780_v8  ;;  %v3788_v6 = vmax.f32 %v3786_v52, %v3787_v58  ;;  %v3795_v0 = vmax.f32 %v3793_v41, %v3794_v49  ;;  %v4668_v17 = vsel %vm2987_vm3, %v7531_v39, -inf }
 0x345   : > { %v3775_v13 = vrot.slane %v3774_v46, 2  ;;  %v2679_v1 = vcombine.high %v2677_v45, %v2677_v45  ;;  %v4669_v36 = vrot.slane %v4668_v17, 4  ;;  %v4675_v16 = vsel %vm2987_vm3, %v2678_v28, -inf }
 0x346   : > { %v3782_v19 = vrot.slane %v3781_v15, 2  ;;  %v3789_v22 = vrot.slane %v3788_v6, 2  ;;  %v3796_v7 = vrot.slane %v3795_v0, 2  ;;  %v4676_v50 = vrot.slane %v4675_v16, 4 }
 0x347   : > { %v3776_v62 = vmax.f32 %v3774_v46, %v3775_v13  ;;  %v4670_v34 = vmax.f32 %v4668_v17, %v4669_v36  ;;  %v4682_v57 = vsel %vm2987_vm3, %v2677_v45, -inf  ;;  %v4689_v60 = vsel %vm2987_vm3, %v2679_v1, -inf }
 0x348   : > { %v3783_v44 = vmax.f32 %v3781_v15, %v3782_v19  ;;  %v3790_v26 = vmax.f32 %v3788_v6, %v3789_v22  ;;  %v3797_v35 = vmax.f32 %v3795_v0, %v3796_v7  ;;  %v4677_v33 = vmax.f32 %v4675_v16, %v4676_v50 }
 0x349   : > { %v3777_v39 = vrot.slane %v3776_v62, 1  ;;  %v4671_v38 = vrot.slane %v4670_v34, 2  ;;  %v4683_v43 = vrot.slane %v4682_v57, 4  ;;  %v4690_v48 = vrot.slane %v4689_v60, 4 }
 0x34a   : > { %v3784_v59 = vrot.slane %v3783_v44, 1  ;;  %v3791_v53 = vrot.slane %v3790_v26, 1  ;;  %v3798_v56 = vrot.slane %v3797_v35, 1  ;;  %v4678_v63 = vrot.slane %v4677_v33, 2 }
 0x34b   : > { %v3778_v54 = vmax.f32 %v3776_v62, %v3777_v39  ;;  %v4672_v14 = vmax.f32 %v4670_v34, %v4671_v38  ;;  %v4684_v40 = vmax.f32 %v4682_v57, %v4683_v43  ;;  %v4691_v37 = vmax.f32 %v4689_v60, %v4690_v48 }
 0x34c   : > { %v3785_v27 = vmax.f32 %v3783_v44, %v3784_v59  ;;  %v3792_v20 = vmax.f32 %v3790_v26, %v3791_v53  ;;  %v7575_v52 = vmax.f32 %v3797_v35, %v3798_v56  ;;  %v4679_v41 = vmax.f32 %v4677_v33, %v4678_v63 }
 0x34d   : > { %v4673_v31 = vrot.slane %v4672_v14, 1  ;;  %v4685_v8 = vrot.slane %v4684_v40, 2  ;;  %v4692_v58 = vrot.slane %v4691_v37, 2  ;;  %v1546_v49 = vmax.f32 %v1446_v4, %v1450_v47 }
 0x34e   : > { %v5141_v46 = vsel %vm5036_vm4, %v3785_v27, %v3778_v54  ;;  %v4680_v45 = vrot.slane %v4679_v41, 1  ;;  %v7584_v28 = vsel %vm5040_vm6, %v7548_v23, %v5149_v21  ;;  %v1578_v15 = vmax.f32 %v1510_v42, %v1514_v3 }
 0x34f   : > { %v7591_v6 = vsel %vm5038_vm5, %v3792_v20, %v5141_v46  ;;  %v4674_v0 = vmax.f32 %v4672_v14, %v4673_v31  ;;  %v4686_v2 = vmax.f32 %v4684_v40, %v4685_v8  ;;  %v4693_v17 = vmax.f32 %v4691_v37, %v4692_v58 }
 0x350   : > { %v4681_v24 = vmax.f32 %v4679_v41, %v4680_v45  ;;  %v2170_v4 = vcombine.high %v1546_v49, %v1546_v49  ;;  %v2177_v47 = vrot.slane %v1546_v49, %v6007_v29  ;;  %v2714_v13 = vcombine.high %v1578_v15, %v1578_v15 }
 0x351   : > { %v4687_v1 = vrot.slane %v4686_v2, 1  ;;  %v4694_v36 = vrot.slane %v4693_v17, 1  ;;  %v2721_v23 = vrot.slane %v1578_v15, %v6007_v29  ;;  %v7597_v51 = vsel %vm5040_vm6, %v7556_v12, %v5261_v32 }
 0x352   : > { %v5253_v10 = vsel %vm5036_vm4, %v4681_v24, %v4674_v0  ;;  %v2184_v42 = vrot.slane %v2170_v4, %v6007_v29  ;;  %v2185_v3 = vcombine.high %v2177_v47, %v2177_v47  ;;  %v3856_v21 = vsel %vm2987_vm3, %v2177_v47, -inf }
 0x353   : > { %v4688_v16 = vmax.f32 %v4686_v2, %v4687_v1  ;;  %v7602_v19 = vmax.f32 %v4693_v17, %v4694_v36  ;;  %v3857_v22 = vrot.slane %v3856_v21, 4  ;;  %v2728_v7 = vrot.slane %v2714_v13, %v6007_v29 }
 0x354   : > { %v2186_v50 = vcombine.high %v2184_v42, %v2184_v42  ;;  %v3863_v62 = vsel %vm2987_vm3, %v2185_v3, -inf  ;;  %v3870_v34 = vsel %vm2987_vm3, %v2184_v42, -inf  ;;  %v2729_v12 = vcombine.high %v2721_v23, %v2721_v23 }
 0x355   : > { %v7608_v32 = vsel %vm5038_vm5, %v4688_v16, %v5253_v10  ;;  %v3858_v57 = vmax.f32 %v3856_v21, %v3857_v22  ;;  %v3864_v60 = vrot.slane %v3863_v62, 4  ;;  %v3871_v44 = vrot.slane %v3870_v34, 4 }
 0x356   : > { %v3877_v26 = vsel %vm2987_vm3, %v2186_v50, -inf  ;;  %v2730_v35 = vcombine.high %v2728_v7, %v2728_v7  ;;  %v4752_v33 = vsel %vm2987_vm3, %v2721_v23, -inf  ;;  %v4759_v39 = vsel %vm2987_vm3, %v2729_v12, -inf }
 0x357   : > { %v3859_v38 = vrot.slane %v3858_v57, 2  ;;  %v3865_v43 = vmax.f32 %v3863_v62, %v3864_v60  ;;  %v3872_v48 = vmax.f32 %v3870_v34, %v3871_v44  ;;  %v3878_v59 = vrot.slane %v3877_v26, 4 }
 0x358   : > { %v4753_v53 = vrot.slane %v4752_v33, 4  ;;  %v4760_v56 = vrot.slane %v4759_v39, 4  ;;  %v4766_v63 = vsel %vm2987_vm3, %v2728_v7, -inf  ;;  %v4773_v54 = vsel %vm2987_vm3, %v2730_v35, -inf }
 0x359   : > { %v3860_v14 = vmax.f32 %v3858_v57, %v3859_v38  ;;  %v3866_v40 = vrot.slane %v3865_v43, 2  ;;  %v3873_v37 = vrot.slane %v3872_v48, 2  ;;  %v3879_v27 = vmax.f32 %v3877_v26, %v3878_v59 }
 0x35a   : > { %v4754_v20 = vmax.f32 %v4752_v33, %v4753_v53  ;;  %v4761_v41 = vmax.f32 %v4759_v39, %v4760_v56  ;;  %v4767_v31 = vrot.slane %v4766_v63, 4  ;;  %v4774_v8 = vrot.slane %v4773_v54, 4 }
 0x35b   : > { %v3861_v58 = vrot.slane %v3860_v14, 1  ;;  %v3867_v49 = vmax.f32 %v3865_v43, %v3866_v40  ;;  %v3874_v46 = vmax.f32 %v3872_v48, %v3873_v37  ;;  %v3880_v45 = vrot.slane %v3879_v27, 2 }
 0x35c   : > { %v4755_v15 = vrot.slane %v4754_v20, 2  ;;  %v4762_v0 = vrot.slane %v4761_v41, 2  ;;  %v4768_v2 = vmax.f32 %v4766_v63, %v4767_v31  ;;  %v4775_v17 = vmax.f32 %v4773_v54, %v4774_v8 }
 0x35d   : > { %v3862_v24 = vmax.f32 %v3860_v14, %v3861_v58  ;;  %v3868_v4 = vrot.slane %v3867_v49, 1  ;;  %v3875_v47 = vrot.slane %v3874_v46, 1  ;;  %v3881_v13 = vmax.f32 %v3879_v27, %v3880_v45 }
 0x35e   : > { %v4756_v1 = vmax.f32 %v4754_v20, %v4755_v15  ;;  %v4763_v36 = vmax.f32 %v4761_v41, %v4762_v0  ;;  %v4769_v23 = vrot.slane %v4768_v2, 2  ;;  %v4776_v10 = vrot.slane %v4775_v17, 2 }
 0x35f   : > { %v3869_v42 = vmax.f32 %v3867_v49, %v3868_v4  ;;  %v3876_v3 = vmax.f32 %v3874_v46, %v3875_v47  ;;  %v3882_v21 = vrot.slane %v3881_v13, 1  ;;  %v5151_v16 = vsel %vm5042_vm7, %v3862_v24, %v7584_v28 }
 0x360   : > { %v4757_v22 = vrot.slane %v4756_v1, 1  ;;  %v4764_v7 = vrot.slane %v4763_v36, 1  ;;  %v4770_v50 = vmax.f32 %v4768_v2, %v4769_v23  ;;  %v4777_v62 = vmax.f32 %v4775_v17, %v4776_v10 }
 0x361   : > { %v3883_v34 = vmax.f32 %v3881_v13, %v3882_v21  ;;  %v5152_v12 = vsel %vm5044_vm8, %v3869_v42, %v5151_v16  ;;  %v1544_v57 = vmax.f32 %v1444_v25, %v1448_v61  ;;  %v7625_v60 = vsel %vm5040_vm6, %v7575_v52, %v7591_v6 }
 0x362   : > { %v5153_v28 = vsel %vm5046_vm9, %v3876_v3, %v5152_v12  ;;  %v4758_v44 = vmax.f32 %v4756_v1, %v4757_v22  ;;  %v4765_v26 = vmax.f32 %v4763_v36, %v4764_v7  ;;  %v4771_v35 = vrot.slane %v4770_v50, 1 }
 0x363   : > { %v5154_v33 = vsel %vm5048_vm10, %v3883_v34, %v5153_v28  ;;  %v4778_v39 = vrot.slane %v4777_v62, 1  ;;  %v2136_v38 = vcombine.high %v1544_v57, %v1544_v57  ;;  %v2143_v43 = vrot.slane %v1544_v57, %v6007_v29 }
 0x364   : > { %5314 = vst [vmem:[%s6117_s27 + $0x78] sm:$0xff] %v5154_v33  ;;  %v4772_v18 = vmax.f32 %v4770_v50, %v4771_v35  ;;  %v5263_v9 = vsel %vm5042_vm7, %v4758_v44, %v7597_v51  ;;  %v1576_v25 = vmax.f32 %v1508_v30, %v1512_v5  ;;  %v7640_v61 = vsel %vm5040_vm6, %v7602_v19, %v7608_v32 }
 0x365   : > { %v4779_v52 = vmax.f32 %v4777_v62, %v4778_v39  ;;  %v5264_v6 = vsel %vm5044_vm8, %v4765_v26, %v5263_v9  ;;  %v2150_v48 = vrot.slane %v2136_v38, %v6007_v29  ;;  %v2151_v59 = vcombine.high %v2143_v43, %v2143_v43 }
 0x366   : > { %v5265_v53 = vsel %vm5046_vm9, %v4772_v18, %v5264_v6  ;;  %v3800_v51 = vsel %vm2987_vm3, %v2143_v43, -inf  ;;  %v2680_v56 = vcombine.high %v1576_v25, %v1576_v25  ;;  %v2687_v55 = vrot.slane %v1576_v25, %v6007_v29 }
 0x367   : > { %v5266_v11 = vsel %vm5048_vm10, %v4779_v52, %v5265_v53  ;;  %v2152_v30 = vcombine.high %v2150_v48, %v2150_v48  ;;  %v3801_v5 = vrot.slane %v3800_v51, 4  ;;  %v3807_v19 = vsel %vm2987_vm3, %v2151_v59, -inf }
 0x368   : > { %5330 = vst [vmem:[%s6117_s27 + $0xf8] sm:$0xff] %v5266_v11  ;;  %v3808_v32 = vrot.slane %v3807_v19, 4  ;;  %v3814_v63 = vsel %vm2987_vm3, %v2150_v48, -inf  ;;  %v2694_v54 = vrot.slane %v2680_v56, %v6007_v29  ;;  %v2695_v14 = vcombine.high %v2687_v55, %v2687_v55 }
 0x369   : > { %v3802_v40 = vmax.f32 %v3800_v51, %v3801_v5  ;;  %v3815_v37 = vrot.slane %v3814_v63, 4  ;;  %v3821_v27 = vsel %vm2987_vm3, %v2152_v30, -inf  ;;  %v4696_v20 = vsel %vm2987_vm3, %v2687_v55, -inf }
 0x36a   : > { %v3809_v41 = vmax.f32 %v3807_v19, %v3808_v32  ;;  %v3822_v31 = vrot.slane %v3821_v27, 4  ;;  %v2696_v8 = vcombine.high %v2694_v54, %v2694_v54  ;;  %v4697_v58 = vrot.slane %v4696_v20, 4 }
 0x36b   : > { %v3803_v49 = vrot.slane %v3802_v40, 2  ;;  %v3816_v46 = vmax.f32 %v3814_v63, %v3815_v37  ;;  %v4703_v45 = vsel %vm2987_vm3, %v2695_v14, -inf  ;;  %v4710_v15 = vsel %vm2987_vm3, %v2694_v54, -inf }
 0x36c   : > { %v3810_v0 = vrot.slane %v3809_v41, 2  ;;  %v3823_v2 = vmax.f32 %v3821_v27, %v3822_v31  ;;  %v4698_v29 = vmax.f32 %v4696_v20, %v4697_v58  ;;  %v4704_v17 = vrot.slane %v4703_v45, 4 }
 0x36d   : > { %v3804_v24 = vmax.f32 %v3802_v40, %v3803_v49  ;;  %v3817_v4 = vrot.slane %v3816_v46, 2  ;;  %v4711_v47 = vrot.slane %v4710_v15, 4  ;;  %v4717_v13 = vsel %vm2987_vm3, %v2696_v8, -inf }
 0x36e   : > { %v3811_v1 = vmax.f32 %v3809_v41, %v3810_v0  ;;  %v3824_v36 = vrot.slane %v3823_v2, 2  ;;  %v4699_v23 = vrot.slane %v4698_v29, 2  ;;  %v4705_v10 = vmax.f32 %v4703_v45, %v4704_v17 }
 0x36f   : > { %v3805_v42 = vrot.slane %v3804_v24, 1  ;;  %v3818_v3 = vmax.f32 %v3816_v46, %v3817_v4  ;;  %v4712_v21 = vmax.f32 %v4710_v15, %v4711_v47  ;;  %v4718_v16 = vrot.slane %v4717_v13, 4 }
 0x370   : > { %v3812_v22 = vrot.slane %v3811_v1, 1  ;;  %v3825_v7 = vmax.f32 %v3823_v2, %v3824_v36  ;;  %v4700_v50 = vmax.f32 %v4698_v29, %v4699_v23  ;;  %v4706_v62 = vrot.slane %v4705_v10, 2 }
 0x371   : > { %v3806_v34 = vmax.f32 %v3804_v24, %v3805_v42  ;;  %v3819_v12 = vrot.slane %v3818_v3, 1  ;;  %v4713_v57 = vrot.slane %v4712_v21, 2  ;;  %v4719_v28 = vmax.f32 %v4717_v13, %v4718_v16 }
 0x372   : > { %v3813_v44 = vmax.f32 %v3811_v1, %v3812_v22  ;;  %v3826_v26 = vrot.slane %v3825_v7, 1  ;;  %v4701_v35 = vrot.slane %v4700_v50, 1  ;;  %v4707_v33 = vmax.f32 %v4705_v10, %v4706_v62 }
 0x373   : > { %v3820_v39 = vmax.f32 %v3818_v3, %v3819_v12  ;;  %v5144_v38 = vsel %vm5042_vm7, %v3806_v34, %v7625_v60  ;;  %v4714_v43 = vmax.f32 %v4712_v21, %v4713_v57  ;;  %v4720_v18 = vrot.slane %v4719_v28, 2 }
 0x374   : > { %v3827_v9 = vmax.f32 %v3825_v7, %v3826_v26  ;;  %v5145_v25 = vsel %vm5044_vm8, %v3813_v44, %v5144_v38  ;;  %v4702_v52 = vmax.f32 %v4700_v50, %v4701_v35  ;;  %v4708_v6 = vrot.slane %v4707_v33, 1 }
 0x375   : > { %v5146_v48 = vsel %vm5046_vm9, %v3820_v39, %v5145_v25  ;;  %v4715_v59 = vrot.slane %v4714_v43, 1  ;;  %v4721_v53 = vmax.f32 %v4719_v28, %v4720_v18 }
 0x376   : > { %v5147_v51 = vsel %vm5048_vm10, %v3827_v9, %v5146_v48  ;;  %v4709_v56 = vmax.f32 %v4707_v33, %v4708_v6  ;;  %v5256_v55 = vsel %vm5042_vm7, %v4702_v52, %v7640_v61 }
 0x377   : > { %5313 = vst [vmem:[%s6117_s27 + $0x70] sm:$0xff] %v5147_v51  ;;  %v4716_v60 = vmax.f32 %v4714_v43, %v4715_v59  ;;  %v4722_v11 = vrot.slane %v4721_v53, 1 }
 0x378   : > { %v5257_v30 = vsel %vm5044_vm8, %v4709_v56, %v5256_v55 }
 0x379   : > { %v4723_v5 = vmax.f32 %v4721_v53, %v4722_v11  ;;  %v5258_v19 = vsel %vm5046_vm9, %v4716_v60, %v5257_v30 }
 0x37b   : > { %v5259_v32 = vsel %vm5048_vm10, %v4723_v5, %v5258_v19 }
 0x37c   : > { %5329 = vst [vmem:[%s6117_s27 + $0xf0] sm:$0xff] %v5259_v32 }
 0x37d PF: > { %s13_s12 = sadd.s32 1, %s5817_s12  }
 0x37e   : > { %p10_p4 = scmp.ge.s32.totalorder %s13_s12, 4  }
 0x380   :  { %12 = sbr.rel (!%p10_p4) target bundleno = 1 (0x1), region = 62 }

// kernel: simple_cnn_forward.4
= control target key start
LH: loop header
LB: loop body
LE: loop exit
PB: predicated region body
PF: predicated region fallthrough
CT: control target
= control target key end

     0   :  { %s2443_s12 = smov 0   ;;  %s2937_s0 = inlined_call_operand.vmem [shape: bf16[2,16,16,288], index: 0, kind: input, shape index: {}]   ;;  %s2938_s1 = inlined_call_operand.vmem [shape: bf16[288,128], index: 1, kind: input, shape index: {}]   ;;  %s2939_s2 = inlined_call_operand.vmem [shape: f32[1,128], index: 2, kind: input, shape index: {}]   ;;  %s2940_s3 = inlined_call_operand.vmem [shape: f32[2,8,8,128], index: 3, kind: output, shape index: {}]  }
   0x1 LB: > { %s2045_s13 = sadd.s32 4294967295, %s2420_s12   ;;  %p2049_p0 = scmp.ge.s32.totalorder %s2420_s12, 1  ;;  %s2420_s12 = sphi %s2443_s12, %s13_s12  }
   0x2   : > { %p137_p1 = scmp.lt.s32.totalorder %s2420_s12, 3 }
   0x4   : > { %p138_p2 = pnand %p2049_p0, %p137_p1 }
   0x5   : > { %p161_p3 = scmp.lt.s32.totalorder (!%p138_p2), %s2045_s13, 1 }
   0x6   : > { %141 = sbr.rel (%p138_p2) target bundleno = 454 (0x1c6), region = 32 }
   0xb   : > { %v2331_v0 = vld [vmem:[%s2938_s1 + $0x78] sm:$0xff]   ;;  %v2333_v2 = vld [vmem:[%s2938_s1 + $0x70] sm:$0xff]   ;;  %v2335_v4 = vld [vmem:[%s2938_s1 + $0x68] sm:$0xff]   ;;  %s2942_s13 = smov (!%p161_p3, %s2045_s13), 1  ;;  %vm627_vm0 = vcmask 261120   ;;  %vm1398_vm1 = vcmask 1041408  }
   0xc   : > { %v2332_v1 = vld [vmem:[%s2938_s1 + $0x38] sm:$0xff]   ;;  %2139 = vmatprep.subr.bf16.mxu0 %v2331_v0  ;;  %2305 = vmatprep.subr.bf16.mxu1 %v2331_v0  ;;  %v2334_v3 = vld [vmem:[%s2938_s1 + $0x30] sm:$0xff]   ;;  %v2336_v5 = vld [vmem:[%s2938_s1 + $0x28] sm:$0xff]   ;;  %s2321_s28 = smul.u32 384, %s2942_s13  ;;  %vm1911_vm2 = vcmask 1041409   ;;  %vm1913_vm3 = vcmask 1042434  }
   0xd   : > { %2140 = vmatpush3.bf16.msra.mxu0 %v2332_v1  ;;  %2313 = vmatpush3.bf16.msra.mxu1 %v2332_v1  ;;  %v2337_v6 = vld [vmem:[%s2938_s1 + $0x60] sm:$0xff]   ;;  %v2339_v8 = vld [vmem:[%s2938_s1 + $0x58] sm:$0xff]   ;;  %v2341_v10 = vld [vmem:[%s2938_s1 + $0x50] sm:$0xff]   ;;  %vm1915_vm4 = vcmask 1043459   ;;  %vm1917_vm5 = vcmask 1044484   ;;  %vm1919_vm6 = vcmask 1045509  }
   0xe   : > { %2141 = vmatprep.subr.bf16.mxu0 %v2333_v2  ;;  %2306 = vmatprep.subr.bf16.mxu1 %v2333_v2  ;;  %v2338_v7 = vld [vmem:[%s2938_s1 + $0x20] sm:$0xff]   ;;  %s2484_s8 = scalar_lea.vmem %s2937_s0, %s2321_s28  ;;  %v2340_v9 = vld [vmem:[%s2938_s1 + $0x18] sm:$0xff]   ;;  %v2342_v13 = vld [vmem:[%s2938_s1 + $0x10] sm:$0xff]   ;;  %vm1921_vm7 = vcmask 1046534   ;;  %vm1923_vm8 = vcmask 1047559   ;;  %s2138_s4 = sshll.u32 %s2942_s13, 6 }
   0xf   : > { %v2349_v11 = vld [vmem:[%s2484_s8 + $0x4] ss:$12 sps:$4 sm:$0xff]   ;;  %v2343_v14 = vld [vmem:[%s2938_s1 + $0x48] sm:$0xff]   ;;  %v2360_v26 = vld [vmem:[%s2484_s8 + $0x34] ss:$12 sps:$4 sm:$0xff]   ;;  %s2663_s6 = scalar_lea.vmem %s2940_s3, %s2138_s4 }
  0x10   : > { %v2352_v12 = vld [vmem:[%s2484_s8 + $0x124] ss:$12 sps:$4 sm:$0xff]   ;;  %708 = vmatprep.mubr.bf16.mxu0 %v2349_v11  ;;  %v2344_v15 = vld [vmem:[%s2938_s1 + $0x8] sm:$0xff]   ;;  %v2362_v27 = vld [vmem:[%s2484_s8 + $0x154] ss:$12 sps:$4 sm:$0xff]  }
  0x11   : > { %2142 = vmatpush3.bf16.msra.mxu0 %v2334_v3  ;;  %2314 = vmatpush3.bf16.msra.mxu1 %v2334_v3  ;;  %v2345_v16 = vld [vmem:[%s2938_s1 + $0x40] sm:$0xff]   ;;  %v2353_v18 = vld [vmem:[%s2938_s1 + $0x88] sm:$0xff]   ;;  %v2364_v28 = vld [vmem:[%s2484_s8 + $0x30] ss:$12 sps:$4 sm:$0xff]  }
  0x12   : > { %2143 = vmatprep.subr.bf16.mxu0 %v2335_v4  ;;  %2307 = vmatprep.subr.bf16.mxu1 %v2335_v4  ;;  %v2346_v17 = vld [vmem:[%s2938_s1] sm:$0xff]   ;;  %v2354_v21 = vld [vmem:[%s2484_s8 + $0x1c] ss:$12 sps:$4 sm:$0xff]   ;;  %v2367_v30 = vld [vmem:[%s2484_s8 + $0x4c] ss:$12 sps:$4 sm:$0xff]  }
  0x13   : > { %804 = vmatprep.mubr.bf16.mxu1 %v2352_v12  ;;  %v2347_v19 = vld [vmem:[%s2484_s8] ss:$12 sps:$4 sm:$0xff]   ;;  %v2356_v22 = vld [vmem:[%s2484_s8 + $0x13c] ss:$12 sps:$4 sm:$0xff]   ;;  %v2358_v24 = vld [vmem:[%s2484_s8 + $0x18] ss:$12 sps:$4 sm:$0xff]  }
  0x14   : > { %v2350_v20 = vld [vmem:[%s2484_s8 + $0x120] ss:$12 sps:$4 sm:$0xff]   ;;  %v2359_v25 = vld [vmem:[%s2484_s8 + $0x138] ss:$12 sps:$4 sm:$0xff]   ;;  %v2365_v29 = vld [vmem:[%s2484_s8 + $0x150] ss:$12 sps:$4 sm:$0xff]  }
  0x15   : > { %2144 = vmatpush3.bf16.msra.mxu0 %v2336_v5  ;;  %2315 = vmatpush3.bf16.msra.mxu1 %v2336_v5  ;;  %v2366_v23 = vld [vmem:[%s2938_s1 + $0x80] sm:$0xff]   ;;  %v2369_v31 = vld [vmem:[%s2484_s8 + $0x16c] ss:$12 sps:$4 sm:$0xff]   ;;  %v2371_v32 = vld [vmem:[%s2484_s8 + $0x48] ss:$12 sps:$4 sm:$0xff]  }
  0x16   : > { %2145 = vmatprep.subr.bf16.mxu0 %v2337_v6  ;;  %2308 = vmatprep.subr.bf16.mxu1 %v2337_v6  ;;  %v2372_v33 = vld [vmem:[%s2484_s8 + $0x168] ss:$12 sps:$4 sm:$0xff]   ;;  %v2373_v34 = vld [vmem:[%s2484_s8 + $0x64] ss:$12 sps:$4 sm:$0xff]   ;;  %v2376_v36 = vld [vmem:[%s2484_s8 + $0x60] ss:$12 sps:$4 sm:$0xff]  }
  0x17   : > { %v2375_v35 = vld [vmem:[%s2484_s8 + $0x8] ss:$12 sps:$4 sm:$0xff]   ;;  %v2377_v37 = vld [vmem:[%s2484_s8 + $0x20] ss:$12 sps:$4 sm:$0xff]   ;;  %v2380_v39 = vld [vmem:[%s2484_s8 + $0x38] ss:$12 sps:$4 sm:$0xff]  }
  0x18   : > { %v2378_v38 = vld [vmem:[%s2484_s8 + $0x7c] ss:$12 sps:$4 sm:$0xff]   ;;  %v2381_v40 = vld [vmem:[%s2484_s8 + $0x78] ss:$12 sps:$4 sm:$0xff]   ;;  %v2383_v42 = vld [vmem:[%s2484_s8 + $0x94] ss:$12 sps:$4 sm:$0xff]  }
  0x19   : > { %2146 = vmatpush3.bf16.msra.mxu0 %v2338_v7  ;;  %2316 = vmatpush3.bf16.msra.mxu1 %v2338_v7  ;;  %v2382_v41 = vld [vmem:[%s2484_s8 + $0x50] ss:$12 sps:$4 sm:$0xff]   ;;  %v2385_v43 = vld [vmem:[%s2484_s8 + $0x68] ss:$12 sps:$4 sm:$0xff]   ;;  %v2387_v45 = vld [vmem:[%s2484_s8 + $0x80] ss:$12 sps:$4 sm:$0xff]  }
  0x1a   : > { %2147 = vmatprep.subr.bf16.mxu0 %v2339_v8  ;;  %2309 = vmatprep.subr.bf16.mxu1 %v2339_v8  ;;  %v2386_v44 = vld [vmem:[%s2484_s8 + $0x90] ss:$12 sps:$4 sm:$0xff]   ;;  %v2388_v46 = vld [vmem:[%s2484_s8 + $0xac] ss:$12 sps:$4 sm:$0xff]   ;;  %v2391_v48 = vld [vmem:[%s2484_s8 + $0xa8] ss:$12 sps:$4 sm:$0xff]  }
  0x1b   : > { %v2390_v47 = vld [vmem:[%s2484_s8 + $0x98] ss:$12 sps:$4 sm:$0xff]   ;;  %v2392_v49 = vld [vmem:[%s2484_s8 + $0xb0] ss:$12 sps:$4 sm:$0xff]   ;;  %v2395_v51 = vld [vmem:[%s2484_s8 + $0xc8] ss:$12 sps:$4 sm:$0xff]  }
  0x1c   : > { %v2393_v50 = vld [vmem:[%s2484_s8 + $0xc4] ss:$12 sps:$4 sm:$0xff]   ;;  %v2396_v52 = vld [vmem:[%s2484_s8 + $0xc0] ss:$12 sps:$4 sm:$0xff]   ;;  %v2398_v54 = vld [vmem:[%s2484_s8 + $0xdc] ss:$12 sps:$4 sm:$0xff]  }
  0x1d   : > { %2148 = vmatpush3.bf16.msra.mxu0 %v2340_v9  ;;  %2317 = vmatpush3.bf16.msra.mxu1 %v2340_v9  ;;  %v2397_v53 = vld [vmem:[%s2484_s8 + $0xe0] ss:$12 sps:$4 sm:$0xff]   ;;  %v2400_v55 = vld [vmem:[%s2484_s8 + $0xf8] ss:$12 sps:$4 sm:$0xff]   ;;  %v2402_v57 = vld [vmem:[%s2484_s8 + $0x110] ss:$12 sps:$4 sm:$0xff]  }
  0x1e   : > { %2149 = vmatprep.subr.bf16.mxu0 %v2341_v10  ;;  %2310 = vmatprep.subr.bf16.mxu1 %v2341_v10  ;;  %v2401_v56 = vld [vmem:[%s2484_s8 + $0xd8] ss:$12 sps:$4 sm:$0xff]   ;;  %v2403_v58 = vld [vmem:[%s2484_s8 + $0xf4] ss:$12 sps:$4 sm:$0xff]   ;;  %v2406_v60 = vld [vmem:[%s2484_s8 + $0xf0] ss:$12 sps:$4 sm:$0xff]  }
  0x1f   : > { %v2405_v59 = vld [vmem:[%s2484_s8 + $0x128] ss:$12 sps:$4 sm:$0xff]   ;;  %v2407_v61 = vld [vmem:[%s2484_s8 + $0x140] ss:$12 sps:$4 sm:$0xff]   ;;  %v2410_v63 = vld [vmem:[%s2484_s8 + $0x158] ss:$12 sps:$4 sm:$0xff]  }
  0x20   : > { %v2408_v62 = vld [vmem:[%s2484_s8 + $0x10c] ss:$12 sps:$4 sm:$0xff]   ;;  %v2411_v0 = vld [vmem:[%s2484_s8 + $0x108] ss:$12 sps:$4 sm:$0xff]   ;;  %v2412_v1 = vld [vmem:[%s2484_s8 + $0x170] ss:$12 sps:$4 sm:$0xff]  }
  0x21   : > { %2150 = vmatpush3.bf16.msra.mxu0 %v2342_v13  ;;  %2318 = vmatpush3.bf16.msra.mxu1 %v2342_v13 }
  0x22   : > { %2151 = vmatprep.subr.bf16.mxu0 %v2343_v14  ;;  %2311 = vmatprep.subr.bf16.mxu1 %v2343_v14 }
  0x25   : > { %2152 = vmatpush3.bf16.msra.mxu0 %v2344_v15  ;;  %2319 = vmatpush3.bf16.msra.mxu1 %v2344_v15 }
  0x26   : > { %2153 = vmatprep.subr.bf16.mxu0 %v2345_v16  ;;  %2312 = vmatprep.subr.bf16.mxu1 %v2345_v16 }
  0x29   : > { %2154 = vmatpush3.bf16.msra.mxu0 %v2346_v17  ;;  %2320 = vmatpush3.bf16.msra.mxu1 %v2346_v17 }
  0x2a   : > { %2269 = vmatprep.subr.bf16.mxu1 %v2353_v18 }
  0x2c   : > { %709 = vmatmul.mubr.bf16.vlgmr.msra.gmra.mxu0 %v2347_v19  ;;  %805 = vmatmul.mubr.bf16.vlgmr.msra.gmra.mxu1 %v2350_v20 }
  0x2d   : > { %2270 = vmatpush3.bf16.msra.mxu1 %v2353_v18  ;;  %716 = vmatprep.mubr.bf16.mxu0 %v2354_v21 }
  0x2e   : > { %812 = vmatprep.mubr.bf16.mxu1 %v2356_v22  ;;  %2271 = vmatprep.subr.bf16.mxu1 %v2366_v23 }
  0x31   : > { %2272 = vmatpush3.bf16.msra.mxu1 %v2366_v23 }
  0x34   : > { %717 = vmatmul.mubr.bf16.gmra.mxu0 %v2358_v24  ;;  %813 = vmatmul.mubr.bf16.gmra.mxu1 %v2359_v25 }
  0x35   : > { %724 = vmatprep.mubr.bf16.mxu0 %v2360_v26  ;;  %820 = vmatprep.mubr.bf16.mxu1 %v2362_v27 }
  0x3c   : > { %725 = vmatmul.mubr.bf16.gmra.mxu0 %v2364_v28  ;;  %821 = vmatmul.mubr.bf16.gmra.mxu1 %v2365_v29 }
  0x3d   : > { %732 = vmatprep.mubr.bf16.mxu0 %v2367_v30  ;;  %828 = vmatprep.mubr.bf16.mxu1 %v2369_v31 }
  0x44   : > { %733 = vmatmul.mubr.bf16.gmra.mxu0 %v2371_v32  ;;  %829 = vmatmul.mubr.bf16.gmra.mxu1 %v2372_v33 }
  0x45   : > { %740 = vmatprep.mubr.bf16.mxu0 %v2373_v34  ;;  %2273 = vmatprep.mubr.msk.bf16.mxu1 %vm627_vm0, %v2375_v35 }
  0x4c   : > { %741 = vmatmul.mubr.bf16.gmra.mxu0 %v2376_v36  ;;  %2274 = vmatmul.mubr.msk.bf16.vlgmr.msra.gmra.mxu1 %vm627_vm0, %v2377_v37 }
  0x4d   : > { %748 = vmatprep.mubr.bf16.mxu0 %v2378_v38  ;;  %2277 = vmatprep.mubr.msk.bf16.mxu1 %vm627_vm0, %v2380_v39 }
  0x54   : > { %749 = vmatmul.mubr.bf16.gmra.mxu0 %v2381_v40  ;;  %2278 = vmatmul.mubr.msk.bf16.gmra.mxu1 %vm627_vm0, %v2382_v41  ;;  %v2422_v40 = vmov 1983009808  }
  0x55   : > { %756 = vmatprep.mubr.bf16.mxu0 %v2383_v42  ;;  %2281 = vmatprep.mubr.msk.bf16.mxu1 %vm627_vm0, %v2385_v43  ;;  %v1064_v41 = vunpack.c.l.s4 %v2422_v40  ;;  %v1066_v42 = vlaneseq }
  0x5c   : > { %757 = vmatmul.mubr.bf16.gmra.mxu0 %v2386_v44  ;;  %2282 = vmatmul.mubr.msk.bf16.gmra.mxu1 %vm627_vm0, %v2387_v45 }
  0x5d   : > { %764 = vmatprep.mubr.bf16.mxu0 %v2388_v46  ;;  %2285 = vmatprep.mubr.msk.bf16.mxu1 %vm627_vm0, %v2390_v47  ;;  %v2594_v46 = vld [vmem:[%s2939_s2] ss:$0 sm:$0xff] }
  0x64   : > { %765 = vmatmul.mubr.bf16.gmra.mxu0 %v2391_v48  ;;  %2286 = vmatmul.mubr.msk.bf16.gmra.mxu1 %vm627_vm0, %v2392_v49 }
  0x65   : > { %772 = vmatprep.mubr.bf16.mxu0 %v2393_v50  ;;  %2289 = vmatprep.mubr.msk.bf16.mxu1 %vm627_vm0, %v2395_v51 }
  0x6c   : > { %773 = vmatmul.mubr.bf16.gmra.mxu0 %v2396_v52  ;;  %2290 = vmatmul.mubr.msk.bf16.gmra.mxu1 %vm627_vm0, %v2397_v53  ;;  %v1065_v52 = vunpack.c.0.s8 %v1064_v41  ;;  %v1067_v53 = vshrl.u32 %v1066_v42, 7 }
  0x6d   : > { %780 = vmatprep.mubr.bf16.mxu0 %v2398_v54  ;;  %2293 = vmatprep.mubr.msk.bf16.mxu1 %vm627_vm0, %v2400_v55 }
  0x74   : > { %781 = vmatmul.mubr.bf16.gmra.mxu0 %v2401_v56  ;;  %2294 = vmatmul.mubr.msk.bf16.gmra.mxu1 %vm627_vm0, %v2402_v57 }
  0x75   : > { %788 = vmatprep.mubr.bf16.mxu0 %v2403_v58  ;;  %2297 = vmatprep.mubr.msk.bf16.mxu1 %vm627_vm0, %v2405_v59 }
  0x7c   : > { %789 = vmatmul.mubr.bf16.gmra.mxu0 %v2406_v60  ;;  %2298 = vmatmul.mubr.msk.bf16.gmra.mxu1 %vm627_vm0, %v2407_v61 }
  0x7d   : > { %796 = vmatprep.mubr.bf16.mxu0 %v2408_v62  ;;  %2301 = vmatprep.mubr.msk.bf16.mxu1 %vm627_vm0, %v2410_v63  ;;  %v2601_v63 = vsub.s32 %v1065_v52, %v1067_v53 }
  0x84   : > { %797 = vmatmul.mubr.bf16.gmra.mxu0 %v2411_v0  ;;  %2302 = vmatmul.mubr.msk.bf16.gmra.mxu1 %vm627_vm0, %v2412_v1 }
  0xec   : > { %v2155_v2 = vpop.f32.mrf.mxu0  ;;  %v2227_v3 = vpop.f32.mrf.mxu1 }
  0xee   : > { %v2156_v4 = vpop.f32.mrf.mxu0  ;;  %v2228_v5 = vpop.f32.mrf.mxu1 }
  0xef   : > { %v2577_v6 = vadd.f32 %v2228_v5, %v2227_v3  ;;  %v2157_v43 = vadd.f32 %v2156_v4, %v2155_v2 }
  0xf0   : > { %v2158_v7 = vpop.f32.mrf.mxu0  ;;  %v2230_v8 = vpop.f32.mrf.mxu1 }
  0xf1   : > { %v711_v56 = vadd.f32 %v2157_v43, %v2594_v46 }
  0xf2   : > { %v2159_v9 = vpop.f32.mrf.mxu0  ;;  %v2231_v10 = vpop.f32.mrf.mxu1 }
  0xf3   : > { %v2579_v11 = vadd.f32 %v2231_v10, %v2230_v8  ;;  %v2160_v54 = vadd.f32 %v2159_v9, %v2158_v7 }
  0xf4   : > { %v2161_v12 = vpop.f32.mrf.mxu0  ;;  %v2233_v13 = vpop.f32.mrf.mxu1 }
  0xf5   : > { %v714_v5 = vadd.f32 %v2160_v54, %v2594_v46 }
  0xf6   : > { %v2162_v14 = vpop.f32.mrf.mxu0  ;;  %v2234_v15 = vpop.f32.mrf.mxu1 }
  0xf7   : > { %v2581_v16 = vadd.f32 %v2234_v15, %v2233_v13  ;;  %v2163_v36 = vadd.f32 %v2162_v14, %v2161_v12  ;;  %v2606_v13 = vadd.f32 %v2577_v6, %v2594_v46 }
  0xf8   : > { %v2164_v17 = vpop.f32.mrf.mxu0  ;;  %v2236_v18 = vpop.f32.mrf.mxu1 }
  0xf9   : > { %v719_v49 = vadd.f32 %v2163_v36, %v2594_v46 }
  0xfa   : > { %v2165_v19 = vpop.f32.mrf.mxu0  ;;  %v2237_v20 = vpop.f32.mrf.mxu1 }
  0xfb   : > { %v2583_v21 = vadd.f32 %v2237_v20, %v2236_v18  ;;  %v2166_v47 = vadd.f32 %v2165_v19, %v2164_v17 }
  0xfc   : > { %v2167_v22 = vpop.f32.mrf.mxu0  ;;  %v2239_v23 = vpop.f32.mrf.mxu1 }
  0xfd   : > { %v722_v61 = vadd.f32 %v2166_v47, %v2594_v46 }
  0xfe   : > { %v2168_v24 = vpop.f32.mrf.mxu0  ;;  %v2240_v25 = vpop.f32.mrf.mxu1 }
  0xff   : > { %v2585_v26 = vadd.f32 %v2240_v25, %v2239_v23  ;;  %v2169_v62 = vadd.f32 %v2168_v24, %v2167_v22  ;;  %v2612_v24 = vadd.f32 %v2581_v16, %v2594_v46  ;;  %v2616_v25 = vadd.f32 %v2579_v11, %v2594_v46 }
 0x100   : > { %v2170_v27 = vpop.f32.mrf.mxu0  ;;  %v2242_v28 = vpop.f32.mrf.mxu1 }
 0x101   : > { %v727_v23 = vadd.f32 %v2169_v62, %v2594_v46 }
 0x102   : > { %v2171_v29 = vpop.f32.mrf.mxu0  ;;  %v2243_v30 = vpop.f32.mrf.mxu1 }
 0x103   : > { %v2587_v31 = vadd.f32 %v2243_v30, %v2242_v28  ;;  %v2172_v7 = vadd.f32 %v2171_v29, %v2170_v27 }
 0x104   : > { %v2173_v32 = vpop.f32.mrf.mxu0  ;;  %v2245_v33 = vpop.f32.mrf.mxu1 }
 0x106   : > { %v2174_v34 = vpop.f32.mrf.mxu0  ;;  %v2246_v35 = vpop.f32.mrf.mxu1 }
 0x107   : > { %v2589_v37 = vadd.f32 %v2246_v35, %v2245_v33  ;;  %v2175_v59 = vadd.f32 %v2174_v34, %v2173_v32  ;;  %v2623_v34 = vadd.f32 %v2172_v7, %v2594_v46 }
 0x108   : > { %v2176_v38 = vpop.f32.mrf.mxu0  ;;  %v2248_v39 = vpop.f32.mrf.mxu1 }
 0x109   : > { %v735_v18 = vadd.f32 %v2175_v59, %v2594_v46 }
 0x10a   : > { %v2177_v44 = vpop.f32.mrf.mxu0  ;;  %v2249_v45 = vpop.f32.mrf.mxu1 }
 0x10b   : > { %v2596_v48 = vadd.f32 %v2249_v45, %v2248_v39  ;;  %v2178_v8 = vadd.f32 %v2177_v44, %v2176_v38 }
 0x10c   : > { %v2179_v50 = vpop.f32.mrf.mxu0  ;;  %v2275_v51 = vpop.f32.mrf.mxu1 }
 0x10d   : > { %v880_v55 = vadd.f32 %v2275_v51, %v719_v49  ;;  %v738_v33 = vadd.f32 %v2178_v8, %v2594_v46 }
 0x10e   : > { %v2180_v57 = vpop.f32.mrf.mxu0  ;;  %v871_v58 = vpop.f32.mrf.mxu1 }
 0x10f   : > { %v872_v60 = vadd.f32 %v871_v58, %v711_v56  ;;  %v1000_v2 = vmax.f32 %v880_v55, 0.0  ;;  %v2181_v9 = vadd.f32 %v2180_v57, %v2179_v50 }
 0x110   : > { %v2182_v0 = vpop.f32.mrf.mxu0  ;;  %v2276_v1 = vpop.f32.mrf.mxu1 }
 0x111   : > { %v998_v3 = vmax.f32 %v872_v60, 0.0  ;;  %v883_v4 = vadd.f32 %v2276_v1, %v722_v61  ;;  %v2626_v16 = vadd.f32 %v2181_v9, %v2594_v46 }
 0x112   : > { %v2183_v10 = vpop.f32.mrf.mxu0  ;;  %v874_v12 = vpop.f32.mrf.mxu1 }
 0x113   : > { %v1030_v14 = vmax.f32 %v998_v3, %v1000_v2  ;;  %v2184_v15 = vadd.f32 %v2183_v10, %v2182_v0  ;;  %v875_v17 = vadd.f32 %v874_v12, %v714_v5  ;;  %v1001_v19 = vmax.f32 %v883_v4, 0.0 }
 0x114   : > { %v2185_v20 = vpop.f32.mrf.mxu0  ;;  %v2279_v22 = vpop.f32.mrf.mxu1 }
 0x115   : > { %v1062_v6 = vcombine.high %v1030_v14, %v1030_v14  ;;  %v1069_v27 = vrot.slane %v1030_v14, %v2601_v63  ;;  %v999_v28 = vmax.f32 %v875_v17, 0.0  ;;  %v2619_v29 = vadd.f32 %v2279_v22, %v735_v18 }
 0x116   : > { %v2186_v30 = vpop.f32.mrf.mxu0  ;;  %v887_v32 = vpop.f32.mrf.mxu1  ;;  %v2629_v35 = vadd.f32 %v2184_v15, %v2594_v46 }
 0x117   : > { %v1076_v11 = vrot.slane %v1062_v6, %v2601_v63  ;;  %v1077_v36 = vcombine.high %v1069_v27, %v1069_v27  ;;  %v1399_v38 = vsel %vm1398_vm1, %v1069_v27, -inf  ;;  %v1031_v39 = vmax.f32 %v999_v28, %v1001_v19 }
 0x118   : > { %v1400_v40 = vrot.slane %v1399_v38, 4  ;;  %v1004_v41 = vmax.f32 %v2619_v29, 0.0  ;;  %v2634_v42 = vadd.f32 %v2186_v30, %v2185_v20  ;;  %v888_v43 = vadd.f32 %v887_v32, %v727_v23  ;;  %v2280_v44 = vpop.f32.mrf.mxu1  ;;  %v2647_v15 = vpop.f32.mrf.mxu0 }
 0x119   : > { %v1078_v45 = vcombine.high %v1076_v11, %v1076_v11  ;;  %v1406_v47 = vsel %vm1398_vm1, %v1077_v36, -inf  ;;  %v1413_v49 = vsel %vm1398_vm1, %v1076_v11, -inf  ;;  %v1079_v50 = vcombine.high %v1031_v39, %v1031_v39 }
 0x11a   : > { %v1401_v51 = vmax.f32 %v1399_v38, %v1400_v40  ;;  %v1407_v52 = vrot.slane %v1406_v47, 4  ;;  %v1414_v53 = vrot.slane %v1413_v49, 4  ;;  %v1086_v54 = vrot.slane %v1031_v39, %v2601_v63  ;;  %v2189_v40 = vpop.f32.mrf.mxu0 }
 0x11b   : > { %v1420_v55 = vsel %vm1398_vm1, %v1078_v45, -inf  ;;  %v1093_v56 = vrot.slane %v1079_v50, %v2601_v63  ;;  %v1002_v57 = vmax.f32 %v888_v43, 0.0  ;;  %v2641_v58 = vadd.f32 %v2280_v44, %v738_v33  ;;  %v890_v33 = vpop.f32.mrf.mxu1 }
 0x11c   : > { %v1402_v59 = vrot.slane %v1401_v51, 2  ;;  %v1408_v60 = vmax.f32 %v1406_v47, %v1407_v52  ;;  %v1415_v61 = vmax.f32 %v1413_v49, %v1414_v53  ;;  %v1421_v62 = vrot.slane %v1420_v55, 4 }
 0x11d   : > { %v1094_v0 = vcombine.high %v1086_v54, %v1086_v54  ;;  %v1095_v1 = vcombine.high %v1093_v56, %v1093_v56  ;;  %v1427_v2 = vsel %vm1398_vm1, %v1086_v54, -inf  ;;  %v1441_v3 = vsel %vm1398_vm1, %v1093_v56, -inf }
 0x11e   : > { %v1403_v4 = vmax.f32 %v1401_v51, %v1402_v59  ;;  %v1409_v5 = vrot.slane %v1408_v60, 2  ;;  %v1416_v7 = vrot.slane %v1415_v61, 2  ;;  %v1422_v8 = vmax.f32 %v1420_v55, %v1421_v62  ;;  %v2283_v59 = vpop.f32.mrf.mxu1 }
 0x11f   : > { %v1428_v9 = vrot.slane %v1427_v2, 4  ;;  %v1434_v10 = vsel %vm1398_vm1, %v1094_v0, -inf  ;;  %v1442_v12 = vrot.slane %v1441_v3, 4  ;;  %v1448_v14 = vsel %vm1398_vm1, %v1095_v1, -inf  ;;  %v2191_v1 = vpop.f32.mrf.mxu0 }
 0x120   : > { %v1404_v17 = vrot.slane %v1403_v4, 1  ;;  %v1410_v18 = vmax.f32 %v1408_v60, %v1409_v5  ;;  %v1417_v19 = vmax.f32 %v1415_v61, %v1416_v7  ;;  %v1423_v20 = vrot.slane %v1422_v8, 2 }
 0x121   : > { %v1429_v22 = vmax.f32 %v1427_v2, %v1428_v9  ;;  %v1435_v23 = vrot.slane %v1434_v10, 4  ;;  %v1443_v6 = vmax.f32 %v1441_v3, %v1442_v12  ;;  %v1449_v27 = vrot.slane %v1448_v14, 4 }
 0x122   : > { %v1405_v28 = vmax.f32 %v1403_v4, %v1404_v17  ;;  %v1411_v29 = vrot.slane %v1410_v18, 1  ;;  %v1418_v30 = vrot.slane %v1417_v19, 1  ;;  %v1424_v32 = vmax.f32 %v1422_v8, %v1423_v20  ;;  %v903_v17 = vpop.f32.mrf.mxu1 }
 0x123   : > { %v1430_v11 = vrot.slane %v1429_v22, 2  ;;  %v1436_v36 = vmax.f32 %v1434_v10, %v1435_v23  ;;  %v1444_v38 = vrot.slane %v1443_v6, 2  ;;  %v1450_v39 = vmax.f32 %v1448_v14, %v1449_v27  ;;  %v2192_v23 = vpop.f32.mrf.mxu0 }
 0x124   : > { %v1412_v43 = vmax.f32 %v1410_v18, %v1411_v29  ;;  %v1419_v44 = vmax.f32 %v1417_v19, %v1418_v30  ;;  %v1425_v45 = vrot.slane %v1424_v32, 1  ;;  %v1032_v47 = vmax.f32 %v1002_v57, %v1004_v41 }
 0x125   : > { %v1431_v49 = vmax.f32 %v1429_v22, %v1430_v11  ;;  %v1437_v50 = vrot.slane %v1436_v36, 2  ;;  %v1445_v51 = vmax.f32 %v1443_v6, %v1444_v38  ;;  %v1451_v52 = vrot.slane %v1450_v39, 2 }
 0x126   : > { %v1426_v53 = vmax.f32 %v1424_v32, %v1425_v45  ;;  %v1912_v54 = vsel %vm1911_vm2, %v1412_v43, %v1405_v28  ;;  %v1096_v55 = vcombine.high %v1032_v47, %v1032_v47  ;;  %v1103_v56 = vrot.slane %v1032_v47, %v2601_v63  ;;  %v2284_v45 = vpop.f32.mrf.mxu1 }
 0x127   : > { %v1914_v60 = vsel %vm1913_vm3, %v1419_v44, %v1912_v54  ;;  %v1432_v61 = vrot.slane %v1431_v49, 1  ;;  %v1438_v62 = vmax.f32 %v1436_v36, %v1437_v50  ;;  %v1446_v0 = vrot.slane %v1445_v51, 1 }
 0x128   : > { %v1452_v2 = vmax.f32 %v1450_v39, %v1451_v52  ;;  %v1916_v41 = vsel %vm1915_vm4, %v1426_v53, %v1914_v60  ;;  %v1110_v57 = vrot.slane %v1096_v55, %v2601_v63  ;;  %v1111_v3 = vcombine.high %v1103_v56, %v1103_v56  ;;  %v2194_v52 = vpop.f32.mrf.mxu0 }
 0x129   : > { %v1433_v4 = vmax.f32 %v1431_v49, %v1432_v61  ;;  %v1439_v5 = vrot.slane %v1438_v62, 1  ;;  %v1447_v7 = vmax.f32 %v1445_v51, %v1446_v0  ;;  %v1455_v8 = vsel %vm1398_vm1, %v1103_v56, -inf }
 0x12a   : > { %v1453_v9 = vrot.slane %v1452_v2, 1  ;;  %v1112_v10 = vcombine.high %v1110_v57, %v1110_v57  ;;  %v1456_v12 = vrot.slane %v1455_v8, 4  ;;  %v1462_v14 = vsel %vm1398_vm1, %v1111_v3, -inf }
 0x12b   : > { %v1440_v18 = vmax.f32 %v1438_v62, %v1439_v5  ;;  %v1918_v19 = vsel %vm1917_vm5, %v1433_v4, %v1916_v41  ;;  %v1463_v20 = vrot.slane %v1462_v14, 4  ;;  %v1469_v22 = vsel %vm1398_vm1, %v1110_v57, -inf  ;;  %v2195_v4 = vpop.f32.mrf.mxu0 }
 0x12c   : > { %v1454_v6 = vmax.f32 %v1452_v2, %v1453_v9  ;;  %v1457_v27 = vmax.f32 %v1455_v8, %v1456_v12  ;;  %v1470_v28 = vrot.slane %v1469_v22, 4  ;;  %v1476_v29 = vsel %vm1398_vm1, %v1112_v10, -inf }
 0x12d   : > { %v1920_v30 = vsel %vm1919_vm6, %v1440_v18, %v1918_v19  ;;  %v1464_v32 = vmax.f32 %v1462_v14, %v1463_v20  ;;  %v1477_v11 = vrot.slane %v1476_v29, 4  ;;  %v1005_v36 = vmax.f32 %v2641_v58, 0.0 }
 0x12e   : > { %v1922_v38 = vsel %vm1921_vm7, %v1447_v7, %v1920_v30  ;;  %v1458_v39 = vrot.slane %v1457_v27, 2  ;;  %v1471_v43 = vmax.f32 %v1469_v22, %v1470_v28  ;;  %v2190_v44 = vadd.f32 %v2189_v40, %v2647_v15 }
 0x12f   : > { %v1924_v47 = vsel %vm1923_vm8, %v1454_v6, %v1922_v38  ;;  %v1465_v49 = vrot.slane %v1464_v32, 2  ;;  %v1478_v50 = vmax.f32 %v1476_v29, %v1477_v11  ;;  %v891_v51 = vadd.f32 %v890_v33, %v2623_v34  ;;  %v2678_v34 = vpop.f32.mrf.mxu1  ;;  %v2690_v6 = vpop.f32.mrf.mxu0 }
 0x130   : > { %1982 = vst [vmem:[%s2663_s6] sm:$0xff] %v1924_v47  ;;  %v1459_v53 = vmax.f32 %v1457_v27, %v1458_v39  ;;  %v1472_v54 = vrot.slane %v1471_v43, 2  ;;  %v751_v58 = vadd.f32 %v2634_v42, %v2594_v46  ;;  %v2674_v55 = vadd.f32 %v2192_v23, %v2191_v1 }
 0x131   : > { %v1466_v56 = vmax.f32 %v1464_v32, %v1465_v49  ;;  %v1479_v60 = vrot.slane %v1478_v50, 2  ;;  %v1003_v61 = vmax.f32 %v891_v51, 0.0  ;;  %v904_v15 = vadd.f32 %v903_v17, %v2626_v16  ;;  %v2686_v18 = vpop.f32.mrf.mxu1 }
 0x132   : > { %v1460_v40 = vrot.slane %v1459_v53, 1  ;;  %v1473_v62 = vmax.f32 %v1471_v43, %v1472_v54  ;;  %v912_v0 = vadd.f32 %v2283_v59, %v751_v58  ;;  %v754_v2 = vadd.f32 %v2190_v44, %v2594_v46 }
 0x133   : > { %v1467_v33 = vrot.slane %v1466_v56, 1  ;;  %v1480_v41 = vmax.f32 %v1478_v50, %v1479_v60  ;;  %v1033_v57 = vmax.f32 %v1003_v61, %v1005_v36  ;;  %v1006_v3 = vmax.f32 %v904_v15, 0.0  ;;  %v2699_v47 = vpop.f32.mrf.mxu1 }
 0x134   : > { %v1461_v42 = vmax.f32 %v1459_v53, %v1460_v40  ;;  %v1474_v1 = vrot.slane %v1473_v62, 1  ;;  %v1008_v5 = vmax.f32 %v912_v0, 0.0  ;;  %v2680_v7 = vadd.f32 %v2284_v45, %v754_v2  ;;  %v2198_v53 = vpop.f32.mrf.mxu0 }
 0x135   : > { %v1468_v8 = vmax.f32 %v1466_v56, %v1467_v33  ;;  %v1481_v9 = vrot.slane %v1480_v41, 1  ;;  %v1113_v16 = vcombine.high %v1033_v57, %v1033_v57  ;;  %v1120_v10 = vrot.slane %v1033_v57, %v2601_v63  ;;  %v2705_v57 = vpop.f32.mrf.mxu1 }
 0x136   : > { %v1475_v59 = vmax.f32 %v1473_v62, %v1474_v1  ;;  %v1034_v12 = vmax.f32 %v1006_v3, %v1008_v5  ;;  %v1009_v14 = vmax.f32 %v2680_v7, 0.0  ;;  %v2684_v17 = vadd.f32 %v2195_v4, %v2194_v52  ;;  %v2200_v5 = vpop.f32.mrf.mxu0 }
 0x137   : > { %v1482_v19 = vmax.f32 %v1480_v41, %v1481_v9  ;;  %v1925_v20 = vsel %vm1911_vm2, %v1468_v8, %v1461_v42  ;;  %v1127_v22 = vrot.slane %v1113_v16, %v2601_v63  ;;  %v1128_v23 = vcombine.high %v1120_v10, %v1120_v10 }
 0x138   : > { %v1926_v27 = vsel %vm1913_vm3, %v1475_v59, %v1925_v20  ;;  %v1483_v28 = vsel %vm1398_vm1, %v1120_v10, -inf  ;;  %v1130_v29 = vcombine.high %v1034_v12, %v1034_v12  ;;  %v1137_v30 = vrot.slane %v1034_v12, %v2601_v63 }
 0x139   : > { %v1129_v32 = vcombine.high %v1127_v22, %v1127_v22  ;;  %v1484_v11 = vrot.slane %v1483_v28, 4  ;;  %v1490_v36 = vsel %vm1398_vm1, %v1128_v23, -inf  ;;  %v1497_v38 = vsel %vm1398_vm1, %v1127_v22, -inf }
 0x13a   : > { %v1491_v39 = vrot.slane %v1490_v36, 4  ;;  %v1498_v43 = vrot.slane %v1497_v38, 4  ;;  %v1927_v44 = vsel %vm1915_vm4, %v1482_v19, %v1926_v27  ;;  %v1144_v45 = vrot.slane %v1130_v29, %v2601_v63  ;;  %v922_v29 = vpop.f32.mrf.mxu1 }
 0x13b   : > { %v1485_v49 = vmax.f32 %v1483_v28, %v1484_v11  ;;  %v1504_v50 = vsel %vm1398_vm1, %v1129_v32, -inf  ;;  %v1145_v51 = vcombine.high %v1137_v30, %v1137_v30  ;;  %v1511_v52 = vsel %vm1398_vm1, %v1137_v30, -inf }
 0x13c   : > { %v1492_v54 = vmax.f32 %v1490_v36, %v1491_v39  ;;  %v1499_v58 = vmax.f32 %v1497_v38, %v1498_v43  ;;  %v1505_v56 = vrot.slane %v1504_v50, 4  ;;  %v1146_v60 = vcombine.high %v1144_v45, %v1144_v45  ;;  %v2201_v38 = vpop.f32.mrf.mxu0 }
 0x13d   : > { %v1486_v61 = vrot.slane %v1485_v49, 2  ;;  %v1512_v15 = vrot.slane %v1511_v52, 4  ;;  %v1518_v40 = vsel %vm1398_vm1, %v1145_v51, -inf  ;;  %v1525_v62 = vsel %vm1398_vm1, %v1144_v45, -inf }
 0x13e   : > { %v1493_v0 = vrot.slane %v1492_v54, 2  ;;  %v1500_v2 = vrot.slane %v1499_v58, 2  ;;  %v1506_v33 = vmax.f32 %v1504_v50, %v1505_v56  ;;  %v1519_v41 = vrot.slane %v1518_v40, 4 }
 0x13f   : > { %v1487_v3 = vmax.f32 %v1485_v49, %v1486_v61  ;;  %v1513_v4 = vmax.f32 %v1511_v52, %v1512_v15  ;;  %v1526_v42 = vrot.slane %v1525_v62, 4  ;;  %v1532_v1 = vsel %vm1398_vm1, %v1146_v60, -inf  ;;  %v2712_v15 = vpop.f32.mrf.mxu1 }
 0x140   : > { %v1494_v8 = vmax.f32 %v1492_v54, %v1493_v0  ;;  %v1501_v9 = vmax.f32 %v1499_v58, %v1500_v2  ;;  %v1507_v16 = vrot.slane %v1506_v33, 2  ;;  %v1520_v10 = vmax.f32 %v1518_v40, %v1519_v41 }
 0x141   : > { %v1488_v59 = vrot.slane %v1487_v3, 1  ;;  %v1514_v12 = vrot.slane %v1513_v4, 2  ;;  %v1527_v19 = vmax.f32 %v1525_v62, %v1526_v42  ;;  %v1533_v20 = vrot.slane %v1532_v1, 4 }
 0x142   : > { %v1495_v22 = vrot.slane %v1494_v8, 1  ;;  %v1502_v23 = vrot.slane %v1501_v9, 1  ;;  %v1508_v27 = vmax.f32 %v1506_v33, %v1507_v16  ;;  %v1521_v28 = vrot.slane %v1520_v10, 2  ;;  %v2203_v33 = vpop.f32.mrf.mxu0 }
 0x143   : > { %v1489_v30 = vmax.f32 %v1487_v3, %v1488_v59  ;;  %v1515_v32 = vmax.f32 %v1513_v4, %v1514_v12  ;;  %v1528_v11 = vrot.slane %v1527_v19, 2  ;;  %v1534_v36 = vmax.f32 %v1532_v1, %v1533_v20  ;;  %v2726_v59 = vpop.f32.mrf.mxu1 }
 0x144   : > { %v1496_v39 = vmax.f32 %v1494_v8, %v1495_v22  ;;  %v1503_v43 = vmax.f32 %v1501_v9, %v1502_v23  ;;  %v1509_v45 = vrot.slane %v1508_v27, 1  ;;  %v1522_v49 = vmax.f32 %v1520_v10, %v1521_v28 }
 0x145   : > { %v1928_v50 = vsel %vm1917_vm5, %v1489_v30, %v1927_v44  ;;  %v1516_v51 = vrot.slane %v1515_v32, 1  ;;  %v1529_v52 = vmax.f32 %v1527_v19, %v1528_v11  ;;  %v1535_v54 = vrot.slane %v1534_v36, 2  ;;  %v2744_v11 = vpop.f32.mrf.mxu1 }
 0x146   : > { %v1510_v58 = vmax.f32 %v1508_v27, %v1509_v45  ;;  %v1929_v56 = vsel %vm1919_vm6, %v1496_v39, %v1928_v50  ;;  %v1523_v60 = vrot.slane %v1522_v49, 1  ;;  %v907_v61 = vadd.f32 %v2678_v34, %v2629_v35 }
 0x147   : > { %v1930_v40 = vsel %vm1921_vm7, %v1503_v43, %v1929_v56  ;;  %v1517_v62 = vmax.f32 %v1515_v32, %v1516_v51  ;;  %v1530_v0 = vrot.slane %v1529_v52, 1  ;;  %v1536_v2 = vmax.f32 %v1534_v36, %v1535_v54 }
 0x148   : > { %v1931_v44 = vsel %vm1923_vm8, %v1510_v58, %v1930_v40  ;;  %v1524_v41 = vmax.f32 %v1522_v49, %v1523_v60  ;;  %v1007_v3 = vmax.f32 %v907_v61, 0.0  ;;  %v2199_v4 = vadd.f32 %v2198_v53, %v2690_v6  ;;  %v2755_v60 = vpop.f32.mrf.mxu1 }
 0x149   : > { %1983 = vst [vmem:[%s2663_s6 + $0x8] sm:$0xff] %v1931_v44  ;;  %v1531_v42 = vmax.f32 %v1529_v52, %v1530_v0  ;;  %v1537_v1 = vrot.slane %v1536_v2, 1  ;;  %v759_v35 = vadd.f32 %v2674_v55, %v2594_v46  ;;  %v2202_v34 = vadd.f32 %v2201_v38, %v2200_v5  ;;  %v2204_v5 = vpop.f32.mrf.mxu0 }
 0x14a   : > { %v1932_v8 = vsel %vm1911_vm2, %v1524_v41, %v1517_v62  ;;  %v1035_v9 = vmax.f32 %v1007_v3, %v1009_v14  ;;  %v767_v16 = vadd.f32 %v2199_v4, %v2594_v46  ;;  %v762_v10 = vadd.f32 %v2684_v17, %v2594_v46 }
 0x14b   : > { %v1538_v6 = vmax.f32 %v1536_v2, %v1537_v1  ;;  %v1933_v53 = vsel %vm1913_vm3, %v1531_v42, %v1932_v8  ;;  %v920_v12 = vadd.f32 %v2699_v47, %v759_v35  ;;  %v770_v55 = vadd.f32 %v2202_v34, %v2594_v46  ;;  %v2747_v38 = vpop.f32.mrf.mxu0 }
 0x14c   : > { %v1147_v19 = vcombine.high %v1035_v9, %v1035_v9  ;;  %v1154_v20 = vrot.slane %v1035_v9, %v2601_v63  ;;  %v928_v7 = vadd.f32 %v2686_v18, %v767_v16  ;;  %v923_v14 = vadd.f32 %v922_v29, %v762_v10  ;;  %v2763_v10 = vpop.f32.mrf.mxu1 }
 0x14d   : > { %v1010_v22 = vmax.f32 %v920_v12, 0.0  ;;  %v931_v23 = vadd.f32 %v2705_v57, %v770_v55  ;;  %v2736_v17 = vadd.f32 %v2583_v21, %v2594_v46  ;;  %v2740_v27 = vadd.f32 %v2585_v26, %v2594_v46  ;;  %v2757_v2 = vpop.f32.mrf.mxu0 }
 0x14e   : > { %v1161_v47 = vrot.slane %v1147_v19, %v2601_v63  ;;  %v1162_v28 = vcombine.high %v1154_v20, %v1154_v20  ;;  %v1539_v30 = vsel %vm1398_vm1, %v1154_v20, -inf  ;;  %v1012_v32 = vmax.f32 %v928_v7, 0.0 }
 0x14f   : > { %v1540_v18 = vrot.slane %v1539_v30, 4  ;;  %v1934_v29 = vsel %vm1915_vm4, %v1538_v6, %v1933_v53  ;;  %v1011_v57 = vmax.f32 %v923_v14, 0.0  ;;  %v1013_v36 = vmax.f32 %v931_v23, 0.0 }
 0x150   : > { %v1163_v21 = vcombine.high %v1161_v47, %v1161_v47  ;;  %v1546_v39 = vsel %vm1398_vm1, %v1162_v28, -inf  ;;  %v1553_v26 = vsel %vm1398_vm1, %v1161_v47, -inf  ;;  %v1036_v43 = vmax.f32 %v1010_v22, %v1012_v32 }
 0x151   : > { %v1541_v45 = vmax.f32 %v1539_v30, %v1540_v18  ;;  %v1547_v49 = vrot.slane %v1546_v39, 4  ;;  %v1554_v50 = vrot.slane %v1553_v26, 4  ;;  %v1037_v51 = vmax.f32 %v1011_v57, %v1013_v36  ;;  %v2768_v36 = vpop.f32.mrf.mxu1 }
 0x152   : > { %v1560_v52 = vsel %vm1398_vm1, %v1163_v21, -inf  ;;  %v1164_v54 = vcombine.high %v1036_v43, %v1036_v43  ;;  %v1171_v58 = vrot.slane %v1036_v43, %v2601_v63  ;;  %v2753_v56 = vadd.f32 %v2204_v5, %v2203_v33  ;;  %v2765_v5 = vpop.f32.mrf.mxu0 }
 0x153   : > { %v1542_v61 = vrot.slane %v1541_v45, 2  ;;  %v1548_v40 = vmax.f32 %v1546_v39, %v1547_v49  ;;  %v1555_v62 = vmax.f32 %v1553_v26, %v1554_v50  ;;  %v1561_v0 = vrot.slane %v1560_v52, 4 }
 0x154   : > { %v1178_v44 = vrot.slane %v1164_v54, %v2601_v63  ;;  %v1179_v41 = vcombine.high %v1171_v58, %v1171_v58  ;;  %v1567_v3 = vsel %vm1398_vm1, %v1171_v58, -inf  ;;  %v1181_v4 = vcombine.high %v1037_v51, %v1037_v51 }
 0x155   : > { %v1543_v42 = vmax.f32 %v1541_v45, %v1542_v61  ;;  %v1549_v1 = vrot.slane %v1548_v40, 2  ;;  %v1556_v35 = vrot.slane %v1555_v62, 2  ;;  %v1562_v34 = vmax.f32 %v1560_v52, %v1561_v0  ;;  %v2210_v45 = vpop.f32.mrf.mxu0 }
 0x156   : > { %v1180_v33 = vcombine.high %v1178_v44, %v1178_v44  ;;  %v1568_v8 = vrot.slane %v1567_v3, 4  ;;  %v1574_v9 = vsel %vm1398_vm1, %v1179_v41, -inf  ;;  %v1581_v16 = vsel %vm1398_vm1, %v1178_v44, -inf }
 0x157   : > { %v1544_v6 = vrot.slane %v1543_v42, 1  ;;  %v1550_v53 = vmax.f32 %v1548_v40, %v1549_v1  ;;  %v1557_v12 = vmax.f32 %v1555_v62, %v1556_v35  ;;  %v1563_v55 = vrot.slane %v1562_v34, 2 }
 0x158   : > { %v1569_v19 = vmax.f32 %v1567_v3, %v1568_v8  ;;  %v1575_v20 = vrot.slane %v1574_v9, 4  ;;  %v1582_v7 = vrot.slane %v1581_v16, 4  ;;  %v1588_v14 = vsel %vm1398_vm1, %v1180_v33, -inf  ;;  %v2212_v33 = vpop.f32.mrf.mxu0 }
 0x159   : > { %v1545_v22 = vmax.f32 %v1543_v42, %v1544_v6  ;;  %v1551_v23 = vrot.slane %v1550_v53, 1  ;;  %v1558_v47 = vrot.slane %v1557_v12, 1  ;;  %v1564_v28 = vmax.f32 %v1562_v34, %v1563_v55  ;;  %v2775_v42 = vpop.f32.mrf.mxu1 }
 0x15a   : > { %v1570_v30 = vrot.slane %v1569_v19, 2  ;;  %v1576_v32 = vmax.f32 %v1574_v9, %v1575_v20  ;;  %v1583_v18 = vmax.f32 %v1581_v16, %v1582_v7  ;;  %v1589_v57 = vrot.slane %v1588_v14, 4 }
 0x15b   : > { %v1552_v21 = vmax.f32 %v1550_v53, %v1551_v23  ;;  %v1559_v39 = vmax.f32 %v1557_v12, %v1558_v47  ;;  %v1565_v26 = vrot.slane %v1564_v28, 1  ;;  %v1935_v43 = vsel %vm1917_vm5, %v1545_v22, %v1934_v29 }
 0x15c   : > { %v1571_v49 = vmax.f32 %v1569_v19, %v1570_v30  ;;  %v1577_v50 = vrot.slane %v1576_v32, 2  ;;  %v1584_v52 = vrot.slane %v1583_v18, 2  ;;  %v1590_v54 = vmax.f32 %v1588_v14, %v1589_v57  ;;  %v2782_v14 = vpop.f32.mrf.mxu1  ;;  %v2213_v30 = vpop.f32.mrf.mxu0 }
 0x15d   : > { %v1566_v58 = vmax.f32 %v1564_v28, %v1565_v26  ;;  %v1936_v61 = vsel %vm1919_vm6, %v1552_v21, %v1935_v43  ;;  %v1188_v40 = vrot.slane %v1037_v51, %v2601_v63  ;;  %v1195_v62 = vrot.slane %v1181_v4, %v2601_v63 }
 0x15e   : > { %v1937_v0 = vsel %vm1921_vm7, %v1559_v39, %v1936_v61  ;;  %v1572_v44 = vrot.slane %v1571_v49, 1  ;;  %v1578_v41 = vmax.f32 %v1576_v32, %v1577_v50  ;;  %v1585_v3 = vmax.f32 %v1583_v18, %v1584_v52  ;;  %v2299_v61 = vpop.f32.mrf.mxu1 }
 0x15f   : > { %v1938_v29 = vsel %vm1923_vm8, %v1566_v58, %v1937_v0  ;;  %v1591_v1 = vrot.slane %v1590_v54, 2  ;;  %v1196_v35 = vcombine.high %v1188_v40, %v1188_v40  ;;  %v1197_v34 = vcombine.high %v1195_v62, %v1195_v62 }
 0x160   : > { %1984 = vst [vmem:[%s2663_s6 + $0x10] sm:$0xff] %v1938_v29  ;;  %v1573_v8 = vmax.f32 %v1571_v49, %v1572_v44  ;;  %v1579_v9 = vrot.slane %v1578_v41, 1  ;;  %v1586_v16 = vrot.slane %v1585_v3, 1  ;;  %v1595_v51 = vsel %vm1398_vm1, %v1188_v40, -inf  ;;  %v2215_v44 = vpop.f32.mrf.mxu0 }
 0x161   : > { %v1592_v4 = vmax.f32 %v1590_v54, %v1591_v1  ;;  %v1596_v6 = vrot.slane %v1595_v51, 4  ;;  %v1602_v53 = vsel %vm1398_vm1, %v1196_v35, -inf  ;;  %v1609_v12 = vsel %vm1398_vm1, %v1195_v62, -inf }
 0x162   : > { %v1580_v55 = vmax.f32 %v1578_v41, %v1579_v9  ;;  %v1587_v19 = vmax.f32 %v1585_v3, %v1586_v16  ;;  %v1603_v20 = vrot.slane %v1602_v53, 4  ;;  %v1610_v7 = vrot.slane %v1609_v12, 4  ;;  %v967_v9 = vpop.f32.mrf.mxu1 }
 0x163   : > { %v1593_v22 = vrot.slane %v1592_v4, 1  ;;  %v1597_v23 = vmax.f32 %v1595_v51, %v1596_v6  ;;  %v1616_v47 = vsel %vm1398_vm1, %v1197_v34, -inf  ;;  %v775_v28 = vadd.f32 %v2753_v56, %v2594_v46  ;;  %v2216_v6 = vpop.f32.mrf.mxu0 }
 0x164   : > { %v1939_v32 = vsel %vm1911_vm2, %v1580_v55, %v1573_v8  ;;  %v1604_v18 = vmax.f32 %v1602_v53, %v1603_v20  ;;  %v1611_v57 = vmax.f32 %v1609_v12, %v1610_v7  ;;  %v1617_v21 = vrot.slane %v1616_v47, 4 }
 0x165   : > { %v1594_v39 = vmax.f32 %v1592_v4, %v1593_v22  ;;  %v1940_v26 = vsel %vm1913_vm3, %v1587_v19, %v1939_v32  ;;  %v1598_v43 = vrot.slane %v1597_v23, 2  ;;  %v2208_v49 = vadd.f32 %v2757_v2, %v2747_v38 }
 0x166   : > { %v1605_v50 = vrot.slane %v1604_v18, 2  ;;  %v1612_v52 = vrot.slane %v1611_v57, 2  ;;  %v1618_v54 = vmax.f32 %v1616_v47, %v1617_v21  ;;  %v2211_v58 = vadd.f32 %v2210_v45, %v2765_v5 }
 0x167   : > { %v1599_v56 = vmax.f32 %v1597_v23, %v1598_v43  ;;  %v936_v40 = vadd.f32 %v2726_v59, %v775_v28  ;;  %v778_v62 = vadd.f32 %v2208_v49, %v2594_v46  ;;  %v2214_v0 = vadd.f32 %v2213_v30, %v2212_v33 }
 0x168   : > { %v1606_v41 = vmax.f32 %v1604_v18, %v1605_v50  ;;  %v1613_v3 = vmax.f32 %v1611_v57, %v1612_v52  ;;  %v1619_v29 = vrot.slane %v1618_v54, 2  ;;  %v783_v1 = vadd.f32 %v2211_v58, %v2594_v46 }
 0x169   : > { %v1600_v35 = vrot.slane %v1599_v56, 1  ;;  %v1941_v38 = vsel %vm1915_vm4, %v1594_v39, %v1940_v26  ;;  %v939_v2 = vadd.f32 %v2755_v60, %v778_v62  ;;  %v786_v5 = vadd.f32 %v2214_v0, %v2594_v46 }
 0x16a   : > { %v1607_v45 = vrot.slane %v1606_v41, 1  ;;  %v1614_v34 = vrot.slane %v1613_v3, 1  ;;  %v1620_v8 = vmax.f32 %v1618_v54, %v1619_v29  ;;  %v944_v59 = vadd.f32 %v2712_v15, %v783_v1 }
 0x16b   : > { %v1601_v33 = vmax.f32 %v1599_v56, %v1600_v35  ;;  %v1014_v16 = vmax.f32 %v936_v40, 0.0  ;;  %v947_v51 = vadd.f32 %v2744_v11, %v786_v5  ;;  %v976_v4 = vadd.f32 %v2299_v61, %v2612_v24  ;;  %v2300_v11 = vpop.f32.mrf.mxu1 }
 0x16c   : > { %v1608_v53 = vmax.f32 %v1606_v41, %v1607_v45  ;;  %v1615_v12 = vmax.f32 %v1613_v3, %v1614_v34  ;;  %v1621_v55 = vrot.slane %v1620_v8, 1  ;;  %v1016_v19 = vmax.f32 %v944_v59, 0.0 }
 0x16d   : > { %v1942_v60 = vsel %vm1917_vm5, %v1601_v33, %v1941_v38  ;;  %v1015_v20 = vmax.f32 %v939_v2, 0.0  ;;  %v1017_v7 = vmax.f32 %v947_v51, 0.0  ;;  %v968_v22 = vadd.f32 %v967_v9, %v2606_v13 }
 0x16e   : > { %v1622_v15 = vmax.f32 %v1620_v8, %v1621_v55  ;;  %v1943_v23 = vsel %vm1919_vm6, %v1608_v53, %v1942_v60  ;;  %v1038_v47 = vmax.f32 %v1014_v16, %v1016_v19  ;;  %v2217_v28 = vadd.f32 %v2216_v6, %v2215_v44 }
 0x16f   : > { %v1944_v24 = vsel %vm1921_vm7, %v1615_v12, %v1943_v23  ;;  %v1039_v30 = vmax.f32 %v1015_v20, %v1017_v7  ;;  %v1024_v32 = vmax.f32 %v976_v4, 0.0  ;;  %v1022_v18 = vmax.f32 %v968_v22, 0.0  ;;  %v2218_v7 = vpop.f32.mrf.mxu0 }
 0x170   : > { %v1945_v57 = vsel %vm1923_vm8, %v1622_v15, %v1944_v24  ;;  %v1198_v21 = vcombine.high %v1038_v47, %v1038_v47  ;;  %v1205_v39 = vrot.slane %v1038_v47, %v2601_v63  ;;  %v2809_v26 = vadd.f32 %v2589_v37, %v2594_v46 }
 0x171   : > { %1985 = vst [vmem:[%s2663_s6 + $0x18] sm:$0xff] %v1945_v57  ;;  %v1215_v13 = vcombine.high %v1039_v30, %v1039_v30  ;;  %v1222_v43 = vrot.slane %v1039_v30, %v2601_v63  ;;  %v2813_v49 = vmax.f32 %v1022_v18, %v1024_v32  ;;  %v2816_v50 = vadd.f32 %v2300_v11, %v2736_v17 }
 0x172   : > { %v1212_v52 = vrot.slane %v1198_v21, %v2601_v63  ;;  %v1213_v54 = vcombine.high %v1205_v39, %v1205_v39  ;;  %v1623_v58 = vsel %vm1398_vm1, %v1205_v39, -inf  ;;  %v2821_v61 = vadd.f32 %v2217_v28, %v2594_v46 }
 0x173   : > { %v1624_v56 = vrot.slane %v1623_v58, 4  ;;  %v1229_v37 = vrot.slane %v1215_v13, %v2601_v63  ;;  %v1230_v40 = vcombine.high %v1222_v43, %v1222_v43  ;;  %v1651_v62 = vsel %vm1398_vm1, %v1222_v43, -inf }
 0x174   : > { %v1214_v0 = vcombine.high %v1212_v52, %v1212_v52  ;;  %v1630_v44 = vsel %vm1398_vm1, %v1213_v54, -inf  ;;  %v1637_v17 = vsel %vm1398_vm1, %v1212_v52, -inf  ;;  %v1652_v41 = vrot.slane %v1651_v62, 4  ;;  %v2219_v54 = vpop.f32.mrf.mxu0 }
 0x175   : > { %v1625_v3 = vmax.f32 %v1623_v58, %v1624_v56  ;;  %v1631_v29 = vrot.slane %v1630_v44, 4  ;;  %v1638_v1 = vrot.slane %v1637_v17, 4  ;;  %v1231_v35 = vcombine.high %v1229_v37, %v1229_v37  ;;  %v970_v58 = vpop.f32.mrf.mxu1 }
 0x176   : > { %v1644_v38 = vsel %vm1398_vm1, %v1214_v0, -inf  ;;  %v1653_v46 = vmax.f32 %v1651_v62, %v1652_v41  ;;  %v1658_v2 = vsel %vm1398_vm1, %v1230_v40, -inf  ;;  %v1665_v5 = vsel %vm1398_vm1, %v1229_v37, -inf }
 0x177   : > { %v1626_v45 = vrot.slane %v1625_v3, 2  ;;  %v1632_v34 = vmax.f32 %v1630_v44, %v1631_v29  ;;  %v1639_v8 = vmax.f32 %v1637_v17, %v1638_v1  ;;  %v1645_v59 = vrot.slane %v1644_v38, 4 }
 0x178   : > { %v1654_v9 = vrot.slane %v1653_v46, 2  ;;  %v1659_v33 = vrot.slane %v1658_v2, 4  ;;  %v1666_v16 = vrot.slane %v1665_v5, 4  ;;  %v1672_v51 = vsel %vm1398_vm1, %v1231_v35, -inf }
 0x179   : > { %v1627_v4 = vmax.f32 %v1625_v3, %v1626_v45  ;;  %v1633_v6 = vrot.slane %v1632_v34, 2  ;;  %v1640_v53 = vrot.slane %v1639_v8, 2  ;;  %v1646_v12 = vmax.f32 %v1644_v38, %v1645_v59  ;;  %v2303_v45 = vpop.f32.mrf.mxu1 }
 0x17a   : > { %v1655_v55 = vmax.f32 %v1653_v46, %v1654_v9  ;;  %v1660_v19 = vmax.f32 %v1658_v2, %v1659_v33  ;;  %v1667_v60 = vmax.f32 %v1665_v5, %v1666_v16  ;;  %v1673_v20 = vrot.slane %v1672_v51, 4  ;;  %v2221_v5 = vpop.f32.mrf.mxu0 }
 0x17b   : > { %v1628_v22 = vrot.slane %v1627_v4, 1  ;;  %v1634_v15 = vmax.f32 %v1632_v34, %v1633_v6  ;;  %v1641_v23 = vmax.f32 %v1639_v8, %v1640_v53  ;;  %v1647_v47 = vrot.slane %v1646_v12, 2 }
 0x17c   : > { %v1656_v28 = vrot.slane %v1655_v55, 1  ;;  %v1661_v11 = vrot.slane %v1660_v19, 2  ;;  %v1668_v24 = vrot.slane %v1667_v60, 2  ;;  %v1674_v30 = vmax.f32 %v1672_v51, %v1673_v20  ;;  %v983_v20 = vpop.f32.mrf.mxu1 }
 0x17d   : > { %v1635_v32 = vrot.slane %v1634_v15, 1  ;;  %v1642_v18 = vrot.slane %v1641_v23, 1  ;;  %v1648_v57 = vmax.f32 %v1646_v12, %v1647_v47  ;;  %v1025_v21 = vmax.f32 %v2816_v50, 0.0 }
 0x17e   : > { %v1629_v39 = vmax.f32 %v1627_v4, %v1628_v22  ;;  %v1662_v13 = vmax.f32 %v1660_v19, %v1661_v11  ;;  %v1669_v43 = vmax.f32 %v1667_v60, %v1668_v24  ;;  %v1675_v52 = vrot.slane %v1674_v30, 2  ;;  %v2222_v60 = vpop.f32.mrf.mxu0 }
 0x17f   : > { %v1636_v56 = vmax.f32 %v1634_v15, %v1635_v32  ;;  %v1643_v37 = vmax.f32 %v1641_v23, %v1642_v18  ;;  %v1649_v40 = vrot.slane %v1648_v57, 1  ;;  %v1657_v62 = vmax.f32 %v1655_v55, %v1656_v28 }
 0x180   : > { %v1663_v0 = vrot.slane %v1662_v13, 1  ;;  %v1670_v44 = vrot.slane %v1669_v43, 1  ;;  %v1676_v17 = vmax.f32 %v1674_v30, %v1675_v52  ;;  %v1266_v41 = vcombine.high %v2813_v49, %v2813_v49 }
 0x181   : > { %v1650_v3 = vmax.f32 %v1648_v57, %v1649_v40  ;;  %v1946_v29 = vsel %vm1911_vm2, %v1636_v56, %v1629_v39  ;;  %v2837_v50 = vadd.f32 %v2768_v36, %v2821_v61  ;;  %v1273_v1 = vrot.slane %v2813_v49, %v2601_v63 }
 0x182   : > { %v1947_v35 = vsel %vm1913_vm3, %v1643_v37, %v1946_v29  ;;  %v1664_v38 = vmax.f32 %v1662_v13, %v1663_v0  ;;  %v1671_v46 = vmax.f32 %v1669_v43, %v1670_v44  ;;  %v1677_v2 = vrot.slane %v1676_v17, 1 }
 0x183   : > { %v1948_v34 = vsel %vm1915_vm4, %v1650_v3, %v1947_v35  ;;  %v1280_v8 = vrot.slane %v1266_v41, %v2601_v63  ;;  %v1281_v59 = vcombine.high %v1273_v1, %v1273_v1  ;;  %v1735_v9 = vsel %vm1398_vm1, %v1273_v1, -inf }
 0x184   : > { %v1678_v33 = vmax.f32 %v1676_v17, %v1677_v2  ;;  %v1949_v36 = vsel %vm1917_vm5, %v1657_v62, %v1948_v34  ;;  %v1736_v61 = vrot.slane %v1735_v9, 4  ;;  %v2846_v49 = vadd.f32 %v2219_v54, %v2218_v7 }
 0x185   : > { %v1950_v16 = vsel %vm1919_vm6, %v1664_v38, %v1949_v36  ;;  %v1282_v51 = vcombine.high %v1280_v8, %v1280_v8  ;;  %v1742_v4 = vsel %vm1398_vm1, %v1281_v59, -inf  ;;  %v1749_v6 = vsel %vm1398_vm1, %v1280_v8, -inf }
 0x186   : > { %v1951_v53 = vsel %vm1921_vm7, %v1671_v46, %v1950_v16  ;;  %v1737_v12 = vmax.f32 %v1735_v9, %v1736_v61  ;;  %v1743_v55 = vrot.slane %v1742_v4, 4  ;;  %v1750_v19 = vrot.slane %v1749_v6, 4 }
 0x187   : > { %v1952_v22 = vsel %vm1923_vm8, %v1678_v33, %v1951_v53  ;;  %v1018_v15 = vmax.f32 %v2837_v50, 0.0  ;;  %v1756_v7 = vsel %vm1398_vm1, %v1282_v51, -inf  ;;  %v971_v23 = vadd.f32 %v970_v58, %v2616_v25  ;;  %v2862_v25 = vld [vmem:[%s2939_s2] ss:$0 sm:$0xff] }
 0x188   : > { %1986 = vst [vmem:[%s2663_s6 + $0x20] sm:$0xff] %v1952_v22  ;;  %v1738_v47 = vrot.slane %v1737_v12, 2  ;;  %v1744_v28 = vmax.f32 %v1742_v4, %v1743_v55  ;;  %v1751_v11 = vmax.f32 %v1749_v6, %v1750_v19  ;;  %v1757_v24 = vrot.slane %v1756_v7, 4 }
 0x189   : > { %v1023_v30 = vmax.f32 %v971_v23, 0.0  ;;  %v992_v32 = vadd.f32 %v2303_v45, %v2809_v26  ;;  %v2223_v18 = vadd.f32 %v2222_v60, %v2221_v5  ;;  %v984_v57 = vadd.f32 %v983_v20, %v2740_v27 }
 0x18a   : > { %v1739_v39 = vmax.f32 %v1737_v12, %v1738_v47  ;;  %v1745_v13 = vrot.slane %v1744_v28, 2  ;;  %v1752_v43 = vrot.slane %v1751_v11, 2  ;;  %v1758_v52 = vmax.f32 %v1756_v7, %v1757_v24 }
 0x18b   : > { %v1043_v54 = vmax.f32 %v1023_v30, %v1025_v21  ;;  %v1028_v56 = vmax.f32 %v992_v32, 0.0  ;;  %v799_v58 = vadd.f32 %v2862_v25, %v2223_v18  ;;  %v1026_v37 = vmax.f32 %v984_v57, 0.0 }
 0x18c   : > { %v1740_v40 = vrot.slane %v1739_v39, 1  ;;  %v1746_v62 = vmax.f32 %v1744_v28, %v1745_v13  ;;  %v1753_v26 = vmax.f32 %v1751_v11, %v1752_v43  ;;  %v1759_v0 = vrot.slane %v1758_v52, 2 }
 0x18d   : > { %v1283_v44 = vcombine.high %v1043_v54, %v1043_v54  ;;  %v1290_v27 = vrot.slane %v1043_v54, %v2601_v63  ;;  %v960_v17 = vadd.f32 %v2763_v10, %v799_v58  ;;  %v2867_v41 = vmax.f32 %v1026_v37, %v1028_v56 }
 0x18e   : > { %v1741_v21 = vmax.f32 %v1739_v39, %v1740_v40  ;;  %v1747_v3 = vrot.slane %v1746_v62, 1  ;;  %v1754_v29 = vrot.slane %v1753_v26, 1  ;;  %v1760_v50 = vmax.f32 %v1758_v52, %v1759_v0 }
 0x18f   : > { %v1297_v1 = vrot.slane %v1283_v44, %v2601_v63  ;;  %v1298_v35 = vcombine.high %v1290_v27, %v1290_v27  ;;  %v1763_v38 = vsel %vm1398_vm1, %v1290_v27, -inf  ;;  %v1020_v46 = vmax.f32 %v960_v17, 0.0 }
 0x190   : > { %v1748_v2 = vmax.f32 %v1746_v62, %v1747_v3  ;;  %v1755_v5 = vmax.f32 %v1753_v26, %v1754_v29  ;;  %v1761_v45 = vrot.slane %v1760_v50, 1  ;;  %v1764_v34 = vrot.slane %v1763_v38, 4 }
 0x191   : > { %v1299_v8 = vcombine.high %v1297_v1, %v1297_v1  ;;  %v1770_v59 = vsel %vm1398_vm1, %v1298_v35, -inf  ;;  %v1777_v10 = vsel %vm1398_vm1, %v1297_v1, -inf  ;;  %v1040_v9 = vmax.f32 %v1018_v15, %v1020_v46 }
 0x192   : > { %v1762_v33 = vmax.f32 %v1760_v50, %v1761_v45  ;;  %v1960_v36 = vsel %vm1911_vm2, %v1748_v2, %v1741_v21  ;;  %v1765_v61 = vmax.f32 %v1763_v38, %v1764_v34  ;;  %v1771_v16 = vrot.slane %v1770_v59, 4 }
 0x193   : > { %v1961_v51 = vsel %vm1913_vm3, %v1755_v5, %v1960_v36  ;;  %v1778_v4 = vrot.slane %v1777_v10, 4  ;;  %v1784_v6 = vsel %vm1398_vm1, %v1299_v8, -inf  ;;  %v1232_v53 = vcombine.high %v1040_v9, %v1040_v9 }
 0x194   : > { %v1766_v12 = vrot.slane %v1765_v61, 2  ;;  %v1772_v55 = vmax.f32 %v1770_v59, %v1771_v16  ;;  %v1785_v19 = vrot.slane %v1784_v6, 4  ;;  %v1962_v60 = vsel %vm1915_vm4, %v1762_v33, %v1961_v51  ;;  %v2304_v16 = vpop.f32.mrf.mxu1 }
 0x195   : > { %v1779_v20 = vmax.f32 %v1777_v10, %v1778_v4  ;;  %v1239_v22 = vrot.slane %v1040_v9, %v2601_v63  ;;  %v1246_v15 = vrot.slane %v1232_v53, %v2601_v63  ;;  %v1300_v7 = vcombine.high %v2867_v41, %v2867_v41 }
 0x196   : > { %v1767_v23 = vmax.f32 %v1765_v61, %v1766_v12  ;;  %v1773_v47 = vrot.slane %v1772_v55, 2  ;;  %v1786_v28 = vmax.f32 %v1784_v6, %v1785_v19  ;;  %v1307_v11 = vrot.slane %v2867_v41, %v2601_v63  ;;  %v2224_v61 = vpop.f32.mrf.mxu0 }
 0x197   : > { %v1780_v24 = vrot.slane %v1779_v20, 2  ;;  %v1247_v30 = vcombine.high %v1239_v22, %v1239_v22  ;;  %v1248_v32 = vcombine.high %v1246_v15, %v1246_v15  ;;  %v1679_v18 = vsel %vm1398_vm1, %v1239_v22, -inf }
 0x198   : > { %v1768_v57 = vrot.slane %v1767_v23, 1  ;;  %v1774_v39 = vmax.f32 %v1772_v55, %v1773_v47  ;;  %v1787_v13 = vrot.slane %v1786_v28, 2  ;;  %v1680_v43 = vrot.slane %v1679_v18, 4 }
 0x199   : > { %v1781_v52 = vmax.f32 %v1779_v20, %v1780_v24  ;;  %v1686_v54 = vsel %vm1398_vm1, %v1247_v30, -inf  ;;  %v1693_v56 = vsel %vm1398_vm1, %v1246_v15, -inf  ;;  %v1700_v58 = vsel %vm1398_vm1, %v1248_v32, -inf  ;;  %v986_v24 = vpop.f32.mrf.mxu1 }
 0x19a   : > { %v1769_v37 = vmax.f32 %v1767_v23, %v1768_v57  ;;  %v1775_v40 = vrot.slane %v1774_v39, 1  ;;  %v1788_v62 = vmax.f32 %v1786_v28, %v1787_v13  ;;  %v1681_v26 = vmax.f32 %v1679_v18, %v1680_v43 }
 0x19b   : > { %v1782_v0 = vrot.slane %v1781_v52, 1  ;;  %v1687_v44 = vrot.slane %v1686_v54, 4  ;;  %v1694_v27 = vrot.slane %v1693_v56, 4  ;;  %v1701_v17 = vrot.slane %v1700_v58, 4 }
 0x19c   : > { %v1776_v41 = vmax.f32 %v1774_v39, %v1775_v40  ;;  %v1789_v21 = vrot.slane %v1788_v62, 1  ;;  %v1963_v3 = vsel %vm1917_vm5, %v1769_v37, %v1962_v60  ;;  %v1682_v29 = vrot.slane %v1681_v26, 2 }
 0x19d   : > { %v1783_v50 = vmax.f32 %v1781_v52, %v1782_v0  ;;  %v1688_v1 = vmax.f32 %v1686_v54, %v1687_v44  ;;  %v1695_v35 = vmax.f32 %v1693_v56, %v1694_v27  ;;  %v1702_v38 = vmax.f32 %v1700_v58, %v1701_v17 }
 0x19e   : > { %v1790_v46 = vmax.f32 %v1788_v62, %v1789_v21  ;;  %v1964_v2 = vsel %vm1919_vm6, %v1776_v41, %v1963_v3  ;;  %v1683_v5 = vmax.f32 %v1681_v26, %v1682_v29  ;;  %v1314_v45 = vrot.slane %v1300_v7, %v2601_v63 }
 0x19f   : > { %v1965_v34 = vsel %vm1921_vm7, %v1783_v50, %v1964_v2  ;;  %v1689_v8 = vrot.slane %v1688_v1, 2  ;;  %v1696_v59 = vrot.slane %v1695_v35, 2  ;;  %v1703_v9 = vrot.slane %v1702_v38, 2 }
 0x1a0   : > { %v1966_v10 = vsel %vm1923_vm8, %v1790_v46, %v1965_v34  ;;  %v1315_v33 = vcombine.high %v1307_v11, %v1307_v11  ;;  %v1316_v36 = vcombine.high %v1314_v45, %v1314_v45  ;;  %v794_v51 = vadd.f32 %v2862_v25, %v2846_v49 }
 0x1a1   : > { %1988 = vst [vmem:[%s2663_s6 + $0x30] sm:$0xff] %v1966_v10  ;;  %v1684_v4 = vrot.slane %v1683_v5, 1  ;;  %v1690_v6 = vmax.f32 %v1688_v1, %v1689_v8  ;;  %v1791_v53 = vsel %vm1398_vm1, %v1307_v11, -inf  ;;  %v1697_v12 = vmax.f32 %v1695_v35, %v1696_v59  ;;  %v2225_v11 = vpop.f32.mrf.mxu0 }
 0x1a2   : > { %v1792_v55 = vrot.slane %v1791_v53, 4  ;;  %v1798_v19 = vsel %vm1398_vm1, %v1315_v33, -inf  ;;  %v1805_v60 = vsel %vm1398_vm1, %v1314_v45, -inf  ;;  %v834_v15 = vadd.f32 %v2862_v25, %v2596_v48 }
 0x1a3   : > { %v1691_v20 = vrot.slane %v1690_v6, 1  ;;  %v1799_v22 = vrot.slane %v1798_v19, 4  ;;  %v826_v7 = vadd.f32 %v2862_v25, %v2587_v31  ;;  %v1704_v49 = vmax.f32 %v1702_v38, %v1703_v9 }
 0x1a4   : > { %v1793_v23 = vmax.f32 %v1791_v53, %v1792_v55  ;;  %v1806_v47 = vrot.slane %v1805_v60, 4  ;;  %v1812_v28 = vsel %vm1398_vm1, %v1316_v36, -inf  ;;  %v955_v30 = vadd.f32 %v2782_v14, %v794_v51 }
 0x1a5   : > { %v1685_v32 = vmax.f32 %v1683_v5, %v1684_v4  ;;  %v1800_v18 = vmax.f32 %v1798_v19, %v1799_v22  ;;  %v995_v57 = vadd.f32 %v2304_v16, %v834_v15  ;;  %v1698_v39 = vrot.slane %v1697_v12, 1 }
 0x1a6   : > { %v1794_v13 = vrot.slane %v1793_v23, 2  ;;  %v1807_v43 = vmax.f32 %v1805_v60, %v1806_v47  ;;  %v1813_v52 = vrot.slane %v1812_v28, 4  ;;  %v1692_v48 = vmax.f32 %v1690_v6, %v1691_v20 }
 0x1a7   : > { %v1801_v54 = vrot.slane %v1800_v18, 2  ;;  %v2226_v56 = vadd.f32 %v2225_v11, %v2224_v61  ;;  %v987_v31 = vadd.f32 %v986_v24, %v826_v7  ;;  %v1705_v58 = vrot.slane %v1704_v49, 1 }
 0x1a8   : > { %v1795_v37 = vmax.f32 %v1793_v23, %v1794_v13  ;;  %v1808_v40 = vrot.slane %v1807_v43, 2  ;;  %v1814_v62 = vmax.f32 %v1812_v28, %v1813_v52  ;;  %v1029_v0 = vmax.f32 %v995_v57, 0.0 }
 0x1a9   : > { %v1802_v26 = vmax.f32 %v1800_v18, %v1801_v54  ;;  %v802_v44 = vadd.f32 %v2862_v25, %v2226_v56  ;;  %v1027_v14 = vmax.f32 %v987_v31, 0.0  ;;  %v1699_v27 = vmax.f32 %v1697_v12, %v1698_v39 }
 0x1aa   : > { %v1796_v17 = vrot.slane %v1795_v37, 1  ;;  %v1809_v41 = vmax.f32 %v1807_v43, %v1808_v40  ;;  %v1815_v21 = vrot.slane %v1814_v62, 2  ;;  %v1953_v3 = vsel %vm1911_vm2, %v1692_v48, %v1685_v32 }
 0x1ab   : > { %v1803_v29 = vrot.slane %v1802_v26, 1  ;;  %v963_v50 = vadd.f32 %v2775_v42, %v802_v44  ;;  %v1045_v1 = vmax.f32 %v1027_v14, %v1029_v0  ;;  %v1019_v35 = vmax.f32 %v955_v30, 0.0 }
 0x1ac   : > { %v1797_v38 = vmax.f32 %v1795_v37, %v1796_v17  ;;  %v1810_v46 = vrot.slane %v1809_v41, 1  ;;  %v1816_v2 = vmax.f32 %v1814_v62, %v1815_v21  ;;  %v1706_v8 = vmax.f32 %v1704_v49, %v1705_v58 }
 0x1ad   : > { %v1804_v5 = vmax.f32 %v1802_v26, %v1803_v29  ;;  %v1021_v45 = vmax.f32 %v963_v50, 0.0  ;;  %v1317_v34 = vcombine.high %v1045_v1, %v1045_v1  ;;  %v1324_v25 = vrot.slane %v1045_v1, %v2601_v63 }
 0x1ae   : > { %v1954_v59 = vsel %vm1913_vm3, %v1699_v27, %v1953_v3  ;;  %v1811_v10 = vmax.f32 %v1809_v41, %v1810_v46  ;;  %v1817_v9 = vrot.slane %v1816_v2, 1 }
 0x1af   : > { %v1967_v33 = vsel %vm1911_vm2, %v1804_v5, %v1797_v38  ;;  %v1041_v36 = vmax.f32 %v1019_v35, %v1021_v45  ;;  %v1331_v42 = vrot.slane %v1317_v34, %v2601_v63  ;;  %v1332_v61 = vcombine.high %v1324_v25, %v1324_v25 }
 0x1b0   : > { %v1818_v16 = vmax.f32 %v1816_v2, %v1817_v9  ;;  %v1968_v51 = vsel %vm1913_vm3, %v1811_v10, %v1967_v33  ;;  %v1819_v4 = vsel %vm1398_vm1, %v1324_v25, -inf  ;;  %v1955_v19 = vsel %vm1915_vm4, %v1706_v8, %v1954_v59 }
 0x1b1   : > { %v1249_v6 = vcombine.high %v1041_v36, %v1041_v36  ;;  %v1256_v53 = vrot.slane %v1041_v36, %v2601_v63  ;;  %v1333_v12 = vcombine.high %v1331_v42, %v1331_v42  ;;  %v1820_v55 = vrot.slane %v1819_v4, 4 }
 0x1b2   : > { %v1826_v60 = vsel %vm1398_vm1, %v1332_v61, -inf  ;;  %v1833_v20 = vsel %vm1398_vm1, %v1331_v42, -inf  ;;  %v1969_v22 = vsel %vm1915_vm4, %v1818_v16, %v1968_v51 }
 0x1b3   : > { %v1263_v15 = vrot.slane %v1249_v6, %v2601_v63  ;;  %v1264_v7 = vcombine.high %v1256_v53, %v1256_v53  ;;  %v1707_v49 = vsel %vm1398_vm1, %v1256_v53, -inf  ;;  %v1821_v23 = vmax.f32 %v1819_v4, %v1820_v55 }
 0x1b4   : > { %v1708_v47 = vrot.slane %v1707_v49, 4  ;;  %v1827_v28 = vrot.slane %v1826_v60, 4  ;;  %v1834_v11 = vrot.slane %v1833_v20, 4  ;;  %v1840_v24 = vsel %vm1398_vm1, %v1333_v12, -inf }
 0x1b5   : > { %v1265_v30 = vcombine.high %v1263_v15, %v1263_v15  ;;  %v1714_v32 = vsel %vm1398_vm1, %v1264_v7, -inf  ;;  %v1721_v18 = vsel %vm1398_vm1, %v1263_v15, -inf  ;;  %v1822_v57 = vrot.slane %v1821_v23, 2 }
 0x1b6   : > { %v1709_v39 = vmax.f32 %v1707_v49, %v1708_v47  ;;  %v1715_v13 = vrot.slane %v1714_v32, 4  ;;  %v1722_v43 = vrot.slane %v1721_v18, 4  ;;  %v1828_v52 = vmax.f32 %v1826_v60, %v1827_v28 }
 0x1b7   : > { %v1728_v63 = vsel %vm1398_vm1, %v1265_v30, -inf  ;;  %v1823_v48 = vmax.f32 %v1821_v23, %v1822_v57  ;;  %v1835_v54 = vmax.f32 %v1833_v20, %v1834_v11  ;;  %v1841_v56 = vrot.slane %v1840_v24, 4 }
 0x1b8   : > { %v1710_v31 = vrot.slane %v1709_v39, 2  ;;  %v1716_v58 = vmax.f32 %v1714_v32, %v1715_v13  ;;  %v1723_v37 = vmax.f32 %v1721_v18, %v1722_v43  ;;  %v1729_v40 = vrot.slane %v1728_v63, 4 }
 0x1b9   : > { %v1824_v62 = vrot.slane %v1823_v48, 1  ;;  %v1829_v26 = vrot.slane %v1828_v52, 2  ;;  %v1836_v0 = vrot.slane %v1835_v54, 2  ;;  %v1842_v44 = vmax.f32 %v1840_v24, %v1841_v56 }
 0x1ba   : > { %v1711_v14 = vmax.f32 %v1709_v39, %v1710_v31  ;;  %v1717_v27 = vrot.slane %v1716_v58, 2  ;;  %v1724_v17 = vrot.slane %v1723_v37, 2  ;;  %v1730_v41 = vmax.f32 %v1728_v63, %v1729_v40 }
 0x1bb   : > { %v1825_v21 = vmax.f32 %v1823_v48, %v1824_v62  ;;  %v1830_v3 = vmax.f32 %v1828_v52, %v1829_v26  ;;  %v1837_v29 = vmax.f32 %v1835_v54, %v1836_v0  ;;  %v1843_v50 = vrot.slane %v1842_v44, 2 }
 0x1bc   : > { %v1712_v1 = vrot.slane %v1711_v14, 1  ;;  %v1718_v35 = vmax.f32 %v1716_v58, %v1717_v27  ;;  %v1725_v38 = vmax.f32 %v1723_v37, %v1724_v17  ;;  %v1731_v46 = vrot.slane %v1730_v41, 2 }
 0x1bd   : > { %v1831_v2 = vrot.slane %v1830_v3, 1  ;;  %v1838_v5 = vrot.slane %v1837_v29, 1  ;;  %v1844_v45 = vmax.f32 %v1842_v44, %v1843_v50  ;;  %v1970_v34 = vsel %vm1917_vm5, %v1825_v21, %v1969_v22 }
 0x1be   : > { %v1713_v25 = vmax.f32 %v1711_v14, %v1712_v1  ;;  %v1719_v8 = vrot.slane %v1718_v35, 1  ;;  %v1726_v59 = vrot.slane %v1725_v38, 1  ;;  %v1732_v10 = vmax.f32 %v1730_v41, %v1731_v46 }
 0x1bf   : > { %v1832_v9 = vmax.f32 %v1830_v3, %v1831_v2  ;;  %v1839_v33 = vmax.f32 %v1837_v29, %v1838_v5  ;;  %v1845_v36 = vrot.slane %v1844_v45, 1 }
 0x1c0   : > { %v1720_v42 = vmax.f32 %v1718_v35, %v1719_v8  ;;  %v1727_v61 = vmax.f32 %v1725_v38, %v1726_v59  ;;  %v1733_v16 = vrot.slane %v1732_v10, 1  ;;  %v1956_v51 = vsel %vm1917_vm5, %v1713_v25, %v1955_v19 }
 0x1c1   : > { %v1846_v4 = vmax.f32 %v1844_v45, %v1845_v36  ;;  %v1971_v6 = vsel %vm1919_vm6, %v1832_v9, %v1970_v34 }
 0x1c2   : > { %v1734_v53 = vmax.f32 %v1732_v10, %v1733_v16  ;;  %v1957_v12 = vsel %vm1919_vm6, %v1720_v42, %v1956_v51  ;;  %v1972_v55 = vsel %vm1921_vm7, %v1839_v33, %v1971_v6 }
 0x1c3   : > { %v1958_v60 = vsel %vm1921_vm7, %v1727_v61, %v1957_v12  ;;  %v1973_v20 = vsel %vm1923_vm8, %v1846_v4, %v1972_v55 }
 0x1c4   : > { %v1959_v22 = vsel %vm1923_vm8, %v1734_v53, %v1958_v60  ;;  %1989 = vst [vmem:[%s2663_s6 + $0x38] sm:$0xff] %v1973_v20 }
 0x1c5   : > { %1987 = vst [vmem:[%s2663_s6 + $0x28] sm:$0xff] %v1959_v22 }
 0x1c6 PF: > { %s13_s12 = sadd.s32 1, %s2420_s12  }
 0x1c7   : > { %p10_p4 = scmp.ge.s32.totalorder %s13_s12, 4  }
 0x1c9   :  { %12 = sbr.rel (!%p10_p4) target bundleno = 1 (0x1), region = 62 }

// kernel: simple_cnn_forward.5
= control target key start
LH: loop header
LB: loop body
LE: loop exit
PB: predicated region body
PF: predicated region fallthrough
CT: control target
= control target key end

     0   :  { %10 = vsyncpa [#allocation4], 0  ;;  %s1521_s18 = smov 0   ;;  %s1673_s0 = inlined_call_operand.vmem [shape: bf16[2,4096], index: 0, kind: input, shape index: {}]   ;;  %s1674_s1 = inlined_call_operand.vmem [shape: bf16[4096,128], index: 1, kind: input, shape index: {}]   ;;  %s1675_s2 = inlined_call_operand.vmem [shape: f32[1,128], index: 2, kind: input, shape index: {}]   ;;  %s1676_s3 = inlined_call_operand.vmem [shape: bf16[128,128], index: 3, kind: input, shape index: {}]   ;;  %s1677_s4 = inlined_call_operand.vmem [shape: f32[1,128], index: 4, kind: input, shape index: {}]   ;;  %s1678_s5 = inlined_call_operand.hbm [shape: f32[2,128], index: 5, kind: output, shape index: {}]  }
   0x1 LB: > { %s1527_s19 = sadd.s32 4294967295, %s1484_s18   ;;  %p1157_p0 = scmp.ge.s32.totalorder %s1484_s18, 1  ;;  %s1484_s18 = sphi %s1521_s18, %s16_s18  }
   0x2   : > { %p194_p1 = scmp.lt.s32.totalorder %s1484_s18, 5 }
   0x4   : > { %p195_p2 = pnand %p1157_p0, %p194_p1 }
   0x5   : > { %s1158_s20 = sshll.u32 (!%p195_p2), %s1527_s19, 3  ;;  %s1159_s21 = sshll.u32 (!%p195_p2), %s1527_s19, 7 }
   0x6   : > { %198 = sbr.rel (%p195_p2) target bundleno = 537 (0x219), region = 40  ;;  %p222_p3 = scmp.lt.s32.totalorder (!%p195_p2), %s1158_s20, 31 }
   0x7   : > { %p227_p4 = scmp.lt.s32.totalorder (!%p195_p2), %s1159_s21, 511  ;;  %p1161_p5 = scmp.ne.s32.totalorder (!%p195_p2), %s1527_s19, 0 }
   0xb   : > { %s1680_s20 = smov (!%p222_p3, %s1158_s20), 31  ;;  %s1682_s21 = smov (!%p227_p4, %s1159_s21), 511 }
   0xc   : > { %s224_s24 = scalar_lea.vmem %s1673_s0, %s1680_s20  ;;  %s1160_s25 = sshll.u32 %s1682_s21, 2 }
   0xd   : > { %s1542_s28 = scalar_lea.vmem %s1674_s1, %s1160_s25  ;;  %236 = sbr.rel (%p1161_p5) target bundleno = 20 (0x14), region = 44 }
  0x12   : > { %v1486_v0 = vmov 0.0  }
  0x13   : > { %237 = vst [vmem:[#allocation2] sm:$0x3] %v1486_v0 }
  0x14 PF: > { %v1377_v1 = vld [vmem:[%s1542_s28 + $0x78] sm:$0xff]   ;;  %v1381_v5 = vld [vmem:[%s1542_s28 + $0x70] sm:$0xff]   ;;  %v1385_v9 = vld [vmem:[%s1542_s28 + $0x68] sm:$0xff]   ;;  %v373_v29 = vlaneseq  ;;  %v1487_v37 = vmov 1966171168   ;;  %p1226_p6 = scmp.ne.s32.totalorder %s1527_s19, 3 }
  0x15   : > { %v1378_v2 = vld [vmem:[%s1542_s28 + $0xf8] sm:$0xff]   ;;  %1241 = vmatprep.subr.bf16.mxu0 %v1377_v1  ;;  %v1382_v6 = vld [vmem:[%s1542_s28 + $0xf0] sm:$0xff]   ;;  %v1386_v10 = vld [vmem:[%s1542_s28 + $0xe8] sm:$0xff]   ;;  %v371_v38 = vunpack.c.l.s4 %v1487_v37 }
  0x16   : > { %v1379_v3 = vld [vmem:[%s1542_s28 + $0x38] sm:$0xff]   ;;  %1263 = vmatprep.subr.bf16.mxu1 %v1378_v2  ;;  %v1383_v7 = vld [vmem:[%s1542_s28 + $0x30] sm:$0xff]   ;;  %v1387_v11 = vld [vmem:[%s1542_s28 + $0x28] sm:$0xff]   ;;  %v374_v34 = vshrl.u32 %v373_v29, 7 }
  0x17   : > { %v1380_v4 = vld [vmem:[%s1542_s28 + $0xb8] sm:$0xff]   ;;  %1242 = vmatpush3.bf16.msra.mxu0 %v1379_v3  ;;  %v1384_v8 = vld [vmem:[%s1542_s28 + $0xb0] sm:$0xff]   ;;  %v1388_v12 = vld [vmem:[%s1542_s28 + $0xa8] sm:$0xff]   ;;  %v372_v41 = vunpack.c.0.s8 %v371_v38 }
  0x18   : > { %1264 = vmatpush3.bf16.msra.mxu1 %v1380_v4  ;;  %1243 = vmatprep.subr.bf16.mxu0 %v1381_v5  ;;  %v1389_v13 = vld [vmem:[%s1542_s28 + $0x60] sm:$0xff]   ;;  %v1393_v17 = vld [vmem:[%s1542_s28 + $0x58] sm:$0xff]   ;;  %v1397_v21 = vld [vmem:[%s1542_s28 + $0x50] sm:$0xff]  }
  0x19   : > { %1265 = vmatprep.subr.bf16.mxu1 %v1382_v6  ;;  %v1390_v14 = vld [vmem:[%s1542_s28 + $0xe0] sm:$0xff]   ;;  %v1394_v18 = vld [vmem:[%s1542_s28 + $0xd8] sm:$0xff]   ;;  %v1398_v22 = vld [vmem:[%s1542_s28 + $0xd0] sm:$0xff]   ;;  %v1584_v42 = vsub.s32 %v372_v41, %v374_v34 }
  0x1a   : > { %v1391_v15 = vld [vmem:[%s1542_s28 + $0x20] sm:$0xff]   ;;  %v1395_v19 = vld [vmem:[%s1542_s28 + $0x18] sm:$0xff]   ;;  %v1399_v23 = vld [vmem:[%s1542_s28 + $0x10] sm:$0xff]  }
  0x1b   : > { %1244 = vmatpush3.bf16.msra.mxu0 %v1383_v7  ;;  %v1392_v16 = vld [vmem:[%s1542_s28 + $0xa0] sm:$0xff]   ;;  %v1396_v20 = vld [vmem:[%s1542_s28 + $0x98] sm:$0xff]   ;;  %v1400_v24 = vld [vmem:[%s1542_s28 + $0x90] sm:$0xff]  }
  0x1c   : > { %1266 = vmatpush3.bf16.msra.mxu1 %v1384_v8  ;;  %1245 = vmatprep.subr.bf16.mxu0 %v1385_v9  ;;  %v1401_v25 = vld [vmem:[%s1542_s28 + $0x48] sm:$0xff]   ;;  %v1405_v30 = vld [vmem:[%s1542_s28 + $0x40] sm:$0xff]   ;;  %v1410_v36 = vld [vmem:[%s1542_s28 + $0x178] sm:$0xff]  }
  0x1d   : > { %1267 = vmatprep.subr.bf16.mxu1 %v1386_v10  ;;  %v1402_v26 = vld [vmem:[%s1542_s28 + $0xc8] sm:$0xff]   ;;  %v1406_v31 = vld [vmem:[%s1542_s28 + $0xc0] sm:$0xff]   ;;  %v1411_v39 = vld [vmem:[%s1542_s28 + $0x1f8] sm:$0xff]  }
  0x1e   : > { %v1403_v27 = vld [vmem:[%s1542_s28 + $0x8] sm:$0xff]   ;;  %v1407_v32 = vld [vmem:[%s1542_s28] sm:$0xff]   ;;  %v1412_v49 = vld [vmem:[%s1542_s28 + $0x138] sm:$0xff]  }
  0x1f   : > { %1246 = vmatpush3.bf16.msra.mxu0 %v1387_v11  ;;  %v1404_v28 = vld [vmem:[%s1542_s28 + $0x88] sm:$0xff]   ;;  %v1408_v33 = vld [vmem:[%s1542_s28 + $0x80] sm:$0xff]   ;;  %v1414_v52 = vld [vmem:[%s1542_s28 + $0x170] sm:$0xff]  }
  0x20   : > { %1268 = vmatpush3.bf16.msra.mxu1 %v1388_v12  ;;  %1247 = vmatprep.subr.bf16.mxu0 %v1389_v13  ;;  %v239_v35 = vld [vmem:[%s224_s24] sm:$0xff]  ;;  %v1413_v54 = vld [vmem:[%s1542_s28 + $0x1b8] sm:$0xff]   ;;  %v1415_v55 = vld [vmem:[%s1542_s28 + $0x1f0] sm:$0xff]  }
  0x21   : > { %1269 = vmatprep.subr.bf16.mxu1 %v1390_v14  ;;  %v369_v40 = vcombine.high %v239_v35, %v239_v35  ;;  %v376_v43 = vrot.slane %v239_v35, %v1584_v42  ;;  %v1416_v57 = vld [vmem:[%s1542_s28 + $0x130] sm:$0xff]   ;;  %v1418_v58 = vld [vmem:[%s1542_s28 + $0x168] sm:$0xff]   ;;  %v1422_v62 = vld [vmem:[%s1542_s28 + $0x160] sm:$0xff]  }
  0x22   : > { %v1417_v59 = vld [vmem:[%s1542_s28 + $0x1b0] sm:$0xff]   ;;  %v1419_v60 = vld [vmem:[%s1542_s28 + $0x1e8] sm:$0xff]   ;;  %v1423_v0 = vld [vmem:[%s1542_s28 + $0x1e0] sm:$0xff]  }
  0x23   : > { %1248 = vmatpush3.bf16.msra.mxu0 %v1391_v15  ;;  %v1588_v44 = vrot.slane %v369_v40, %v1584_v42  ;;  %v384_v45 = vcombine.high %v376_v43, %v376_v43  ;;  %v392_v46 = vrot.slane %v376_v43, %v1584_v42  ;;  %v1420_v61 = vld [vmem:[%s1542_s28 + $0x128] sm:$0xff]   ;;  %v1424_v1 = vld [vmem:[%s1542_s28 + $0x120] sm:$0xff]   ;;  %v1426_v2 = vld [vmem:[%s1542_s28 + $0x158] sm:$0xff]  }
  0x24   : > { %1270 = vmatpush3.bf16.msra.mxu1 %v1392_v16  ;;  %1249 = vmatprep.subr.bf16.mxu0 %v1393_v17  ;;  %v1421_v63 = vld [vmem:[%s1542_s28 + $0x1a8] sm:$0xff]   ;;  %v1425_v3 = vld [vmem:[%s1542_s28 + $0x1a0] sm:$0xff]   ;;  %v1427_v4 = vld [vmem:[%s1542_s28 + $0x1d8] sm:$0xff]  }
  0x25   : > { %1271 = vmatprep.subr.bf16.mxu1 %v1394_v18  ;;  %v385_v47 = vcombine.high %v1588_v44, %v1588_v44  ;;  %v406_v48 = vrot.slane %v384_v45, %v1584_v42  ;;  %v414_v51 = vcombine.high %v392_v46, %v392_v46  ;;  %v1428_v5 = vld [vmem:[%s1542_s28 + $0x118] sm:$0xff]   ;;  %v1430_v6 = vld [vmem:[%s1542_s28 + $0x150] sm:$0xff]   ;;  %v1434_v10 = vld [vmem:[%s1542_s28 + $0x148] sm:$0xff]   ;;  %v399_v18 = vrot.slane %v1588_v44, %v1584_v42 }
  0x26   : > { %v1429_v7 = vld [vmem:[%s1542_s28 + $0x198] sm:$0xff]   ;;  %v1431_v8 = vld [vmem:[%s1542_s28 + $0x1d0] sm:$0xff]   ;;  %v1435_v12 = vld [vmem:[%s1542_s28 + $0x1c8] sm:$0xff]  }
  0x27   : > { %1250 = vmatpush3.bf16.msra.mxu0 %v1395_v19  ;;  %v413_v50 = vrot.slane %v385_v47, %v1584_v42  ;;  %842 = vmatprep.mubr.bf16.mxu0 %v406_v48  ;;  %v416_v53 = vcombine.high %v406_v48, %v406_v48  ;;  %v1432_v9 = vld [vmem:[%s1542_s28 + $0x110] sm:$0xff]   ;;  %v1436_v13 = vld [vmem:[%s1542_s28 + $0x108] sm:$0xff]   ;;  %v1438_v14 = vld [vmem:[%s1542_s28 + $0x140] sm:$0xff]  }
  0x28   : > { %1272 = vmatpush3.bf16.msra.mxu1 %v1396_v20  ;;  %1251 = vmatprep.subr.bf16.mxu0 %v1397_v21  ;;  %v1433_v11 = vld [vmem:[%s1542_s28 + $0x190] sm:$0xff]   ;;  %v1437_v15 = vld [vmem:[%s1542_s28 + $0x188] sm:$0xff]   ;;  %v1439_v16 = vld [vmem:[%s1542_s28 + $0x1c0] sm:$0xff]   ;;  %v415_v20 = vcombine.high %v399_v18, %v399_v18 }
  0x29   : > { %1273 = vmatprep.subr.bf16.mxu1 %v1398_v22  ;;  %v417_v56 = vcombine.high %v413_v50, %v413_v50  ;;  %882 = vmatprep.mubr.bf16.mxu1 %v416_v53  ;;  %v1440_v17 = vld [vmem:[%s1542_s28 + $0x100] sm:$0xff]  }
  0x2a   : > { %v1441_v19 = vld [vmem:[%s1542_s28 + $0x180] sm:$0xff]  }
  0x2b   : > { %1252 = vmatpush3.bf16.msra.mxu0 %v1399_v23  ;;  %v238_v40 = vld [vmem:[#allocation2] sm:$0x3] }
  0x2c   : > { %1274 = vmatpush3.bf16.msra.mxu1 %v1400_v24  ;;  %1253 = vmatprep.subr.bf16.mxu0 %v1401_v25 }
  0x2d   : > { %1275 = vmatprep.subr.bf16.mxu1 %v1402_v26 }
  0x2f   : > { %1254 = vmatpush3.bf16.msra.mxu0 %v1403_v27 }
  0x30   : > { %1276 = vmatpush3.bf16.msra.mxu1 %v1404_v28  ;;  %1255 = vmatprep.subr.bf16.mxu0 %v1405_v30 }
  0x31   : > { %1277 = vmatprep.subr.bf16.mxu1 %v1406_v31 }
  0x33   : > { %1256 = vmatpush3.bf16.msra.mxu0 %v1407_v32 }
  0x34   : > { %1278 = vmatpush3.bf16.msra.mxu1 %v1408_v33  ;;  %1285 = vmatprep.subr.bf16.mxu0 %v1410_v36 }
  0x35   : > { %1307 = vmatprep.subr.bf16.mxu1 %v1411_v39 }
  0x36   : > { %843 = vmatmul.mubr.bf16.vlgmr.msra.gmra.mxu0 %v392_v46 }
  0x37   : > { %1286 = vmatpush3.bf16.msra.mxu0 %v1412_v49  ;;  %883 = vmatmul.mubr.bf16.vlgmr.msra.gmra.mxu1 %v414_v51 }
  0x38   : > { %1287 = vmatprep.subr.bf16.mxu0 %v1414_v52  ;;  %1308 = vmatpush3.bf16.msra.mxu1 %v1413_v54 }
  0x39   : > { %922 = vmatprep.mubr.bf16.mxu0 %v413_v50  ;;  %1309 = vmatprep.subr.bf16.mxu1 %v1415_v55 }
  0x3a   : > { %962 = vmatprep.mubr.bf16.mxu1 %v417_v56 }
  0x3b   : > { %1288 = vmatpush3.bf16.msra.mxu0 %v1416_v57 }
  0x3c   : > { %1289 = vmatprep.subr.bf16.mxu0 %v1418_v58  ;;  %1310 = vmatpush3.bf16.msra.mxu1 %v1417_v59 }
  0x3d   : > { %1311 = vmatprep.subr.bf16.mxu1 %v1419_v60 }
  0x3f   : > { %1290 = vmatpush3.bf16.msra.mxu0 %v1420_v61 }
  0x40   : > { %1291 = vmatprep.subr.bf16.mxu0 %v1422_v62  ;;  %1312 = vmatpush3.bf16.msra.mxu1 %v1421_v63 }
  0x41   : > { %1313 = vmatprep.subr.bf16.mxu1 %v1423_v0 }
  0x43   : > { %1292 = vmatpush3.bf16.msra.mxu0 %v1424_v1 }
  0x44   : > { %1293 = vmatprep.subr.bf16.mxu0 %v1426_v2  ;;  %1314 = vmatpush3.bf16.msra.mxu1 %v1425_v3 }
  0x45   : > { %1315 = vmatprep.subr.bf16.mxu1 %v1427_v4 }
  0x47   : > { %1294 = vmatpush3.bf16.msra.mxu0 %v1428_v5 }
  0x48   : > { %1295 = vmatprep.subr.bf16.mxu0 %v1430_v6  ;;  %1316 = vmatpush3.bf16.msra.mxu1 %v1429_v7 }
  0x49   : > { %1317 = vmatprep.subr.bf16.mxu1 %v1431_v8 }
  0x4b   : > { %1296 = vmatpush3.bf16.msra.mxu0 %v1432_v9 }
  0x4c   : > { %1297 = vmatprep.subr.bf16.mxu0 %v1434_v10  ;;  %1318 = vmatpush3.bf16.msra.mxu1 %v1433_v11 }
  0x4d   : > { %1319 = vmatprep.subr.bf16.mxu1 %v1435_v12 }
  0x4f   : > { %1298 = vmatpush3.bf16.msra.mxu0 %v1436_v13 }
  0x50   : > { %1299 = vmatprep.subr.bf16.mxu0 %v1438_v14  ;;  %1320 = vmatpush3.bf16.msra.mxu1 %v1437_v15 }
  0x51   : > { %1321 = vmatprep.subr.bf16.mxu1 %v1439_v16 }
  0x53   : > { %1300 = vmatpush3.bf16.msra.mxu0 %v1440_v17 }
  0x54   : > { %1322 = vmatpush3.bf16.msra.mxu1 %v1441_v19 }
  0x56   : > { %923 = vmatmul.mubr.bf16.vlgmr.msra.gmra.mxu0 %v399_v18 }
  0x57   : > { %963 = vmatmul.mubr.bf16.vlgmr.msra.gmra.mxu1 %v415_v20 }
  0xf6   : > { %v1257_v21 = vpop.f32.mrf.mxu0 }
  0xf7   : > { %v1279_v22 = vpop.f32.mrf.mxu1 }
  0xf8   : > { %v1258_v23 = vpop.f32.mrf.mxu0 }
  0xf9   : > { %v1280_v24 = vpop.f32.mrf.mxu1  ;;  %v1259_v29 = vadd.f32 %v1258_v23, %v1257_v21 }
  0xfa   : > { %v1260_v25 = vpop.f32.mrf.mxu0  ;;  %v1281_v30 = vadd.f32 %v1280_v24, %v1279_v22 }
  0xfb   : > { %v1282_v26 = vpop.f32.mrf.mxu1 }
  0xfc   : > { %v1261_v27 = vpop.f32.mrf.mxu0  ;;  %v885_v34 = vadd.f32 %v1281_v30, %v1259_v29 }
  0xfd   : > { %v1283_v28 = vpop.f32.mrf.mxu1 }
 0x116   : > { %v1301_v31 = vpop.f32.mrf.mxu0 }
 0x117   : > { %v1323_v32 = vpop.f32.mrf.mxu1 }
 0x118   : > { %v1302_v33 = vpop.f32.mrf.mxu0 }
 0x119   : > { %v1303_v35 = vadd.f32 %v1302_v33, %v1301_v31  ;;  %v1324_v36 = vpop.f32.mrf.mxu1 }
 0x11a   : > { %v1304_v37 = vpop.f32.mrf.mxu0  ;;  %v1325_v39 = vadd.f32 %v1324_v36, %v1323_v32 }
 0x11b   : > { %v925_v38 = vadd.f32 %v1303_v35, %v885_v34  ;;  %v1326_v41 = vpop.f32.mrf.mxu1 }
 0x11c   : > { %v1305_v42 = vpop.f32.mrf.mxu0 }
 0x11d   : > { %v965_v43 = vadd.f32 %v1325_v39, %v925_v38  ;;  %v1327_v44 = vpop.f32.mrf.mxu1  ;;  %975 = sbr.rel (%p1226_p6) target bundleno = 522 (0x20a), region = 48 }
 0x11f   : > { %v970_v45 = vadd.f32 %v965_v43, %v238_v40 }
 0x121   : > { %971 = vst [vmem:[#allocation2] sm:$0x3] %v970_v45 }
 0x122   : > { %v1442_v46 = vld [vmem:[%s1676_s3 + $0x38] sm:$0xff]   ;;  %v1488_v47 = vmov 0.0   ;;  %v1443_v48 = vld [vmem:[%s1676_s3 + $0x30] sm:$0xff]   ;;  %vm1489_vm0 = vmmov 0   ;;  %v1444_v49 = vld [vmem:[%s1676_s3 + $0x28] sm:$0xff]  }
 0x123   : > { %1338 = vmatprep.subr.bf16.mxu0 %v1488_v47  ;;  %1354 = vmatprep.mubr.msk.bf16.mxu0 %vm1489_vm0, %v1488_v47  ;;  %v1445_v50 = vld [vmem:[%s1676_s3 + $0x20] sm:$0xff]   ;;  %v1446_v51 = vld [vmem:[%s1676_s3 + $0x18] sm:$0xff]   ;;  %v1447_v52 = vld [vmem:[%s1676_s3 + $0x10] sm:$0xff]  }
 0x124   : > { %1339 = vmatpush3.bf16.msra.mxu0 %v1442_v46  ;;  %v1227_v54 = vld [vmem:[%s1675_s2] ss:$0 sm:$0xff]  ;;  %v1448_v56 = vld [vmem:[%s1676_s3 + $0x8] sm:$0xff]  }
 0x125   : > { %1340 = vmatprep.subr.bf16.mxu0 %v1488_v47  ;;  %v1449_v58 = vld [vmem:[%s1676_s3] sm:$0xff]  }
 0x126   : > { %v1228_v60 = vld [vmem:[%s1677_s4] ss:$0 sm:$0xff] }
 0x128   : > { %1341 = vmatpush3.bf16.msra.mxu0 %v1443_v48  ;;  %v976_v53 = vld [vmem:[#allocation2] sm:$0x3] }
 0x129   : > { %1342 = vmatprep.subr.bf16.mxu0 %v1488_v47  ;;  %v984_v55 = vadd.f32 %v1227_v54, %v976_v53 }
 0x12b   : > { %v985_v57 = vmax.f32 %v984_v55, 0.0 }
 0x12c   : > { %1343 = vmatpush3.bf16.msra.mxu0 %v1444_v49 }
 0x12d   : > { %1344 = vmatprep.subr.bf16.mxu0 %v1488_v47  ;;  %v986_v59 = vpack.c.bf16 %v985_v57, %v985_v57 }
 0x130   : > { %1345 = vmatpush3.bf16.msra.mxu0 %v1445_v50 }
 0x131   : > { %1346 = vmatprep.subr.bf16.mxu0 %v1488_v47 }
 0x134   : > { %1347 = vmatpush3.bf16.msra.mxu0 %v1446_v51 }
 0x135   : > { %1348 = vmatprep.subr.bf16.mxu0 %v1488_v47 }
 0x138   : > { %1349 = vmatpush3.bf16.msra.mxu0 %v1447_v52 }
 0x139   : > { %1350 = vmatprep.subr.bf16.mxu0 %v1488_v47 }
 0x13c   : > { %1351 = vmatpush3.bf16.msra.mxu0 %v1448_v56 }
 0x13d   : > { %1352 = vmatprep.subr.bf16.mxu0 %v1488_v47 }
 0x140   : > { %1353 = vmatpush3.bf16.msra.mxu0 %v1449_v58 }
 0x143   : > { %1355 = vmatmul.mubr.bf16.vlgmr.msra.gmra.mxu0 %v986_v59 }
 0x203   : > { %v1092_v61 = vpop.f32.mrf.mxu0 }
 0x204   : > { %v1093_v62 = vadd.f32 %v1228_v60, %v1092_v61 }
 0x205   : > { %v1356_v63 = vpop.f32.mrf.mxu0 }
 0x206   : > { %1098 = vst [vmem:[#allocation3] sm:$0x3] %v1093_v62 }
 0x207   : > { %v1095_v0 = vpop.f32.mrf.mxu0 }
 0x209   : > { %v1357_v1 = vpop.f32.mrf.mxu0 }
 0x20a PF: > { %p1362_p7 = scmp.eq.s32.totalorder %s1527_s19, 3  ;;  %s1490_s28 = smov [#allocation3]  }
 0x20b   : > { %s1106_s29 = sshll.u32 %s1490_s28, 4  ;;  %s1107_s29 = int_to_ptr.vmem [resolvable:$true] %s1106_s29 }
 0x20c   : > { %s1450_s30 = scalar_lea.vmem %s1107_s29, 32  ;;  %p1457_p11 = scmp.lt.s32.totalorder %s1107_s29, %s1107_s29 }
 0x20d   : > { %p1451_p8 = scmp.ne.s32.totalorder %s1107_s29, %s1450_s30  ;;  %p1458_p12 = scmp.lt.s32.totalorder %s1450_s30, %s1450_s30 }
 0x20f   : > { %p1452_p9 = pnand %p1451_p8, %p1362_p7  ;;  %p1459_p13 = por %p1458_p12, %p1457_p11 }
 0x211   : > { %p1453_p10 = pneg %p1452_p9 }
 0x213   : > { %p1460_p0 = pnand %p1459_p13, %p1453_p10 }
 0x215   : > { %1463 = shalt.err (!%p1460_p0)
}
 0x216   : > { %1359 = dma.vmem_to_hbm [thread:$0]  (%p1362_p7), %s1107_s29, 32, %s1678_s5, [#allocation4]  }
 0x217   : > { %1479 = dma.done.wait (%p1362_p7), [#allocation4], 32  }
 0x218   : > { %1481 = vsyncadd (%p1362_p7), [#allocation4], 4294967264 }
 0x219 PF: > { %s16_s18 = sadd.s32 1, %s1484_s18  }
 0x21a   : > { %p13_p1 = scmp.ge.s32.totalorder %s16_s18, 6  }
 0x21c   :  { %15 = sbr.rel (!%p13_p1) target bundleno = 1 (0x1), region = 78 }
 0x221   :  { %1119 = vsyncpa [#allocation4], 1 }
 0x222   :  { %1121 = vsyncpa [#allocation4 + $0x1], 1 }

</bundles_post_ra>
